<compile_context>
chip_gen: v6e
topology: v6e:2x2x1
jax: 0.10.0
libtpu: 0.0.40
codegen_flags: <defaults>
</compile_context>

<pallas_src>
import numpy as np
import jax
import jax.numpy as jnp
from jax import lax
from jax.experimental import pallas as pl
from jax.experimental.pallas import tpu as pltpu


# --------------------------- Pallas kernels / wrappers ------------------------

def conv_pool(patches, w, b, lo):
    """Fused 3x3-conv + bias + clamp(lo) + 2x2-maxpool, batched over branches.

    patches: (G, K, 4*M) -- four pooling-phase im2col slabs concatenated along
                            the lane axis; K = Cin*9, M = B*Ho*Wo (pooled size)
    w:       (G, Cout, K)
    b:       (G, Cout, 1)
    lo:      (G, 1, 1)    -- 0.0 => ReLU, -1e30 => identity
    returns  (G, Cout, M) -- pooled activations, column order = (b, ho, wo)
    """
    G, K, M4 = patches.shape
    M = M4 // 4
    Cout = w.shape[1]

    def kernel(p_ref, w_ref, b_ref, lo_ref, o_ref):
        # One long MXU push over 4*M lanes, then 3 VPU maxima over the phases.
        y = jnp.dot(w_ref[0], p_ref[0], preferred_element_type=jnp.float32)
        y = jnp.maximum(jnp.maximum(y[:, 0 * M:1 * M], y[:, 1 * M:2 * M]),
                        jnp.maximum(y[:, 2 * M:3 * M], y[:, 3 * M:4 * M]))
        o_ref[0] = jnp.maximum(y + b_ref[0], lo_ref[0])

    return pl.pallas_call(
        kernel,
        out_shape=jax.ShapeDtypeStruct((G, Cout, M), jnp.float32),
        grid_spec=pltpu.PrefetchScalarGridSpec(
            num_scalar_prefetch=0,
            grid=(G,),
            in_specs=[
                pl.BlockSpec((1, K, M4), lambda g: (g, 0, 0)),
                pl.BlockSpec((1, Cout, K), lambda g: (g, 0, 0)),
                pl.BlockSpec((1, Cout, 1), lambda g: (g, 0, 0)),
                pl.BlockSpec((1, 1, 1), lambda g: (g, 0, 0)),
            ],
            out_specs=pl.BlockSpec((1, Cout, M), lambda g: (g, 0, 0)),
        ),
        compiler_params=pltpu.CompilerParams(
            dimension_semantics=("parallel",)),
    )(patches, w, b, lo)


def fc_stage1(xcat, wcat, bias, K1):
    """fc1/fc2/fc3/fc4 (+ReLU) fused in one K-streaming, N-split kernel.

    xcat: (B, 7*K1) f32   = [lf | uf | vf | luvf]
    wcat: (7*K1, Np) bf16 = [fc1_w ; fc2_w ; fc3_w ; fc4_w]  (row-concatenated)
    bias: (4, 1, Np) f32
    returns hs: (4, B, Np) f32 = relu(fc_i(x_i)) per branch
    """
    B, Ktot = xcat.shape
    G, _, Np = bias.shape
    assert Ktot == 7 * K1 and wcat.shape == (Ktot, Np)

    # K tile: prefer 1024 (fewer grid steps, larger contiguous weight DMAs).
    tk = next((c for c in (1024, 512, 256, 128) if K1 % c == 0), K1)
    n1 = K1 // tk                            # K tiles per small branch
    n_tiles = Ktot // tk
    branch_ids = jnp.asarray(np.minimum(np.arange(n_tiles) // n1, 3),
                             dtype=jnp.int32)

    # Leading "parallel" N axis: splits the dominant weight stream across the
    # two TensorCores on v7x; neutral (single core) on v5e/v6e.
    nt = 2 if Np % 256 == 0 else 1
    tn = Np // nt

    def kernel(tbl_ref, x_ref, w_ref, b_ref, o_ref, acc_ref):
        k = pl.program_id(1)
        nk = pl.num_programs(1)
        cur = tbl_ref[k]
        is_first = jnp.logical_or(k == 0, cur != tbl_ref[jnp.maximum(k - 1, 0)])
        is_last = jnp.logical_or(k == nk - 1,
                                 cur != tbl_ref[jnp.minimum(k + 1, nk - 1)])

        @pl.when(is_first)
        def _():
            acc_ref[...] = jnp.zeros_like(acc_ref)

        acc_ref[...] += jnp.dot(x_ref[...].astype(jnp.bfloat16), w_ref[...],
                                preferred_element_type=jnp.float32)

        @pl.when(is_last)
        def _():
            o_ref[0] = jnp.maximum(acc_ref[...] + b_ref[0], 0.0)

    return pl.pallas_call(
        kernel,
        out_shape=jax.ShapeDtypeStruct((G, B, Np), jnp.float32),
        grid_spec=pltpu.PrefetchScalarGridSpec(
            num_scalar_prefetch=1,
            grid=(nt, n_tiles),
            in_specs=[
                pl.BlockSpec((B, tk), lambda n, k, tbl: (0, k)),
                pl.BlockSpec((tk, tn), lambda n, k, tbl: (k, n)),
                pl.BlockSpec((1, 1, tn), lambda n, k, tbl: (tbl[k], 0, n)),
            ],
            out_specs=pl.BlockSpec((1, B, tn), lambda n, k, tbl: (tbl[k], 0, n)),
            scratch_shapes=[pltpu.VMEM((B, tn), jnp.float32)],
        ),
        compiler_params=pltpu.CompilerParams(
            dimension_semantics=("parallel", "arbitrary")),
    )(branch_ids, xcat, wcat, bias)


def fc_stage2(hs, w2, b2, lo, w10, b10):
    """fc{1,2,3,4}_1 (+per-branch clamp) + branch-sum + fc10 in one kernel.

    hs:  (4, B, Np) f32   w2: (4, Np, N2) bf16   b2: (4, 1, N2) f32
    lo:  (4, 1, 1) f32    w10: (N2, NO) f32      b10: (1, NO) f32
    returns (B, NO) f32
    """
    G, B, Np = hs.shape
    N2 = w2.shape[2]
    NO = w10.shape[1]

    def kernel(h_ref, w_ref, b_ref, lo_ref, w10_ref, b10_ref, o_ref, acc_ref):
        g = pl.program_id(0)

        @pl.when(g == 0)
        def _():
            acc_ref[...] = jnp.zeros_like(acc_ref)

        y = jnp.dot(h_ref[0].astype(jnp.bfloat16), w_ref[0],
                    preferred_element_type=jnp.float32) + b_ref[0]
        acc_ref[...] += jnp.maximum(y, lo_ref[0])

        @pl.when(g == pl.num_programs(0) - 1)
        def _():
            o_ref[...] = (jnp.dot(acc_ref[...], w10_ref[...],
                                  preferred_element_type=jnp.float32)
                          + b10_ref[...]).astype(o_ref.dtype)

    return pl.pallas_call(
        kernel,
        out_shape=jax.ShapeDtypeStruct((B, NO), jnp.float32),
        grid_spec=pltpu.PrefetchScalarGridSpec(
            num_scalar_prefetch=0,
            grid=(G,),
            in_specs=[
                pl.BlockSpec((1, B, Np), lambda g: (g, 0, 0)),
                pl.BlockSpec((1, Np, N2), lambda g: (g, 0, 0)),
                pl.BlockSpec((1, 1, N2), lambda g: (g, 0, 0)),
                pl.BlockSpec((1, 1, 1), lambda g: (g, 0, 0)),
                pl.BlockSpec((N2, NO), lambda g: (0, 0)),
                pl.BlockSpec((1, NO), lambda g: (0, 0)),
            ],
            out_specs=pl.BlockSpec((B, NO), lambda g: (0, 0)),
            scratch_shapes=[pltpu.VMEM((B, N2), jnp.float32)],
        ),
        compiler_params=pltpu.CompilerParams(
            dimension_semantics=("arbitrary",)),
    )(hs, w2, b2, lo, w10, b10)


# --------------------------- im2col glue (pool-phase split) -------------------

def build_patches(x):
    """x: (G, Cin, B, H, W) -> (G, Cin*9, 4 * B*(H//2)*(W//2)).

    The four 2x2-pooling phases (py, px) are concatenated along the lane axis.
    Patch row = ci*9 + dy*3 + dx; within a phase, column = b*(H//2)*(W//2)
    + ho*(W//2) + wo.  Pure XLA glue (tiny tensors compared to the FC weights).
    """
    G, Cin, B, H, W = x.shape
    Ho, Wo = H // 2, W // 2
    xp = jnp.pad(x, ((0, 0), (0, 0), (0, 0), (1, 1), (1, 1)))
    phases = []
    for py in range(2):
        for px in range(2):
            taps = []
            for dy in range(3):
                for dx in range(3):
                    taps.append(xp[:, :, :, py + dy: py + dy + H: 2,
                                         px + dx: px + dx + W: 2])
            t = jnp.stack(taps, axis=2)                 # (G, Cin, 9, B, Ho, Wo)
            phases.append(t.reshape(G, Cin * 9, B * Ho * Wo))
    return jnp.concatenate(phases, axis=-1)             # (G, Cin*9, 4*M)


# --------------------------- Model (forward) ----------------------------------

def forward(params, x):
    B, C, H, W = x.shape
    nf = params['convA_w'].shape[1]
    assert C == 3 and H % 4 == 0 and W % 4 == 0

    # ---- Stage A: conv1/conv2/conv3_1 + ReLU + maxpool (fused, 3 branches)
    xA = jnp.transpose(x, (1, 0, 2, 3))[:, None]              # (3, 1, B, H, W)
    pA = build_patches(xA)                                    # (3, 9, 4*B*Ho*Wo)
    loA = jnp.zeros((3, 1, 1), jnp.float32)
    yA = conv_pool(pA, params['convA_w'], params['convA_b'], loA)

    Ho, Wo = H // 2, W // 2
    yA = yA.reshape(3, nf, B, Ho, Wo)                         # l, u, v (pooled)

    # ---- Stage B+C: conv1_1/conv2_1/conv3_2 (+ReLU) and conv4 (no ReLU), + pool
    xBC = jnp.concatenate([yA, jnp.sum(yA, axis=0, keepdims=True)], axis=0)
    pBC = build_patches(xBC)                                  # (4, nf*9, 4*B*H2*W2)
    loBC = jnp.array([0.0, 0.0, 0.0, -1e30], jnp.float32).reshape(4, 1, 1)
    yBC = conv_pool(pBC, params['convBC_w'], params['convBC_b'], loBC)

    H2, W2 = Ho // 2, Wo // 2
    S = H2 * W2
    yBC = yBC.reshape(4, 4 * nf, B, S)

    def feat(t):                       # (C, B, S) -> (B, C*S)  (torch flatten order)
        return jnp.transpose(t, (1, 0, 2)).reshape(B, -1)

    xcat = jnp.concatenate(
        [feat(yBC[0, :nf]), feat(yBC[1, :nf]), feat(yBC[2, :nf]), feat(yBC[3])],
        axis=1)                                               # (B, 7*nf*S)

    # ---- Classifier (Dropout = identity at inference)
    hs = fc_stage1(xcat, params['fcA_w'], params['fcA_b'], nf * S)   # (4, B, 1536)
    loF = jnp.array([0.0, 0.0, 0.0, -1e30], jnp.float32).reshape(4, 1, 1)
    return fc_stage2(hs, params['fcB_w'], params['fcB_b'], loF,
                     params['fc10_w'], params['fc10_b'])


# --------------------------- Parameters ----------------------------------------

def init_params(key, n_filters, out_channels):
    nf = n_filters
    K1 = nf * 16 * 16
    NP1, NP2 = 1536, 512          # 1500 -> 1536, 500 -> 512 (lane-multiple pads)
    keys = iter(jax.random.split(key, 40))

    def uni(shape, fan_in):
        bound = 1.0 / float(np.sqrt(fan_in))
        return jax.random.uniform(next(keys), shape, jnp.float32, -bound, bound)

    def conv_wb(cin, cout):
        w = uni((cout, cin, 3, 3), cin * 9).reshape(cout, cin * 9)
        b = uni((cout,), cin * 9)
        return w, b

    w1, b1 = conv_wb(1, nf)        # conv1
    w2, b2 = conv_wb(1, nf)        # conv2
    w3, b3 = conv_wb(1, nf)        # conv3_1
    w11, b11 = conv_wb(nf, nf)     # conv1_1
    w21, b21 = conv_wb(nf, nf)     # conv2_1
    w32, b32 = conv_wb(nf, nf)     # conv3_2
    w4, b4 = conv_wb(nf, 4 * nf)   # conv4

    convA_w = jnp.stack([w1, w2, w3], 0)                          # (3, nf, 9)
    convA_b = jnp.stack([b1, b2, b3], 0)[:, :, None]              # (3, nf, 1)

    def pad_cout(w, b):
        return (jnp.pad(w, ((0, 3 * nf), (0, 0))),
                jnp.pad(b, ((0, 3 * nf),)))

    w11p, b11p = pad_cout(w11, b11)
    w21p, b21p = pad_cout(w21, b21)
    w32p, b32p = pad_cout(w32, b32)
    convBC_w = jnp.stack([w11p, w21p, w32p, w4], 0)               # (4, 4nf, nf*9)
    convBC_b = jnp.stack([b11p, b21p, b32p, b4], 0)[:, :, None]   # (4, 4nf, 1)

    # FC stage 1 weights, stored transposed (K, N), zero-padded 1500->NP1, bf16.
    def fcA_wb(k_in):
        w = uni((k_in, 1500), k_in)
        b = uni((1500,), k_in)
        return (jnp.pad(w, ((0, 0), (0, NP1 - 1500))),
                jnp.pad(b, (0, NP1 - 1500)))

    f1w, f1b = fcA_wb(K1)
    f2w, f2b = fcA_wb(K1)
    f3w, f3b = fcA_wb(K1)
    f4w, f4b = fcA_wb(4 * K1)
    fcA_w = jnp.concatenate([f1w, f2w, f3w, f4w], axis=0).astype(jnp.bfloat16)
    fcA_b = jnp.stack([f1b, f2b, f3b, f4b], 0)[:, None, :]        # (4, 1, NP1) f32

    # FC stage 2 weights, zero-padded (1500->NP1 rows, 500->NP2 cols), bf16.
    def fcB_wb():
        w = uni((1500, 500), 1500)
        b = uni((500,), 1500)
        return (jnp.pad(w, ((0, NP1 - 1500), (0, NP2 - 500))),
                jnp.pad(b, (0, NP2 - 500)))

    g1w, g1b = fcB_wb()
    g2w, g2b = fcB_wb()
    g3w, g3b = fcB_wb()
    g4w, g4b = fcB_wb()
    fcB_w = jnp.stack([g1w, g2w, g3w, g4w], 0).astype(jnp.bfloat16)  # (4, NP1, NP2)
    fcB_b = jnp.stack([g1b, g2b, g3b, g4b], 0)[:, None, :]           # (4, 1, NP2)

    f10w = uni((500, out_channels), 500)
    f10b = uni((out_channels,), 500)
    fc10_w = jnp.pad(f10w, ((0, NP2 - 500), (0, 0)))                 # (NP2, NO) f32

    return dict(convA_w=convA_w, convA_b=convA_b,
                convBC_w=convBC_w, convBC_b=convBC_b,
                fcA_w=fcA_w, fcA_b=fcA_b,
                fcB_w=fcB_w, fcB_b=fcB_b,
                fc10_w=fc10_w, fc10_b=f10b[None, :])


# --------------------------- Pure-JAX reference --------------------------------

def ref_forward(params, x):
    nf = params['convA_w'].shape[1]
    relu = lambda t: jnp.maximum(t, 0.0)

    def conv(t, w2d, b, cin, cout):
        w = w2d.reshape(cout, cin, 3, 3)
        y = lax.conv_general_dilated(t, w, (1, 1), ((1, 1), (1, 1)),
                                     dimension_numbers=('NCHW', 'OIHW', 'NCHW'))
        return y + b.reshape(1, cout, 1, 1)

    def pool(t):
        return lax.reduce_window(t, -jnp.inf, lax.max,
                                 (1, 1, 2, 2), (1, 1, 2, 2), 'VALID')

    wA, bA = params['convA_w'], params['convA_b']
    wBC, bBC = params['convBC_w'], params['convBC_b']

    l = x[:, 0:1]; u = x[:, 1:2]; v = x[:, 2:3]
    l = pool(relu(conv(l, wA[0], bA[0, :, 0], 1, nf)))
    u = pool(relu(conv(u, wA[1], bA[1, :, 0], 1, nf)))
    v = pool(relu(conv(v, wA[2], bA[2, :, 0], 1, nf)))
    l1 = pool(relu(conv(l, wBC[0, :nf], bBC[0, :nf, 0], nf, nf)))
    u1 = pool(relu(conv(u, wBC[1, :nf], bBC[1, :nf, 0], nf, nf)))
    v1 = pool(relu(conv(v, wBC[2, :nf], bBC[2, :nf, 0], nf, nf)))
    luv = pool(conv(l + u + v, wBC[3], bBC[3, :, 0], nf, 4 * nf))

    B = x.shape[0]
    lf = l1.reshape(B, -1); uf = u1.reshape(B, -1); vf = v1.reshape(B, -1)
    luvf = luv.reshape(B, -1)

    K1 = nf * 16 * 16
    wfc = params['fcA_w'].astype(jnp.float32)     # padded cols are exactly zero
    bfc = params['fcA_b']
    h_l = relu(lf @ wfc[0:K1] + bfc[0, 0])
    h_u = relu(uf @ wfc[K1:2 * K1] + bfc[1, 0])
    h_v = relu(vf @ wfc[2 * K1:3 * K1] + bfc[2, 0])
    h_luv = relu(luvf @ wfc[3 * K1:] + bfc[3, 0])

    w2 = params['fcB_w'].astype(jnp.float32)
    b2 = params['fcB_b']
    z_l = relu(h_l @ w2[0] + b2[0, 0])
    z_u = relu(h_u @ w2[1] + b2[1, 0])
    z_v = relu(h_v @ w2[2] + b2[2, 0])
    z_luv = h_luv @ w2[3] + b2[3, 0]
    z = z_l + z_u + z_v + z_luv
    return z @ params['fc10_w'] + params['fc10_b']


# --------------------------- Main -----------------------------------------------

if __name__ == "__main__":
    key = jax.random.PRNGKey(0)
    pkey, xkey = jax.random.split(key)

    n_filters, out_channels = 4, 10
    params = init_params(pkey, n_filters, out_channels)

    # fc1 expects n_filters*16*16 features after two 2x2 pools -> 64x64 input.
    x = jax.random.normal(xkey, (2, 3, 64, 64), jnp.float32)

    out = jax.block_until_ready(jax.jit(forward)(params, x))
    ref = jax.block_until_ready(jax.jit(ref_forward)(params, x))

    assert out.shape == (2, out_channels)
    assert bool(jnp.all(jnp.isfinite(out)))
    # bf16 weight streaming + bf16 activation casts => relax the f32 tolerance.
    rel_err = float(jnp.max(jnp.abs(out - ref)) / (jnp.max(jnp.abs(ref)) + 1e-6))
    assert rel_err < 2e-2, f"mismatch vs reference: rel_err={rel_err}"

    print("KERNEL_OK")
</pallas_src>

<mosaic_0001>
module attributes {stable_mosaic.version = 11 : i64} {
  func.func @kernel(%arg0: i32, %arg1: memref<1x9x8192xf32, #tpu.memory_space<vmem>>, %arg2: memref<1x4x9xf32, #tpu.memory_space<vmem>>, %arg3: memref<1x4x1xf32, #tpu.memory_space<vmem>>, %arg4: memref<1x1x1xf32, #tpu.memory_space<vmem>>, %arg5: memref<1x4x2048xf32, #tpu.memory_space<vmem>>) attributes {dimension_semantics = [#tpu.dimension_semantics<parallel>], iteration_bounds = array<i64: 3>, scalar_prefetch = 0 : i64, scratch_operands = 0 : i64, tpu.core_type = #tpu.core_type<tc>, window_params = [{transform_indices = @transform_0, window_bounds = array<i64: 1, 9, 8192>}, {transform_indices = @transform_1, window_bounds = array<i64: 1, 4, 9>}, {transform_indices = @transform_2, window_bounds = array<i64: 1, 4, 1>}, {transform_indices = @transform_3, window_bounds = array<i64: 1, 1, 1>}, {transform_indices = @transform_4, window_bounds = array<i64: 1, 4, 2048>}]} {
    %c0 = arith.constant 0 : index
    %c0_0 = arith.constant 0 : index
    %c0_1 = arith.constant 0 : index
    %0 = vector.load %arg2[%c0, %c0_0, %c0_1] : memref<1x4x9xf32, #tpu.memory_space<vmem>>, vector<1x4x9xf32>
    %1 = vector.shape_cast %0 : vector<1x4x9xf32> to vector<4x9xf32>
    %c0_2 = arith.constant 0 : index
    %c0_3 = arith.constant 0 : index
    %c0_4 = arith.constant 0 : index
    %2 = vector.load %arg1[%c0_2, %c0_3, %c0_4] : memref<1x9x8192xf32, #tpu.memory_space<vmem>>, vector<1x9x8192xf32>
    %3 = vector.shape_cast %2 : vector<1x9x8192xf32> to vector<9x8192xf32>
    %cst = arith.constant dense<0.000000e+00> : vector<4x8192xf32>
    %4 = tpu.matmul %1, %3, %cst {dimension_numbers = #tpu.dot_dimension_numbers<[1], [0], [0], [1], [0, 0, 1, 1], [], []>} : vector<4x9xf32>, vector<9x8192xf32>, vector<4x8192xf32> -> vector<4x8192xf32>
    %5 = vector.extract_strided_slice %4 {offsets = [0, 0], sizes = [4, 2048], strides = [1, 1]} : vector<4x8192xf32> to vector<4x2048xf32>
    %6 = vector.extract_strided_slice %4 {offsets = [0, 2048], sizes = [4, 2048], strides = [1, 1]} : vector<4x8192xf32> to vector<4x2048xf32>
    %7 = arith.maximumf %5, %6 : vector<4x2048xf32>
    %8 = vector.extract_strided_slice %4 {offsets = [0, 4096], sizes = [4, 2048], strides = [1, 1]} : vector<4x8192xf32> to vector<4x2048xf32>
    %9 = vector.extract_strided_slice %4 {offsets = [0, 6144], sizes = [4, 2048], strides = [1, 1]} : vector<4x8192xf32> to vector<4x2048xf32>
    %10 = arith.maximumf %8, %9 : vector<4x2048xf32>
    %11 = arith.maximumf %7, %10 : vector<4x2048xf32>
    %c0_5 = arith.constant 0 : index
    %c0_6 = arith.constant 0 : index
    %c0_7 = arith.constant 0 : index
    %12 = vector.load %arg3[%c0_5, %c0_6, %c0_7] : memref<1x4x1xf32, #tpu.memory_space<vmem>>, vector<1x4x1xf32>
    %13 = vector.shape_cast %12 : vector<1x4x1xf32> to vector<4x1xf32>
    %14 = vector.broadcast %13 : vector<4x1xf32> to vector<4x2048xf32>
    %15 = arith.addf %11, %14 : vector<4x2048xf32>
    %c0_8 = arith.constant 0 : index
    %c0_9 = arith.constant 0 : index
    %c0_10 = arith.constant 0 : index
    %16 = vector.load %arg4[%c0_8, %c0_9, %c0_10] : memref<1x1x1xf32, #tpu.memory_space<vmem>>, vector<1x1x1xf32>
    %17 = vector.shape_cast %16 : vector<1x1x1xf32> to vector<1x1xf32>
    %18 = vector.broadcast %17 : vector<1x1xf32> to vector<4x2048xf32>
    %19 = arith.maximumf %15, %18 : vector<4x2048xf32>
    %c0_11 = arith.constant 0 : index
    %c0_12 = arith.constant 0 : index
    %c0_13 = arith.constant 0 : index
    %20 = vector.load %arg5[%c0_11, %c0_12, %c0_13] : memref<1x4x2048xf32, #tpu.memory_space<vmem>>, vector<1x4x2048xf32>
    %21 = vector.shape_cast %20 : vector<1x4x2048xf32> to vector<4x2048xf32>
    %22 = vector.shape_cast %19 : vector<4x2048xf32> to vector<1x4x2048xf32>
    tpu.vector_store %arg5[%c0_11, %c0_12, %c0_13], %22 {strides = array<i32>} : memref<1x4x2048xf32, #tpu.memory_space<vmem>>, vector<1x4x2048xf32>,
    return
  }
  func.func @transform_0(%arg0: i32) -> (i32, i32, i32) {
    %c0_i32 = arith.constant 0 : i32
    %c0_i32_0 = arith.constant 0 : i32
    %c0_i32_1 = arith.constant 0 : i32
    return %arg0, %c0_i32, %c0_i32_0 : i32, i32, i32
  }
  func.func @transform_1(%arg0: i32) -> (i32, i32, i32) {
    %c0_i32 = arith.constant 0 : i32
    %c0_i32_0 = arith.constant 0 : i32
    %c0_i32_1 = arith.constant 0 : i32
    return %arg0, %c0_i32, %c0_i32_0 : i32, i32, i32
  }
  func.func @transform_2(%arg0: i32) -> (i32, i32, i32) {
    %c0_i32 = arith.constant 0 : i32
    %c0_i32_0 = arith.constant 0 : i32
    %c0_i32_1 = arith.constant 0 : i32
    return %arg0, %c0_i32, %c0_i32_0 : i32, i32, i32
  }
  func.func @transform_3(%arg0: i32) -> (i32, i32, i32) {
    %c0_i32 = arith.constant 0 : i32
    %c0_i32_0 = arith.constant 0 : i32
    %c0_i32_1 = arith.constant 0 : i32
    return %arg0, %c0_i32, %c0_i32_0 : i32, i32, i32
  }
  func.func @transform_4(%arg0: i32) -> (i32, i32, i32) {
    %c0_i32 = arith.constant 0 : i32
    %c0_i32_0 = arith.constant 0 : i32
    %c0_i32_1 = arith.constant 0 : i32
    return %arg0, %c0_i32, %c0_i32_0 : i32, i32, i32
  }
}

module attributes {stable_mosaic.version = 11 : i64} {
  func.func @kernel(%arg0: i32, %arg1: memref<1x36x2048xf32, #tpu.memory_space<vmem>>, %arg2: memref<1x16x36xf32, #tpu.memory_space<vmem>>, %arg3: memref<1x16x1xf32, #tpu.memory_space<vmem>>, %arg4: memref<1x1x1xf32, #tpu.memory_space<vmem>>, %arg5: memref<1x16x512xf32, #tpu.memory_space<vmem>>) attributes {dimension_semantics = [#tpu.dimension_semantics<parallel>], iteration_bounds = array<i64: 4>, scalar_prefetch = 0 : i64, scratch_operands = 0 : i64, tpu.core_type = #tpu.core_type<tc>, window_params = [{transform_indices = @transform_0, window_bounds = array<i64: 1, 36, 2048>}, {transform_indices = @transform_1, window_bounds = array<i64: 1, 16, 36>}, {transform_indices = @transform_2, window_bounds = array<i64: 1, 16, 1>}, {transform_indices = @transform_3, window_bounds = array<i64: 1, 1, 1>}, {transform_indices = @transform_4, window_bounds = array<i64: 1, 16, 512>}]} {
    %c0 = arith.constant 0 : index
    %c0_0 = arith.constant 0 : index
    %c0_1 = arith.constant 0 : index
    %0 = vector.load %arg2[%c0, %c0_0, %c0_1] : memref<1x16x36xf32, #tpu.memory_space<vmem>>, vector<1x16x36xf32>
    %1 = vector.shape_cast %0 : vector<1x16x36xf32> to vector<16x36xf32>
    %c0_2 = arith.constant 0 : index
    %c0_3 = arith.constant 0 : index
    %c0_4 = arith.constant 0 : index
    %2 = vector.load %arg1[%c0_2, %c0_3, %c0_4] : memref<1x36x2048xf32, #tpu.memory_space<vmem>>, vector<1x36x2048xf32>
    %3 = vector.shape_cast %2 : vector<1x36x2048xf32> to vector<36x2048xf32>
    %cst = arith.constant dense<0.000000e+00> : vector<16x2048xf32>
    %4 = tpu.matmul %1, %3, %cst {dimension_numbers = #tpu.dot_dimension_numbers<[1], [0], [0], [1], [0, 0, 1, 1], [], []>} : vector<16x36xf32>, vector<36x2048xf32>, vector<16x2048xf32> -> vector<16x2048xf32>
    %5 = vector.extract_strided_slice %4 {offsets = [0, 0], sizes = [16, 512], strides = [1, 1]} : vector<16x2048xf32> to vector<16x512xf32>
    %6 = vector.extract_strided_slice %4 {offsets = [0, 512], sizes = [16, 512], strides = [1, 1]} : vector<16x2048xf32> to vector<16x512xf32>
    %7 = arith.maximumf %5, %6 : vector<16x512xf32>
    %8 = vector.extract_strided_slice %4 {offsets = [0, 1024], sizes = [16, 512], strides = [1, 1]} : vector<16x2048xf32> to vector<16x512xf32>
    %9 = vector.extract_strided_slice %4 {offsets = [0, 1536], sizes = [16, 512], strides = [1, 1]} : vector<16x2048xf32> to vector<16x512xf32>
    %10 = arith.maximumf %8, %9 : vector<16x512xf32>
    %11 = arith.maximumf %7, %10 : vector<16x512xf32>
    %c0_5 = arith.constant 0 : index
    %c0_6 = arith.constant 0 : index
    %c0_7 = arith.constant 0 : index
    %12 = vector.load %arg3[%c0_5, %c0_6, %c0_7] : memref<1x16x1xf32, #tpu.memory_space<vmem>>, vector<1x16x1xf32>
    %13 = vector.shape_cast %12 : vector<1x16x1xf32> to vector<16x1xf32>
    %14 = vector.broadcast %13 : vector<16x1xf32> to vector<16x512xf32>
    %15 = arith.addf %11, %14 : vector<16x512xf32>
    %c0_8 = arith.constant 0 : index
    %c0_9 = arith.constant 0 : index
    %c0_10 = arith.constant 0 : index
    %16 = vector.load %arg4[%c0_8, %c0_9, %c0_10] : memref<1x1x1xf32, #tpu.memory_space<vmem>>, vector<1x1x1xf32>
    %17 = vector.shape_cast %16 : vector<1x1x1xf32> to vector<1x1xf32>
    %18 = vector.broadcast %17 : vector<1x1xf32> to vector<16x512xf32>
    %19 = arith.maximumf %15, %18 : vector<16x512xf32>
    %c0_11 = arith.constant 0 : index
    %c0_12 = arith.constant 0 : index
    %c0_13 = arith.constant 0 : index
    %20 = vector.load %arg5[%c0_11, %c0_12, %c0_13] : memref<1x16x512xf32, #tpu.memory_space<vmem>>, vector<1x16x512xf32>
    %21 = vector.shape_cast %20 : vector<1x16x512xf32> to vector<16x512xf32>
    %22 = vector.shape_cast %19 : vector<16x512xf32> to vector<1x16x512xf32>
    tpu.vector_store %arg5[%c0_11, %c0_12, %c0_13], %22 {strides = array<i32>} : memref<1x16x512xf32, #tpu.memory_space<vmem>>, vector<1x16x512xf32>,
    return
  }
  func.func @transform_0(%arg0: i32) -> (i32, i32, i32) {
    %c0_i32 = arith.constant 0 : i32
    %c0_i32_0 = arith.constant 0 : i32
    %c0_i32_1 = arith.constant 0 : i32
    return %arg0, %c0_i32, %c0_i32_0 : i32, i32, i32
  }
  func.func @transform_1(%arg0: i32) -> (i32, i32, i32) {
    %c0_i32 = arith.constant 0 : i32
    %c0_i32_0 = arith.constant 0 : i32
    %c0_i32_1 = arith.constant 0 : i32
    return %arg0, %c0_i32, %c0_i32_0 : i32, i32, i32
  }
  func.func @transform_2(%arg0: i32) -> (i32, i32, i32) {
    %c0_i32 = arith.constant 0 : i32
    %c0_i32_0 = arith.constant 0 : i32
    %c0_i32_1 = arith.constant 0 : i32
    return %arg0, %c0_i32, %c0_i32_0 : i32, i32, i32
  }
  func.func @transform_3(%arg0: i32) -> (i32, i32, i32) {
    %c0_i32 = arith.constant 0 : i32
    %c0_i32_0 = arith.constant 0 : i32
    %c0_i32_1 = arith.constant 0 : i32
    return %arg0, %c0_i32, %c0_i32_0 : i32, i32, i32
  }
  func.func @transform_4(%arg0: i32) -> (i32, i32, i32) {
    %c0_i32 = arith.constant 0 : i32
    %c0_i32_0 = arith.constant 0 : i32
    %c0_i32_1 = arith.constant 0 : i32
    return %arg0, %c0_i32, %c0_i32_0 : i32, i32, i32
  }
}

module attributes {stable_mosaic.version = 11 : i64} {
  func.func @kernel(%arg0: i32, %arg1: i32, %arg2: memref<7xi32, #tpu.memory_space<smem>>, %arg3: memref<2x1024xf32, #tpu.memory_space<vmem>>, %arg4: memref<1024x768xbf16, #tpu.memory_space<vmem>>, %arg5: memref<1x1x768xf32, #tpu.memory_space<vmem>>, %arg6: memref<1x2x768xf32, #tpu.memory_space<vmem>>, %arg7: memref<2x768xf32, #tpu.memory_space<vmem>>) attributes {dimension_semantics = [#tpu.dimension_semantics<parallel>, #tpu.dimension_semantics<arbitrary>], iteration_bounds = array<i64: 2, 7>, scalar_prefetch = 1 : i64, scratch_operands = 1 : i64, tpu.core_type = #tpu.core_type<tc>, window_params = [{transform_indices = @transform_0, window_bounds = array<i64: 2, 1024>}, {transform_indices = @transform_1, window_bounds = array<i64: 1024, 768>}, {transform_indices = @transform_2, window_bounds = array<i64: 1, 1, 768>}, {transform_indices = @transform_3, window_bounds = array<i64: 1, 2, 768>}]} {
    %0 = arith.index_cast %arg1 : i32 to index
    %1 = memref.load %arg2[%0] : memref<7xi32, #tpu.memory_space<smem>>
    %c0_i32 = arith.constant 0 : i32
    %2 = arith.cmpi eq, %arg1, %c0_i32 : i32
    %c1_i32 = arith.constant 1 : i32
    %3 = arith.subi %arg1, %c1_i32 : i32
    %c0_i32_0 = arith.constant 0 : i32
    %4 = arith.maxsi %3, %c0_i32_0 : i32
    %5 = arith.index_cast %4 : i32 to index
    %6 = memref.load %arg2[%5] : memref<7xi32, #tpu.memory_space<smem>>
    %7 = arith.cmpi ne, %1, %6 : i32
    %8 = arith.ori %2, %7 : i1
    %c6_i32 = arith.constant 6 : i32
    %9 = arith.cmpi eq, %arg1, %c6_i32 : i32
    %c1_i32_1 = arith.constant 1 : i32
    %10 = arith.addi %arg1, %c1_i32_1 : i32
    %c6_i32_2 = arith.constant 6 : i32
    %11 = arith.minsi %10, %c6_i32_2 : i32
    %12 = arith.index_cast %11 : i32 to index
    %13 = memref.load %arg2[%12] : memref<7xi32, #tpu.memory_space<smem>>
    %14 = arith.cmpi ne, %1, %13 : i32
    %15 = arith.ori %9, %14 : i1
    %16 = arith.extui %8 : i1 to i32
    %c0_i32_3 = arith.constant 0 : i32
    %17 = arith.cmpi ne, %16, %c0_i32_3 : i32
    scf.if %17 {
      %cst_12 = arith.constant 0.000000e+00 : f32
      %27 = vector.broadcast %cst_12 : f32 to vector<2x768xf32>
      %c0_13 = arith.constant 0 : index
      %c0_14 = arith.constant 0 : index
      %28 = vector.load %arg7[%c0_13, %c0_14] : memref<2x768xf32, #tpu.memory_space<vmem>>, vector<2x768xf32>
      tpu.vector_store %arg7[%c0_13, %c0_14], %27 {strides = array<i32>} : memref<2x768xf32, #tpu.memory_space<vmem>>, vector<2x768xf32>,
    } else {
    }
    %c0 = arith.constant 0 : index
    %c0_4 = arith.constant 0 : index
    %18 = vector.load %arg7[%c0, %c0_4] : memref<2x768xf32, #tpu.memory_space<vmem>>, vector<2x768xf32>
    %c0_5 = arith.constant 0 : index
    %c0_6 = arith.constant 0 : index
    %19 = vector.load %arg3[%c0_5, %c0_6] : memref<2x1024xf32, #tpu.memory_space<vmem>>, vector<2x1024xf32>
    %20 = arith.truncf %19 : vector<2x1024xf32> to vector<2x1024xbf16>
    %c0_7 = arith.constant 0 : index
    %c0_8 = arith.constant 0 : index
    %21 = vector.load %arg4[%c0_7, %c0_8] : memref<1024x768xbf16, #tpu.memory_space<vmem>>, vector<1024x768xbf16>
    %cst = arith.constant dense<0.000000e+00> : vector<2x768xf32>
    %22 = tpu.matmul %20, %21, %cst {dimension_numbers = #tpu.dot_dimension_numbers<[1], [0], [0], [1], [0, 0, 1, 1], [], []>} : vector<2x1024xbf16>, vector<1024x768xbf16>, vector<2x768xf32> -> vector<2x768xf32>
    %23 = arith.addf %18, %22 : vector<2x768xf32>
    %c0_9 = arith.constant 0 : index
    %c0_10 = arith.constant 0 : index
    %24 = vector.load %arg7[%c0_9, %c0_10] : memref<2x768xf32, #tpu.memory_space<vmem>>, vector<2x768xf32>
    tpu.vector_store %arg7[%c0_9, %c0_10], %23 {strides = array<i32>} : memref<2x768xf32, #tpu.memory_space<vmem>>, vector<2x768xf32>,
    %25 = arith.extui %15 : i1 to i32
    %c0_i32_11 = arith.constant 0 : i32
    %26 = arith.cmpi ne, %25, %c0_i32_11 : i32
    scf.if %26 {
      %c0_12 = arith.constant 0 : index
      %c0_13 = arith.constant 0 : index
      %27 = vector.load %arg7[%c0_12, %c0_13] : memref<2x768xf32, #tpu.memory_space<vmem>>, vector<2x768xf32>
      %c0_14 = arith.constant 0 : index
      %c0_15 = arith.constant 0 : index
      %c0_16 = arith.constant 0 : index
      %28 = vector.load %arg5[%c0_14, %c0_15, %c0_16] : memref<1x1x768xf32, #tpu.memory_space<vmem>>, vector<1x1x768xf32>
      %29 = vector.shape_cast %28 : vector<1x1x768xf32> to vector<1x768xf32>
      %30 = vector.broadcast %29 : vector<1x768xf32> to vector<2x768xf32>
      %31 = arith.addf %27, %30 : vector<2x768xf32>
      %cst_17 = arith.constant 0.000000e+00 : f32
      %32 = vector.broadcast %cst_17 : f32 to vector<2x768xf32>
      %33 = arith.maximumf %31, %32 : vector<2x768xf32>
      %c0_18 = arith.constant 0 : index
      %c0_19 = arith.constant 0 : index
      %c0_20 = arith.constant 0 : index
      %34 = vector.load %arg6[%c0_18, %c0_19, %c0_20] : memref<1x2x768xf32, #tpu.memory_space<vmem>>, vector<1x2x768xf32>
      %35 = vector.shape_cast %34 : vector<1x2x768xf32> to vector<2x768xf32>
      %36 = vector.shape_cast %33 : vector<2x768xf32> to vector<1x2x768xf32>
      tpu.vector_store %arg6[%c0_18, %c0_19, %c0_20], %36 {strides = array<i32>} : memref<1x2x768xf32, #tpu.memory_space<vmem>>, vector<1x2x768xf32>,
    } else {
    }
    return
  }
  func.func @transform_0(%arg0: i32, %arg1: i32, %arg2: memref<7xi32, #tpu.memory_space<smem>>) -> (i32, i32) {
    %c0_i32 = arith.constant 0 : i32
    %c0_i32_0 = arith.constant 0 : i32
    return %c0_i32, %arg1 : i32, i32
  }
  func.func @transform_1(%arg0: i32, %arg1: i32, %arg2: memref<7xi32, #tpu.memory_space<smem>>) -> (i32, i32) {
    %c0_i32 = arith.constant 0 : i32
    return %arg1, %arg0 : i32, i32
  }
  func.func @transform_2(%arg0: i32, %arg1: i32, %arg2: memref<7xi32, #tpu.memory_space<smem>>) -> (i32, i32, i32) {
    %0 = arith.index_cast %arg1 : i32 to index
    %1 = memref.load %arg2[%0] : memref<7xi32, #tpu.memory_space<smem>>
    %c0_i32 = arith.constant 0 : i32
    %c0_i32_0 = arith.constant 0 : i32
    return %1, %c0_i32, %arg0 : i32, i32, i32
  }
  func.func @transform_3(%arg0: i32, %arg1: i32, %arg2: memref<7xi32, #tpu.memory_space<smem>>) -> (i32, i32, i32) {
    %0 = arith.index_cast %arg1 : i32 to index
    %1 = memref.load %arg2[%0] : memref<7xi32, #tpu.memory_space<smem>>
    %c0_i32 = arith.constant 0 : i32
    %c0_i32_0 = arith.constant 0 : i32
    return %1, %c0_i32, %arg0 : i32, i32, i32
  }
}

module attributes {stable_mosaic.version = 11 : i64} {
  func.func @kernel(%arg0: i32, %arg1: memref<1x2x1536xf32, #tpu.memory_space<vmem>>, %arg2: memref<1x1536x512xbf16, #tpu.memory_space<vmem>>, %arg3: memref<1x1x512xf32, #tpu.memory_space<vmem>>, %arg4: memref<1x1x1xf32, #tpu.memory_space<vmem>>, %arg5: memref<512x10xf32, #tpu.memory_space<vmem>>, %arg6: memref<1x10xf32, #tpu.memory_space<vmem>>, %arg7: memref<2x10xf32, #tpu.memory_space<vmem>>, %arg8: memref<2x512xf32, #tpu.memory_space<vmem>>) attributes {dimension_semantics = [#tpu.dimension_semantics<arbitrary>], iteration_bounds = array<i64: 4>, scalar_prefetch = 0 : i64, scratch_operands = 1 : i64, tpu.core_type = #tpu.core_type<tc>, window_params = [{transform_indices = @transform_0, window_bounds = array<i64: 1, 2, 1536>}, {transform_indices = @transform_1, window_bounds = array<i64: 1, 1536, 512>}, {transform_indices = @transform_2, window_bounds = array<i64: 1, 1, 512>}, {transform_indices = @transform_3, window_bounds = array<i64: 1, 1, 1>}, {pipeline_mode = #tpu.pipeline_mode<synchronous>, transform_indices = @transform_4, window_bounds = array<i64: 512, 10>}, {pipeline_mode = #tpu.pipeline_mode<synchronous>, transform_indices = @transform_5, window_bounds = array<i64: 1, 10>}, {pipeline_mode = #tpu.pipeline_mode<synchronous>, transform_indices = @transform_6, window_bounds = array<i64: 2, 10>}]} {
    %c0_i32 = arith.constant 0 : i32
    %0 = arith.cmpi eq, %arg0, %c0_i32 : i32
    %1 = arith.extui %0 : i1 to i32
    %c0_i32_0 = arith.constant 0 : i32
    %2 = arith.cmpi ne, %1, %c0_i32_0 : i32
    scf.if %2 {
      %cst_17 = arith.constant 0.000000e+00 : f32
      %23 = vector.broadcast %cst_17 : f32 to vector<2x512xf32>
      %c0_18 = arith.constant 0 : index
      %c0_19 = arith.constant 0 : index
      %24 = vector.load %arg8[%c0_18, %c0_19] : memref<2x512xf32, #tpu.memory_space<vmem>>, vector<2x512xf32>
      tpu.vector_store %arg8[%c0_18, %c0_19], %23 {strides = array<i32>} : memref<2x512xf32, #tpu.memory_space<vmem>>, vector<2x512xf32>,
    } else {
    }
    %c0 = arith.constant 0 : index
    %c0_1 = arith.constant 0 : index
    %c0_2 = arith.constant 0 : index
    %3 = vector.load %arg1[%c0, %c0_1, %c0_2] : memref<1x2x1536xf32, #tpu.memory_space<vmem>>, vector<1x2x1536xf32>
    %4 = vector.shape_cast %3 : vector<1x2x1536xf32> to vector<2x1536xf32>
    %5 = arith.truncf %4 : vector<2x1536xf32> to vector<2x1536xbf16>
    %c0_3 = arith.constant 0 : index
    %c0_4 = arith.constant 0 : index
    %c0_5 = arith.constant 0 : index
    %6 = vector.load %arg2[%c0_3, %c0_4, %c0_5] : memref<1x1536x512xbf16, #tpu.memory_space<vmem>>, vector<1x1536x512xbf16>
    %7 = vector.shape_cast %6 : vector<1x1536x512xbf16> to vector<1536x512xbf16>
    %cst = arith.constant dense<0.000000e+00> : vector<2x512xf32>
    %8 = tpu.matmul %5, %7, %cst {dimension_numbers = #tpu.dot_dimension_numbers<[1], [0], [0], [1], [0, 0, 1, 1], [], []>} : vector<2x1536xbf16>, vector<1536x512xbf16>, vector<2x512xf32> -> vector<2x512xf32>
    %c0_6 = arith.constant 0 : index
    %c0_7 = arith.constant 0 : index
    %c0_8 = arith.constant 0 : index
    %9 = vector.load %arg3[%c0_6, %c0_7, %c0_8] : memref<1x1x512xf32, #tpu.memory_space<vmem>>, vector<1x1x512xf32>
    %10 = vector.shape_cast %9 : vector<1x1x512xf32> to vector<1x512xf32>
    %11 = vector.broadcast %10 : vector<1x512xf32> to vector<2x512xf32>
    %12 = arith.addf %8, %11 : vector<2x512xf32>
    %c0_9 = arith.constant 0 : index
    %c0_10 = arith.constant 0 : index
    %13 = vector.load %arg8[%c0_9, %c0_10] : memref<2x512xf32, #tpu.memory_space<vmem>>, vector<2x512xf32>
    %c0_11 = arith.constant 0 : index
    %c0_12 = arith.constant 0 : index
    %c0_13 = arith.constant 0 : index
    %14 = vector.load %arg4[%c0_11, %c0_12, %c0_13] : memref<1x1x1xf32, #tpu.memory_space<vmem>>, vector<1x1x1xf32>
    %15 = vector.shape_cast %14 : vector<1x1x1xf32> to vector<1x1xf32>
    %16 = vector.broadcast %15 : vector<1x1xf32> to vector<2x512xf32>
    %17 = arith.maximumf %12, %16 : vector<2x512xf32>
    %18 = arith.addf %13, %17 : vector<2x512xf32>
    %c0_14 = arith.constant 0 : index
    %c0_15 = arith.constant 0 : index
    %19 = vector.load %arg8[%c0_14, %c0_15] : memref<2x512xf32, #tpu.memory_space<vmem>>, vector<2x512xf32>
    tpu.vector_store %arg8[%c0_14, %c0_15], %18 {strides = array<i32>} : memref<2x512xf32, #tpu.memory_space<vmem>>, vector<2x512xf32>,
    %c3_i32 = arith.constant 3 : i32
    %20 = arith.cmpi eq, %arg0, %c3_i32 : i32
    %21 = arith.extui %20 : i1 to i32
    %c0_i32_16 = arith.constant 0 : i32
    %22 = arith.cmpi ne, %21, %c0_i32_16 : i32
    scf.if %22 {
      %c0_17 = arith.constant 0 : index
      %c0_18 = arith.constant 0 : index
      %23 = vector.load %arg8[%c0_17, %c0_18] : memref<2x512xf32, #tpu.memory_space<vmem>>, vector<2x512xf32>
      %c0_19 = arith.constant 0 : index
      %c0_20 = arith.constant 0 : index
      %24 = vector.load %arg5[%c0_19, %c0_20] : memref<512x10xf32, #tpu.memory_space<vmem>>, vector<512x10xf32>
      %cst_21 = arith.constant dense<0.000000e+00> : vector<2x10xf32>
      %25 = tpu.matmul %23, %24, %cst_21 {dimension_numbers = #tpu.dot_dimension_numbers<[1], [0], [0], [1], [0, 0, 1, 1], [], []>} : vector<2x512xf32>, vector<512x10xf32>, vector<2x10xf32> -> vector<2x10xf32>
      %c0_22 = arith.constant 0 : index
      %c0_23 = arith.constant 0 : index
      %26 = vector.load %arg6[%c0_22, %c0_23] : memref<1x10xf32, #tpu.memory_space<vmem>>, vector<1x10xf32>
      %27 = vector.broadcast %26 : vector<1x10xf32> to vector<2x10xf32>
      %28 = arith.addf %25, %27 : vector<2x10xf32>
      %c0_24 = arith.constant 0 : index
      %c0_25 = arith.constant 0 : index
      %29 = vector.load %arg7[%c0_24, %c0_25] : memref<2x10xf32, #tpu.memory_space<vmem>>, vector<2x10xf32>
      tpu.vector_store %arg7[%c0_24, %c0_25], %28 {strides = array<i32>} : memref<2x10xf32, #tpu.memory_space<vmem>>, vector<2x10xf32>,
    } else {
    }
    return
  }
  func.func @transform_0(%arg0: i32) -> (i32, i32, i32) {
    %c0_i32 = arith.constant 0 : i32
    %c0_i32_0 = arith.constant 0 : i32
    %c0_i32_1 = arith.constant 0 : i32
    return %arg0, %c0_i32, %c0_i32_0 : i32, i32, i32
  }
  func.func @transform_1(%arg0: i32) -> (i32, i32, i32) {
    %c0_i32 = arith.constant 0 : i32
    %c0_i32_0 = arith.constant 0 : i32
    %c0_i32_1 = arith.constant 0 : i32
    return %arg0, %c0_i32, %c0_i32_0 : i32, i32, i32
  }
  func.func @transform_2(%arg0: i32) -> (i32, i32, i32) {
    %c0_i32 = arith.constant 0 : i32
    %c0_i32_0 = arith.constant 0 : i32
    %c0_i32_1 = arith.constant 0 : i32
    return %arg0, %c0_i32, %c0_i32_0 : i32, i32, i32
  }
  func.func @transform_3(%arg0: i32) -> (i32, i32, i32) {
    %c0_i32 = arith.constant 0 : i32
    %c0_i32_0 = arith.constant 0 : i32
    %c0_i32_1 = arith.constant 0 : i32
    return %arg0, %c0_i32, %c0_i32_0 : i32, i32, i32
  }
  func.func @transform_4(%arg0: i32) -> (i32, i32) {
    %c0_i32 = arith.constant 0 : i32
    %c0_i32_0 = arith.constant 0 : i32
    %c0_i32_1 = arith.constant 0 : i32
    return %c0_i32, %c0_i32_0 : i32, i32
  }
  func.func @transform_5(%arg0: i32) -> (i32, i32) {
    %c0_i32 = arith.constant 0 : i32
    %c0_i32_0 = arith.constant 0 : i32
    %c0_i32_1 = arith.constant 0 : i32
    return %c0_i32, %c0_i32_0 : i32, i32
  }
  func.func @transform_6(%arg0: i32) -> (i32, i32) {
    %c0_i32 = arith.constant 0 : i32
    %c0_i32_0 = arith.constant 0 : i32
    %c0_i32_1 = arith.constant 0 : i32
    return %c0_i32, %c0_i32_0 : i32, i32
  }
}

</mosaic_0001>

<bundles_post_ra>
// kernel: forward.4
= control target key start
LH: loop header
LB: loop body
LE: loop exit
PB: predicated region body
PF: predicated region fallthrough
CT: control target
= control target key end

     0   :  { %s3226_s15 = smov 0   ;;  %s3690_s0 = inlined_call_operand.vmem [shape: f32[3,9,8192], index: 0, kind: input, shape index: {}]   ;;  %s3691_s1 = inlined_call_operand.vmem [shape: f32[3,4,9], index: 1, kind: input, shape index: {}]   ;;  %s3692_s2 = inlined_call_operand.vmem [shape: f32[3,4,1], index: 2, kind: input, shape index: {}]   ;;  %s3693_s3 = inlined_call_operand.vmem [shape: f32[3,1,1], index: 3, kind: input, shape index: {}]   ;;  %s3694_s4 = inlined_call_operand.vmem [shape: f32[3,4,2048], index: 4, kind: output, shape index: {}]  }
   0x1 LB: > { %s3068_s16 = sadd.s32 4294967295, %s3197_s15   ;;  %p3072_p0 = scmp.ge.s32.totalorder %s3197_s15, 1  ;;  %s3197_s15 = sphi %s3226_s15, %s14_s15  }
   0x2   : > { %p188_p1 = scmp.lt.s32.totalorder %s3197_s15, 4 }
   0x4   : > { %p189_p2 = pnand %p3072_p0, %p188_p1 }
   0x6   : > { %192 = sbr.rel (%p189_p2) target bundleno = 318 (0x13e), region = 36 }
   0xb   : > { %p225_p3 = scmp.lt.s32.totalorder %s3068_s16, 2  ;;  %v3199_v0 = vmov 0.0   ;;  %v3200_v1 = vmov 0   ;;  %vm379_vm0 = vcmask 1040384   ;;  %vm375_vm1 = vcmask 72704  }
   0xc   : > { %636 = vmatprep.mubr.f32.mxu0 %v3199_v0  ;;  %707 = vmatprep.mubr.f32.mxu1 %v3199_v0 }
   0xd   : > { %s3702_s16 = smov (!%p225_p3, %s3068_s16), 2  ;;  %3190 = vset.pattern.permute.xlu0 %v3200_v1 }
   0xe   : > { %s3178_s17 = sshll.u32 %s3702_s16, 10  ;;  %s3075_s18 = sshll.u32 %s3702_s16, 2 }
   0xf   : > { %s3243_s21 = scalar_lea.vmem %s3690_s0, %s3178_s17  ;;  %s233_s24 = scalar_lea.vmem %s3691_s1, %s3075_s18 }
  0x10   : > { %v312_v2 = vld [vmem:[%s3243_s21 + $0x208] sm:$0x1]  ;;  %v314_v3 = vld [vmem:[%s3243_s21 + $0x218] sm:$0x1]  ;;  %v311_v4 = vld [vmem:[%s3243_s21 + $0x200] sm:$0x1]  ;;  %s237_s27 = scalar_lea.vmem %s3692_s2, %s3075_s18  ;;  %s240_s30 = scalar_lea.vmem %s3693_s3, %s3702_s16 }
  0x11   : > { %3079 = vmatprep.subr.msk.mxu0 %vm379_vm0, %v312_v2  ;;  %3082 = vmatprep.subr.msk.mxu1 %vm379_vm0, %v314_v3  ;;  %v313_v5 = vld [vmem:[%s3243_s21 + $0x210] sm:$0x1]  ;;  %v248_v6 = vld [vmem:[%s3243_s21 + $0x8] sm:$0xff]  ;;  %v250_v7 = vld [vmem:[%s3243_s21 + $0x18] sm:$0xff]  ;;  %s3179_s5 = sshll.u32 %s3702_s16, 6 }
  0x12   : > { %3080 = vmatpush1.msk.msra.mxu0 %vm379_vm0, %v311_v4  ;;  %3083 = vmatpush1.msk.msra.mxu1 %vm379_vm0, %v313_v5  ;;  %v247_v8 = vld [vmem:[%s3243_s21] sm:$0xff]  ;;  %v249_v9 = vld [vmem:[%s3243_s21 + $0x10] sm:$0xff]  ;;  %v316_v11 = vld [vmem:[%s3243_s21 + $0x228] sm:$0x1]  ;;  %s3627_s8 = scalar_lea.vmem %s3694_s4, %s3179_s5 }
  0x13   : > { %v3262_v10 = vld [vmem:[%s233_s24] sm:$0xf]  ;;  %602 = vmatprep.subr.mxu0 %v248_v6  ;;  %673 = vmatprep.subr.mxu1 %v250_v7  ;;  %v318_v12 = vld [vmem:[%s3243_s21 + $0x238] sm:$0x1]  ;;  %v317_v14 = vld [vmem:[%s3243_s21 + $0x230] sm:$0x1] }
  0x14   : > { %603 = vmatpush1.msra.mxu0 %v247_v8  ;;  %674 = vmatpush1.msra.mxu1 %v249_v9  ;;  %v315_v13 = vld [vmem:[%s3243_s21 + $0x220] sm:$0x1]  ;;  %v252_v15 = vld [vmem:[%s3243_s21 + $0x28] sm:$0xff]  ;;  %v254_v16 = vld [vmem:[%s3243_s21 + $0x38] sm:$0xff] }
  0x15   : > { %3081 = vmatmul.mubr.msk.f32.vlgmr.msra.gmra.mxu0 %vm375_vm1, %v3262_v10  ;;  %3084 = vmatmul.mubr.msk.f32.vlgmr.msra.gmra.mxu1 %vm375_vm1, %v3262_v10  ;;  %v251_v17 = vld [vmem:[%s3243_s21 + $0x20] sm:$0xff]  ;;  %v253_v18 = vld [vmem:[%s3243_s21 + $0x30] sm:$0xff]  ;;  %v320_v19 = vld [vmem:[%s3243_s21 + $0x248] sm:$0x1] }
  0x16   : > { %3085 = vmatprep.subr.msk.mxu0 %vm379_vm0, %v316_v11  ;;  %3088 = vmatprep.subr.msk.mxu1 %vm379_vm0, %v318_v12  ;;  %v322_v20 = vld [vmem:[%s3243_s21 + $0x258] sm:$0x1]  ;;  %v319_v21 = vld [vmem:[%s3243_s21 + $0x240] sm:$0x1]  ;;  %v321_v22 = vld [vmem:[%s3243_s21 + $0x250] sm:$0x1] }
  0x17   : > { %3086 = vmatpush1.msk.msra.mxu0 %vm379_vm0, %v315_v13  ;;  %3089 = vmatpush1.msk.msra.mxu1 %vm379_vm0, %v317_v14  ;;  %v256_v23 = vld [vmem:[%s3243_s21 + $0x48] sm:$0xff]  ;;  %v258_v24 = vld [vmem:[%s3243_s21 + $0x58] sm:$0xff]  ;;  %v255_v25 = vld [vmem:[%s3243_s21 + $0x40] sm:$0xff] }
  0x18   : > { %744 = vmatprep.subr.mxu0 %v252_v15  ;;  %815 = vmatprep.subr.mxu1 %v254_v16  ;;  %v257_v26 = vld [vmem:[%s3243_s21 + $0x50] sm:$0xff]  ;;  %v324_v27 = vld [vmem:[%s3243_s21 + $0x268] sm:$0x1]  ;;  %v326_v28 = vld [vmem:[%s3243_s21 + $0x278] sm:$0x1] }
  0x19   : > { %745 = vmatpush1.msra.mxu0 %v251_v17  ;;  %778 = vmatprep.mubr.f32.mxu0 %v3199_v0  ;;  %v323_v29 = vld [vmem:[%s3243_s21 + $0x260] sm:$0x1]  ;;  %v325_v30 = vld [vmem:[%s3243_s21 + $0x270] sm:$0x1]  ;;  %v260_v31 = vld [vmem:[%s3243_s21 + $0x68] sm:$0xff] }
  0x1a   : > { %816 = vmatpush1.msra.mxu1 %v253_v18  ;;  %849 = vmatprep.mubr.f32.mxu1 %v3199_v0  ;;  %v262_v32 = vld [vmem:[%s3243_s21 + $0x78] sm:$0xff]  ;;  %v259_v33 = vld [vmem:[%s3243_s21 + $0x60] sm:$0xff]  ;;  %v261_v34 = vld [vmem:[%s3243_s21 + $0x70] sm:$0xff] }
  0x1b   : > { %3087 = vmatmul.mubr.msk.f32.vlgmr.msra.gmra.mxu0 %vm375_vm1, %v3262_v10  ;;  %3090 = vmatmul.mubr.msk.f32.vlgmr.msra.gmra.mxu1 %vm375_vm1, %v3262_v10  ;;  %v328_v35 = vld [vmem:[%s3243_s21 + $0x288] sm:$0x1]  ;;  %v330_v36 = vld [vmem:[%s3243_s21 + $0x298] sm:$0x1]  ;;  %v327_v37 = vld [vmem:[%s3243_s21 + $0x280] sm:$0x1] }
  0x1c   : > { %3091 = vmatprep.subr.msk.mxu0 %vm379_vm0, %v320_v19  ;;  %3094 = vmatprep.subr.msk.mxu1 %vm379_vm0, %v322_v20  ;;  %v329_v38 = vld [vmem:[%s3243_s21 + $0x290] sm:$0x1]  ;;  %v264_v39 = vld [vmem:[%s3243_s21 + $0x88] sm:$0xff]  ;;  %v266_v40 = vld [vmem:[%s3243_s21 + $0x98] sm:$0xff] }
  0x1d   : > { %3092 = vmatpush1.msk.msra.mxu0 %vm379_vm0, %v319_v21  ;;  %3095 = vmatpush1.msk.msra.mxu1 %vm379_vm0, %v321_v22  ;;  %v263_v41 = vld [vmem:[%s3243_s21 + $0x80] sm:$0xff]  ;;  %v265_v42 = vld [vmem:[%s3243_s21 + $0x90] sm:$0xff]  ;;  %v332_v43 = vld [vmem:[%s3243_s21 + $0x2a8] sm:$0x1] }
  0x1e   : > { %886 = vmatprep.subr.mxu0 %v256_v23  ;;  %957 = vmatprep.subr.mxu1 %v258_v24  ;;  %v334_v44 = vld [vmem:[%s3243_s21 + $0x2b8] sm:$0x1]  ;;  %v331_v45 = vld [vmem:[%s3243_s21 + $0x2a0] sm:$0x1]  ;;  %v333_v46 = vld [vmem:[%s3243_s21 + $0x2b0] sm:$0x1] }
  0x1f   : > { %887 = vmatpush1.msra.mxu0 %v255_v25  ;;  %920 = vmatprep.mubr.f32.mxu0 %v3199_v0  ;;  %v268_v47 = vld [vmem:[%s3243_s21 + $0xa8] sm:$0xff]  ;;  %v270_v48 = vld [vmem:[%s3243_s21 + $0xb8] sm:$0xff]  ;;  %v267_v49 = vld [vmem:[%s3243_s21 + $0xa0] sm:$0xff] }
  0x20   : > { %958 = vmatpush1.msra.mxu1 %v257_v26  ;;  %991 = vmatprep.mubr.f32.mxu1 %v3199_v0  ;;  %v269_v50 = vld [vmem:[%s3243_s21 + $0xb0] sm:$0xff]  ;;  %v336_v51 = vld [vmem:[%s3243_s21 + $0x2c8] sm:$0x1]  ;;  %v338_v52 = vld [vmem:[%s3243_s21 + $0x2d8] sm:$0x1] }
  0x21   : > { %3093 = vmatmul.mubr.msk.f32.vlgmr.msra.gmra.mxu0 %vm375_vm1, %v3262_v10  ;;  %3096 = vmatmul.mubr.msk.f32.vlgmr.msra.gmra.mxu1 %vm375_vm1, %v3262_v10  ;;  %v335_v53 = vld [vmem:[%s3243_s21 + $0x2c0] sm:$0x1]  ;;  %v337_v54 = vld [vmem:[%s3243_s21 + $0x2d0] sm:$0x1]  ;;  %v272_v55 = vld [vmem:[%s3243_s21 + $0xc8] sm:$0xff] }
  0x22   : > { %3097 = vmatprep.subr.msk.mxu0 %vm379_vm0, %v324_v27  ;;  %3100 = vmatprep.subr.msk.mxu1 %vm379_vm0, %v326_v28  ;;  %v274_v56 = vld [vmem:[%s3243_s21 + $0xd8] sm:$0xff]  ;;  %v271_v57 = vld [vmem:[%s3243_s21 + $0xc0] sm:$0xff]  ;;  %v273_v58 = vld [vmem:[%s3243_s21 + $0xd0] sm:$0xff] }
  0x23   : > { %3098 = vmatpush1.msk.msra.mxu0 %vm379_vm0, %v323_v29  ;;  %3101 = vmatpush1.msk.msra.mxu1 %vm379_vm0, %v325_v30  ;;  %v340_v59 = vld [vmem:[%s3243_s21 + $0x2e8] sm:$0x1]  ;;  %v342_v60 = vld [vmem:[%s3243_s21 + $0x2f8] sm:$0x1]  ;;  %v339_v61 = vld [vmem:[%s3243_s21 + $0x2e0] sm:$0x1] }
  0x24   : > { %1028 = vmatprep.subr.mxu0 %v260_v31  ;;  %1099 = vmatprep.subr.mxu1 %v262_v32  ;;  %v341_v62 = vld [vmem:[%s3243_s21 + $0x2f0] sm:$0x1]  ;;  %v276_v63 = vld [vmem:[%s3243_s21 + $0xe8] sm:$0xff]  ;;  %v278_v1 = vld [vmem:[%s3243_s21 + $0xf8] sm:$0xff] }
  0x25   : > { %1029 = vmatpush1.msra.mxu0 %v259_v33  ;;  %1062 = vmatprep.mubr.f32.mxu0 %v3199_v0  ;;  %v275_v2 = vld [vmem:[%s3243_s21 + $0xe0] sm:$0xff]  ;;  %v277_v3 = vld [vmem:[%s3243_s21 + $0xf0] sm:$0xff]  ;;  %v344_v4 = vld [vmem:[%s3243_s21 + $0x308] sm:$0x1] }
  0x26   : > { %1100 = vmatpush1.msra.mxu1 %v261_v34  ;;  %1133 = vmatprep.mubr.f32.mxu1 %v3199_v0  ;;  %v346_v5 = vld [vmem:[%s3243_s21 + $0x318] sm:$0x1]  ;;  %v343_v6 = vld [vmem:[%s3243_s21 + $0x300] sm:$0x1]  ;;  %v345_v7 = vld [vmem:[%s3243_s21 + $0x310] sm:$0x1] }
  0x27   : > { %3099 = vmatmul.mubr.msk.f32.vlgmr.msra.gmra.mxu0 %vm375_vm1, %v3262_v10  ;;  %3102 = vmatmul.mubr.msk.f32.vlgmr.msra.gmra.mxu1 %vm375_vm1, %v3262_v10  ;;  %v280_v8 = vld [vmem:[%s3243_s21 + $0x108] sm:$0xff]  ;;  %v282_v9 = vld [vmem:[%s3243_s21 + $0x118] sm:$0xff]  ;;  %v279_v11 = vld [vmem:[%s3243_s21 + $0x100] sm:$0xff] }
  0x28   : > { %3103 = vmatprep.subr.msk.mxu0 %vm379_vm0, %v328_v35  ;;  %3106 = vmatprep.subr.msk.mxu1 %vm379_vm0, %v330_v36  ;;  %v281_v12 = vld [vmem:[%s3243_s21 + $0x110] sm:$0xff]  ;;  %v348_v13 = vld [vmem:[%s3243_s21 + $0x328] sm:$0x1]  ;;  %v350_v14 = vld [vmem:[%s3243_s21 + $0x338] sm:$0x1] }
  0x29   : > { %3104 = vmatpush1.msk.msra.mxu0 %vm379_vm0, %v327_v37  ;;  %3107 = vmatpush1.msk.msra.mxu1 %vm379_vm0, %v329_v38  ;;  %v347_v15 = vld [vmem:[%s3243_s21 + $0x320] sm:$0x1]  ;;  %v349_v16 = vld [vmem:[%s3243_s21 + $0x330] sm:$0x1]  ;;  %v284_v17 = vld [vmem:[%s3243_s21 + $0x128] sm:$0xff] }
  0x2a   : > { %1170 = vmatprep.subr.mxu0 %v264_v39  ;;  %1241 = vmatprep.subr.mxu1 %v266_v40  ;;  %v286_v18 = vld [vmem:[%s3243_s21 + $0x138] sm:$0xff]  ;;  %v283_v19 = vld [vmem:[%s3243_s21 + $0x120] sm:$0xff]  ;;  %v285_v20 = vld [vmem:[%s3243_s21 + $0x130] sm:$0xff] }
  0x2b   : > { %1171 = vmatpush1.msra.mxu0 %v263_v41  ;;  %1204 = vmatprep.mubr.f32.mxu0 %v3199_v0  ;;  %v352_v21 = vld [vmem:[%s3243_s21 + $0x348] sm:$0x1]  ;;  %v354_v22 = vld [vmem:[%s3243_s21 + $0x358] sm:$0x1]  ;;  %v351_v23 = vld [vmem:[%s3243_s21 + $0x340] sm:$0x1] }
  0x2c   : > { %1242 = vmatpush1.msra.mxu1 %v265_v42  ;;  %1275 = vmatprep.mubr.f32.mxu1 %v3199_v0  ;;  %v353_v24 = vld [vmem:[%s3243_s21 + $0x350] sm:$0x1]  ;;  %v288_v25 = vld [vmem:[%s3243_s21 + $0x148] sm:$0xff]  ;;  %v290_v26 = vld [vmem:[%s3243_s21 + $0x158] sm:$0xff] }
  0x2d   : > { %3105 = vmatmul.mubr.msk.f32.vlgmr.msra.gmra.mxu0 %vm375_vm1, %v3262_v10  ;;  %3108 = vmatmul.mubr.msk.f32.vlgmr.msra.gmra.mxu1 %vm375_vm1, %v3262_v10  ;;  %v287_v27 = vld [vmem:[%s3243_s21 + $0x140] sm:$0xff]  ;;  %v289_v28 = vld [vmem:[%s3243_s21 + $0x150] sm:$0xff]  ;;  %v356_v29 = vld [vmem:[%s3243_s21 + $0x368] sm:$0x1] }
  0x2e   : > { %3109 = vmatprep.subr.msk.mxu0 %vm379_vm0, %v332_v43  ;;  %3112 = vmatprep.subr.msk.mxu1 %vm379_vm0, %v334_v44  ;;  %v358_v30 = vld [vmem:[%s3243_s21 + $0x378] sm:$0x1]  ;;  %v355_v31 = vld [vmem:[%s3243_s21 + $0x360] sm:$0x1]  ;;  %v357_v32 = vld [vmem:[%s3243_s21 + $0x370] sm:$0x1] }
  0x2f   : > { %3110 = vmatpush1.msk.msra.mxu0 %vm379_vm0, %v331_v45  ;;  %3113 = vmatpush1.msk.msra.mxu1 %vm379_vm0, %v333_v46  ;;  %v292_v33 = vld [vmem:[%s3243_s21 + $0x168] sm:$0xff]  ;;  %v294_v34 = vld [vmem:[%s3243_s21 + $0x178] sm:$0xff]  ;;  %v291_v35 = vld [vmem:[%s3243_s21 + $0x160] sm:$0xff] }
  0x30   : > { %1312 = vmatprep.subr.mxu0 %v268_v47  ;;  %1383 = vmatprep.subr.mxu1 %v270_v48  ;;  %v293_v36 = vld [vmem:[%s3243_s21 + $0x170] sm:$0xff]  ;;  %v360_v37 = vld [vmem:[%s3243_s21 + $0x388] sm:$0x1]  ;;  %v362_v38 = vld [vmem:[%s3243_s21 + $0x398] sm:$0x1] }
  0x31   : > { %1313 = vmatpush1.msra.mxu0 %v267_v49  ;;  %1346 = vmatprep.mubr.f32.mxu0 %v3199_v0  ;;  %v359_v39 = vld [vmem:[%s3243_s21 + $0x380] sm:$0x1]  ;;  %v361_v40 = vld [vmem:[%s3243_s21 + $0x390] sm:$0x1]  ;;  %v296_v41 = vld [vmem:[%s3243_s21 + $0x188] sm:$0xff] }
  0x32   : > { %1384 = vmatpush1.msra.mxu1 %v269_v50  ;;  %1417 = vmatprep.mubr.f32.mxu1 %v3199_v0  ;;  %v298_v42 = vld [vmem:[%s3243_s21 + $0x198] sm:$0xff]  ;;  %v295_v43 = vld [vmem:[%s3243_s21 + $0x180] sm:$0xff]  ;;  %v297_v44 = vld [vmem:[%s3243_s21 + $0x190] sm:$0xff] }
  0x33   : > { %3111 = vmatmul.mubr.msk.f32.vlgmr.msra.gmra.mxu0 %vm375_vm1, %v3262_v10  ;;  %3114 = vmatmul.mubr.msk.f32.vlgmr.msra.gmra.mxu1 %vm375_vm1, %v3262_v10  ;;  %v364_v45 = vld [vmem:[%s3243_s21 + $0x3a8] sm:$0x1]  ;;  %v366_v46 = vld [vmem:[%s3243_s21 + $0x3b8] sm:$0x1]  ;;  %v363_v47 = vld [vmem:[%s3243_s21 + $0x3a0] sm:$0x1] }
  0x34   : > { %3115 = vmatprep.subr.msk.mxu0 %vm379_vm0, %v336_v51  ;;  %3118 = vmatprep.subr.msk.mxu1 %vm379_vm0, %v338_v52  ;;  %v365_v48 = vld [vmem:[%s3243_s21 + $0x3b0] sm:$0x1]  ;;  %v300_v49 = vld [vmem:[%s3243_s21 + $0x1a8] sm:$0xff]  ;;  %v302_v50 = vld [vmem:[%s3243_s21 + $0x1b8] sm:$0xff] }
  0x35   : > { %3116 = vmatpush1.msk.msra.mxu0 %vm379_vm0, %v335_v53  ;;  %3119 = vmatpush1.msk.msra.mxu1 %vm379_vm0, %v337_v54  ;;  %v299_v51 = vld [vmem:[%s3243_s21 + $0x1a0] sm:$0xff]  ;;  %v301_v52 = vld [vmem:[%s3243_s21 + $0x1b0] sm:$0xff]  ;;  %v368_v53 = vld [vmem:[%s3243_s21 + $0x3c8] sm:$0x1] }
  0x36   : > { %1454 = vmatprep.subr.mxu0 %v272_v55  ;;  %1525 = vmatprep.subr.mxu1 %v274_v56  ;;  %v370_v54 = vld [vmem:[%s3243_s21 + $0x3d8] sm:$0x1]  ;;  %v367_v55 = vld [vmem:[%s3243_s21 + $0x3c0] sm:$0x1]  ;;  %v369_v56 = vld [vmem:[%s3243_s21 + $0x3d0] sm:$0x1] }
  0x37   : > { %1455 = vmatpush1.msra.mxu0 %v271_v57  ;;  %1488 = vmatprep.mubr.f32.mxu0 %v3199_v0  ;;  %v304_v57 = vld [vmem:[%s3243_s21 + $0x1c8] sm:$0xff] }
  0x38   : > { %1526 = vmatpush1.msra.mxu1 %v273_v58  ;;  %1559 = vmatprep.mubr.f32.mxu1 %v3199_v0  ;;  %v306_v58 = vld [vmem:[%s3243_s21 + $0x1d8] sm:$0xff] }
  0x39   : > { %3117 = vmatmul.mubr.msk.f32.vlgmr.msra.gmra.mxu0 %vm375_vm1, %v3262_v10  ;;  %3120 = vmatmul.mubr.msk.f32.vlgmr.msra.gmra.mxu1 %vm375_vm1, %v3262_v10 }
  0x3a   : > { %3121 = vmatprep.subr.msk.mxu0 %vm379_vm0, %v340_v59  ;;  %3124 = vmatprep.subr.msk.mxu1 %vm379_vm0, %v342_v60  ;;  %v303_v59 = vld [vmem:[%s3243_s21 + $0x1c0] sm:$0xff]  ;;  %v305_v60 = vld [vmem:[%s3243_s21 + $0x1d0] sm:$0xff] }
  0x3b   : > { %3122 = vmatpush1.msk.msra.mxu0 %vm379_vm0, %v339_v61  ;;  %3125 = vmatpush1.msk.msra.mxu1 %vm379_vm0, %v341_v62  ;;  %v372_v61 = vld [vmem:[%s3243_s21 + $0x3e8] sm:$0x1]  ;;  %v374_v62 = vld [vmem:[%s3243_s21 + $0x3f8] sm:$0x1] }
  0x3c   : > { %1596 = vmatprep.subr.mxu0 %v276_v63  ;;  %1667 = vmatprep.subr.mxu1 %v278_v1  ;;  %v371_v63 = vld [vmem:[%s3243_s21 + $0x3e0] sm:$0x1]  ;;  %v373_v1 = vld [vmem:[%s3243_s21 + $0x3f0] sm:$0x1] }
  0x3d   : > { %1597 = vmatpush1.msra.mxu0 %v275_v2  ;;  %1630 = vmatprep.mubr.f32.mxu0 %v3199_v0  ;;  %v308_v2 = vld [vmem:[%s3243_s21 + $0x1e8] sm:$0xff] }
  0x3e   : > { %1668 = vmatpush1.msra.mxu1 %v277_v3  ;;  %1701 = vmatprep.mubr.f32.mxu1 %v3199_v0  ;;  %v310_v3 = vld [vmem:[%s3243_s21 + $0x1f8] sm:$0xff] }
  0x3f   : > { %3123 = vmatmul.mubr.msk.f32.vlgmr.msra.gmra.mxu0 %vm375_vm1, %v3262_v10  ;;  %3126 = vmatmul.mubr.msk.f32.vlgmr.msra.gmra.mxu1 %vm375_vm1, %v3262_v10 }
  0x40   : > { %3127 = vmatprep.subr.msk.mxu0 %vm379_vm0, %v344_v4  ;;  %3130 = vmatprep.subr.msk.mxu1 %vm379_vm0, %v346_v5  ;;  %v307_v4 = vld [vmem:[%s3243_s21 + $0x1e0] sm:$0xff]  ;;  %v309_v5 = vld [vmem:[%s3243_s21 + $0x1f0] sm:$0xff] }
  0x41   : > { %3128 = vmatpush1.msk.msra.mxu0 %vm379_vm0, %v343_v6  ;;  %3131 = vmatpush1.msk.msra.mxu1 %vm379_vm0, %v345_v7  ;;  %v2892_v6 = vld [vmem:[%s237_s27] sm:$0xf] }
  0x42   : > { %1738 = vmatprep.subr.mxu0 %v280_v8  ;;  %1809 = vmatprep.subr.mxu1 %v282_v9  ;;  %v3175_v7 = vld [vmem:[%s240_s30] ss:$0 sm:$0xff] }
  0x43   : > { %1739 = vmatpush1.msra.mxu0 %v279_v11  ;;  %1772 = vmatprep.mubr.f32.mxu0 %v3199_v0 }
  0x44   : > { %1810 = vmatpush1.msra.mxu1 %v281_v12  ;;  %1843 = vmatprep.mubr.f32.mxu1 %v3199_v0 }
  0x45   : > { %3129 = vmatmul.mubr.msk.f32.vlgmr.msra.gmra.mxu0 %vm375_vm1, %v3262_v10  ;;  %3132 = vmatmul.mubr.msk.f32.vlgmr.msra.gmra.mxu1 %vm375_vm1, %v3262_v10 }
  0x46   : > { %3133 = vmatprep.subr.msk.mxu0 %vm379_vm0, %v348_v13  ;;  %3136 = vmatprep.subr.msk.mxu1 %vm379_vm0, %v350_v14 }
  0x47   : > { %3134 = vmatpush1.msk.msra.mxu0 %vm379_vm0, %v347_v15  ;;  %3137 = vmatpush1.msk.msra.mxu1 %vm379_vm0, %v349_v16 }
  0x48   : > { %1880 = vmatprep.subr.mxu0 %v284_v17  ;;  %1951 = vmatprep.subr.mxu1 %v286_v18 }
  0x49   : > { %1881 = vmatpush1.msra.mxu0 %v283_v19  ;;  %1914 = vmatprep.mubr.f32.mxu0 %v3199_v0 }
  0x4a   : > { %1952 = vmatpush1.msra.mxu1 %v285_v20  ;;  %1985 = vmatprep.mubr.f32.mxu1 %v3199_v0 }
  0x4b   : > { %3135 = vmatmul.mubr.msk.f32.vlgmr.msra.gmra.mxu0 %vm375_vm1, %v3262_v10  ;;  %3138 = vmatmul.mubr.msk.f32.vlgmr.msra.gmra.mxu1 %vm375_vm1, %v3262_v10 }
  0x4c   : > { %3139 = vmatprep.subr.msk.mxu0 %vm379_vm0, %v352_v21  ;;  %3142 = vmatprep.subr.msk.mxu1 %vm379_vm0, %v354_v22 }
  0x4d   : > { %3140 = vmatpush1.msk.msra.mxu0 %vm379_vm0, %v351_v23  ;;  %3143 = vmatpush1.msk.msra.mxu1 %vm379_vm0, %v353_v24 }
  0x4e   : > { %2022 = vmatprep.subr.mxu0 %v288_v25  ;;  %2093 = vmatprep.subr.mxu1 %v290_v26 }
  0x4f   : > { %2023 = vmatpush1.msra.mxu0 %v287_v27  ;;  %2056 = vmatprep.mubr.f32.mxu0 %v3199_v0 }
  0x50   : > { %2094 = vmatpush1.msra.mxu1 %v289_v28  ;;  %2127 = vmatprep.mubr.f32.mxu1 %v3199_v0 }
  0x51   : > { %3141 = vmatmul.mubr.msk.f32.vlgmr.msra.gmra.mxu0 %vm375_vm1, %v3262_v10  ;;  %3144 = vmatmul.mubr.msk.f32.vlgmr.msra.gmra.mxu1 %vm375_vm1, %v3262_v10 }
  0x52   : > { %3145 = vmatprep.subr.msk.mxu0 %vm379_vm0, %v356_v29  ;;  %3148 = vmatprep.subr.msk.mxu1 %vm379_vm0, %v358_v30 }
  0x53   : > { %3146 = vmatpush1.msk.msra.mxu0 %vm379_vm0, %v355_v31  ;;  %3149 = vmatpush1.msk.msra.mxu1 %vm379_vm0, %v357_v32 }
  0x54   : > { %2164 = vmatprep.subr.mxu0 %v292_v33  ;;  %2235 = vmatprep.subr.mxu1 %v294_v34 }
  0x55   : > { %2165 = vmatpush1.msra.mxu0 %v291_v35  ;;  %2198 = vmatprep.mubr.f32.mxu0 %v3199_v0 }
  0x56   : > { %2236 = vmatpush1.msra.mxu1 %v293_v36  ;;  %2269 = vmatprep.mubr.f32.mxu1 %v3199_v0 }
  0x57   : > { %3147 = vmatmul.mubr.msk.f32.vlgmr.msra.gmra.mxu0 %vm375_vm1, %v3262_v10  ;;  %3150 = vmatmul.mubr.msk.f32.vlgmr.msra.gmra.mxu1 %vm375_vm1, %v3262_v10 }
  0x58   : > { %3151 = vmatprep.subr.msk.mxu0 %vm379_vm0, %v360_v37  ;;  %3154 = vmatprep.subr.msk.mxu1 %vm379_vm0, %v362_v38 }
  0x59   : > { %3152 = vmatpush1.msk.msra.mxu0 %vm379_vm0, %v359_v39  ;;  %3155 = vmatpush1.msk.msra.mxu1 %vm379_vm0, %v361_v40 }
  0x5a   : > { %2306 = vmatprep.subr.mxu0 %v296_v41  ;;  %2377 = vmatprep.subr.mxu1 %v298_v42 }
  0x5b   : > { %2307 = vmatpush1.msra.mxu0 %v295_v43  ;;  %2340 = vmatprep.mubr.f32.mxu0 %v3199_v0 }
  0x5c   : > { %2378 = vmatpush1.msra.mxu1 %v297_v44  ;;  %2411 = vmatprep.mubr.f32.mxu1 %v3199_v0 }
  0x5d   : > { %3153 = vmatmul.mubr.msk.f32.vlgmr.msra.gmra.mxu0 %vm375_vm1, %v3262_v10  ;;  %3156 = vmatmul.mubr.msk.f32.vlgmr.msra.gmra.mxu1 %vm375_vm1, %v3262_v10 }
  0x5e   : > { %3157 = vmatprep.subr.msk.mxu0 %vm379_vm0, %v364_v45  ;;  %3160 = vmatprep.subr.msk.mxu1 %vm379_vm0, %v366_v46 }
  0x5f   : > { %3158 = vmatpush1.msk.msra.mxu0 %vm379_vm0, %v363_v47  ;;  %3161 = vmatpush1.msk.msra.mxu1 %vm379_vm0, %v365_v48 }
  0x60   : > { %2448 = vmatprep.subr.mxu0 %v300_v49  ;;  %2519 = vmatprep.subr.mxu1 %v302_v50 }
  0x61   : > { %2449 = vmatpush1.msra.mxu0 %v299_v51  ;;  %2482 = vmatprep.mubr.f32.mxu0 %v3199_v0 }
  0x62   : > { %2520 = vmatpush1.msra.mxu1 %v301_v52  ;;  %2553 = vmatprep.mubr.f32.mxu1 %v3199_v0 }
  0x63   : > { %3159 = vmatmul.mubr.msk.f32.vlgmr.msra.gmra.mxu0 %vm375_vm1, %v3262_v10  ;;  %3162 = vmatmul.mubr.msk.f32.vlgmr.msra.gmra.mxu1 %vm375_vm1, %v3262_v10 }
  0x64   : > { %3163 = vmatprep.subr.msk.mxu0 %vm379_vm0, %v368_v53  ;;  %3166 = vmatprep.subr.msk.mxu1 %vm379_vm0, %v370_v54 }
  0x65   : > { %3164 = vmatpush1.msk.msra.mxu0 %vm379_vm0, %v367_v55  ;;  %3167 = vmatpush1.msk.msra.mxu1 %vm379_vm0, %v369_v56 }
  0x66   : > { %2590 = vmatprep.subr.mxu0 %v304_v57  ;;  %2661 = vmatprep.subr.mxu1 %v306_v58 }
  0x67   : > { %2591 = vmatpush1.msra.mxu0 %v303_v59  ;;  %2624 = vmatprep.mubr.f32.mxu0 %v3199_v0 }
  0x68   : > { %2662 = vmatpush1.msra.mxu1 %v305_v60  ;;  %2695 = vmatprep.mubr.f32.mxu1 %v3199_v0 }
  0x69   : > { %3165 = vmatmul.mubr.msk.f32.vlgmr.msra.gmra.mxu0 %vm375_vm1, %v3262_v10  ;;  %3168 = vmatmul.mubr.msk.f32.vlgmr.msra.gmra.mxu1 %vm375_vm1, %v3262_v10 }
  0x6a   : > { %3169 = vmatprep.subr.msk.mxu0 %vm379_vm0, %v372_v61  ;;  %3172 = vmatprep.subr.msk.mxu1 %vm379_vm0, %v374_v62 }
  0x6b   : > { %3170 = vmatpush1.msk.msra.mxu0 %vm379_vm0, %v371_v63  ;;  %3173 = vmatpush1.msk.msra.mxu1 %vm379_vm0, %v373_v1 }
  0x6c   : > { %2732 = vmatprep.subr.mxu0 %v308_v2  ;;  %2803 = vmatprep.subr.mxu1 %v310_v3 }
  0x6d   : > { %2733 = vmatpush1.msra.mxu0 %v307_v4  ;;  %2766 = vmatprep.mubr.f32.mxu0 %v3199_v0 }
  0x6e   : > { %2804 = vmatpush1.msra.mxu1 %v309_v5  ;;  %2837 = vmatprep.mubr.f32.mxu1 %v3199_v0 }
  0x6f   : > { %3171 = vmatmul.mubr.msk.f32.vlgmr.msra.gmra.mxu0 %vm375_vm1, %v3262_v10  ;;  %3174 = vmatmul.mubr.msk.f32.vlgmr.msra.gmra.mxu1 %vm375_vm1, %v3262_v10 }
  0x70   : > { %2895 = vperm.xlu0 %3190, %v2892_v6  }
  0x74   : > { %2921 = vperm.xlu0 %3190, %v3175_v7  }
  0xd5   : > { %v638_v8 = vpop.f32.mrf.mxu0  ;;  %v709_v9 = vpop.f32.mrf.mxu1 }
  0xd7   : > { %v640_v11 = vpop.f32.mrf.mxu0  ;;  %v711_v12 = vpop.f32.mrf.mxu1 }
  0xdb   : > { %v3547_v13 = vpop.f32.mrf.mxu0  ;;  %v3549_v0 = vpop.f32.mrf.mxu1 }
  0xdd   : > { %v3551_v14 = vpop.f32.mrf.mxu0  ;;  %v3553_v15 = vpop.f32.mrf.mxu1 }
  0xe1   : > { %v3555_v16 = vpop.f32.mrf.mxu0  ;;  %v3557_v17 = vpop.f32.mrf.mxu1 }
  0xe3   : > { %v3559_v10 = vpop.f32.mrf.mxu0  ;;  %v3561_v18 = vpop.f32.mrf.mxu1 }
  0xe7   : > { %v3563_v19 = vpop.f32.mrf.mxu0  ;;  %v3565_v20 = vpop.f32.mrf.mxu1 }
  0xe9   : > { %v3567_v21 = vpop.f32.mrf.mxu0  ;;  %v3569_v22 = vpop.f32.mrf.mxu1 }
  0xea   : > { %3695 = vst [vmem:[#allocation2_spill] sm:$0xff] %v3569_v22 }
  0xeb   : > { %v3607_v55 = vpop.permute.xlu0 %2895 }
  0xed   : > { %v1206_v23 = vpop.f32.mrf.mxu0  ;;  %v1277_v24 = vpop.f32.mrf.mxu1 }
  0xee   : > { %v2844_v58 = vmax.f32 %v638_v8, %v1206_v23  ;;  %v2846_v59 = vmax.f32 %v709_v9, %v1277_v24 }
  0xef   : > { %v1208_v25 = vpop.f32.mrf.mxu0  ;;  %v1279_v26 = vpop.f32.mrf.mxu1 }
  0xf0   : > { %v2845_v62 = vmax.f32 %v640_v11, %v1208_v25  ;;  %v2847_v63 = vmax.f32 %v711_v12, %v1279_v26 }
  0xf3   : > { %v1348_v27 = vpop.f32.mrf.mxu0  ;;  %v1419_v28 = vpop.f32.mrf.mxu1 }
  0xf4   : > { %v2848_v8 = vmax.f32 %v3547_v13, %v1348_v27  ;;  %v2850_v9 = vmax.f32 %v3549_v0, %v1419_v28 }
  0xf5   : > { %v3571_v29 = vpop.f32.mrf.mxu0  ;;  %v3573_v30 = vpop.f32.mrf.mxu1 }
  0xf9   : > { %v3575_v31 = vpop.f32.mrf.mxu0  ;;  %v3577_v32 = vpop.f32.mrf.mxu1 }
  0xfb   : > { %v3579_v33 = vpop.f32.mrf.mxu0  ;;  %v3581_v34 = vpop.f32.mrf.mxu1 }
  0xff   : > { %v3583_v35 = vpop.f32.mrf.mxu0  ;;  %v3585_v36 = vpop.f32.mrf.mxu1 }
 0x101   : > { %v3587_v37 = vpop.f32.mrf.mxu0  ;;  %v3589_v38 = vpop.f32.mrf.mxu1 }
 0x102   : > { %3696 = vst [vmem:[#allocation3_spill] sm:$0xff] %v3589_v38 }
 0x105   : > { %v1774_v39 = vpop.f32.mrf.mxu0  ;;  %v1845_v40 = vpop.f32.mrf.mxu1 }
 0x107   : > { %v1776_v41 = vpop.f32.mrf.mxu0  ;;  %v1847_v42 = vpop.f32.mrf.mxu1 }
 0x10b   : > { %v1916_v43 = vpop.f32.mrf.mxu0  ;;  %v1987_v44 = vpop.f32.mrf.mxu1 }
 0x10d   : > { %v1918_v45 = vpop.f32.mrf.mxu0  ;;  %v1989_v46 = vpop.f32.mrf.mxu1 }
 0x111   : > { %v3591_v47 = vpop.f32.mrf.mxu0  ;;  %v3593_v48 = vpop.f32.mrf.mxu1 }
 0x113   : > { %v3595_v49 = vpop.f32.mrf.mxu0  ;;  %v3597_v50 = vpop.f32.mrf.mxu1 }
 0x117   : > { %v3599_v51 = vpop.f32.mrf.mxu0  ;;  %v3601_v52 = vpop.f32.mrf.mxu1 }
 0x119   : > { %v3603_v53 = vpop.f32.mrf.mxu0  ;;  %v3605_v54 = vpop.f32.mrf.mxu1 }
 0x11a   : > { %3697 = vst [vmem:[#allocation4_spill] sm:$0xff] %v3605_v54  ;;  %v3609_v54 = vpop.permute.xlu0 %2921 }
 0x11d   : > { %v2342_v56 = vpop.f32.mrf.mxu0  ;;  %v2413_v57 = vpop.f32.mrf.mxu1 }
 0x11e   : > { %v2860_v60 = vmax.f32 %v1774_v39, %v2342_v56  ;;  %v2862_v61 = vmax.f32 %v1845_v40, %v2413_v57  ;;  %v2849_v40 = vmax.f32 %v3551_v14, %v3571_v29  ;;  %v2851_v57 = vmax.f32 %v3553_v15, %v3573_v30 }
 0x11f   : > { %v2344_v1 = vpop.f32.mrf.mxu0  ;;  %v2415_v2 = vpop.f32.mrf.mxu1 }
 0x120   : > { %v2876_v3 = vmax.f32 %v2844_v58, %v2860_v60  ;;  %v2878_v4 = vmax.f32 %v2846_v59, %v2862_v61  ;;  %v2861_v5 = vmax.f32 %v1776_v41, %v2344_v1  ;;  %v2863_v6 = vmax.f32 %v1847_v42, %v2415_v2 }
 0x121   : > { %v2854_v61 = vmax.f32 %v3557_v17, %v3577_v32 }
 0x122   : > { %v2877_v7 = vmax.f32 %v2845_v62, %v2861_v5  ;;  %v2879_v22 = vmax.f32 %v2847_v63, %v2863_v6  ;;  %v2898_v38 = vadd.f32 %v3607_v55, %v2876_v3  ;;  %v2900_v12 = vadd.f32 %v3607_v55, %v2878_v4 }
 0x123   : > { %v2484_v23 = vpop.f32.mrf.mxu0  ;;  %v2555_v11 = vpop.f32.mrf.mxu1 }
 0x124   : > { %v2899_v24 = vadd.f32 %v3607_v55, %v2877_v7  ;;  %v2901_v25 = vadd.f32 %v3607_v55, %v2879_v22  ;;  %v2864_v26 = vmax.f32 %v1916_v43, %v2484_v23  ;;  %v2866_v39 = vmax.f32 %v1987_v44, %v2555_v11 }
 0x125   : > { %v2486_v41 = vpop.f32.mrf.mxu0  ;;  %v2924_v42 = vmax.f32 %v2898_v38, %v3609_v54  ;;  %v2557_v13 = vpop.f32.mrf.mxu1  ;;  %v2926_v14 = vmax.f32 %v2900_v12, %v3609_v54 }
 0x126   : > { %v2880_v27 = vmax.f32 %v2848_v8, %v2864_v26  ;;  %v2882_v0 = vmax.f32 %v2850_v9, %v2866_v39  ;;  %v2865_v28 = vmax.f32 %v1918_v45, %v2486_v41  ;;  %v2925_v56 = vmax.f32 %v2899_v24, %v3609_v54 }
 0x127   : > { %v2927_v22 = vmax.f32 %v2901_v25, %v3609_v54  ;;  %v2867_v29 = vmax.f32 %v1989_v46, %v2557_v13  ;;  %v2852_v45 = vmax.f32 %v3555_v16, %v3575_v31  ;;  %v2853_v46 = vmax.f32 %v3559_v10, %v3579_v33  ;;  %v3698_v13 = vld [vmem:[#allocation3_spill] sm:$0xff] }
 0x128   : > { %v2902_v38 = vadd.f32 %v3607_v55, %v2880_v27  ;;  %v2881_v43 = vmax.f32 %v2849_v40, %v2865_v28  ;;  %v2956_v44 = vcombine.low %v2924_v42, %v2925_v56  ;;  %v2904_v15 = vadd.f32 %v3607_v55, %v2882_v0  ;;  %v3700_v0 = vld [vmem:[#allocation4_spill] sm:$0xff] }
 0x129   : > { %v2957_v30 = vcombine.low %v2926_v14, %v2927_v22  ;;  %v2883_v58 = vmax.f32 %v2851_v57, %v2867_v29  ;;  %v2626_v59 = vpop.f32.mrf.mxu0  ;;  %v2697_v60 = vpop.f32.mrf.mxu1  ;;  %v2855_v16 = vmax.f32 %v3561_v18, %v3581_v34  ;;  %v2856_v8 = vmax.f32 %v3563_v19, %v3583_v35 }
 0x12a   : > { %v2903_v62 = vadd.f32 %v3607_v55, %v2881_v43  ;;  %2972 = vst [vmem:[%s3627_s8] sm:$0xff] %v2956_v44  ;;  %v2868_v63 = vmax.f32 %v3591_v47, %v2626_v59  ;;  %v2928_v31 = vmax.f32 %v2902_v38, %v3609_v54  ;;  %v2870_v2 = vmax.f32 %v3593_v48, %v2697_v60 }
 0x12b   : > { %2973 = vst [vmem:[%s3627_s8 + $0x8] sm:$0xff] %v2957_v30  ;;  %v2905_v1 = vadd.f32 %v3607_v55, %v2883_v58  ;;  %v2628_v3 = vpop.f32.mrf.mxu0  ;;  %v2699_v17 = vpop.f32.mrf.mxu1  ;;  %v2930_v4 = vmax.f32 %v2904_v15, %v3609_v54  ;;  %v2857_v26 = vmax.f32 %v3567_v21, %v3587_v37  ;;  %v3699_v21 = vld [vmem:[#allocation2_spill] sm:$0xff] }
 0x12c   : > { %v2929_v32 = vmax.f32 %v2903_v62, %v3609_v54  ;;  %v2884_v10 = vmax.f32 %v2852_v45, %v2868_v63  ;;  %v2869_v33 = vmax.f32 %v3595_v49, %v2628_v3  ;;  %v2871_v47 = vmax.f32 %v3597_v50, %v2699_v17 }
 0x12d   : > { %v2931_v18 = vmax.f32 %v2905_v1, %v3609_v54  ;;  %v2886_v34 = vmax.f32 %v2854_v61, %v2870_v2  ;;  %v2858_v50 = vmax.f32 %v3565_v20, %v3585_v36  ;;  %v2859_v37 = vmax.f32 %v3699_v21, %v3698_v13 }
 0x12e   : > { %v2958_v5 = vcombine.low %v2928_v31, %v2929_v32  ;;  %v2906_v6 = vadd.f32 %v3607_v55, %v2884_v10  ;;  %v2885_v48 = vmax.f32 %v2853_v46, %v2869_v33  ;;  %v2887_v7 = vmax.f32 %v2855_v16, %v2871_v47 }
 0x12f   : > { %v2959_v9 = vcombine.low %v2930_v4, %v2931_v18  ;;  %v2908_v23 = vadd.f32 %v3607_v55, %v2886_v34  ;;  %v2768_v49 = vpop.f32.mrf.mxu0  ;;  %v2839_v11 = vpop.f32.mrf.mxu1 }
 0x130   : > { %2974 = vst [vmem:[%s3627_s8 + $0x10] sm:$0xff] %v2958_v5  ;;  %v2907_v12 = vadd.f32 %v3607_v55, %v2885_v48  ;;  %v2909_v24 = vadd.f32 %v3607_v55, %v2887_v7  ;;  %v2872_v25 = vmax.f32 %v3599_v51, %v2768_v49  ;;  %v2932_v19 = vmax.f32 %v2906_v6, %v3609_v54 }
 0x131   : > { %2975 = vst [vmem:[%s3627_s8 + $0x18] sm:$0xff] %v2959_v9  ;;  %v2934_v35 = vmax.f32 %v2908_v23, %v3609_v54  ;;  %v2874_v39 = vmax.f32 %v3601_v52, %v2839_v11  ;;  %v2770_v40 = vpop.f32.mrf.mxu0  ;;  %v2841_v20 = vpop.f32.mrf.mxu1 }
 0x132   : > { %v2933_v36 = vmax.f32 %v2907_v12, %v3609_v54  ;;  %v2935_v41 = vmax.f32 %v2909_v24, %v3609_v54  ;;  %v2888_v42 = vmax.f32 %v2856_v8, %v2872_v25  ;;  %v2873_v51 = vmax.f32 %v3603_v53, %v2770_v40 }
 0x133   : > { %v2890_v27 = vmax.f32 %v2858_v50, %v2874_v39  ;;  %v2875_v28 = vmax.f32 %v3700_v0, %v2841_v20 }
 0x134   : > { %v2960_v56 = vcombine.low %v2932_v19, %v2933_v36  ;;  %v2961_v52 = vcombine.low %v2934_v35, %v2935_v41  ;;  %v2910_v57 = vadd.f32 %v3607_v55, %v2888_v42  ;;  %v2889_v14 = vmax.f32 %v2857_v26, %v2873_v51 }
 0x135   : > { %v2912_v22 = vadd.f32 %v3607_v55, %v2890_v27  ;;  %v2891_v29 = vmax.f32 %v2859_v37, %v2875_v28 }
 0x136   : > { %2976 = vst [vmem:[%s3627_s8 + $0x20] sm:$0xff] %v2960_v56  ;;  %2977 = vst [vmem:[%s3627_s8 + $0x28] sm:$0xff] %v2961_v52  ;;  %v2911_v53 = vadd.f32 %v3607_v55, %v2889_v14  ;;  %v2936_v43 = vmax.f32 %v2910_v57, %v3609_v54 }
 0x137   : > { %v2913_v38 = vadd.f32 %v3607_v55, %v2891_v29  ;;  %v2938_v45 = vmax.f32 %v2912_v22, %v3609_v54 }
 0x138   : > { %v2937_v44 = vmax.f32 %v2911_v53, %v3609_v54 }
 0x139   : > { %v2939_v15 = vmax.f32 %v2913_v38, %v3609_v54 }
 0x13a   : > { %v2962_v30 = vcombine.low %v2936_v43, %v2937_v44 }
 0x13b   : > { %v2963_v58 = vcombine.low %v2938_v45, %v2939_v15 }
 0x13c   : > { %2978 = vst [vmem:[%s3627_s8 + $0x30] sm:$0xff] %v2962_v30 }
 0x13d   : > { %2979 = vst [vmem:[%s3627_s8 + $0x38] sm:$0xff] %v2963_v58 }
 0x13e PF: > { %s14_s15 = sadd.s32 1, %s3197_s15  }
 0x13f   : > { %p11_p4 = scmp.ge.s32.totalorder %s14_s15, 5  }
 0x141   :  { %13 = sbr.rel (!%p11_p4) target bundleno = 1 (0x1), region = 75 }

// kernel: forward.5
= control target key start
LH: loop header
LB: loop body
LE: loop exit
PB: predicated region body
PF: predicated region fallthrough
CT: control target
= control target key end

     0   :  { %s1262_s15 = smov 0   ;;  %s1472_s0 = inlined_call_operand.vmem [shape: f32[4,36,2048], index: 0, kind: input, shape index: {}]   ;;  %s1473_s1 = inlined_call_operand.vmem [shape: f32[4,16,36], index: 1, kind: input, shape index: {}]   ;;  %s1474_s2 = inlined_call_operand.vmem [shape: f32[4,16,1], index: 2, kind: input, shape index: {}]   ;;  %s1475_s3 = inlined_call_operand.vmem [shape: f32[4,1,1], index: 3, kind: input, shape index: {}]   ;;  %s1476_s4 = inlined_call_operand.vmem [shape: f32[4,16,512], index: 4, kind: output, shape index: {}]  }
   0x1 LB: > { %s1164_s16 = sadd.s32 4294967295, %s1233_s15   ;;  %p1168_p0 = scmp.ge.s32.totalorder %s1233_s15, 1  ;;  %s1233_s15 = sphi %s1262_s15, %s14_s15  }
   0x2   : > { %p190_p1 = scmp.lt.s32.totalorder %s1233_s15, 5 }
   0x4   : > { %p191_p2 = pnand %p1168_p0, %p190_p1 }
   0x5   : > { %p229_p3 = scmp.lt.s32.totalorder (!%p191_p2), %s1164_s16, 3 }
   0x6   : > { %194 = sbr.rel (%p191_p2) target bundleno = 277 (0x115), region = 36 }
   0xb   : > { %v1235_v0 = vmov 0.0   ;;  %s1478_s16 = smov (!%p229_p3, %s1164_s16), 3  ;;  %v1236_v1 = vmov 0   ;;  %vm341_vm0 = vcmask 1043456   ;;  %vm334_vm1 = vcmask 293888  }
   0xc   : > { %454 = vmatprep.mubr.f32.mxu0 %v1235_v0  ;;  %531 = vmatprep.mubr.f32.mxu1 %v1235_v0  ;;  %s1214_s17 = smul.u32 640, %s1478_s16  ;;  %s1211_s18 = sshll.u32 %s1478_s16, 4 }
   0xd   : > { %1225 = vset.pattern.permute.xlu0 %v1236_v1  ;;  %1226 = vset.pattern.permute.xlu1 %v1236_v1  ;;  %s1281_s21 = scalar_lea.vmem %s1474_s2, %s1211_s18  ;;  %s1314_s27 = scalar_lea.vmem %s1473_s1, %s1211_s18 }
   0xe   : > { %s1286_s24 = scalar_lea.vmem %s1472_s0, %s1214_s17  ;;  %v1030_v2 = vld [vmem:[%s1281_s21] sm:$0xff]  ;;  %v1342_v34 = vld [vmem:[%s1314_s27 + $0x8] sm:$0xff]  ;;  %s246_s30 = scalar_lea.vmem %s1475_s3, %s1478_s16 }
   0xf   : > { %v319_v3 = vld [vmem:[%s1286_s24 + $0x208] sm:$0xf]  ;;  %v321_v4 = vld [vmem:[%s1286_s24 + $0x218] sm:$0xf]  ;;  %v318_v5 = vld [vmem:[%s1286_s24 + $0x200] sm:$0xf]  ;;  %1034 = vperm.xlu0 %1225, %v1030_v2  }
  0x10   : > { %1176 = vmatprep.subr.msk.mxu0 %vm341_vm0, %v319_v3  ;;  %1180 = vmatprep.subr.msk.mxu1 %vm341_vm0, %v321_v4  ;;  %v320_v6 = vld [vmem:[%s1286_s24 + $0x210] sm:$0xf]  ;;  %v303_v7 = vld [vmem:[%s1286_s24 + $0x188] sm:$0xff]  ;;  %v305_v8 = vld [vmem:[%s1286_s24 + $0x198] sm:$0xff]  ;;  %s1213_s5 = sshll.u32 %s1478_s16, 6 }
  0x11   : > { %1177 = vmatpush1.msk.msra.mxu0 %vm341_vm0, %v318_v5  ;;  %1181 = vmatpush1.msk.msra.mxu1 %vm341_vm0, %v320_v6  ;;  %v302_v9 = vld [vmem:[%s1286_s24 + $0x180] sm:$0xff]  ;;  %v304_v10 = vld [vmem:[%s1286_s24 + $0x190] sm:$0xff]  ;;  %v287_v11 = vld [vmem:[%s1286_s24 + $0x108] sm:$0xff]  ;;  %s1459_s8 = scalar_lea.vmem %s1476_s4, %s1213_s5 }
  0x12   : > { %414 = vmatprep.subr.mxu0 %v303_v7  ;;  %491 = vmatprep.subr.mxu1 %v305_v8  ;;  %v289_v12 = vld [vmem:[%s1286_s24 + $0x118] sm:$0xff]  ;;  %v286_v13 = vld [vmem:[%s1286_s24 + $0x100] sm:$0xff]  ;;  %v288_v14 = vld [vmem:[%s1286_s24 + $0x110] sm:$0xff] }
  0x13   : > { %415 = vmatpush1.msra.mxu0 %v302_v9  ;;  %492 = vmatpush1.msra.mxu1 %v304_v10  ;;  %v271_v15 = vld [vmem:[%s1286_s24 + $0x88] sm:$0xff]  ;;  %v273_v16 = vld [vmem:[%s1286_s24 + $0x98] sm:$0xff]  ;;  %v270_v17 = vld [vmem:[%s1286_s24 + $0x80] sm:$0xff] }
  0x14   : > { %416 = vmatprep.subr.mxu0 %v287_v11  ;;  %493 = vmatprep.subr.mxu1 %v289_v12  ;;  %v272_v18 = vld [vmem:[%s1286_s24 + $0x90] sm:$0xff]  ;;  %v255_v19 = vld [vmem:[%s1286_s24 + $0x8] sm:$0xff]  ;;  %v257_v20 = vld [vmem:[%s1286_s24 + $0x18] sm:$0xff] }
  0x15   : > { %417 = vmatpush1.msra.mxu0 %v286_v13  ;;  %494 = vmatpush1.msra.mxu1 %v288_v14  ;;  %v254_v21 = vld [vmem:[%s1286_s24] sm:$0xff]  ;;  %v256_v22 = vld [vmem:[%s1286_s24 + $0x10] sm:$0xff]  ;;  %v323_v24 = vld [vmem:[%s1286_s24 + $0x228] sm:$0xf] }
  0x16   : > { %418 = vmatprep.subr.mxu0 %v271_v15  ;;  %495 = vmatprep.subr.mxu1 %v273_v16  ;;  %v1321_v23 = vld [vmem:[%s1314_s27] sm:$0xff]  ;;  %v325_v25 = vld [vmem:[%s1286_s24 + $0x238] sm:$0xf]  ;;  %v324_v27 = vld [vmem:[%s1286_s24 + $0x230] sm:$0xf] }
  0x17   : > { %419 = vmatpush1.msra.mxu0 %v270_v17  ;;  %496 = vmatpush1.msra.mxu1 %v272_v18  ;;  %v322_v26 = vld [vmem:[%s1286_s24 + $0x220] sm:$0xf]  ;;  %v307_v28 = vld [vmem:[%s1286_s24 + $0x1a8] sm:$0xff]  ;;  %v309_v29 = vld [vmem:[%s1286_s24 + $0x1b8] sm:$0xff] }
  0x18   : > { %420 = vmatprep.subr.mxu0 %v255_v19  ;;  %497 = vmatprep.subr.mxu1 %v257_v20  ;;  %v306_v30 = vld [vmem:[%s1286_s24 + $0x1a0] sm:$0xff]  ;;  %v308_v31 = vld [vmem:[%s1286_s24 + $0x1b0] sm:$0xff]  ;;  %v291_v32 = vld [vmem:[%s1286_s24 + $0x128] sm:$0xff] }
  0x19   : > { %421 = vmatpush1.msra.mxu0 %v254_v21  ;;  %498 = vmatpush1.msra.mxu1 %v256_v22  ;;  %v293_v33 = vld [vmem:[%s1286_s24 + $0x138] sm:$0xff]  ;;  %v290_v35 = vld [vmem:[%s1286_s24 + $0x120] sm:$0xff]  ;;  %v292_v36 = vld [vmem:[%s1286_s24 + $0x130] sm:$0xff] }
  0x1a   : > { %1178 = vmatmul.mubr.msk.f32.vlgmr.msra.gmra.mxu0 %vm334_vm1, %v1321_v23  ;;  %1182 = vmatmul.mubr.msk.f32.vlgmr.msra.gmra.mxu1 %vm334_vm1, %v1321_v23  ;;  %v275_v37 = vld [vmem:[%s1286_s24 + $0xa8] sm:$0xff]  ;;  %v277_v38 = vld [vmem:[%s1286_s24 + $0xb8] sm:$0xff]  ;;  %v274_v39 = vld [vmem:[%s1286_s24 + $0xa0] sm:$0xff] }
  0x1b   : > { %1184 = vmatprep.subr.msk.mxu0 %vm341_vm0, %v323_v24  ;;  %1188 = vmatprep.subr.msk.mxu1 %vm341_vm0, %v325_v25  ;;  %v276_v40 = vld [vmem:[%s1286_s24 + $0xb0] sm:$0xff]  ;;  %v259_v41 = vld [vmem:[%s1286_s24 + $0x28] sm:$0xff]  ;;  %v261_v42 = vld [vmem:[%s1286_s24 + $0x38] sm:$0xff] }
  0x1c   : > { %1185 = vmatpush1.msk.msra.mxu0 %vm341_vm0, %v322_v26  ;;  %1189 = vmatpush1.msk.msra.mxu1 %vm341_vm0, %v324_v27  ;;  %v258_v43 = vld [vmem:[%s1286_s24 + $0x20] sm:$0xff]  ;;  %v260_v44 = vld [vmem:[%s1286_s24 + $0x30] sm:$0xff]  ;;  %v327_v45 = vld [vmem:[%s1286_s24 + $0x248] sm:$0xf] }
  0x1d   : > { %568 = vmatprep.subr.mxu0 %v307_v28  ;;  %645 = vmatprep.subr.mxu1 %v309_v29  ;;  %v329_v46 = vld [vmem:[%s1286_s24 + $0x258] sm:$0xf]  ;;  %v326_v47 = vld [vmem:[%s1286_s24 + $0x240] sm:$0xf]  ;;  %v328_v48 = vld [vmem:[%s1286_s24 + $0x250] sm:$0xf] }
  0x1e   : > { %569 = vmatpush1.msra.mxu0 %v306_v30  ;;  %646 = vmatpush1.msra.mxu1 %v308_v31  ;;  %v311_v49 = vld [vmem:[%s1286_s24 + $0x1c8] sm:$0xff]  ;;  %v313_v50 = vld [vmem:[%s1286_s24 + $0x1d8] sm:$0xff]  ;;  %v310_v51 = vld [vmem:[%s1286_s24 + $0x1c0] sm:$0xff] }
  0x1f   : > { %460 = vmatprep.mubr.f32.mxu0 %v1235_v0  ;;  %537 = vmatprep.mubr.f32.mxu1 %v1235_v0  ;;  %v312_v52 = vld [vmem:[%s1286_s24 + $0x1d0] sm:$0xff]  ;;  %v295_v53 = vld [vmem:[%s1286_s24 + $0x148] sm:$0xff]  ;;  %v297_v54 = vld [vmem:[%s1286_s24 + $0x158] sm:$0xff] }
  0x20   : > { %570 = vmatprep.subr.mxu0 %v291_v32  ;;  %647 = vmatprep.subr.mxu1 %v293_v33  ;;  %v294_v55 = vld [vmem:[%s1286_s24 + $0x140] sm:$0xff]  ;;  %v296_v56 = vld [vmem:[%s1286_s24 + $0x150] sm:$0xff]  ;;  %v279_v57 = vld [vmem:[%s1286_s24 + $0xc8] sm:$0xff] }
  0x21   : > { %1179 = vmatmul.mubr.msk.f32.gmra.mxu0 %vm334_vm1, %v1342_v34  ;;  %1183 = vmatmul.mubr.msk.f32.gmra.mxu1 %vm334_vm1, %v1342_v34  ;;  %v281_v58 = vld [vmem:[%s1286_s24 + $0xd8] sm:$0xff]  ;;  %v278_v59 = vld [vmem:[%s1286_s24 + $0xc0] sm:$0xff]  ;;  %v280_v60 = vld [vmem:[%s1286_s24 + $0xd0] sm:$0xff] }
  0x22   : > { %571 = vmatpush1.msra.mxu0 %v290_v35  ;;  %648 = vmatpush1.msra.mxu1 %v292_v36  ;;  %v263_v61 = vld [vmem:[%s1286_s24 + $0x48] sm:$0xff]  ;;  %v265_v62 = vld [vmem:[%s1286_s24 + $0x58] sm:$0xff]  ;;  %v262_v63 = vld [vmem:[%s1286_s24 + $0x40] sm:$0xff] }
  0x23   : > { %572 = vmatprep.subr.mxu0 %v275_v37  ;;  %649 = vmatprep.subr.mxu1 %v277_v38  ;;  %v264_v1 = vld [vmem:[%s1286_s24 + $0x50] sm:$0xff]  ;;  %v331_v2 = vld [vmem:[%s1286_s24 + $0x268] sm:$0xf]  ;;  %v333_v3 = vld [vmem:[%s1286_s24 + $0x278] sm:$0xf] }
  0x24   : > { %573 = vmatpush1.msra.mxu0 %v274_v39  ;;  %650 = vmatpush1.msra.mxu1 %v276_v40  ;;  %v330_v4 = vld [vmem:[%s1286_s24 + $0x260] sm:$0xf]  ;;  %v332_v5 = vld [vmem:[%s1286_s24 + $0x270] sm:$0xf]  ;;  %v315_v6 = vld [vmem:[%s1286_s24 + $0x1e8] sm:$0xff] }
  0x25   : > { %574 = vmatprep.subr.mxu0 %v259_v41  ;;  %651 = vmatprep.subr.mxu1 %v261_v42  ;;  %v317_v7 = vld [vmem:[%s1286_s24 + $0x1f8] sm:$0xff]  ;;  %v314_v8 = vld [vmem:[%s1286_s24 + $0x1e0] sm:$0xff]  ;;  %v316_v9 = vld [vmem:[%s1286_s24 + $0x1f0] sm:$0xff] }
  0x26   : > { %575 = vmatpush1.msra.mxu0 %v258_v43  ;;  %608 = vmatprep.mubr.f32.mxu0 %v1235_v0  ;;  %v299_v10 = vld [vmem:[%s1286_s24 + $0x168] sm:$0xff]  ;;  %v301_v11 = vld [vmem:[%s1286_s24 + $0x178] sm:$0xff]  ;;  %v298_v12 = vld [vmem:[%s1286_s24 + $0x160] sm:$0xff] }
  0x27   : > { %652 = vmatpush1.msra.mxu1 %v260_v44  ;;  %685 = vmatprep.mubr.f32.mxu1 %v1235_v0  ;;  %v300_v13 = vld [vmem:[%s1286_s24 + $0x170] sm:$0xff]  ;;  %v283_v14 = vld [vmem:[%s1286_s24 + $0xe8] sm:$0xff]  ;;  %v285_v15 = vld [vmem:[%s1286_s24 + $0xf8] sm:$0xff] }
  0x28   : > { %1186 = vmatmul.mubr.msk.f32.vlgmr.msra.gmra.mxu0 %vm334_vm1, %v1321_v23  ;;  %1190 = vmatmul.mubr.msk.f32.vlgmr.msra.gmra.mxu1 %vm334_vm1, %v1321_v23  ;;  %v282_v16 = vld [vmem:[%s1286_s24 + $0xe0] sm:$0xff]  ;;  %v284_v17 = vld [vmem:[%s1286_s24 + $0xf0] sm:$0xff]  ;;  %v267_v18 = vld [vmem:[%s1286_s24 + $0x68] sm:$0xff] }
  0x29   : > { %1192 = vmatprep.subr.msk.mxu0 %vm341_vm0, %v327_v45  ;;  %1196 = vmatprep.subr.msk.mxu1 %vm341_vm0, %v329_v46  ;;  %v269_v19 = vld [vmem:[%s1286_s24 + $0x78] sm:$0xff]  ;;  %v266_v20 = vld [vmem:[%s1286_s24 + $0x60] sm:$0xff]  ;;  %v268_v21 = vld [vmem:[%s1286_s24 + $0x70] sm:$0xff] }
  0x2a   : > { %1193 = vmatpush1.msk.msra.mxu0 %vm341_vm0, %v326_v47  ;;  %1197 = vmatpush1.msk.msra.mxu1 %vm341_vm0, %v328_v48  ;;  %v1208_v22 = vld [vmem:[%s246_s30] ss:$0 sm:$0xff]  ;;  %v1031_v24 = vld [vmem:[%s1281_s21 + $0x8] sm:$0xff] }
  0x2b   : > { %722 = vmatprep.subr.mxu0 %v311_v49  ;;  %799 = vmatprep.subr.mxu1 %v313_v50 }
  0x2c   : > { %614 = vmatprep.mubr.f32.mxu0 %v1235_v0  ;;  %691 = vmatprep.mubr.f32.mxu1 %v1235_v0 }
  0x2d   : > { %723 = vmatpush1.msra.mxu0 %v310_v51  ;;  %800 = vmatpush1.msra.mxu1 %v312_v52 }
  0x2e   : > { %1187 = vmatmul.mubr.msk.f32.gmra.mxu0 %vm334_vm1, %v1342_v34  ;;  %1191 = vmatmul.mubr.msk.f32.gmra.mxu1 %vm334_vm1, %v1342_v34 }
  0x2f   : > { %724 = vmatprep.subr.mxu0 %v295_v53  ;;  %801 = vmatprep.subr.mxu1 %v297_v54 }
  0x30   : > { %725 = vmatpush1.msra.mxu0 %v294_v55  ;;  %802 = vmatpush1.msra.mxu1 %v296_v56 }
  0x31   : > { %726 = vmatprep.subr.mxu0 %v279_v57  ;;  %803 = vmatprep.subr.mxu1 %v281_v58 }
  0x32   : > { %727 = vmatpush1.msra.mxu0 %v278_v59  ;;  %804 = vmatpush1.msra.mxu1 %v280_v60 }
  0x33   : > { %728 = vmatprep.subr.mxu0 %v263_v61  ;;  %805 = vmatprep.subr.mxu1 %v265_v62 }
  0x34   : > { %729 = vmatpush1.msra.mxu0 %v262_v63  ;;  %762 = vmatprep.mubr.f32.mxu0 %v1235_v0 }
  0x35   : > { %806 = vmatpush1.msra.mxu1 %v264_v1  ;;  %839 = vmatprep.mubr.f32.mxu1 %v1235_v0 }
  0x36   : > { %1194 = vmatmul.mubr.msk.f32.vlgmr.msra.gmra.mxu0 %vm334_vm1, %v1321_v23  ;;  %1198 = vmatmul.mubr.msk.f32.vlgmr.msra.gmra.mxu1 %vm334_vm1, %v1321_v23 }
  0x37   : > { %1200 = vmatprep.subr.msk.mxu0 %vm341_vm0, %v331_v2  ;;  %1204 = vmatprep.subr.msk.mxu1 %vm341_vm0, %v333_v3 }
  0x38   : > { %1201 = vmatpush1.msk.msra.mxu0 %vm341_vm0, %v330_v4  ;;  %1205 = vmatpush1.msk.msra.mxu1 %vm341_vm0, %v332_v5 }
  0x39   : > { %876 = vmatprep.subr.mxu0 %v315_v6  ;;  %953 = vmatprep.subr.mxu1 %v317_v7 }
  0x3a   : > { %768 = vmatprep.mubr.f32.mxu0 %v1235_v0  ;;  %845 = vmatprep.mubr.f32.mxu1 %v1235_v0 }
  0x3b   : > { %877 = vmatpush1.msra.mxu0 %v314_v8  ;;  %954 = vmatpush1.msra.mxu1 %v316_v9 }
  0x3c   : > { %1195 = vmatmul.mubr.msk.f32.gmra.mxu0 %vm334_vm1, %v1342_v34  ;;  %1199 = vmatmul.mubr.msk.f32.gmra.mxu1 %vm334_vm1, %v1342_v34 }
  0x3d   : > { %878 = vmatprep.subr.mxu0 %v299_v10  ;;  %955 = vmatprep.subr.mxu1 %v301_v11 }
  0x3e   : > { %879 = vmatpush1.msra.mxu0 %v298_v12  ;;  %956 = vmatpush1.msra.mxu1 %v300_v13 }
  0x3f   : > { %880 = vmatprep.subr.mxu0 %v283_v14  ;;  %957 = vmatprep.subr.mxu1 %v285_v15 }
  0x40   : > { %881 = vmatpush1.msra.mxu0 %v282_v16  ;;  %958 = vmatpush1.msra.mxu1 %v284_v17 }
  0x41   : > { %882 = vmatprep.subr.mxu0 %v267_v18  ;;  %959 = vmatprep.subr.mxu1 %v269_v19 }
  0x42   : > { %883 = vmatpush1.msra.mxu0 %v266_v20  ;;  %916 = vmatprep.mubr.f32.mxu0 %v1235_v0 }
  0x43   : > { %960 = vmatpush1.msra.mxu1 %v268_v21  ;;  %993 = vmatprep.mubr.f32.mxu1 %v1235_v0 }
  0x44   : > { %1202 = vmatmul.mubr.msk.f32.vlgmr.msra.gmra.mxu0 %vm334_vm1, %v1321_v23  ;;  %1206 = vmatmul.mubr.msk.f32.vlgmr.msra.gmra.mxu1 %vm334_vm1, %v1321_v23 }
  0x45   : > { %922 = vmatprep.mubr.f32.mxu0 %v1235_v0  ;;  %999 = vmatprep.mubr.f32.mxu1 %v1235_v0 }
  0x46   : > { %1057 = vperm.xlu1 %1226, %v1208_v22   ;;  %1039 = vperm.xlu0 %1225, %v1031_v24  }
  0x48   : > { %1203 = vmatmul.mubr.msk.f32.gmra.mxu0 %vm334_vm1, %v1342_v34  ;;  %1207 = vmatmul.mubr.msk.f32.gmra.mxu1 %vm334_vm1, %v1342_v34 }
  0x8a   : > { %v1035_v59 = vpop.permute.xlu0 %1034 }
  0xc1   : > { %v1058_v62 = vpop.permute.xlu1 %1057 }
  0xda   : > { %v456_v25 = vpop.f32.mrf.mxu0  ;;  %v533_v26 = vpop.f32.mrf.mxu1 }
  0xdc   : > { %v458_v27 = vpop.f32.mrf.mxu0  ;;  %v535_v28 = vpop.f32.mrf.mxu1 }
  0xe1   : > { %v462_v29 = vpop.f32.mrf.mxu0  ;;  %v539_v30 = vpop.f32.mrf.mxu1 }
  0xe3   : > { %v1449_v31 = vpop.f32.mrf.mxu0  ;;  %v1451_v23 = vpop.f32.mrf.mxu1 }
  0xe8   : > { %v610_v32 = vpop.f32.mrf.mxu0  ;;  %v687_v0 = vpop.f32.mrf.mxu1 }
  0xe9   : > { %v1006_v49 = vmax.f32 %v456_v25, %v610_v32  ;;  %v1008_v50 = vmax.f32 %v533_v26, %v687_v0  ;;  %v1040_v25 = vpop.permute.xlu0 %1039 }
  0xea   : > { %v612_v33 = vpop.f32.mrf.mxu0  ;;  %v689_v35 = vpop.f32.mrf.mxu1 }
  0xeb   : > { %v1007_v53 = vmax.f32 %v458_v27, %v612_v33  ;;  %v1009_v54 = vmax.f32 %v535_v28, %v689_v35 }
  0xee   : > { %v616_v36 = vpop.f32.mrf.mxu0  ;;  %v693_v37 = vpop.f32.mrf.mxu1 }
  0xef   : > { %v1010_v63 = vmax.f32 %v462_v29, %v616_v36  ;;  %v1012_v1 = vmax.f32 %v539_v30, %v693_v37 }
  0xf0   : > { %v618_v38 = vpop.f32.mrf.mxu0  ;;  %v695_v39 = vpop.f32.mrf.mxu1 }
  0xf1   : > { %v1011_v8 = vmax.f32 %v1449_v31, %v618_v38  ;;  %v1013_v9 = vmax.f32 %v1451_v23, %v695_v39 }
  0xf6   : > { %v764_v40 = vpop.f32.mrf.mxu0  ;;  %v841_v34 = vpop.f32.mrf.mxu1 }
  0xf8   : > { %v766_v41 = vpop.f32.mrf.mxu0  ;;  %v843_v42 = vpop.f32.mrf.mxu1 }
  0xfc   : > { %v770_v43 = vpop.f32.mrf.mxu0  ;;  %v847_v44 = vpop.f32.mrf.mxu1 }
  0xfe   : > { %v772_v45 = vpop.f32.mrf.mxu0  ;;  %v849_v46 = vpop.f32.mrf.mxu1 }
 0x104   : > { %v918_v47 = vpop.f32.mrf.mxu0  ;;  %v995_v48 = vpop.f32.mrf.mxu1 }
 0x105   : > { %v1014_v51 = vmax.f32 %v764_v40, %v918_v47  ;;  %v1016_v52 = vmax.f32 %v841_v34, %v995_v48 }
 0x106   : > { %v920_v55 = vpop.f32.mrf.mxu0  ;;  %v997_v56 = vpop.f32.mrf.mxu1 }
 0x107   : > { %v1022_v57 = vmax.f32 %v1006_v49, %v1014_v51  ;;  %v1024_v58 = vmax.f32 %v1008_v50, %v1016_v52  ;;  %v1015_v60 = vmax.f32 %v766_v41, %v920_v55  ;;  %v1017_v61 = vmax.f32 %v843_v42, %v997_v56 }
 0x108   : > { %v924_v2 = vpop.f32.mrf.mxu0  ;;  %v1001_v3 = vpop.f32.mrf.mxu1 }
 0x109   : > { %v1042_v4 = vadd.f32 %v1035_v59, %v1022_v57  ;;  %v1044_v5 = vadd.f32 %v1035_v59, %v1024_v58  ;;  %v1023_v6 = vmax.f32 %v1007_v53, %v1015_v60  ;;  %v1025_v7 = vmax.f32 %v1009_v54, %v1017_v61 }
 0x10a   : > { %v1018_v10 = vmax.f32 %v770_v43, %v924_v2  ;;  %v1020_v11 = vmax.f32 %v847_v44, %v1001_v3  ;;  %v926_v12 = vpop.f32.mrf.mxu0  ;;  %v1003_v13 = vpop.f32.mrf.mxu1 }
 0x10b   : > { %v1043_v14 = vadd.f32 %v1035_v59, %v1023_v6  ;;  %v1045_v15 = vadd.f32 %v1035_v59, %v1025_v7  ;;  %v1060_v16 = vmax.f32 %v1042_v4, %v1058_v62  ;;  %v1062_v17 = vmax.f32 %v1044_v5, %v1058_v62 }
 0x10c   : > { %v1026_v18 = vmax.f32 %v1010_v63, %v1018_v10  ;;  %v1028_v19 = vmax.f32 %v1012_v1, %v1020_v11  ;;  %v1019_v20 = vmax.f32 %v772_v45, %v926_v12  ;;  %v1021_v21 = vmax.f32 %v849_v46, %v1003_v13 }
 0x10d   : > { %v1061_v22 = vmax.f32 %v1043_v14, %v1058_v62  ;;  %v1063_v24 = vmax.f32 %v1045_v15, %v1058_v62  ;;  %1068 = vst [vmem:[%s1459_s8] sm:$0xff] %v1060_v16  ;;  %1070 = vst [vmem:[%s1459_s8 + $0x10] sm:$0xff] %v1062_v17 }
 0x10e   : > { %v1046_v26 = vadd.f32 %v1040_v25, %v1026_v18  ;;  %v1048_v27 = vadd.f32 %v1040_v25, %v1028_v19  ;;  %v1027_v28 = vmax.f32 %v1011_v8, %v1019_v20  ;;  %v1029_v29 = vmax.f32 %v1013_v9, %v1021_v21 }
 0x10f   : > { %1069 = vst [vmem:[%s1459_s8 + $0x8] sm:$0xff] %v1061_v22  ;;  %1071 = vst [vmem:[%s1459_s8 + $0x18] sm:$0xff] %v1063_v24 }
 0x110   : > { %v1064_v30 = vmax.f32 %v1046_v26, %v1058_v62  ;;  %v1066_v31 = vmax.f32 %v1048_v27, %v1058_v62  ;;  %v1047_v23 = vadd.f32 %v1040_v25, %v1027_v28  ;;  %v1049_v32 = vadd.f32 %v1040_v25, %v1029_v29 }
 0x112   : > { %1072 = vst [vmem:[%s1459_s8 + $0x20] sm:$0xff] %v1064_v30  ;;  %1074 = vst [vmem:[%s1459_s8 + $0x30] sm:$0xff] %v1066_v31  ;;  %v1065_v0 = vmax.f32 %v1047_v23, %v1058_v62  ;;  %v1067_v33 = vmax.f32 %v1049_v32, %v1058_v62 }
 0x114   : > { %1073 = vst [vmem:[%s1459_s8 + $0x28] sm:$0xff] %v1065_v0  ;;  %1075 = vst [vmem:[%s1459_s8 + $0x38] sm:$0xff] %v1067_v33 }
 0x115 PF: > { %s14_s15 = sadd.s32 1, %s1233_s15  }
 0x116   : > { %p11_p4 = scmp.ge.s32.totalorder %s14_s15, 6  }
 0x118   :  { %13 = sbr.rel (!%p11_p4) target bundleno = 1 (0x1), region = 75 }

// kernel: forward.6
= control target key start
LH: loop header
LB: loop body
LE: loop exit
PB: predicated region body
PF: predicated region fallthrough
CT: control target
= control target key end

     0   :  { %s6671_s0 = inlined_call_operand.vmem [shape: s32[7], index: 0, kind: input, shape index: {}]   ;;  %s6672_s1 = inlined_call_operand.vmem [shape: f32[2,7168], index: 1, kind: input, shape index: {}]   ;;  %s6673_s2 = inlined_call_operand.vmem [shape: bf16[7168,1536], index: 2, kind: input, shape index: {}]   ;;  %s6674_s3 = inlined_call_operand.vmem [shape: f32[4,1,1536], index: 3, kind: input, shape index: {}]   ;;  %s6675_s4 = inlined_call_operand.vmem [shape: f32[4,2,1536], index: 4, kind: output, shape index: {}]  }
   0x1   :  { %s9_s17 = sshll.u32 %s6671_s0, 4  ;;  %s10_s17 = int_to_ptr.vmem [resolvable:$true] %s9_s17 }
   0x2   :  { %s5197_s18 = scalar_lea.vmem %s10_s17, 16  ;;  %p5202_p1 = scmp.lt.s32.totalorder %s10_s17, %s10_s17 }
   0x3   :  { %p5198_p0 = scmp.ne.s32.totalorder %s10_s17, %s5197_s18  ;;  %p5203_p2 = scmp.lt.s32.totalorder %s5197_s18, %s5197_s18 }
   0x5   :  { %p5204_p3 = por %p5203_p2, %p5202_p1 }
   0x7   :  { %p5205_p4 = pnand %p5204_p3, %p5198_p0 }
   0x9   :  { %5208 = shalt.err (!%p5205_p4)  }
   0xa   :  { %s5267_s19 = smov [#allocation4]  }
   0xb   :  { %12 = dma.vmem_to_smem %s10_s17, 16, %s5267_s19, [#allocation3] }
   0xc   :  { %5237 = dma.done.wait [#allocation3], 16 }
   0xd   :  { %5238 = vsyncadd [#allocation3], 4294967280 }
   0xe   :  { %14 = sfence }
   0xf   :  { %s5298_s20 = smov 0   ;;  %s5300_s21 = smov 0  }
  0x10   :  { %s5302_s22 = smov 0   ;;  %s5304_s0 = smov 0  }
  0x11   :  { %s5306_s23 = smov 0   ;;  %s5308_s24 = smov 0  }
  0x12   :  { %s5310_s25 = smov 0  }
  0x13 LB: > { %s29_s26 = sadd.s32 1, %s5257_s23  ;;  %s32_s27 = sadd.s32 1, %s5261_s24  ;;  %s5265_s25 = sphi %s5310_s25, %s20_s25   ;;  %s5261_s24 = sphi %s5308_s24, %s6682_s24   ;;  %s5257_s23 = sphi %s5306_s23, %s6681_s23   ;;  %s5253_s0 = sphi %s5304_s0, %s6680_s0   ;;  %s5249_s22 = sphi %s5302_s22, %s6679_s22   ;;  %s5245_s21 = sphi %s5300_s21, %s6678_s21   ;;  %s5241_s20 = sphi %s5298_s20, %s6677_s20  }
  0x14   : > { %p30_p5 = scmp.ge.s32.totalorder %s29_s26, 7  ;;  %p74_p6 = scmp.ne.s32.totalorder %s5245_s21, %s5241_s20 }
  0x15   : > { %p75_p7 = scmp.eq.s32.totalorder %s5265_s25, 0  ;;  %s67_s5 = sadd.s32 1, %s5245_s21 }
  0x16   : > { %s6684_s26 = smov (%p30_p5, %s29_s26), 0  ;;  %s6686_s27 = smov (!%p30_p5, %s32_s27), %s5261_s24 }
  0x17   : > { %p76_p8 = por %p75_p7, %p74_p6  ;;  %p34_p9 = scmp.ge.s32.totalorder %s6686_s27, 2 }
  0x18   : > { %s62_s28 = ssub.s32 %s5257_s23, %s6684_s26  ;;  %p4160_p11 = scmp.ge.s32.totalorder %s5265_s25, 14 }
  0x19   : > { %s6688_s27 = smov (%p34_p9, %s6686_s27), 0 }
  0x1a   : > { %s63_s29 = ssub.s32 %s5261_s24, %s6688_s27  ;;  %160 = sbr.rel (%p4160_p11) target bundleno = 232 (0xe8), region = 16 }
  0x1b   : > { %s64_s30 = sor.u32 %s63_s29, %s62_s28 }
  0x1c   : > { %p65_p10 = scmp.eq.s32.totalorder %s64_s30, 0 }
  0x1e   : > { %s5349_s6 = scalar_select %p65_p10, %s5245_s21, %s67_s5  }
  0x1f   : > { %172 = sbr.rel (!%p76_p8) target bundleno = 232 (0xe8), region = 24  ;;  %s174_s7 = sand.u32 (%p76_p8), 1, %s5245_s21  }
  0x20   : > { %s178_s8 = smul.u32 (%p76_p8), 6, %s5261_s24 }
  0x21   : > { %s4555_s9 = smul.u32 (%p76_p8), 3072, %s174_s7 }
  0x22   : > { %s4556_s10 = smul.u32 (%p76_p8), 1536, %s5257_s23 }
  0x23   : > { %s5363_s16 = scalar_lea.vmem (%p76_p8), [#allocation5], %s4555_s9 }
  0x24   : > { %s180_s11 = sadd.s32 %s4556_s10, %s178_s8 }
  0x25   : > { %s4163_s12 = sshll.u32 %s180_s11, 2 }
  0x26   : > { %s5358_s15 = scalar_lea.vmem %s6673_s2, %s4163_s12 }
  0x27   : > { %v195_v0 = vld [vmem:[%s5358_s15] sm:$0xff]  ;;  %v197_v1 = vld [vmem:[%s5358_s15 + $0x8] sm:$0xff]  ;;  %v199_v2 = vld [vmem:[%s5358_s15 + $0x10] sm:$0xff] }
  0x28   : > { %196 = vst [vmem:[%s5363_s16] sm:$0xff] %v195_v0  ;;  %198 = vst [vmem:[%s5363_s16 + $0x8] sm:$0xff] %v197_v1  ;;  %v201_v3 = vld [vmem:[%s5358_s15 + $0x30] sm:$0xff]  ;;  %v203_v4 = vld [vmem:[%s5358_s15 + $0x38] sm:$0xff] }
  0x29   : > { %200 = vst [vmem:[%s5363_s16 + $0x10] sm:$0xff] %v199_v2  ;;  %v205_v5 = vld [vmem:[%s5358_s15 + $0x40] sm:$0xff]  ;;  %202 = vst [vmem:[%s5363_s16 + $0x18] sm:$0xff] %v201_v3  ;;  %v209_v7 = vld [vmem:[%s5358_s15 + $0x68] sm:$0xff] }
  0x2a   : > { %204 = vst [vmem:[%s5363_s16 + $0x20] sm:$0xff] %v203_v4  ;;  %206 = vst [vmem:[%s5363_s16 + $0x28] sm:$0xff] %v205_v5  ;;  %v207_v6 = vld [vmem:[%s5358_s15 + $0x60] sm:$0xff]  ;;  %v211_v8 = vld [vmem:[%s5358_s15 + $0x70] sm:$0xff] }
  0x2b   : > { %208 = vst [vmem:[%s5363_s16 + $0x30] sm:$0xff] %v207_v6  ;;  %210 = vst [vmem:[%s5363_s16 + $0x38] sm:$0xff] %v209_v7  ;;  %v213_v9 = vld [vmem:[%s5358_s15 + $0x90] sm:$0xff]  ;;  %v215_v10 = vld [vmem:[%s5358_s15 + $0x98] sm:$0xff] }
  0x2c   : > { %212 = vst [vmem:[%s5363_s16 + $0x40] sm:$0xff] %v211_v8  ;;  %v217_v11 = vld [vmem:[%s5358_s15 + $0xa0] sm:$0xff]  ;;  %214 = vst [vmem:[%s5363_s16 + $0x48] sm:$0xff] %v213_v9  ;;  %v221_v13 = vld [vmem:[%s5358_s15 + $0xc8] sm:$0xff] }
  0x2d   : > { %216 = vst [vmem:[%s5363_s16 + $0x50] sm:$0xff] %v215_v10  ;;  %218 = vst [vmem:[%s5363_s16 + $0x58] sm:$0xff] %v217_v11  ;;  %v219_v12 = vld [vmem:[%s5358_s15 + $0xc0] sm:$0xff]  ;;  %v223_v14 = vld [vmem:[%s5358_s15 + $0xd0] sm:$0xff] }
  0x2e   : > { %220 = vst [vmem:[%s5363_s16 + $0x60] sm:$0xff] %v219_v12  ;;  %222 = vst [vmem:[%s5363_s16 + $0x68] sm:$0xff] %v221_v13  ;;  %v225_v15 = vld [vmem:[%s5358_s15 + $0xf0] sm:$0xff]  ;;  %v227_v16 = vld [vmem:[%s5358_s15 + $0xf8] sm:$0xff] }
  0x2f   : > { %224 = vst [vmem:[%s5363_s16 + $0x70] sm:$0xff] %v223_v14  ;;  %v229_v17 = vld [vmem:[%s5358_s15 + $0x100] sm:$0xff]  ;;  %226 = vst [vmem:[%s5363_s16 + $0x78] sm:$0xff] %v225_v15  ;;  %v233_v19 = vld [vmem:[%s5358_s15 + $0x128] sm:$0xff] }
  0x30   : > { %228 = vst [vmem:[%s5363_s16 + $0x80] sm:$0xff] %v227_v16  ;;  %230 = vst [vmem:[%s5363_s16 + $0x88] sm:$0xff] %v229_v17  ;;  %v231_v18 = vld [vmem:[%s5358_s15 + $0x120] sm:$0xff]  ;;  %v235_v20 = vld [vmem:[%s5358_s15 + $0x130] sm:$0xff] }
  0x31   : > { %232 = vst [vmem:[%s5363_s16 + $0x90] sm:$0xff] %v231_v18  ;;  %234 = vst [vmem:[%s5363_s16 + $0x98] sm:$0xff] %v233_v19  ;;  %v237_v21 = vld [vmem:[%s5358_s15 + $0x150] sm:$0xff]  ;;  %v239_v22 = vld [vmem:[%s5358_s15 + $0x158] sm:$0xff] }
  0x32   : > { %236 = vst [vmem:[%s5363_s16 + $0xa0] sm:$0xff] %v235_v20  ;;  %v241_v23 = vld [vmem:[%s5358_s15 + $0x160] sm:$0xff]  ;;  %238 = vst [vmem:[%s5363_s16 + $0xa8] sm:$0xff] %v237_v21  ;;  %v245_v25 = vld [vmem:[%s5358_s15 + $0x188] sm:$0xff] }
  0x33   : > { %240 = vst [vmem:[%s5363_s16 + $0xb0] sm:$0xff] %v239_v22  ;;  %242 = vst [vmem:[%s5363_s16 + $0xb8] sm:$0xff] %v241_v23  ;;  %v243_v24 = vld [vmem:[%s5358_s15 + $0x180] sm:$0xff]  ;;  %v247_v26 = vld [vmem:[%s5358_s15 + $0x190] sm:$0xff] }
  0x34   : > { %244 = vst [vmem:[%s5363_s16 + $0xc0] sm:$0xff] %v243_v24  ;;  %246 = vst [vmem:[%s5363_s16 + $0xc8] sm:$0xff] %v245_v25  ;;  %v249_v27 = vld [vmem:[%s5358_s15 + $0x1b0] sm:$0xff]  ;;  %v251_v28 = vld [vmem:[%s5358_s15 + $0x1b8] sm:$0xff] }
  0x35   : > { %248 = vst [vmem:[%s5363_s16 + $0xd0] sm:$0xff] %v247_v26  ;;  %v253_v29 = vld [vmem:[%s5358_s15 + $0x1c0] sm:$0xff]  ;;  %250 = vst [vmem:[%s5363_s16 + $0xd8] sm:$0xff] %v249_v27  ;;  %v257_v31 = vld [vmem:[%s5358_s15 + $0x1e8] sm:$0xff] }
  0x36   : > { %252 = vst [vmem:[%s5363_s16 + $0xe0] sm:$0xff] %v251_v28  ;;  %254 = vst [vmem:[%s5363_s16 + $0xe8] sm:$0xff] %v253_v29  ;;  %v255_v30 = vld [vmem:[%s5358_s15 + $0x1e0] sm:$0xff]  ;;  %v259_v32 = vld [vmem:[%s5358_s15 + $0x1f0] sm:$0xff] }
  0x37   : > { %256 = vst [vmem:[%s5363_s16 + $0xf0] sm:$0xff] %v255_v30  ;;  %258 = vst [vmem:[%s5363_s16 + $0xf8] sm:$0xff] %v257_v31  ;;  %v261_v33 = vld [vmem:[%s5358_s15 + $0x210] sm:$0xff]  ;;  %v263_v34 = vld [vmem:[%s5358_s15 + $0x218] sm:$0xff] }
  0x38   : > { %260 = vst [vmem:[%s5363_s16 + $0x100] sm:$0xff] %v259_v32  ;;  %v265_v35 = vld [vmem:[%s5358_s15 + $0x220] sm:$0xff]  ;;  %262 = vst [vmem:[%s5363_s16 + $0x108] sm:$0xff] %v261_v33  ;;  %v269_v37 = vld [vmem:[%s5358_s15 + $0x248] sm:$0xff] }
  0x39   : > { %264 = vst [vmem:[%s5363_s16 + $0x110] sm:$0xff] %v263_v34  ;;  %266 = vst [vmem:[%s5363_s16 + $0x118] sm:$0xff] %v265_v35  ;;  %v267_v36 = vld [vmem:[%s5358_s15 + $0x240] sm:$0xff]  ;;  %v271_v38 = vld [vmem:[%s5358_s15 + $0x250] sm:$0xff] }
  0x3a   : > { %268 = vst [vmem:[%s5363_s16 + $0x120] sm:$0xff] %v267_v36  ;;  %270 = vst [vmem:[%s5363_s16 + $0x128] sm:$0xff] %v269_v37  ;;  %v273_v39 = vld [vmem:[%s5358_s15 + $0x270] sm:$0xff]  ;;  %v275_v40 = vld [vmem:[%s5358_s15 + $0x278] sm:$0xff] }
  0x3b   : > { %272 = vst [vmem:[%s5363_s16 + $0x130] sm:$0xff] %v271_v38  ;;  %v277_v41 = vld [vmem:[%s5358_s15 + $0x280] sm:$0xff]  ;;  %274 = vst [vmem:[%s5363_s16 + $0x138] sm:$0xff] %v273_v39  ;;  %v281_v43 = vld [vmem:[%s5358_s15 + $0x2a8] sm:$0xff] }
  0x3c   : > { %276 = vst [vmem:[%s5363_s16 + $0x140] sm:$0xff] %v275_v40  ;;  %278 = vst [vmem:[%s5363_s16 + $0x148] sm:$0xff] %v277_v41  ;;  %v279_v42 = vld [vmem:[%s5358_s15 + $0x2a0] sm:$0xff]  ;;  %v283_v44 = vld [vmem:[%s5358_s15 + $0x2b0] sm:$0xff] }
  0x3d   : > { %280 = vst [vmem:[%s5363_s16 + $0x150] sm:$0xff] %v279_v42  ;;  %282 = vst [vmem:[%s5363_s16 + $0x158] sm:$0xff] %v281_v43  ;;  %v285_v45 = vld [vmem:[%s5358_s15 + $0x2d0] sm:$0xff]  ;;  %v287_v46 = vld [vmem:[%s5358_s15 + $0x2d8] sm:$0xff] }
  0x3e   : > { %284 = vst [vmem:[%s5363_s16 + $0x160] sm:$0xff] %v283_v44  ;;  %v289_v47 = vld [vmem:[%s5358_s15 + $0x2e0] sm:$0xff]  ;;  %286 = vst [vmem:[%s5363_s16 + $0x168] sm:$0xff] %v285_v45  ;;  %v293_v49 = vld [vmem:[%s5358_s15 + $0x308] sm:$0xff] }
  0x3f   : > { %288 = vst [vmem:[%s5363_s16 + $0x170] sm:$0xff] %v287_v46  ;;  %290 = vst [vmem:[%s5363_s16 + $0x178] sm:$0xff] %v289_v47  ;;  %v291_v48 = vld [vmem:[%s5358_s15 + $0x300] sm:$0xff]  ;;  %v295_v50 = vld [vmem:[%s5358_s15 + $0x310] sm:$0xff] }
  0x40   : > { %292 = vst [vmem:[%s5363_s16 + $0x180] sm:$0xff] %v291_v48  ;;  %294 = vst [vmem:[%s5363_s16 + $0x188] sm:$0xff] %v293_v49  ;;  %v297_v51 = vld [vmem:[%s5358_s15 + $0x330] sm:$0xff]  ;;  %v299_v52 = vld [vmem:[%s5358_s15 + $0x338] sm:$0xff] }
  0x41   : > { %296 = vst [vmem:[%s5363_s16 + $0x190] sm:$0xff] %v295_v50  ;;  %v301_v53 = vld [vmem:[%s5358_s15 + $0x340] sm:$0xff]  ;;  %298 = vst [vmem:[%s5363_s16 + $0x198] sm:$0xff] %v297_v51  ;;  %v305_v55 = vld [vmem:[%s5358_s15 + $0x368] sm:$0xff] }
  0x42   : > { %300 = vst [vmem:[%s5363_s16 + $0x1a0] sm:$0xff] %v299_v52  ;;  %302 = vst [vmem:[%s5363_s16 + $0x1a8] sm:$0xff] %v301_v53  ;;  %v303_v54 = vld [vmem:[%s5358_s15 + $0x360] sm:$0xff]  ;;  %v307_v56 = vld [vmem:[%s5358_s15 + $0x370] sm:$0xff] }
  0x43   : > { %304 = vst [vmem:[%s5363_s16 + $0x1b0] sm:$0xff] %v303_v54  ;;  %306 = vst [vmem:[%s5363_s16 + $0x1b8] sm:$0xff] %v305_v55  ;;  %v309_v57 = vld [vmem:[%s5358_s15 + $0x390] sm:$0xff]  ;;  %v311_v58 = vld [vmem:[%s5358_s15 + $0x398] sm:$0xff] }
  0x44   : > { %308 = vst [vmem:[%s5363_s16 + $0x1c0] sm:$0xff] %v307_v56  ;;  %v313_v59 = vld [vmem:[%s5358_s15 + $0x3a0] sm:$0xff]  ;;  %310 = vst [vmem:[%s5363_s16 + $0x1c8] sm:$0xff] %v309_v57  ;;  %v317_v61 = vld [vmem:[%s5358_s15 + $0x3c8] sm:$0xff] }
  0x45   : > { %312 = vst [vmem:[%s5363_s16 + $0x1d0] sm:$0xff] %v311_v58  ;;  %314 = vst [vmem:[%s5363_s16 + $0x1d8] sm:$0xff] %v313_v59  ;;  %v315_v60 = vld [vmem:[%s5358_s15 + $0x3c0] sm:$0xff]  ;;  %v319_v62 = vld [vmem:[%s5358_s15 + $0x3d0] sm:$0xff] }
  0x46   : > { %316 = vst [vmem:[%s5363_s16 + $0x1e0] sm:$0xff] %v315_v60  ;;  %318 = vst [vmem:[%s5363_s16 + $0x1e8] sm:$0xff] %v317_v61  ;;  %v321_v63 = vld [vmem:[%s5358_s15 + $0x3f0] sm:$0xff]  ;;  %v323_v0 = vld [vmem:[%s5358_s15 + $0x3f8] sm:$0xff] }
  0x47   : > { %320 = vst [vmem:[%s5363_s16 + $0x1f0] sm:$0xff] %v319_v62  ;;  %v325_v1 = vld [vmem:[%s5358_s15 + $0x400] sm:$0xff]  ;;  %322 = vst [vmem:[%s5363_s16 + $0x1f8] sm:$0xff] %v321_v63  ;;  %v329_v3 = vld [vmem:[%s5358_s15 + $0x428] sm:$0xff] }
  0x48   : > { %324 = vst [vmem:[%s5363_s16 + $0x200] sm:$0xff] %v323_v0  ;;  %326 = vst [vmem:[%s5363_s16 + $0x208] sm:$0xff] %v325_v1  ;;  %v327_v2 = vld [vmem:[%s5358_s15 + $0x420] sm:$0xff]  ;;  %v331_v4 = vld [vmem:[%s5358_s15 + $0x430] sm:$0xff] }
  0x49   : > { %328 = vst [vmem:[%s5363_s16 + $0x210] sm:$0xff] %v327_v2  ;;  %330 = vst [vmem:[%s5363_s16 + $0x218] sm:$0xff] %v329_v3  ;;  %v333_v5 = vld [vmem:[%s5358_s15 + $0x450] sm:$0xff]  ;;  %v335_v6 = vld [vmem:[%s5358_s15 + $0x458] sm:$0xff] }
  0x4a   : > { %332 = vst [vmem:[%s5363_s16 + $0x220] sm:$0xff] %v331_v4  ;;  %v337_v7 = vld [vmem:[%s5358_s15 + $0x460] sm:$0xff]  ;;  %334 = vst [vmem:[%s5363_s16 + $0x228] sm:$0xff] %v333_v5  ;;  %v341_v9 = vld [vmem:[%s5358_s15 + $0x488] sm:$0xff] }
  0x4b   : > { %336 = vst [vmem:[%s5363_s16 + $0x230] sm:$0xff] %v335_v6  ;;  %338 = vst [vmem:[%s5363_s16 + $0x238] sm:$0xff] %v337_v7  ;;  %v339_v8 = vld [vmem:[%s5358_s15 + $0x480] sm:$0xff]  ;;  %v343_v10 = vld [vmem:[%s5358_s15 + $0x490] sm:$0xff] }
  0x4c   : > { %340 = vst [vmem:[%s5363_s16 + $0x240] sm:$0xff] %v339_v8  ;;  %342 = vst [vmem:[%s5363_s16 + $0x248] sm:$0xff] %v341_v9  ;;  %v345_v11 = vld [vmem:[%s5358_s15 + $0x4b0] sm:$0xff]  ;;  %v347_v12 = vld [vmem:[%s5358_s15 + $0x4b8] sm:$0xff] }
  0x4d   : > { %344 = vst [vmem:[%s5363_s16 + $0x250] sm:$0xff] %v343_v10  ;;  %v349_v13 = vld [vmem:[%s5358_s15 + $0x4c0] sm:$0xff]  ;;  %346 = vst [vmem:[%s5363_s16 + $0x258] sm:$0xff] %v345_v11  ;;  %v353_v15 = vld [vmem:[%s5358_s15 + $0x4e8] sm:$0xff] }
  0x4e   : > { %348 = vst [vmem:[%s5363_s16 + $0x260] sm:$0xff] %v347_v12  ;;  %350 = vst [vmem:[%s5363_s16 + $0x268] sm:$0xff] %v349_v13  ;;  %v351_v14 = vld [vmem:[%s5358_s15 + $0x4e0] sm:$0xff]  ;;  %v355_v16 = vld [vmem:[%s5358_s15 + $0x4f0] sm:$0xff] }
  0x4f   : > { %352 = vst [vmem:[%s5363_s16 + $0x270] sm:$0xff] %v351_v14  ;;  %354 = vst [vmem:[%s5363_s16 + $0x278] sm:$0xff] %v353_v15  ;;  %v357_v17 = vld [vmem:[%s5358_s15 + $0x510] sm:$0xff]  ;;  %v359_v18 = vld [vmem:[%s5358_s15 + $0x518] sm:$0xff] }
  0x50   : > { %356 = vst [vmem:[%s5363_s16 + $0x280] sm:$0xff] %v355_v16  ;;  %v361_v19 = vld [vmem:[%s5358_s15 + $0x520] sm:$0xff]  ;;  %358 = vst [vmem:[%s5363_s16 + $0x288] sm:$0xff] %v357_v17  ;;  %v365_v21 = vld [vmem:[%s5358_s15 + $0x548] sm:$0xff] }
  0x51   : > { %360 = vst [vmem:[%s5363_s16 + $0x290] sm:$0xff] %v359_v18  ;;  %362 = vst [vmem:[%s5363_s16 + $0x298] sm:$0xff] %v361_v19  ;;  %v363_v20 = vld [vmem:[%s5358_s15 + $0x540] sm:$0xff]  ;;  %v367_v22 = vld [vmem:[%s5358_s15 + $0x550] sm:$0xff] }
  0x52   : > { %364 = vst [vmem:[%s5363_s16 + $0x2a0] sm:$0xff] %v363_v20  ;;  %366 = vst [vmem:[%s5363_s16 + $0x2a8] sm:$0xff] %v365_v21  ;;  %v369_v23 = vld [vmem:[%s5358_s15 + $0x570] sm:$0xff]  ;;  %v371_v24 = vld [vmem:[%s5358_s15 + $0x578] sm:$0xff] }
  0x53   : > { %368 = vst [vmem:[%s5363_s16 + $0x2b0] sm:$0xff] %v367_v22  ;;  %v373_v25 = vld [vmem:[%s5358_s15 + $0x580] sm:$0xff]  ;;  %370 = vst [vmem:[%s5363_s16 + $0x2b8] sm:$0xff] %v369_v23  ;;  %v377_v27 = vld [vmem:[%s5358_s15 + $0x5a8] sm:$0xff] }
  0x54   : > { %372 = vst [vmem:[%s5363_s16 + $0x2c0] sm:$0xff] %v371_v24  ;;  %374 = vst [vmem:[%s5363_s16 + $0x2c8] sm:$0xff] %v373_v25  ;;  %v375_v26 = vld [vmem:[%s5358_s15 + $0x5a0] sm:$0xff]  ;;  %v379_v28 = vld [vmem:[%s5358_s15 + $0x5b0] sm:$0xff] }
  0x55   : > { %376 = vst [vmem:[%s5363_s16 + $0x2d0] sm:$0xff] %v375_v26  ;;  %378 = vst [vmem:[%s5363_s16 + $0x2d8] sm:$0xff] %v377_v27  ;;  %v381_v29 = vld [vmem:[%s5358_s15 + $0x5d0] sm:$0xff]  ;;  %v383_v30 = vld [vmem:[%s5358_s15 + $0x5d8] sm:$0xff] }
  0x56   : > { %380 = vst [vmem:[%s5363_s16 + $0x2e0] sm:$0xff] %v379_v28  ;;  %v385_v31 = vld [vmem:[%s5358_s15 + $0x5e0] sm:$0xff]  ;;  %382 = vst [vmem:[%s5363_s16 + $0x2e8] sm:$0xff] %v381_v29  ;;  %v389_v33 = vld [vmem:[%s5358_s15 + $0x608] sm:$0xff] }
  0x57   : > { %384 = vst [vmem:[%s5363_s16 + $0x2f0] sm:$0xff] %v383_v30  ;;  %386 = vst [vmem:[%s5363_s16 + $0x2f8] sm:$0xff] %v385_v31  ;;  %v387_v32 = vld [vmem:[%s5358_s15 + $0x600] sm:$0xff]  ;;  %v391_v34 = vld [vmem:[%s5358_s15 + $0x610] sm:$0xff] }
  0x58   : > { %388 = vst [vmem:[%s5363_s16 + $0x300] sm:$0xff] %v387_v32  ;;  %390 = vst [vmem:[%s5363_s16 + $0x308] sm:$0xff] %v389_v33  ;;  %v393_v35 = vld [vmem:[%s5358_s15 + $0x630] sm:$0xff]  ;;  %v395_v36 = vld [vmem:[%s5358_s15 + $0x638] sm:$0xff] }
  0x59   : > { %392 = vst [vmem:[%s5363_s16 + $0x310] sm:$0xff] %v391_v34  ;;  %v397_v37 = vld [vmem:[%s5358_s15 + $0x640] sm:$0xff]  ;;  %394 = vst [vmem:[%s5363_s16 + $0x318] sm:$0xff] %v393_v35  ;;  %v401_v39 = vld [vmem:[%s5358_s15 + $0x668] sm:$0xff] }
  0x5a   : > { %396 = vst [vmem:[%s5363_s16 + $0x320] sm:$0xff] %v395_v36  ;;  %398 = vst [vmem:[%s5363_s16 + $0x328] sm:$0xff] %v397_v37  ;;  %v399_v38 = vld [vmem:[%s5358_s15 + $0x660] sm:$0xff]  ;;  %v403_v40 = vld [vmem:[%s5358_s15 + $0x670] sm:$0xff] }
  0x5b   : > { %400 = vst [vmem:[%s5363_s16 + $0x330] sm:$0xff] %v399_v38  ;;  %402 = vst [vmem:[%s5363_s16 + $0x338] sm:$0xff] %v401_v39  ;;  %v405_v41 = vld [vmem:[%s5358_s15 + $0x690] sm:$0xff]  ;;  %v407_v42 = vld [vmem:[%s5358_s15 + $0x698] sm:$0xff] }
  0x5c   : > { %404 = vst [vmem:[%s5363_s16 + $0x340] sm:$0xff] %v403_v40  ;;  %v409_v43 = vld [vmem:[%s5358_s15 + $0x6a0] sm:$0xff]  ;;  %406 = vst [vmem:[%s5363_s16 + $0x348] sm:$0xff] %v405_v41  ;;  %v413_v45 = vld [vmem:[%s5358_s15 + $0x6c8] sm:$0xff] }
  0x5d   : > { %408 = vst [vmem:[%s5363_s16 + $0x350] sm:$0xff] %v407_v42  ;;  %410 = vst [vmem:[%s5363_s16 + $0x358] sm:$0xff] %v409_v43  ;;  %v411_v44 = vld [vmem:[%s5358_s15 + $0x6c0] sm:$0xff]  ;;  %v415_v46 = vld [vmem:[%s5358_s15 + $0x6d0] sm:$0xff] }
  0x5e   : > { %412 = vst [vmem:[%s5363_s16 + $0x360] sm:$0xff] %v411_v44  ;;  %414 = vst [vmem:[%s5363_s16 + $0x368] sm:$0xff] %v413_v45  ;;  %v417_v47 = vld [vmem:[%s5358_s15 + $0x6f0] sm:$0xff]  ;;  %v419_v48 = vld [vmem:[%s5358_s15 + $0x6f8] sm:$0xff] }
  0x5f   : > { %416 = vst [vmem:[%s5363_s16 + $0x370] sm:$0xff] %v415_v46  ;;  %v421_v49 = vld [vmem:[%s5358_s15 + $0x700] sm:$0xff]  ;;  %418 = vst [vmem:[%s5363_s16 + $0x378] sm:$0xff] %v417_v47  ;;  %v425_v51 = vld [vmem:[%s5358_s15 + $0x728] sm:$0xff] }
  0x60   : > { %420 = vst [vmem:[%s5363_s16 + $0x380] sm:$0xff] %v419_v48  ;;  %422 = vst [vmem:[%s5363_s16 + $0x388] sm:$0xff] %v421_v49  ;;  %v423_v50 = vld [vmem:[%s5358_s15 + $0x720] sm:$0xff]  ;;  %v427_v52 = vld [vmem:[%s5358_s15 + $0x730] sm:$0xff] }
  0x61   : > { %424 = vst [vmem:[%s5363_s16 + $0x390] sm:$0xff] %v423_v50  ;;  %426 = vst [vmem:[%s5363_s16 + $0x398] sm:$0xff] %v425_v51  ;;  %v429_v53 = vld [vmem:[%s5358_s15 + $0x750] sm:$0xff]  ;;  %v431_v54 = vld [vmem:[%s5358_s15 + $0x758] sm:$0xff] }
  0x62   : > { %428 = vst [vmem:[%s5363_s16 + $0x3a0] sm:$0xff] %v427_v52  ;;  %v433_v55 = vld [vmem:[%s5358_s15 + $0x760] sm:$0xff]  ;;  %430 = vst [vmem:[%s5363_s16 + $0x3a8] sm:$0xff] %v429_v53  ;;  %v437_v57 = vld [vmem:[%s5358_s15 + $0x788] sm:$0xff] }
  0x63   : > { %432 = vst [vmem:[%s5363_s16 + $0x3b0] sm:$0xff] %v431_v54  ;;  %434 = vst [vmem:[%s5363_s16 + $0x3b8] sm:$0xff] %v433_v55  ;;  %v435_v56 = vld [vmem:[%s5358_s15 + $0x780] sm:$0xff]  ;;  %v439_v58 = vld [vmem:[%s5358_s15 + $0x790] sm:$0xff] }
  0x64   : > { %436 = vst [vmem:[%s5363_s16 + $0x3c0] sm:$0xff] %v435_v56  ;;  %438 = vst [vmem:[%s5363_s16 + $0x3c8] sm:$0xff] %v437_v57  ;;  %v441_v59 = vld [vmem:[%s5358_s15 + $0x7b0] sm:$0xff]  ;;  %v443_v60 = vld [vmem:[%s5358_s15 + $0x7b8] sm:$0xff] }
  0x65   : > { %440 = vst [vmem:[%s5363_s16 + $0x3d0] sm:$0xff] %v439_v58  ;;  %v445_v61 = vld [vmem:[%s5358_s15 + $0x7c0] sm:$0xff]  ;;  %442 = vst [vmem:[%s5363_s16 + $0x3d8] sm:$0xff] %v441_v59  ;;  %v449_v63 = vld [vmem:[%s5358_s15 + $0x7e8] sm:$0xff] }
  0x66   : > { %444 = vst [vmem:[%s5363_s16 + $0x3e0] sm:$0xff] %v443_v60  ;;  %446 = vst [vmem:[%s5363_s16 + $0x3e8] sm:$0xff] %v445_v61  ;;  %v447_v62 = vld [vmem:[%s5358_s15 + $0x7e0] sm:$0xff]  ;;  %v451_v0 = vld [vmem:[%s5358_s15 + $0x7f0] sm:$0xff] }
  0x67   : > { %448 = vst [vmem:[%s5363_s16 + $0x3f0] sm:$0xff] %v447_v62  ;;  %450 = vst [vmem:[%s5363_s16 + $0x3f8] sm:$0xff] %v449_v63  ;;  %v453_v1 = vld [vmem:[%s5358_s15 + $0x810] sm:$0xff]  ;;  %v455_v2 = vld [vmem:[%s5358_s15 + $0x818] sm:$0xff] }
  0x68   : > { %452 = vst [vmem:[%s5363_s16 + $0x400] sm:$0xff] %v451_v0  ;;  %v457_v3 = vld [vmem:[%s5358_s15 + $0x820] sm:$0xff]  ;;  %454 = vst [vmem:[%s5363_s16 + $0x408] sm:$0xff] %v453_v1  ;;  %v461_v5 = vld [vmem:[%s5358_s15 + $0x848] sm:$0xff] }
  0x69   : > { %456 = vst [vmem:[%s5363_s16 + $0x410] sm:$0xff] %v455_v2  ;;  %458 = vst [vmem:[%s5363_s16 + $0x418] sm:$0xff] %v457_v3  ;;  %v459_v4 = vld [vmem:[%s5358_s15 + $0x840] sm:$0xff]  ;;  %v463_v6 = vld [vmem:[%s5358_s15 + $0x850] sm:$0xff] }
  0x6a   : > { %460 = vst [vmem:[%s5363_s16 + $0x420] sm:$0xff] %v459_v4  ;;  %462 = vst [vmem:[%s5363_s16 + $0x428] sm:$0xff] %v461_v5  ;;  %v465_v7 = vld [vmem:[%s5358_s15 + $0x870] sm:$0xff]  ;;  %v467_v8 = vld [vmem:[%s5358_s15 + $0x878] sm:$0xff] }
  0x6b   : > { %464 = vst [vmem:[%s5363_s16 + $0x430] sm:$0xff] %v463_v6  ;;  %v469_v9 = vld [vmem:[%s5358_s15 + $0x880] sm:$0xff]  ;;  %466 = vst [vmem:[%s5363_s16 + $0x438] sm:$0xff] %v465_v7  ;;  %v473_v11 = vld [vmem:[%s5358_s15 + $0x8a8] sm:$0xff] }
  0x6c   : > { %468 = vst [vmem:[%s5363_s16 + $0x440] sm:$0xff] %v467_v8  ;;  %470 = vst [vmem:[%s5363_s16 + $0x448] sm:$0xff] %v469_v9  ;;  %v471_v10 = vld [vmem:[%s5358_s15 + $0x8a0] sm:$0xff]  ;;  %v475_v12 = vld [vmem:[%s5358_s15 + $0x8b0] sm:$0xff] }
  0x6d   : > { %472 = vst [vmem:[%s5363_s16 + $0x450] sm:$0xff] %v471_v10  ;;  %474 = vst [vmem:[%s5363_s16 + $0x458] sm:$0xff] %v473_v11  ;;  %v477_v13 = vld [vmem:[%s5358_s15 + $0x8d0] sm:$0xff]  ;;  %v479_v14 = vld [vmem:[%s5358_s15 + $0x8d8] sm:$0xff] }
  0x6e   : > { %476 = vst [vmem:[%s5363_s16 + $0x460] sm:$0xff] %v475_v12  ;;  %v481_v15 = vld [vmem:[%s5358_s15 + $0x8e0] sm:$0xff]  ;;  %478 = vst [vmem:[%s5363_s16 + $0x468] sm:$0xff] %v477_v13  ;;  %v485_v17 = vld [vmem:[%s5358_s15 + $0x908] sm:$0xff] }
  0x6f   : > { %480 = vst [vmem:[%s5363_s16 + $0x470] sm:$0xff] %v479_v14  ;;  %482 = vst [vmem:[%s5363_s16 + $0x478] sm:$0xff] %v481_v15  ;;  %v483_v16 = vld [vmem:[%s5358_s15 + $0x900] sm:$0xff]  ;;  %v487_v18 = vld [vmem:[%s5358_s15 + $0x910] sm:$0xff] }
  0x70   : > { %484 = vst [vmem:[%s5363_s16 + $0x480] sm:$0xff] %v483_v16  ;;  %486 = vst [vmem:[%s5363_s16 + $0x488] sm:$0xff] %v485_v17  ;;  %v489_v19 = vld [vmem:[%s5358_s15 + $0x930] sm:$0xff]  ;;  %v491_v20 = vld [vmem:[%s5358_s15 + $0x938] sm:$0xff] }
  0x71   : > { %488 = vst [vmem:[%s5363_s16 + $0x490] sm:$0xff] %v487_v18  ;;  %v493_v21 = vld [vmem:[%s5358_s15 + $0x940] sm:$0xff]  ;;  %490 = vst [vmem:[%s5363_s16 + $0x498] sm:$0xff] %v489_v19  ;;  %v497_v23 = vld [vmem:[%s5358_s15 + $0x968] sm:$0xff] }
  0x72   : > { %492 = vst [vmem:[%s5363_s16 + $0x4a0] sm:$0xff] %v491_v20  ;;  %494 = vst [vmem:[%s5363_s16 + $0x4a8] sm:$0xff] %v493_v21  ;;  %v495_v22 = vld [vmem:[%s5358_s15 + $0x960] sm:$0xff]  ;;  %v499_v24 = vld [vmem:[%s5358_s15 + $0x970] sm:$0xff] }
  0x73   : > { %496 = vst [vmem:[%s5363_s16 + $0x4b0] sm:$0xff] %v495_v22  ;;  %498 = vst [vmem:[%s5363_s16 + $0x4b8] sm:$0xff] %v497_v23  ;;  %v501_v25 = vld [vmem:[%s5358_s15 + $0x990] sm:$0xff]  ;;  %v503_v26 = vld [vmem:[%s5358_s15 + $0x998] sm:$0xff] }
  0x74   : > { %500 = vst [vmem:[%s5363_s16 + $0x4c0] sm:$0xff] %v499_v24  ;;  %v505_v27 = vld [vmem:[%s5358_s15 + $0x9a0] sm:$0xff]  ;;  %502 = vst [vmem:[%s5363_s16 + $0x4c8] sm:$0xff] %v501_v25  ;;  %v509_v29 = vld [vmem:[%s5358_s15 + $0x9c8] sm:$0xff] }
  0x75   : > { %504 = vst [vmem:[%s5363_s16 + $0x4d0] sm:$0xff] %v503_v26  ;;  %506 = vst [vmem:[%s5363_s16 + $0x4d8] sm:$0xff] %v505_v27  ;;  %v507_v28 = vld [vmem:[%s5358_s15 + $0x9c0] sm:$0xff]  ;;  %v511_v30 = vld [vmem:[%s5358_s15 + $0x9d0] sm:$0xff] }
  0x76   : > { %508 = vst [vmem:[%s5363_s16 + $0x4e0] sm:$0xff] %v507_v28  ;;  %510 = vst [vmem:[%s5363_s16 + $0x4e8] sm:$0xff] %v509_v29  ;;  %v513_v31 = vld [vmem:[%s5358_s15 + $0x9f0] sm:$0xff]  ;;  %v515_v32 = vld [vmem:[%s5358_s15 + $0x9f8] sm:$0xff] }
  0x77   : > { %512 = vst [vmem:[%s5363_s16 + $0x4f0] sm:$0xff] %v511_v30  ;;  %v517_v33 = vld [vmem:[%s5358_s15 + $0xa00] sm:$0xff]  ;;  %514 = vst [vmem:[%s5363_s16 + $0x4f8] sm:$0xff] %v513_v31  ;;  %v521_v35 = vld [vmem:[%s5358_s15 + $0xa28] sm:$0xff] }
  0x78   : > { %516 = vst [vmem:[%s5363_s16 + $0x500] sm:$0xff] %v515_v32  ;;  %518 = vst [vmem:[%s5363_s16 + $0x508] sm:$0xff] %v517_v33  ;;  %v519_v34 = vld [vmem:[%s5358_s15 + $0xa20] sm:$0xff]  ;;  %v523_v36 = vld [vmem:[%s5358_s15 + $0xa30] sm:$0xff] }
  0x79   : > { %520 = vst [vmem:[%s5363_s16 + $0x510] sm:$0xff] %v519_v34  ;;  %522 = vst [vmem:[%s5363_s16 + $0x518] sm:$0xff] %v521_v35  ;;  %v525_v37 = vld [vmem:[%s5358_s15 + $0xa50] sm:$0xff]  ;;  %v527_v38 = vld [vmem:[%s5358_s15 + $0xa58] sm:$0xff] }
  0x7a   : > { %524 = vst [vmem:[%s5363_s16 + $0x520] sm:$0xff] %v523_v36  ;;  %v529_v39 = vld [vmem:[%s5358_s15 + $0xa60] sm:$0xff]  ;;  %526 = vst [vmem:[%s5363_s16 + $0x528] sm:$0xff] %v525_v37  ;;  %v533_v41 = vld [vmem:[%s5358_s15 + $0xa88] sm:$0xff] }
  0x7b   : > { %528 = vst [vmem:[%s5363_s16 + $0x530] sm:$0xff] %v527_v38  ;;  %530 = vst [vmem:[%s5363_s16 + $0x538] sm:$0xff] %v529_v39  ;;  %v531_v40 = vld [vmem:[%s5358_s15 + $0xa80] sm:$0xff]  ;;  %v535_v42 = vld [vmem:[%s5358_s15 + $0xa90] sm:$0xff] }
  0x7c   : > { %532 = vst [vmem:[%s5363_s16 + $0x540] sm:$0xff] %v531_v40  ;;  %534 = vst [vmem:[%s5363_s16 + $0x548] sm:$0xff] %v533_v41  ;;  %v537_v43 = vld [vmem:[%s5358_s15 + $0xab0] sm:$0xff]  ;;  %v539_v44 = vld [vmem:[%s5358_s15 + $0xab8] sm:$0xff] }
  0x7d   : > { %536 = vst [vmem:[%s5363_s16 + $0x550] sm:$0xff] %v535_v42  ;;  %v541_v45 = vld [vmem:[%s5358_s15 + $0xac0] sm:$0xff]  ;;  %538 = vst [vmem:[%s5363_s16 + $0x558] sm:$0xff] %v537_v43  ;;  %v545_v47 = vld [vmem:[%s5358_s15 + $0xae8] sm:$0xff] }
  0x7e   : > { %540 = vst [vmem:[%s5363_s16 + $0x560] sm:$0xff] %v539_v44  ;;  %542 = vst [vmem:[%s5363_s16 + $0x568] sm:$0xff] %v541_v45  ;;  %v543_v46 = vld [vmem:[%s5358_s15 + $0xae0] sm:$0xff]  ;;  %v547_v48 = vld [vmem:[%s5358_s15 + $0xaf0] sm:$0xff] }
  0x7f   : > { %544 = vst [vmem:[%s5363_s16 + $0x570] sm:$0xff] %v543_v46  ;;  %546 = vst [vmem:[%s5363_s16 + $0x578] sm:$0xff] %v545_v47  ;;  %v549_v49 = vld [vmem:[%s5358_s15 + $0xb10] sm:$0xff]  ;;  %v551_v50 = vld [vmem:[%s5358_s15 + $0xb18] sm:$0xff] }
  0x80   : > { %548 = vst [vmem:[%s5363_s16 + $0x580] sm:$0xff] %v547_v48  ;;  %v553_v51 = vld [vmem:[%s5358_s15 + $0xb20] sm:$0xff]  ;;  %550 = vst [vmem:[%s5363_s16 + $0x588] sm:$0xff] %v549_v49  ;;  %v557_v53 = vld [vmem:[%s5358_s15 + $0xb48] sm:$0xff] }
  0x81   : > { %552 = vst [vmem:[%s5363_s16 + $0x590] sm:$0xff] %v551_v50  ;;  %554 = vst [vmem:[%s5363_s16 + $0x598] sm:$0xff] %v553_v51  ;;  %v555_v52 = vld [vmem:[%s5358_s15 + $0xb40] sm:$0xff]  ;;  %v559_v54 = vld [vmem:[%s5358_s15 + $0xb50] sm:$0xff] }
  0x82   : > { %556 = vst [vmem:[%s5363_s16 + $0x5a0] sm:$0xff] %v555_v52  ;;  %558 = vst [vmem:[%s5363_s16 + $0x5a8] sm:$0xff] %v557_v53  ;;  %v561_v55 = vld [vmem:[%s5358_s15 + $0xb70] sm:$0xff]  ;;  %v563_v56 = vld [vmem:[%s5358_s15 + $0xb78] sm:$0xff] }
  0x83   : > { %560 = vst [vmem:[%s5363_s16 + $0x5b0] sm:$0xff] %v559_v54  ;;  %v565_v57 = vld [vmem:[%s5358_s15 + $0xb80] sm:$0xff]  ;;  %562 = vst [vmem:[%s5363_s16 + $0x5b8] sm:$0xff] %v561_v55  ;;  %v569_v59 = vld [vmem:[%s5358_s15 + $0xba8] sm:$0xff] }
  0x84   : > { %564 = vst [vmem:[%s5363_s16 + $0x5c0] sm:$0xff] %v563_v56  ;;  %566 = vst [vmem:[%s5363_s16 + $0x5c8] sm:$0xff] %v565_v57  ;;  %v567_v58 = vld [vmem:[%s5358_s15 + $0xba0] sm:$0xff]  ;;  %v571_v60 = vld [vmem:[%s5358_s15 + $0xbb0] sm:$0xff] }
  0x85   : > { %568 = vst [vmem:[%s5363_s16 + $0x5d0] sm:$0xff] %v567_v58  ;;  %570 = vst [vmem:[%s5363_s16 + $0x5d8] sm:$0xff] %v569_v59  ;;  %v573_v61 = vld [vmem:[%s5358_s15 + $0xbd0] sm:$0xff]  ;;  %v575_v62 = vld [vmem:[%s5358_s15 + $0xbd8] sm:$0xff] }
  0x86   : > { %572 = vst [vmem:[%s5363_s16 + $0x5e0] sm:$0xff] %v571_v60  ;;  %v577_v63 = vld [vmem:[%s5358_s15 + $0xbe0] sm:$0xff]  ;;  %574 = vst [vmem:[%s5363_s16 + $0x5e8] sm:$0xff] %v573_v61  ;;  %v581_v1 = vld [vmem:[%s5358_s15 + $0xc08] sm:$0xff] }
  0x87   : > { %576 = vst [vmem:[%s5363_s16 + $0x5f0] sm:$0xff] %v575_v62  ;;  %578 = vst [vmem:[%s5363_s16 + $0x5f8] sm:$0xff] %v577_v63  ;;  %v579_v0 = vld [vmem:[%s5358_s15 + $0xc00] sm:$0xff]  ;;  %v583_v2 = vld [vmem:[%s5358_s15 + $0xc10] sm:$0xff] }
  0x88   : > { %580 = vst [vmem:[%s5363_s16 + $0x600] sm:$0xff] %v579_v0  ;;  %582 = vst [vmem:[%s5363_s16 + $0x608] sm:$0xff] %v581_v1  ;;  %v585_v3 = vld [vmem:[%s5358_s15 + $0xc30] sm:$0xff]  ;;  %v587_v4 = vld [vmem:[%s5358_s15 + $0xc38] sm:$0xff] }
  0x89   : > { %584 = vst [vmem:[%s5363_s16 + $0x610] sm:$0xff] %v583_v2  ;;  %v589_v5 = vld [vmem:[%s5358_s15 + $0xc40] sm:$0xff]  ;;  %586 = vst [vmem:[%s5363_s16 + $0x618] sm:$0xff] %v585_v3  ;;  %v593_v7 = vld [vmem:[%s5358_s15 + $0xc68] sm:$0xff] }
  0x8a   : > { %588 = vst [vmem:[%s5363_s16 + $0x620] sm:$0xff] %v587_v4  ;;  %590 = vst [vmem:[%s5363_s16 + $0x628] sm:$0xff] %v589_v5  ;;  %v591_v6 = vld [vmem:[%s5358_s15 + $0xc60] sm:$0xff]  ;;  %v595_v8 = vld [vmem:[%s5358_s15 + $0xc70] sm:$0xff] }
  0x8b   : > { %592 = vst [vmem:[%s5363_s16 + $0x630] sm:$0xff] %v591_v6  ;;  %594 = vst [vmem:[%s5363_s16 + $0x638] sm:$0xff] %v593_v7  ;;  %v597_v9 = vld [vmem:[%s5358_s15 + $0xc90] sm:$0xff]  ;;  %v599_v10 = vld [vmem:[%s5358_s15 + $0xc98] sm:$0xff] }
  0x8c   : > { %596 = vst [vmem:[%s5363_s16 + $0x640] sm:$0xff] %v595_v8  ;;  %v601_v11 = vld [vmem:[%s5358_s15 + $0xca0] sm:$0xff]  ;;  %598 = vst [vmem:[%s5363_s16 + $0x648] sm:$0xff] %v597_v9  ;;  %v605_v13 = vld [vmem:[%s5358_s15 + $0xcc8] sm:$0xff] }
  0x8d   : > { %600 = vst [vmem:[%s5363_s16 + $0x650] sm:$0xff] %v599_v10  ;;  %602 = vst [vmem:[%s5363_s16 + $0x658] sm:$0xff] %v601_v11  ;;  %v603_v12 = vld [vmem:[%s5358_s15 + $0xcc0] sm:$0xff]  ;;  %v607_v14 = vld [vmem:[%s5358_s15 + $0xcd0] sm:$0xff] }
  0x8e   : > { %604 = vst [vmem:[%s5363_s16 + $0x660] sm:$0xff] %v603_v12  ;;  %606 = vst [vmem:[%s5363_s16 + $0x668] sm:$0xff] %v605_v13  ;;  %v609_v15 = vld [vmem:[%s5358_s15 + $0xcf0] sm:$0xff]  ;;  %v611_v16 = vld [vmem:[%s5358_s15 + $0xcf8] sm:$0xff] }
  0x8f   : > { %608 = vst [vmem:[%s5363_s16 + $0x670] sm:$0xff] %v607_v14  ;;  %v613_v17 = vld [vmem:[%s5358_s15 + $0xd00] sm:$0xff]  ;;  %610 = vst [vmem:[%s5363_s16 + $0x678] sm:$0xff] %v609_v15  ;;  %v617_v19 = vld [vmem:[%s5358_s15 + $0xd28] sm:$0xff] }
  0x90   : > { %612 = vst [vmem:[%s5363_s16 + $0x680] sm:$0xff] %v611_v16  ;;  %614 = vst [vmem:[%s5363_s16 + $0x688] sm:$0xff] %v613_v17  ;;  %v615_v18 = vld [vmem:[%s5358_s15 + $0xd20] sm:$0xff]  ;;  %v619_v20 = vld [vmem:[%s5358_s15 + $0xd30] sm:$0xff] }
  0x91   : > { %616 = vst [vmem:[%s5363_s16 + $0x690] sm:$0xff] %v615_v18  ;;  %618 = vst [vmem:[%s5363_s16 + $0x698] sm:$0xff] %v617_v19  ;;  %v621_v21 = vld [vmem:[%s5358_s15 + $0xd50] sm:$0xff]  ;;  %v623_v22 = vld [vmem:[%s5358_s15 + $0xd58] sm:$0xff] }
  0x92   : > { %620 = vst [vmem:[%s5363_s16 + $0x6a0] sm:$0xff] %v619_v20  ;;  %v625_v23 = vld [vmem:[%s5358_s15 + $0xd60] sm:$0xff]  ;;  %622 = vst [vmem:[%s5363_s16 + $0x6a8] sm:$0xff] %v621_v21  ;;  %v629_v25 = vld [vmem:[%s5358_s15 + $0xd88] sm:$0xff] }
  0x93   : > { %624 = vst [vmem:[%s5363_s16 + $0x6b0] sm:$0xff] %v623_v22  ;;  %626 = vst [vmem:[%s5363_s16 + $0x6b8] sm:$0xff] %v625_v23  ;;  %v627_v24 = vld [vmem:[%s5358_s15 + $0xd80] sm:$0xff]  ;;  %v631_v26 = vld [vmem:[%s5358_s15 + $0xd90] sm:$0xff] }
  0x94   : > { %628 = vst [vmem:[%s5363_s16 + $0x6c0] sm:$0xff] %v627_v24  ;;  %630 = vst [vmem:[%s5363_s16 + $0x6c8] sm:$0xff] %v629_v25  ;;  %v633_v27 = vld [vmem:[%s5358_s15 + $0xdb0] sm:$0xff]  ;;  %v635_v28 = vld [vmem:[%s5358_s15 + $0xdb8] sm:$0xff] }
  0x95   : > { %632 = vst [vmem:[%s5363_s16 + $0x6d0] sm:$0xff] %v631_v26  ;;  %v637_v29 = vld [vmem:[%s5358_s15 + $0xdc0] sm:$0xff]  ;;  %634 = vst [vmem:[%s5363_s16 + $0x6d8] sm:$0xff] %v633_v27  ;;  %v641_v31 = vld [vmem:[%s5358_s15 + $0xde8] sm:$0xff] }
  0x96   : > { %636 = vst [vmem:[%s5363_s16 + $0x6e0] sm:$0xff] %v635_v28  ;;  %638 = vst [vmem:[%s5363_s16 + $0x6e8] sm:$0xff] %v637_v29  ;;  %v639_v30 = vld [vmem:[%s5358_s15 + $0xde0] sm:$0xff]  ;;  %v643_v32 = vld [vmem:[%s5358_s15 + $0xdf0] sm:$0xff] }
  0x97   : > { %640 = vst [vmem:[%s5363_s16 + $0x6f0] sm:$0xff] %v639_v30  ;;  %642 = vst [vmem:[%s5363_s16 + $0x6f8] sm:$0xff] %v641_v31  ;;  %v645_v33 = vld [vmem:[%s5358_s15 + $0xe10] sm:$0xff]  ;;  %v647_v34 = vld [vmem:[%s5358_s15 + $0xe18] sm:$0xff] }
  0x98   : > { %644 = vst [vmem:[%s5363_s16 + $0x700] sm:$0xff] %v643_v32  ;;  %v649_v35 = vld [vmem:[%s5358_s15 + $0xe20] sm:$0xff]  ;;  %646 = vst [vmem:[%s5363_s16 + $0x708] sm:$0xff] %v645_v33  ;;  %v653_v37 = vld [vmem:[%s5358_s15 + $0xe48] sm:$0xff] }
  0x99   : > { %648 = vst [vmem:[%s5363_s16 + $0x710] sm:$0xff] %v647_v34  ;;  %650 = vst [vmem:[%s5363_s16 + $0x718] sm:$0xff] %v649_v35  ;;  %v651_v36 = vld [vmem:[%s5358_s15 + $0xe40] sm:$0xff]  ;;  %v655_v38 = vld [vmem:[%s5358_s15 + $0xe50] sm:$0xff] }
  0x9a   : > { %652 = vst [vmem:[%s5363_s16 + $0x720] sm:$0xff] %v651_v36  ;;  %654 = vst [vmem:[%s5363_s16 + $0x728] sm:$0xff] %v653_v37  ;;  %v657_v39 = vld [vmem:[%s5358_s15 + $0xe70] sm:$0xff]  ;;  %v659_v40 = vld [vmem:[%s5358_s15 + $0xe78] sm:$0xff] }
  0x9b   : > { %656 = vst [vmem:[%s5363_s16 + $0x730] sm:$0xff] %v655_v38  ;;  %v661_v41 = vld [vmem:[%s5358_s15 + $0xe80] sm:$0xff]  ;;  %658 = vst [vmem:[%s5363_s16 + $0x738] sm:$0xff] %v657_v39  ;;  %v665_v43 = vld [vmem:[%s5358_s15 + $0xea8] sm:$0xff] }
  0x9c   : > { %660 = vst [vmem:[%s5363_s16 + $0x740] sm:$0xff] %v659_v40  ;;  %662 = vst [vmem:[%s5363_s16 + $0x748] sm:$0xff] %v661_v41  ;;  %v663_v42 = vld [vmem:[%s5358_s15 + $0xea0] sm:$0xff]  ;;  %v667_v44 = vld [vmem:[%s5358_s15 + $0xeb0] sm:$0xff] }
  0x9d   : > { %664 = vst [vmem:[%s5363_s16 + $0x750] sm:$0xff] %v663_v42  ;;  %666 = vst [vmem:[%s5363_s16 + $0x758] sm:$0xff] %v665_v43  ;;  %v669_v45 = vld [vmem:[%s5358_s15 + $0xed0] sm:$0xff]  ;;  %v671_v46 = vld [vmem:[%s5358_s15 + $0xed8] sm:$0xff] }
  0x9e   : > { %668 = vst [vmem:[%s5363_s16 + $0x760] sm:$0xff] %v667_v44  ;;  %v673_v47 = vld [vmem:[%s5358_s15 + $0xee0] sm:$0xff]  ;;  %670 = vst [vmem:[%s5363_s16 + $0x768] sm:$0xff] %v669_v45  ;;  %v677_v49 = vld [vmem:[%s5358_s15 + $0xf08] sm:$0xff] }
  0x9f   : > { %672 = vst [vmem:[%s5363_s16 + $0x770] sm:$0xff] %v671_v46  ;;  %674 = vst [vmem:[%s5363_s16 + $0x778] sm:$0xff] %v673_v47  ;;  %v675_v48 = vld [vmem:[%s5358_s15 + $0xf00] sm:$0xff]  ;;  %v679_v50 = vld [vmem:[%s5358_s15 + $0xf10] sm:$0xff] }
  0xa0   : > { %676 = vst [vmem:[%s5363_s16 + $0x780] sm:$0xff] %v675_v48  ;;  %678 = vst [vmem:[%s5363_s16 + $0x788] sm:$0xff] %v677_v49  ;;  %v681_v51 = vld [vmem:[%s5358_s15 + $0xf30] sm:$0xff]  ;;  %v683_v52 = vld [vmem:[%s5358_s15 + $0xf38] sm:$0xff] }
  0xa1   : > { %680 = vst [vmem:[%s5363_s16 + $0x790] sm:$0xff] %v679_v50  ;;  %v685_v53 = vld [vmem:[%s5358_s15 + $0xf40] sm:$0xff]  ;;  %682 = vst [vmem:[%s5363_s16 + $0x798] sm:$0xff] %v681_v51  ;;  %v689_v55 = vld [vmem:[%s5358_s15 + $0xf68] sm:$0xff] }
  0xa2   : > { %684 = vst [vmem:[%s5363_s16 + $0x7a0] sm:$0xff] %v683_v52  ;;  %686 = vst [vmem:[%s5363_s16 + $0x7a8] sm:$0xff] %v685_v53  ;;  %v687_v54 = vld [vmem:[%s5358_s15 + $0xf60] sm:$0xff]  ;;  %v691_v56 = vld [vmem:[%s5358_s15 + $0xf70] sm:$0xff] }
  0xa3   : > { %688 = vst [vmem:[%s5363_s16 + $0x7b0] sm:$0xff] %v687_v54  ;;  %690 = vst [vmem:[%s5363_s16 + $0x7b8] sm:$0xff] %v689_v55  ;;  %v693_v57 = vld [vmem:[%s5358_s15 + $0xf90] sm:$0xff]  ;;  %v695_v58 = vld [vmem:[%s5358_s15 + $0xf98] sm:$0xff] }
  0xa4   : > { %692 = vst [vmem:[%s5363_s16 + $0x7c0] sm:$0xff] %v691_v56  ;;  %v697_v59 = vld [vmem:[%s5358_s15 + $0xfa0] sm:$0xff]  ;;  %694 = vst [vmem:[%s5363_s16 + $0x7c8] sm:$0xff] %v693_v57  ;;  %v701_v61 = vld [vmem:[%s5358_s15 + $0xfc8] sm:$0xff] }
  0xa5   : > { %696 = vst [vmem:[%s5363_s16 + $0x7d0] sm:$0xff] %v695_v58  ;;  %698 = vst [vmem:[%s5363_s16 + $0x7d8] sm:$0xff] %v697_v59  ;;  %v699_v60 = vld [vmem:[%s5358_s15 + $0xfc0] sm:$0xff]  ;;  %v703_v62 = vld [vmem:[%s5358_s15 + $0xfd0] sm:$0xff] }
  0xa6   : > { %700 = vst [vmem:[%s5363_s16 + $0x7e0] sm:$0xff] %v699_v60  ;;  %702 = vst [vmem:[%s5363_s16 + $0x7e8] sm:$0xff] %v701_v61  ;;  %v705_v63 = vld [vmem:[%s5358_s15 + $0xff0] sm:$0xff]  ;;  %v707_v0 = vld [vmem:[%s5358_s15 + $0xff8] sm:$0xff] }
  0xa7   : > { %704 = vst [vmem:[%s5363_s16 + $0x7f0] sm:$0xff] %v703_v62  ;;  %v709_v1 = vld [vmem:[%s5358_s15 + $0x1000] sm:$0xff]  ;;  %706 = vst [vmem:[%s5363_s16 + $0x7f8] sm:$0xff] %v705_v63  ;;  %v713_v3 = vld [vmem:[%s5358_s15 + $0x1028] sm:$0xff] }
  0xa8   : > { %708 = vst [vmem:[%s5363_s16 + $0x800] sm:$0xff] %v707_v0  ;;  %710 = vst [vmem:[%s5363_s16 + $0x808] sm:$0xff] %v709_v1  ;;  %v711_v2 = vld [vmem:[%s5358_s15 + $0x1020] sm:$0xff]  ;;  %v715_v4 = vld [vmem:[%s5358_s15 + $0x1030] sm:$0xff] }
  0xa9   : > { %712 = vst [vmem:[%s5363_s16 + $0x810] sm:$0xff] %v711_v2  ;;  %714 = vst [vmem:[%s5363_s16 + $0x818] sm:$0xff] %v713_v3  ;;  %v717_v5 = vld [vmem:[%s5358_s15 + $0x1050] sm:$0xff]  ;;  %v719_v6 = vld [vmem:[%s5358_s15 + $0x1058] sm:$0xff] }
  0xaa   : > { %716 = vst [vmem:[%s5363_s16 + $0x820] sm:$0xff] %v715_v4  ;;  %v721_v7 = vld [vmem:[%s5358_s15 + $0x1060] sm:$0xff]  ;;  %718 = vst [vmem:[%s5363_s16 + $0x828] sm:$0xff] %v717_v5  ;;  %v725_v9 = vld [vmem:[%s5358_s15 + $0x1088] sm:$0xff] }
  0xab   : > { %720 = vst [vmem:[%s5363_s16 + $0x830] sm:$0xff] %v719_v6  ;;  %722 = vst [vmem:[%s5363_s16 + $0x838] sm:$0xff] %v721_v7  ;;  %v723_v8 = vld [vmem:[%s5358_s15 + $0x1080] sm:$0xff]  ;;  %v727_v10 = vld [vmem:[%s5358_s15 + $0x1090] sm:$0xff] }
  0xac   : > { %724 = vst [vmem:[%s5363_s16 + $0x840] sm:$0xff] %v723_v8  ;;  %726 = vst [vmem:[%s5363_s16 + $0x848] sm:$0xff] %v725_v9  ;;  %v729_v11 = vld [vmem:[%s5358_s15 + $0x10b0] sm:$0xff]  ;;  %v731_v12 = vld [vmem:[%s5358_s15 + $0x10b8] sm:$0xff] }
  0xad   : > { %728 = vst [vmem:[%s5363_s16 + $0x850] sm:$0xff] %v727_v10  ;;  %v733_v13 = vld [vmem:[%s5358_s15 + $0x10c0] sm:$0xff]  ;;  %730 = vst [vmem:[%s5363_s16 + $0x858] sm:$0xff] %v729_v11  ;;  %v737_v15 = vld [vmem:[%s5358_s15 + $0x10e8] sm:$0xff] }
  0xae   : > { %732 = vst [vmem:[%s5363_s16 + $0x860] sm:$0xff] %v731_v12  ;;  %734 = vst [vmem:[%s5363_s16 + $0x868] sm:$0xff] %v733_v13  ;;  %v735_v14 = vld [vmem:[%s5358_s15 + $0x10e0] sm:$0xff]  ;;  %v739_v16 = vld [vmem:[%s5358_s15 + $0x10f0] sm:$0xff] }
  0xaf   : > { %736 = vst [vmem:[%s5363_s16 + $0x870] sm:$0xff] %v735_v14  ;;  %738 = vst [vmem:[%s5363_s16 + $0x878] sm:$0xff] %v737_v15  ;;  %v741_v17 = vld [vmem:[%s5358_s15 + $0x1110] sm:$0xff]  ;;  %v743_v18 = vld [vmem:[%s5358_s15 + $0x1118] sm:$0xff] }
  0xb0   : > { %740 = vst [vmem:[%s5363_s16 + $0x880] sm:$0xff] %v739_v16  ;;  %v745_v19 = vld [vmem:[%s5358_s15 + $0x1120] sm:$0xff]  ;;  %742 = vst [vmem:[%s5363_s16 + $0x888] sm:$0xff] %v741_v17  ;;  %v749_v21 = vld [vmem:[%s5358_s15 + $0x1148] sm:$0xff] }
  0xb1   : > { %744 = vst [vmem:[%s5363_s16 + $0x890] sm:$0xff] %v743_v18  ;;  %746 = vst [vmem:[%s5363_s16 + $0x898] sm:$0xff] %v745_v19  ;;  %v747_v20 = vld [vmem:[%s5358_s15 + $0x1140] sm:$0xff]  ;;  %v751_v22 = vld [vmem:[%s5358_s15 + $0x1150] sm:$0xff] }
  0xb2   : > { %748 = vst [vmem:[%s5363_s16 + $0x8a0] sm:$0xff] %v747_v20  ;;  %750 = vst [vmem:[%s5363_s16 + $0x8a8] sm:$0xff] %v749_v21  ;;  %v753_v23 = vld [vmem:[%s5358_s15 + $0x1170] sm:$0xff]  ;;  %v755_v24 = vld [vmem:[%s5358_s15 + $0x1178] sm:$0xff] }
  0xb3   : > { %752 = vst [vmem:[%s5363_s16 + $0x8b0] sm:$0xff] %v751_v22  ;;  %v757_v25 = vld [vmem:[%s5358_s15 + $0x1180] sm:$0xff]  ;;  %754 = vst [vmem:[%s5363_s16 + $0x8b8] sm:$0xff] %v753_v23  ;;  %v761_v27 = vld [vmem:[%s5358_s15 + $0x11a8] sm:$0xff] }
  0xb4   : > { %756 = vst [vmem:[%s5363_s16 + $0x8c0] sm:$0xff] %v755_v24  ;;  %758 = vst [vmem:[%s5363_s16 + $0x8c8] sm:$0xff] %v757_v25  ;;  %v759_v26 = vld [vmem:[%s5358_s15 + $0x11a0] sm:$0xff]  ;;  %v763_v28 = vld [vmem:[%s5358_s15 + $0x11b0] sm:$0xff] }
  0xb5   : > { %760 = vst [vmem:[%s5363_s16 + $0x8d0] sm:$0xff] %v759_v26  ;;  %762 = vst [vmem:[%s5363_s16 + $0x8d8] sm:$0xff] %v761_v27  ;;  %v765_v29 = vld [vmem:[%s5358_s15 + $0x11d0] sm:$0xff]  ;;  %v767_v30 = vld [vmem:[%s5358_s15 + $0x11d8] sm:$0xff] }
  0xb6   : > { %764 = vst [vmem:[%s5363_s16 + $0x8e0] sm:$0xff] %v763_v28  ;;  %v769_v31 = vld [vmem:[%s5358_s15 + $0x11e0] sm:$0xff]  ;;  %766 = vst [vmem:[%s5363_s16 + $0x8e8] sm:$0xff] %v765_v29  ;;  %v773_v33 = vld [vmem:[%s5358_s15 + $0x1208] sm:$0xff] }
  0xb7   : > { %768 = vst [vmem:[%s5363_s16 + $0x8f0] sm:$0xff] %v767_v30  ;;  %770 = vst [vmem:[%s5363_s16 + $0x8f8] sm:$0xff] %v769_v31  ;;  %v771_v32 = vld [vmem:[%s5358_s15 + $0x1200] sm:$0xff]  ;;  %v775_v34 = vld [vmem:[%s5358_s15 + $0x1210] sm:$0xff] }
  0xb8   : > { %772 = vst [vmem:[%s5363_s16 + $0x900] sm:$0xff] %v771_v32  ;;  %774 = vst [vmem:[%s5363_s16 + $0x908] sm:$0xff] %v773_v33  ;;  %v777_v35 = vld [vmem:[%s5358_s15 + $0x1230] sm:$0xff]  ;;  %v779_v36 = vld [vmem:[%s5358_s15 + $0x1238] sm:$0xff] }
  0xb9   : > { %776 = vst [vmem:[%s5363_s16 + $0x910] sm:$0xff] %v775_v34  ;;  %v781_v37 = vld [vmem:[%s5358_s15 + $0x1240] sm:$0xff]  ;;  %778 = vst [vmem:[%s5363_s16 + $0x918] sm:$0xff] %v777_v35  ;;  %v785_v39 = vld [vmem:[%s5358_s15 + $0x1268] sm:$0xff] }
  0xba   : > { %780 = vst [vmem:[%s5363_s16 + $0x920] sm:$0xff] %v779_v36  ;;  %782 = vst [vmem:[%s5363_s16 + $0x928] sm:$0xff] %v781_v37  ;;  %v783_v38 = vld [vmem:[%s5358_s15 + $0x1260] sm:$0xff]  ;;  %v787_v40 = vld [vmem:[%s5358_s15 + $0x1270] sm:$0xff] }
  0xbb   : > { %784 = vst [vmem:[%s5363_s16 + $0x930] sm:$0xff] %v783_v38  ;;  %786 = vst [vmem:[%s5363_s16 + $0x938] sm:$0xff] %v785_v39  ;;  %v789_v41 = vld [vmem:[%s5358_s15 + $0x1290] sm:$0xff]  ;;  %v791_v42 = vld [vmem:[%s5358_s15 + $0x1298] sm:$0xff] }
  0xbc   : > { %788 = vst [vmem:[%s5363_s16 + $0x940] sm:$0xff] %v787_v40  ;;  %v793_v43 = vld [vmem:[%s5358_s15 + $0x12a0] sm:$0xff]  ;;  %790 = vst [vmem:[%s5363_s16 + $0x948] sm:$0xff] %v789_v41  ;;  %v797_v45 = vld [vmem:[%s5358_s15 + $0x12c8] sm:$0xff] }
  0xbd   : > { %792 = vst [vmem:[%s5363_s16 + $0x950] sm:$0xff] %v791_v42  ;;  %794 = vst [vmem:[%s5363_s16 + $0x958] sm:$0xff] %v793_v43  ;;  %v795_v44 = vld [vmem:[%s5358_s15 + $0x12c0] sm:$0xff]  ;;  %v799_v46 = vld [vmem:[%s5358_s15 + $0x12d0] sm:$0xff] }
  0xbe   : > { %796 = vst [vmem:[%s5363_s16 + $0x960] sm:$0xff] %v795_v44  ;;  %798 = vst [vmem:[%s5363_s16 + $0x968] sm:$0xff] %v797_v45  ;;  %v801_v47 = vld [vmem:[%s5358_s15 + $0x12f0] sm:$0xff]  ;;  %v803_v48 = vld [vmem:[%s5358_s15 + $0x12f8] sm:$0xff] }
  0xbf   : > { %800 = vst [vmem:[%s5363_s16 + $0x970] sm:$0xff] %v799_v46  ;;  %v805_v49 = vld [vmem:[%s5358_s15 + $0x1300] sm:$0xff]  ;;  %802 = vst [vmem:[%s5363_s16 + $0x978] sm:$0xff] %v801_v47  ;;  %v809_v51 = vld [vmem:[%s5358_s15 + $0x1328] sm:$0xff] }
  0xc0   : > { %804 = vst [vmem:[%s5363_s16 + $0x980] sm:$0xff] %v803_v48  ;;  %806 = vst [vmem:[%s5363_s16 + $0x988] sm:$0xff] %v805_v49  ;;  %v807_v50 = vld [vmem:[%s5358_s15 + $0x1320] sm:$0xff]  ;;  %v811_v52 = vld [vmem:[%s5358_s15 + $0x1330] sm:$0xff] }
  0xc1   : > { %808 = vst [vmem:[%s5363_s16 + $0x990] sm:$0xff] %v807_v50  ;;  %810 = vst [vmem:[%s5363_s16 + $0x998] sm:$0xff] %v809_v51  ;;  %v813_v53 = vld [vmem:[%s5358_s15 + $0x1350] sm:$0xff]  ;;  %v815_v54 = vld [vmem:[%s5358_s15 + $0x1358] sm:$0xff] }
  0xc2   : > { %812 = vst [vmem:[%s5363_s16 + $0x9a0] sm:$0xff] %v811_v52  ;;  %v817_v55 = vld [vmem:[%s5358_s15 + $0x1360] sm:$0xff]  ;;  %814 = vst [vmem:[%s5363_s16 + $0x9a8] sm:$0xff] %v813_v53  ;;  %v821_v57 = vld [vmem:[%s5358_s15 + $0x1388] sm:$0xff] }
  0xc3   : > { %816 = vst [vmem:[%s5363_s16 + $0x9b0] sm:$0xff] %v815_v54  ;;  %818 = vst [vmem:[%s5363_s16 + $0x9b8] sm:$0xff] %v817_v55  ;;  %v819_v56 = vld [vmem:[%s5358_s15 + $0x1380] sm:$0xff]  ;;  %v823_v58 = vld [vmem:[%s5358_s15 + $0x1390] sm:$0xff] }
  0xc4   : > { %820 = vst [vmem:[%s5363_s16 + $0x9c0] sm:$0xff] %v819_v56  ;;  %822 = vst [vmem:[%s5363_s16 + $0x9c8] sm:$0xff] %v821_v57  ;;  %v825_v59 = vld [vmem:[%s5358_s15 + $0x13b0] sm:$0xff]  ;;  %v827_v60 = vld [vmem:[%s5358_s15 + $0x13b8] sm:$0xff] }
  0xc5   : > { %824 = vst [vmem:[%s5363_s16 + $0x9d0] sm:$0xff] %v823_v58  ;;  %v829_v61 = vld [vmem:[%s5358_s15 + $0x13c0] sm:$0xff]  ;;  %826 = vst [vmem:[%s5363_s16 + $0x9d8] sm:$0xff] %v825_v59  ;;  %v833_v63 = vld [vmem:[%s5358_s15 + $0x13e8] sm:$0xff] }
  0xc6   : > { %828 = vst [vmem:[%s5363_s16 + $0x9e0] sm:$0xff] %v827_v60  ;;  %830 = vst [vmem:[%s5363_s16 + $0x9e8] sm:$0xff] %v829_v61  ;;  %v831_v62 = vld [vmem:[%s5358_s15 + $0x13e0] sm:$0xff]  ;;  %v835_v0 = vld [vmem:[%s5358_s15 + $0x13f0] sm:$0xff] }
  0xc7   : > { %832 = vst [vmem:[%s5363_s16 + $0x9f0] sm:$0xff] %v831_v62  ;;  %834 = vst [vmem:[%s5363_s16 + $0x9f8] sm:$0xff] %v833_v63  ;;  %v837_v1 = vld [vmem:[%s5358_s15 + $0x1410] sm:$0xff]  ;;  %v839_v2 = vld [vmem:[%s5358_s15 + $0x1418] sm:$0xff] }
  0xc8   : > { %836 = vst [vmem:[%s5363_s16 + $0xa00] sm:$0xff] %v835_v0  ;;  %v841_v3 = vld [vmem:[%s5358_s15 + $0x1420] sm:$0xff]  ;;  %838 = vst [vmem:[%s5363_s16 + $0xa08] sm:$0xff] %v837_v1  ;;  %v845_v5 = vld [vmem:[%s5358_s15 + $0x1448] sm:$0xff] }
  0xc9   : > { %840 = vst [vmem:[%s5363_s16 + $0xa10] sm:$0xff] %v839_v2  ;;  %842 = vst [vmem:[%s5363_s16 + $0xa18] sm:$0xff] %v841_v3  ;;  %v843_v4 = vld [vmem:[%s5358_s15 + $0x1440] sm:$0xff]  ;;  %v847_v6 = vld [vmem:[%s5358_s15 + $0x1450] sm:$0xff] }
  0xca   : > { %844 = vst [vmem:[%s5363_s16 + $0xa20] sm:$0xff] %v843_v4  ;;  %846 = vst [vmem:[%s5363_s16 + $0xa28] sm:$0xff] %v845_v5  ;;  %v849_v7 = vld [vmem:[%s5358_s15 + $0x1470] sm:$0xff]  ;;  %v851_v8 = vld [vmem:[%s5358_s15 + $0x1478] sm:$0xff] }
  0xcb   : > { %848 = vst [vmem:[%s5363_s16 + $0xa30] sm:$0xff] %v847_v6  ;;  %v853_v9 = vld [vmem:[%s5358_s15 + $0x1480] sm:$0xff]  ;;  %850 = vst [vmem:[%s5363_s16 + $0xa38] sm:$0xff] %v849_v7  ;;  %v857_v11 = vld [vmem:[%s5358_s15 + $0x14a8] sm:$0xff] }
  0xcc   : > { %852 = vst [vmem:[%s5363_s16 + $0xa40] sm:$0xff] %v851_v8  ;;  %854 = vst [vmem:[%s5363_s16 + $0xa48] sm:$0xff] %v853_v9  ;;  %v855_v10 = vld [vmem:[%s5358_s15 + $0x14a0] sm:$0xff]  ;;  %v859_v12 = vld [vmem:[%s5358_s15 + $0x14b0] sm:$0xff] }
  0xcd   : > { %856 = vst [vmem:[%s5363_s16 + $0xa50] sm:$0xff] %v855_v10  ;;  %858 = vst [vmem:[%s5363_s16 + $0xa58] sm:$0xff] %v857_v11  ;;  %v861_v13 = vld [vmem:[%s5358_s15 + $0x14d0] sm:$0xff]  ;;  %v863_v14 = vld [vmem:[%s5358_s15 + $0x14d8] sm:$0xff] }
  0xce   : > { %860 = vst [vmem:[%s5363_s16 + $0xa60] sm:$0xff] %v859_v12  ;;  %v865_v15 = vld [vmem:[%s5358_s15 + $0x14e0] sm:$0xff]  ;;  %862 = vst [vmem:[%s5363_s16 + $0xa68] sm:$0xff] %v861_v13  ;;  %v869_v17 = vld [vmem:[%s5358_s15 + $0x1508] sm:$0xff] }
  0xcf   : > { %864 = vst [vmem:[%s5363_s16 + $0xa70] sm:$0xff] %v863_v14  ;;  %866 = vst [vmem:[%s5363_s16 + $0xa78] sm:$0xff] %v865_v15  ;;  %v867_v16 = vld [vmem:[%s5358_s15 + $0x1500] sm:$0xff]  ;;  %v871_v18 = vld [vmem:[%s5358_s15 + $0x1510] sm:$0xff] }
  0xd0   : > { %868 = vst [vmem:[%s5363_s16 + $0xa80] sm:$0xff] %v867_v16  ;;  %870 = vst [vmem:[%s5363_s16 + $0xa88] sm:$0xff] %v869_v17  ;;  %v873_v19 = vld [vmem:[%s5358_s15 + $0x1530] sm:$0xff]  ;;  %v875_v20 = vld [vmem:[%s5358_s15 + $0x1538] sm:$0xff] }
  0xd1   : > { %872 = vst [vmem:[%s5363_s16 + $0xa90] sm:$0xff] %v871_v18  ;;  %v877_v21 = vld [vmem:[%s5358_s15 + $0x1540] sm:$0xff]  ;;  %874 = vst [vmem:[%s5363_s16 + $0xa98] sm:$0xff] %v873_v19  ;;  %v881_v23 = vld [vmem:[%s5358_s15 + $0x1568] sm:$0xff] }
  0xd2   : > { %876 = vst [vmem:[%s5363_s16 + $0xaa0] sm:$0xff] %v875_v20  ;;  %878 = vst [vmem:[%s5363_s16 + $0xaa8] sm:$0xff] %v877_v21  ;;  %v879_v22 = vld [vmem:[%s5358_s15 + $0x1560] sm:$0xff]  ;;  %v883_v24 = vld [vmem:[%s5358_s15 + $0x1570] sm:$0xff] }
  0xd3   : > { %880 = vst [vmem:[%s5363_s16 + $0xab0] sm:$0xff] %v879_v22  ;;  %882 = vst [vmem:[%s5363_s16 + $0xab8] sm:$0xff] %v881_v23  ;;  %v885_v25 = vld [vmem:[%s5358_s15 + $0x1590] sm:$0xff]  ;;  %v887_v26 = vld [vmem:[%s5358_s15 + $0x1598] sm:$0xff] }
  0xd4   : > { %884 = vst [vmem:[%s5363_s16 + $0xac0] sm:$0xff] %v883_v24  ;;  %v889_v27 = vld [vmem:[%s5358_s15 + $0x15a0] sm:$0xff]  ;;  %886 = vst [vmem:[%s5363_s16 + $0xac8] sm:$0xff] %v885_v25  ;;  %v893_v29 = vld [vmem:[%s5358_s15 + $0x15c8] sm:$0xff] }
  0xd5   : > { %888 = vst [vmem:[%s5363_s16 + $0xad0] sm:$0xff] %v887_v26  ;;  %890 = vst [vmem:[%s5363_s16 + $0xad8] sm:$0xff] %v889_v27  ;;  %v891_v28 = vld [vmem:[%s5358_s15 + $0x15c0] sm:$0xff]  ;;  %v895_v30 = vld [vmem:[%s5358_s15 + $0x15d0] sm:$0xff] }
  0xd6   : > { %892 = vst [vmem:[%s5363_s16 + $0xae0] sm:$0xff] %v891_v28  ;;  %894 = vst [vmem:[%s5363_s16 + $0xae8] sm:$0xff] %v893_v29  ;;  %v897_v31 = vld [vmem:[%s5358_s15 + $0x15f0] sm:$0xff]  ;;  %v899_v32 = vld [vmem:[%s5358_s15 + $0x15f8] sm:$0xff] }
  0xd7   : > { %896 = vst [vmem:[%s5363_s16 + $0xaf0] sm:$0xff] %v895_v30  ;;  %v901_v33 = vld [vmem:[%s5358_s15 + $0x1600] sm:$0xff]  ;;  %898 = vst [vmem:[%s5363_s16 + $0xaf8] sm:$0xff] %v897_v31  ;;  %v905_v35 = vld [vmem:[%s5358_s15 + $0x1628] sm:$0xff] }
  0xd8   : > { %900 = vst [vmem:[%s5363_s16 + $0xb00] sm:$0xff] %v899_v32  ;;  %902 = vst [vmem:[%s5363_s16 + $0xb08] sm:$0xff] %v901_v33  ;;  %v903_v34 = vld [vmem:[%s5358_s15 + $0x1620] sm:$0xff]  ;;  %v907_v36 = vld [vmem:[%s5358_s15 + $0x1630] sm:$0xff] }
  0xd9   : > { %904 = vst [vmem:[%s5363_s16 + $0xb10] sm:$0xff] %v903_v34  ;;  %906 = vst [vmem:[%s5363_s16 + $0xb18] sm:$0xff] %v905_v35  ;;  %v909_v37 = vld [vmem:[%s5358_s15 + $0x1650] sm:$0xff]  ;;  %v911_v38 = vld [vmem:[%s5358_s15 + $0x1658] sm:$0xff] }
  0xda   : > { %908 = vst [vmem:[%s5363_s16 + $0xb20] sm:$0xff] %v907_v36  ;;  %v913_v39 = vld [vmem:[%s5358_s15 + $0x1660] sm:$0xff]  ;;  %910 = vst [vmem:[%s5363_s16 + $0xb28] sm:$0xff] %v909_v37  ;;  %v917_v41 = vld [vmem:[%s5358_s15 + $0x1688] sm:$0xff] }
  0xdb   : > { %912 = vst [vmem:[%s5363_s16 + $0xb30] sm:$0xff] %v911_v38  ;;  %914 = vst [vmem:[%s5363_s16 + $0xb38] sm:$0xff] %v913_v39  ;;  %v915_v40 = vld [vmem:[%s5358_s15 + $0x1680] sm:$0xff]  ;;  %v919_v42 = vld [vmem:[%s5358_s15 + $0x1690] sm:$0xff] }
  0xdc   : > { %916 = vst [vmem:[%s5363_s16 + $0xb40] sm:$0xff] %v915_v40  ;;  %918 = vst [vmem:[%s5363_s16 + $0xb48] sm:$0xff] %v917_v41  ;;  %v921_v43 = vld [vmem:[%s5358_s15 + $0x16b0] sm:$0xff]  ;;  %v923_v44 = vld [vmem:[%s5358_s15 + $0x16b8] sm:$0xff] }
  0xdd   : > { %920 = vst [vmem:[%s5363_s16 + $0xb50] sm:$0xff] %v919_v42  ;;  %v925_v45 = vld [vmem:[%s5358_s15 + $0x16c0] sm:$0xff]  ;;  %922 = vst [vmem:[%s5363_s16 + $0xb58] sm:$0xff] %v921_v43  ;;  %v929_v47 = vld [vmem:[%s5358_s15 + $0x16e8] sm:$0xff] }
  0xde   : > { %924 = vst [vmem:[%s5363_s16 + $0xb60] sm:$0xff] %v923_v44  ;;  %926 = vst [vmem:[%s5363_s16 + $0xb68] sm:$0xff] %v925_v45  ;;  %v927_v46 = vld [vmem:[%s5358_s15 + $0x16e0] sm:$0xff]  ;;  %v931_v48 = vld [vmem:[%s5358_s15 + $0x16f0] sm:$0xff] }
  0xdf   : > { %928 = vst [vmem:[%s5363_s16 + $0xb70] sm:$0xff] %v927_v46  ;;  %930 = vst [vmem:[%s5363_s16 + $0xb78] sm:$0xff] %v929_v47  ;;  %v933_v49 = vld [vmem:[%s5358_s15 + $0x1710] sm:$0xff]  ;;  %v935_v50 = vld [vmem:[%s5358_s15 + $0x1718] sm:$0xff] }
  0xe0   : > { %932 = vst [vmem:[%s5363_s16 + $0xb80] sm:$0xff] %v931_v48  ;;  %v937_v51 = vld [vmem:[%s5358_s15 + $0x1720] sm:$0xff]  ;;  %934 = vst [vmem:[%s5363_s16 + $0xb88] sm:$0xff] %v933_v49  ;;  %v941_v53 = vld [vmem:[%s5358_s15 + $0x1748] sm:$0xff] }
  0xe1   : > { %936 = vst [vmem:[%s5363_s16 + $0xb90] sm:$0xff] %v935_v50  ;;  %938 = vst [vmem:[%s5363_s16 + $0xb98] sm:$0xff] %v937_v51  ;;  %v939_v52 = vld [vmem:[%s5358_s15 + $0x1740] sm:$0xff]  ;;  %v943_v54 = vld [vmem:[%s5358_s15 + $0x1750] sm:$0xff] }
  0xe2   : > { %940 = vst [vmem:[%s5363_s16 + $0xba0] sm:$0xff] %v939_v52  ;;  %942 = vst [vmem:[%s5363_s16 + $0xba8] sm:$0xff] %v941_v53  ;;  %v945_v55 = vld [vmem:[%s5358_s15 + $0x1770] sm:$0xff]  ;;  %v947_v56 = vld [vmem:[%s5358_s15 + $0x1778] sm:$0xff] }
  0xe3   : > { %944 = vst [vmem:[%s5363_s16 + $0xbb0] sm:$0xff] %v943_v54  ;;  %v949_v57 = vld [vmem:[%s5358_s15 + $0x1780] sm:$0xff]  ;;  %946 = vst [vmem:[%s5363_s16 + $0xbb8] sm:$0xff] %v945_v55  ;;  %v953_v59 = vld [vmem:[%s5358_s15 + $0x17a8] sm:$0xff] }
  0xe4   : > { %948 = vst [vmem:[%s5363_s16 + $0xbc0] sm:$0xff] %v947_v56  ;;  %950 = vst [vmem:[%s5363_s16 + $0xbc8] sm:$0xff] %v949_v57  ;;  %v951_v58 = vld [vmem:[%s5358_s15 + $0x17a0] sm:$0xff]  ;;  %v955_v60 = vld [vmem:[%s5358_s15 + $0x17b0] sm:$0xff] }
  0xe5   : > { %952 = vst [vmem:[%s5363_s16 + $0xbd0] sm:$0xff] %v951_v58  ;;  %954 = vst [vmem:[%s5363_s16 + $0xbd8] sm:$0xff] %v953_v59  ;;  %v957_v61 = vld [vmem:[%s5358_s15 + $0x17d0] sm:$0xff]  ;;  %v959_v62 = vld [vmem:[%s5358_s15 + $0x17d8] sm:$0xff] }
  0xe6   : > { %956 = vst [vmem:[%s5363_s16 + $0xbe0] sm:$0xff] %v955_v60  ;;  %v961_v63 = vld [vmem:[%s5358_s15 + $0x17e0] sm:$0xff]  ;;  %958 = vst [vmem:[%s5363_s16 + $0xbe8] sm:$0xff] %v957_v61 }
  0xe7   : > { %960 = vst [vmem:[%s5363_s16 + $0xbf0] sm:$0xff] %v959_v62  ;;  %962 = vst [vmem:[%s5363_s16 + $0xbf8] sm:$0xff] %v961_v63 }
  0xe8 PF: > { %p4164_p12 = scmp.ge.s32.totalorder %s5265_s25, 1  ;;  %p981_p13 = scmp.lt.s32.totalorder %s5265_s25, 15 }
  0xea   : > { %p982_p0 = pnand %p4164_p12, %p981_p13 }
  0xeb   : > { %s988_s17 = sand.u32 (!%p982_p0), 1, %s5241_s20   ;;  %s4165_s18 = sshll.u32 (!%p982_p0), %s5249_s22, 3 }
  0xec   : > { %985 = sbr.rel (%p982_p0) target bundleno = 865 (0x361), region = 51  ;;  %p1031_p1 = scmp.lt.s32.totalorder (!%p982_p0), %s4165_s18, 55 }
  0xed   : > { %s6134_s19 = smul.u32 (!%p982_p0), 3072, %s988_s17  ;;  %s1038_s28 = sld [smem:[#allocation4 + %s5249_s22]] (!%p982_p0) }
  0xee   : > { %s1039_s29 = smul.u32 (!%p982_p0), 6, %s5253_s0  ;;  %s1049_s30 = sld [smem:[#allocation4 + %s5249_s22]] (!%p982_p0) }
  0xef   : > { %s1061_s10 = sld [smem:[#allocation4 + %s5249_s22]] (!%p982_p0)  ;;  %s4168_s11 = sadd.s32 (!%p982_p0), 4294967295, %s5249_s22 }
  0xf0   : > { %p1042_p2 = scmp.lt.s32.totalorder (!%p982_p0), %s1039_s29, 11  ;;  %p1064_p5 = scmp.gt.s32.totalorder (!%p982_p0), %s4168_s11, 0 }
  0xf1   : > { %s6690_s18 = smov (!%p1031_p1, %s4165_s18), 55  ;;  %s1070_s12 = sadd.s32 1, %s5249_s22 }
  0xf2   : > { %s4166_s5 = sshll.u32 %s6690_s18, 1  ;;  %s6692_s29 = smov (!%p1042_p2, %s1039_s29), 11 }
  0xf3   : > { %s6142_s9 = scalar_lea.vmem %s6672_s1, %s4166_s5  ;;  %p1040_p3 = scmp.lt.s32.totalorder %s1038_s28, 3 }
  0xf4   : > { %p1051_p4 = scmp.lt.s32.totalorder %s1049_s30, 3  ;;  %p1071_p6 = scmp.lt.s32.totalorder %s1070_s12, 6 }
  0xf5   : > { %s6694_s28 = smov (!%p1040_p3, %s1038_s28), 3  ;;  %s6698_s11 = smov (!%p1064_p5, %s4168_s11), 0 }
  0xf6   : > { %s4558_s20 = smul.u32 12, %s6694_s28  ;;  %s6696_s30 = smov (!%p1051_p4, %s1049_s30), 3 }
  0xf7   : > { %s4559_s16 = smul.u32 12, %s6696_s30  ;;  %s1066_s5 = sld [smem:[#allocation4 + %s6698_s11]] }
  0xf8   : > { %s6147_s0 = sadd.s32 %s4558_s20, %s6692_s29  ;;  %s6700_s12 = smov (!%p1071_p6, %s1070_s12), 6 }
  0xf9   : > { %s1046_s15 = scalar_lea.vmem %s6674_s3, %s6147_s0  ;;  %s1056_s17 = sadd.s32 %s4559_s16, %s6692_s29 }
  0xfa   : > { %s4167_s18 = sshll.u32 %s1056_s17, 1  ;;  %p1062_p7 = scmp.eq.s32.totalorder %s5249_s22, 0 }
  0xfb   : > { %s6156_s28 = scalar_lea.vmem %s6675_s4, %s4167_s18  ;;  %s1073_s20 = sld [smem:[#allocation4 + %s6700_s12]] }
  0xfc   : > { %p1069_p10 = scmp.eq.s32.totalorder %s5249_s22, 6  ;;  %s6165_s30 = scalar_lea.vmem [#allocation5], %s6134_s19 }
  0xfd   : > { %p1067_p8 = scmp.ne.s32.totalorder %s1061_s10, %s1066_s5 }
  0xff   : > { %p1068_p9 = por %p1067_p8, %p1062_p7 }
 0x100   : > { %v5268_v0 = vmov (%p1068_p9), 0.0  }
 0x101   : > { %p1074_p11 = scmp.ne.s32.totalorder %s1061_s10, %s1073_s20  ;;  %1078 = sbr.rel (!%p1068_p9) target bundleno = 262 (0x106), region = 59  ;;  %1079 = vst [vmem:[#allocation2] sm:$0xff] (%p1068_p9), %v5268_v0  ;;  %1080 = vst [vmem:[#allocation2 + $0x8] sm:$0xf] (%p1068_p9), %v5268_v0 }
 0x103   : > { %p6160_p12 = por %p1074_p11, %p1069_p10 }
 0x106 PF: > { %v4619_v1 = vld [vmem:[%s6165_s30 + $0x154] ss:$24 sps:$4 sm:$0xff]   ;;  %v4623_v3 = vld [vmem:[%s6165_s30 + $0x150] ss:$24 sps:$4 sm:$0xff]   ;;  %v4625_v5 = vld [vmem:[%s6165_s30 + $0x124] ss:$24 sps:$4 sm:$0xff]   ;;  %v1091_v39 = vlaneseq }
 0x107   : > { %v4621_v2 = vld [vmem:[%s6165_s30 + $0x454] ss:$24 sps:$4 sm:$0xff]   ;;  %3441 = vmatprep.subr.bf16.mxu0 %v4619_v1  ;;  %v4624_v4 = vld [vmem:[%s6165_s30 + $0x450] ss:$24 sps:$4 sm:$0xff]   ;;  %v4627_v6 = vld [vmem:[%s6165_s30 + $0x424] ss:$24 sps:$4 sm:$0xff]  }
 0x108   : > { %3482 = vmatprep.subr.bf16.mxu1 %v4621_v2  ;;  %3442 = vmatpush1.bf16.msra.mxu0 %v4623_v3  ;;  %v4629_v7 = vld [vmem:[%s6165_s30 + $0x120] ss:$24 sps:$4 sm:$0xff]   ;;  %v4631_v9 = vld [vmem:[%s6165_s30 + $0xf4] ss:$24 sps:$4 sm:$0xff]   ;;  %v4635_v11 = vld [vmem:[%s6165_s30 + $0xf0] ss:$24 sps:$4 sm:$0xff]  }
 0x109   : > { %3483 = vmatpush1.bf16.msra.mxu1 %v4624_v4  ;;  %3443 = vmatprep.subr.bf16.mxu0 %v4625_v5  ;;  %v4630_v8 = vld [vmem:[%s6165_s30 + $0x420] ss:$24 sps:$4 sm:$0xff]   ;;  %v4633_v10 = vld [vmem:[%s6165_s30 + $0x3f4] ss:$24 sps:$4 sm:$0xff]   ;;  %v4636_v12 = vld [vmem:[%s6165_s30 + $0x3f0] ss:$24 sps:$4 sm:$0xff]  }
 0x10a   : > { %3484 = vmatprep.subr.bf16.mxu1 %v4627_v6  ;;  %v4637_v13 = vld [vmem:[%s6165_s30 + $0xc4] ss:$24 sps:$4 sm:$0xff]   ;;  %v4641_v15 = vld [vmem:[%s6165_s30 + $0xc0] ss:$24 sps:$4 sm:$0xff]   ;;  %v4643_v17 = vld [vmem:[%s6165_s30 + $0x94] ss:$24 sps:$4 sm:$0xff]  }
 0x10b   : > { %v4639_v14 = vld [vmem:[%s6165_s30 + $0x3c4] ss:$24 sps:$4 sm:$0xff]   ;;  %v4642_v16 = vld [vmem:[%s6165_s30 + $0x3c0] ss:$24 sps:$4 sm:$0xff]   ;;  %v4645_v18 = vld [vmem:[%s6165_s30 + $0x394] ss:$24 sps:$4 sm:$0xff]  }
 0x10c   : > { %3444 = vmatpush1.bf16.msra.mxu0 %v4629_v7  ;;  %v4647_v19 = vld [vmem:[%s6165_s30 + $0x90] ss:$24 sps:$4 sm:$0xff]   ;;  %v4649_v21 = vld [vmem:[%s6165_s30 + $0x64] ss:$24 sps:$4 sm:$0xff]   ;;  %v4653_v23 = vld [vmem:[%s6165_s30 + $0x60] ss:$24 sps:$4 sm:$0xff]  }
 0x10d   : > { %3485 = vmatpush1.bf16.msra.mxu1 %v4630_v8  ;;  %3445 = vmatprep.subr.bf16.mxu0 %v4631_v9  ;;  %v4648_v20 = vld [vmem:[%s6165_s30 + $0x390] ss:$24 sps:$4 sm:$0xff]   ;;  %v4651_v22 = vld [vmem:[%s6165_s30 + $0x364] ss:$24 sps:$4 sm:$0xff]   ;;  %v4654_v24 = vld [vmem:[%s6165_s30 + $0x360] ss:$24 sps:$4 sm:$0xff]  }
 0x10e   : > { %3486 = vmatprep.subr.bf16.mxu1 %v4633_v10  ;;  %v4655_v25 = vld [vmem:[%s6165_s30 + $0x34] ss:$24 sps:$4 sm:$0xff]   ;;  %v4659_v27 = vld [vmem:[%s6165_s30 + $0x30] ss:$24 sps:$4 sm:$0xff]   ;;  %v4661_v29 = vld [vmem:[%s6165_s30 + $0x4] ss:$24 sps:$4 sm:$0xff]  }
 0x10f   : > { %v4657_v26 = vld [vmem:[%s6165_s30 + $0x334] ss:$24 sps:$4 sm:$0xff]   ;;  %v4660_v28 = vld [vmem:[%s6165_s30 + $0x330] ss:$24 sps:$4 sm:$0xff]   ;;  %v4663_v30 = vld [vmem:[%s6165_s30 + $0x304] ss:$24 sps:$4 sm:$0xff]  }
 0x110   : > { %3446 = vmatpush1.bf16.msra.mxu0 %v4635_v11  ;;  %v4665_v31 = vld [vmem:[%s6165_s30] ss:$24 sps:$4 sm:$0xff]   ;;  %v4667_v33 = vld [vmem:[%s6165_s30 + $0x2d4] ss:$24 sps:$4 sm:$0xff]   ;;  %v4671_v35 = vld [vmem:[%s6165_s30 + $0x2d0] ss:$24 sps:$4 sm:$0xff]  }
 0x111   : > { %3487 = vmatpush1.bf16.msra.mxu1 %v4636_v12  ;;  %3447 = vmatprep.subr.bf16.mxu0 %v4637_v13  ;;  %v4666_v32 = vld [vmem:[%s6165_s30 + $0x300] ss:$24 sps:$4 sm:$0xff]   ;;  %v4669_v34 = vld [vmem:[%s6165_s30 + $0x5d4] ss:$24 sps:$4 sm:$0xff]   ;;  %v4672_v36 = vld [vmem:[%s6165_s30 + $0x5d0] ss:$24 sps:$4 sm:$0xff]  }
 0x112   : > { %3488 = vmatprep.subr.bf16.mxu1 %v4639_v14  ;;  %v5269_v37 = vmov 1983009808   ;;  %v4673_v40 = vld [vmem:[%s6165_s30 + $0x2a4] ss:$24 sps:$4 sm:$0xff]   ;;  %v4677_v42 = vld [vmem:[%s6165_s30 + $0x2a0] ss:$24 sps:$4 sm:$0xff]  }
 0x113   : > { %v1089_v38 = vunpack.c.l.s4 %v5269_v37  ;;  %v4675_v41 = vld [vmem:[%s6165_s30 + $0x5a4] ss:$24 sps:$4 sm:$0xff]   ;;  %v6206_v44 = vshrl.u32 %v1091_v39, 7  ;;  %v4678_v45 = vld [vmem:[%s6165_s30 + $0x5a0] ss:$24 sps:$4 sm:$0xff]  }
 0x114   : > { %3448 = vmatpush1.bf16.msra.mxu0 %v4641_v15  ;;  %v4679_v46 = vld [vmem:[%s6165_s30 + $0x274] ss:$24 sps:$4 sm:$0xff]   ;;  %v4683_v48 = vld [vmem:[%s6165_s30 + $0x270] ss:$24 sps:$4 sm:$0xff]   ;;  %v4685_v51 = vld [vmem:[%s6165_s30 + $0x244] ss:$24 sps:$4 sm:$0xff]  }
 0x115   : > { %3489 = vmatpush1.bf16.msra.mxu1 %v4642_v16  ;;  %3449 = vmatprep.subr.bf16.mxu0 %v4643_v17  ;;  %v1090_v43 = vunpack.c.0.s8 %v1089_v38  ;;  %v4681_v47 = vld [vmem:[%s6165_s30 + $0x574] ss:$24 sps:$4 sm:$0xff]   ;;  %v4684_v49 = vld [vmem:[%s6165_s30 + $0x570] ss:$24 sps:$4 sm:$0xff]   ;;  %v4687_v52 = vld [vmem:[%s6165_s30 + $0x544] ss:$24 sps:$4 sm:$0xff]  }
 0x116   : > { %3490 = vmatprep.subr.bf16.mxu1 %v4645_v18  ;;  %v1083_v53 = vld [vmem:[%s6142_s9] sm:$0xff]  ;;  %v4695_v62 = vld [vmem:[%s6165_s30 + $0x210] ss:$24 sps:$4 sm:$0xff]   ;;  %v4697_v2 = vld [vmem:[%s6165_s30 + $0x1e4] ss:$24 sps:$4 sm:$0xff]  }
 0x117   : > { %v6214_v50 = vsub.s32 %v1090_v43, %v6206_v44  ;;  %v4689_v54 = vld [vmem:[%s6165_s30 + $0x240] ss:$24 sps:$4 sm:$0xff]   ;;  %v1087_v56 = vcombine.high %v1083_v53, %v1083_v53  ;;  %v4691_v58 = vld [vmem:[%s6165_s30 + $0x214] ss:$24 sps:$4 sm:$0xff]   ;;  %v4696_v1 = vld [vmem:[%s6165_s30 + $0x510] ss:$24 sps:$4 sm:$0xff]  }
 0x118   : > { %3450 = vmatpush1.bf16.msra.mxu0 %v4647_v19  ;;  %v4690_v57 = vld [vmem:[%s6165_s30 + $0x540] ss:$24 sps:$4 sm:$0xff]   ;;  %v4693_v59 = vld [vmem:[%s6165_s30 + $0x514] ss:$24 sps:$4 sm:$0xff]   ;;  %v4699_v3 = vld [vmem:[%s6165_s30 + $0x4e4] ss:$24 sps:$4 sm:$0xff]  }
 0x119   : > { %3491 = vmatpush1.bf16.msra.mxu1 %v4648_v20  ;;  %3451 = vmatprep.subr.bf16.mxu0 %v4649_v21  ;;  %v1094_v55 = vrot.slane %v1083_v53, %v6214_v50  ;;  %v1101_v61 = vrot.slane %v1087_v56, %v6214_v50  ;;  %v4701_v5 = vld [vmem:[%s6165_s30 + $0x1e0] ss:$24 sps:$4 sm:$0xff]   ;;  %v4703_v7 = vld [vmem:[%s6165_s30 + $0x1b4] ss:$24 sps:$4 sm:$0xff]   ;;  %v4707_v9 = vld [vmem:[%s6165_s30 + $0x1b0] ss:$24 sps:$4 sm:$0xff]  }
 0x11a   : > { %3492 = vmatprep.subr.bf16.mxu1 %v4651_v22  ;;  %v4702_v6 = vld [vmem:[%s6165_s30 + $0x4e0] ss:$24 sps:$4 sm:$0xff]   ;;  %v4705_v8 = vld [vmem:[%s6165_s30 + $0x4b4] ss:$24 sps:$4 sm:$0xff]   ;;  %v4708_v10 = vld [vmem:[%s6165_s30 + $0x4b0] ss:$24 sps:$4 sm:$0xff]  }
 0x11b   : > { %v1102_v60 = vcombine.high %v1094_v55, %v1094_v55  ;;  %v1103_v0 = vcombine.high %v1101_v61, %v1101_v61  ;;  %v4709_v11 = vld [vmem:[%s6165_s30 + $0x184] ss:$24 sps:$4 sm:$0xff]   ;;  %v4713_v13 = vld [vmem:[%s6165_s30 + $0x180] ss:$24 sps:$4 sm:$0xff]   ;;  %v4718_v15 = vld [vmem:[%s6165_s30 + $0x754] ss:$24 sps:$4 sm:$0xff]   ;;  %v6247_v17 = vpack.c.bf16 %v1094_v55, %v1094_v55  ;;  %v6249_v18 = vpack.c.bf16 %v1101_v61, %v1101_v61 }
 0x11c   : > { %3452 = vmatpush1.bf16.msra.mxu0 %v4653_v23  ;;  %v4711_v12 = vld [vmem:[%s6165_s30 + $0x484] ss:$24 sps:$4 sm:$0xff]   ;;  %v4714_v14 = vld [vmem:[%s6165_s30 + $0x480] ss:$24 sps:$4 sm:$0xff]   ;;  %v4721_v16 = vld [vmem:[%s6165_s30 + $0xa54] ss:$24 sps:$4 sm:$0xff]  }
 0x11d   : > { %3493 = vmatpush1.bf16.msra.mxu1 %v4654_v24  ;;  %3453 = vmatprep.subr.bf16.mxu0 %v4655_v25  ;;  %v6226_v63 = vpack.c.bf16 %v1102_v60, %v1102_v60  ;;  %v6231_v4 = vpack.c.bf16 %v1103_v0, %v1103_v0  ;;  %v4716_v19 = vld [vmem:[%s6165_s30 + $0x750] ss:$24 sps:$4 sm:$0xff]   ;;  %v4724_v21 = vld [vmem:[%s6165_s30 + $0x724] ss:$24 sps:$4 sm:$0xff]   ;;  %v4722_v23 = vld [vmem:[%s6165_s30 + $0x720] ss:$24 sps:$4 sm:$0xff]  }
 0x11e   : > { %3494 = vmatprep.subr.bf16.mxu1 %v4657_v26  ;;  %v4719_v20 = vld [vmem:[%s6165_s30 + $0xa50] ss:$24 sps:$4 sm:$0xff]   ;;  %v4727_v22 = vld [vmem:[%s6165_s30 + $0xa24] ss:$24 sps:$4 sm:$0xff]   ;;  %v4725_v24 = vld [vmem:[%s6165_s30 + $0xa20] ss:$24 sps:$4 sm:$0xff]  }
 0x11f   : > { %3473 = vmatprep.mubr.bf16.mxu0 %v6226_v63  ;;  %3514 = vmatprep.mubr.bf16.mxu1 %v6231_v4  ;;  %v4730_v25 = vld [vmem:[%s6165_s30 + $0x6f4] ss:$24 sps:$4 sm:$0xff]   ;;  %v4748_v37 = vld [vmem:[%s6165_s30 + $0x664] ss:$24 sps:$4 sm:$0xff]   ;;  %v4746_v39 = vld [vmem:[%s6165_s30 + $0x660] ss:$24 sps:$4 sm:$0xff]  }
 0x120   : > { %3454 = vmatpush1.bf16.msra.mxu0 %v4659_v27  ;;  %v4733_v26 = vld [vmem:[%s6165_s30 + $0x9f4] ss:$24 sps:$4 sm:$0xff]   ;;  %v4728_v27 = vld [vmem:[%s6165_s30 + $0x6f0] ss:$24 sps:$4 sm:$0xff]   ;;  %v4751_v38 = vld [vmem:[%s6165_s30 + $0x964] ss:$24 sps:$4 sm:$0xff]  }
 0x121   : > { %3495 = vmatpush1.bf16.msra.mxu1 %v4660_v28  ;;  %3455 = vmatprep.subr.bf16.mxu0 %v4661_v29  ;;  %v4731_v28 = vld [vmem:[%s6165_s30 + $0x9f0] ss:$24 sps:$4 sm:$0xff]   ;;  %v4736_v29 = vld [vmem:[%s6165_s30 + $0x6c4] ss:$24 sps:$4 sm:$0xff]   ;;  %v4758_v56 = vld [vmem:[%s6165_s30 + $0x600] ss:$24 sps:$4 sm:$0xff]  }
 0x122   : > { %3496 = vmatprep.subr.bf16.mxu1 %v4663_v30  ;;  %v4739_v30 = vld [vmem:[%s6165_s30 + $0x9c4] ss:$24 sps:$4 sm:$0xff]   ;;  %v4769_v60 = vld [vmem:[%s6165_s30 + $0xbd4] ss:$24 sps:$4 sm:$0xff]   ;;  %v4764_v61 = vld [vmem:[%s6165_s30 + $0x8d0] ss:$24 sps:$4 sm:$0xff]  }
 0x123   : > { %v1084_v43 = vld [vmem:[%s6142_s9 + $0x8] sm:$0xff] }
 0x124   : > { %3456 = vmatpush1.bf16.msra.mxu0 %v4665_v31  ;;  %v4734_v31 = vld [vmem:[%s6165_s30 + $0x6c0] ss:$24 sps:$4 sm:$0xff]   ;;  %v4763_v53 = vld [vmem:[%s6165_s30 + $0x904] ss:$24 sps:$4 sm:$0xff]  }
 0x125   : > { %3497 = vmatpush1.bf16.msra.mxu1 %v4666_v32  ;;  %3457 = vmatprep.subr.bf16.mxu0 %v4667_v33  ;;  %v4737_v32 = vld [vmem:[%s6165_s30 + $0x9c0] ss:$24 sps:$4 sm:$0xff]   ;;  %v4742_v33 = vld [vmem:[%s6165_s30 + $0x694] ss:$24 sps:$4 sm:$0xff]   ;;  %v4772_v0 = vld [vmem:[%s6165_s30 + $0x8a4] ss:$24 sps:$4 sm:$0xff]  }
 0x126   : > { %3498 = vmatprep.subr.bf16.mxu1 %v4669_v34  ;;  %v4745_v34 = vld [vmem:[%s6165_s30 + $0x994] ss:$24 sps:$4 sm:$0xff]  }
 0x128   : > { %3458 = vmatpush2.bf16.msra.mxu0 %v4671_v35  ;;  %v4740_v35 = vld [vmem:[%s6165_s30 + $0x690] ss:$24 sps:$4 sm:$0xff]  }
 0x129   : > { %3499 = vmatpush2.bf16.msra.mxu1 %v4672_v36  ;;  %3459 = vmatprep.subr.bf16.mxu0 %v4673_v40  ;;  %v4743_v36 = vld [vmem:[%s6165_s30 + $0x990] ss:$24 sps:$4 sm:$0xff]   ;;  %v4749_v40 = vld [vmem:[%s6165_s30 + $0x960] ss:$24 sps:$4 sm:$0xff]  }
 0x12a   : > { %3500 = vmatprep.subr.bf16.mxu1 %v4675_v41  ;;  %v4754_v41 = vld [vmem:[%s6165_s30 + $0x634] ss:$24 sps:$4 sm:$0xff]  }
 0x12c   : > { %3460 = vmatpush2.bf16.msra.mxu0 %v4677_v42  ;;  %v4757_v42 = vld [vmem:[%s6165_s30 + $0x934] ss:$24 sps:$4 sm:$0xff]  }
 0x12d   : > { %3501 = vmatpush2.bf16.msra.mxu1 %v4678_v45  ;;  %3461 = vmatprep.subr.bf16.mxu0 %v4679_v46  ;;  %v6279_v45 = vrot.slane %v1084_v43, %v6214_v50  ;;  %v1104_v46 = vcombine.high %v1084_v43, %v1084_v43  ;;  %v4825_v43 = vld [vmem:[%s6165_s30 + $0xf8] ss:$24 sps:$4 sm:$0xff]  }
 0x12e   : > { %3502 = vmatprep.subr.bf16.mxu1 %v4681_v47  ;;  %v4752_v47 = vld [vmem:[%s6165_s30 + $0x630] ss:$24 sps:$4 sm:$0xff]  }
 0x130   : > { %3462 = vmatpush2.bf16.msra.mxu0 %v4683_v48  ;;  %v4755_v48 = vld [vmem:[%s6165_s30 + $0x930] ss:$24 sps:$4 sm:$0xff]  }
 0x131   : > { %3503 = vmatpush2.bf16.msra.mxu1 %v4684_v49  ;;  %3463 = vmatprep.subr.bf16.mxu0 %v4685_v51  ;;  %v1119_v49 = vcombine.high %v6279_v45, %v6279_v45  ;;  %v6286_v51 = vrot.slane %v1104_v46, %v6214_v50  ;;  %v4833_v46 = vld [vmem:[%s6165_s30 + $0xcc] ss:$24 sps:$4 sm:$0xff]  }
 0x132   : > { %3504 = vmatprep.subr.bf16.mxu1 %v4687_v52  ;;  %v4760_v52 = vld [vmem:[%s6165_s30 + $0x604] ss:$24 sps:$4 sm:$0xff]  }
 0x133   : > { %v1120_v55 = vcombine.high %v6286_v51, %v6286_v51 }
 0x134   : > { %3464 = vmatpush2.bf16.msra.mxu0 %v4689_v54  ;;  %v6290_v54 = vpack.c.bf16 %v1119_v49, %v1119_v49  ;;  %v4834_v49 = vld [vmem:[%s6165_s30 + $0x3c8] ss:$24 sps:$4 sm:$0xff]  }
 0x135   : > { %3505 = vmatpush2.bf16.msra.mxu1 %v4690_v57  ;;  %3465 = vmatprep.subr.bf16.mxu0 %v4691_v58  ;;  %v4761_v57 = vld [vmem:[%s6165_s30 + $0x900] ss:$24 sps:$4 sm:$0xff]   ;;  %v6296_v58 = vpack.c.bf16 %v1120_v55, %v1120_v55 }
 0x136   : > { %3506 = vmatprep.subr.bf16.mxu1 %v4693_v59  ;;  %v4766_v59 = vld [vmem:[%s6165_s30 + $0x8d4] ss:$24 sps:$4 sm:$0xff]   ;;  %v4840_v55 = vld [vmem:[%s6165_s30 + $0x398] ss:$24 sps:$4 sm:$0xff]  }
 0x138   : > { %3466 = vmatpush2.bf16.msra.mxu0 %v4695_v62  ;;  %v4767_v62 = vld [vmem:[%s6165_s30 + $0xbd0] ss:$24 sps:$4 sm:$0xff]  }
 0x139   : > { %3507 = vmatpush2.bf16.msra.mxu1 %v4696_v1  ;;  %3467 = vmatprep.subr.bf16.mxu0 %v4697_v2  ;;  %v4775_v1 = vld [vmem:[%s6165_s30 + $0xba4] ss:$24 sps:$4 sm:$0xff]   ;;  %v4770_v2 = vld [vmem:[%s6165_s30 + $0x8a0] ss:$24 sps:$4 sm:$0xff]  }
 0x13a   : > { %3508 = vmatprep.subr.bf16.mxu1 %v4699_v3  ;;  %v4773_v3 = vld [vmem:[%s6165_s30 + $0xba0] ss:$24 sps:$4 sm:$0xff]  }
 0x13c   : > { %3468 = vmatpush2.bf16.msra.mxu0 %v4701_v5  ;;  %v4778_v5 = vld [vmem:[%s6165_s30 + $0x874] ss:$24 sps:$4 sm:$0xff]  }
 0x13d   : > { %3509 = vmatpush2.bf16.msra.mxu1 %v4702_v6  ;;  %3469 = vmatprep.subr.bf16.mxu0 %v4703_v7  ;;  %v4781_v6 = vld [vmem:[%s6165_s30 + $0xb74] ss:$24 sps:$4 sm:$0xff]   ;;  %v4776_v7 = vld [vmem:[%s6165_s30 + $0x870] ss:$24 sps:$4 sm:$0xff]  }
 0x13e   : > { %3510 = vmatprep.subr.bf16.mxu1 %v4705_v8  ;;  %v4779_v8 = vld [vmem:[%s6165_s30 + $0xb70] ss:$24 sps:$4 sm:$0xff]  }
 0x140   : > { %3470 = vmatpush2.bf16.msra.mxu0 %v4707_v9  ;;  %v4784_v9 = vld [vmem:[%s6165_s30 + $0x844] ss:$24 sps:$4 sm:$0xff]  }
 0x141   : > { %3511 = vmatpush2.bf16.msra.mxu1 %v4708_v10  ;;  %3471 = vmatprep.subr.bf16.mxu0 %v4709_v11  ;;  %v4787_v10 = vld [vmem:[%s6165_s30 + $0xb44] ss:$24 sps:$4 sm:$0xff]   ;;  %v4782_v11 = vld [vmem:[%s6165_s30 + $0x840] ss:$24 sps:$4 sm:$0xff]  }
 0x142   : > { %3512 = vmatprep.subr.bf16.mxu1 %v4711_v12  ;;  %v4785_v12 = vld [vmem:[%s6165_s30 + $0xb40] ss:$24 sps:$4 sm:$0xff]  }
 0x144   : > { %3472 = vmatpush2.bf16.msra.mxu0 %v4713_v13  ;;  %v4790_v13 = vld [vmem:[%s6165_s30 + $0x814] ss:$24 sps:$4 sm:$0xff]  }
 0x145   : > { %3513 = vmatpush2.bf16.msra.mxu1 %v4714_v14  ;;  %3523 = vmatprep.subr.bf16.mxu0 %v4718_v15  ;;  %v4793_v14 = vld [vmem:[%s6165_s30 + $0xb14] ss:$24 sps:$4 sm:$0xff]   ;;  %v4788_v15 = vld [vmem:[%s6165_s30 + $0x810] ss:$24 sps:$4 sm:$0xff]  }
 0x146   : > { %3564 = vmatprep.subr.bf16.mxu1 %v4721_v16  ;;  %v4791_v16 = vld [vmem:[%s6165_s30 + $0xb10] ss:$24 sps:$4 sm:$0xff]  }
 0x147   : > { %3474 = vmatmul.mubr.bf16.vlgmr.msra.gmra.mxu0 %v6247_v17 }
 0x148   : > { %3515 = vmatmul.mubr.bf16.vlgmr.msra.gmra.mxu1 %v6249_v18  ;;  %3524 = vmatpush1.bf16.msra.mxu0 %v4716_v19  ;;  %v4796_v19 = vld [vmem:[%s6165_s30 + $0x7e4] ss:$24 sps:$4 sm:$0xff]  }
 0x149   : > { %3565 = vmatpush1.bf16.msra.mxu1 %v4719_v20  ;;  %3525 = vmatprep.subr.bf16.mxu0 %v4724_v21  ;;  %v4799_v20 = vld [vmem:[%s6165_s30 + $0xae4] ss:$24 sps:$4 sm:$0xff]   ;;  %v4794_v21 = vld [vmem:[%s6165_s30 + $0x7e0] ss:$24 sps:$4 sm:$0xff]  }
 0x14a   : > { %3566 = vmatprep.subr.bf16.mxu1 %v4727_v22  ;;  %3555 = vmatprep.mubr.bf16.mxu0 %v6290_v54  ;;  %v4797_v22 = vld [vmem:[%s6165_s30 + $0xae0] ss:$24 sps:$4 sm:$0xff]  }
 0x14b   : > { %3596 = vmatprep.mubr.bf16.mxu1 %v6296_v58 }
 0x14c   : > { %3526 = vmatpush1.bf16.msra.mxu0 %v4722_v23  ;;  %v4802_v23 = vld [vmem:[%s6165_s30 + $0x7b4] ss:$24 sps:$4 sm:$0xff]  }
 0x14d   : > { %3567 = vmatpush1.bf16.msra.mxu1 %v4725_v24  ;;  %3527 = vmatprep.subr.bf16.mxu0 %v4730_v25  ;;  %v4805_v24 = vld [vmem:[%s6165_s30 + $0xab4] ss:$24 sps:$4 sm:$0xff]   ;;  %v4800_v25 = vld [vmem:[%s6165_s30 + $0x7b0] ss:$24 sps:$4 sm:$0xff]  }
 0x14e   : > { %3568 = vmatprep.subr.bf16.mxu1 %v4733_v26  ;;  %v4803_v26 = vld [vmem:[%s6165_s30 + $0xab0] ss:$24 sps:$4 sm:$0xff]  }
 0x150   : > { %3528 = vmatpush1.bf16.msra.mxu0 %v4728_v27  ;;  %v4808_v27 = vld [vmem:[%s6165_s30 + $0x784] ss:$24 sps:$4 sm:$0xff]  }
 0x151   : > { %3569 = vmatpush1.bf16.msra.mxu1 %v4731_v28  ;;  %3529 = vmatprep.subr.bf16.mxu0 %v4736_v29  ;;  %v4811_v28 = vld [vmem:[%s6165_s30 + $0xa84] ss:$24 sps:$4 sm:$0xff]   ;;  %v4806_v29 = vld [vmem:[%s6165_s30 + $0x780] ss:$24 sps:$4 sm:$0xff]  }
 0x152   : > { %3570 = vmatprep.subr.bf16.mxu1 %v4739_v30  ;;  %v4809_v30 = vld [vmem:[%s6165_s30 + $0xa80] ss:$24 sps:$4 sm:$0xff]  }
 0x154   : > { %3530 = vmatpush1.bf16.msra.mxu0 %v4734_v31  ;;  %v4815_v31 = vld [vmem:[%s6165_s30 + $0x15c] ss:$24 sps:$4 sm:$0xff]  }
 0x155   : > { %3571 = vmatpush1.bf16.msra.mxu1 %v4737_v32  ;;  %3531 = vmatprep.subr.bf16.mxu0 %v4742_v33  ;;  %v4818_v32 = vld [vmem:[%s6165_s30 + $0x45c] ss:$24 sps:$4 sm:$0xff]   ;;  %v6336_v33 = vpack.c.bf16 %v6279_v45, %v6279_v45  ;;  %v4828_v45 = vld [vmem:[%s6165_s30 + $0x3f8] ss:$24 sps:$4 sm:$0xff]  }
 0x156   : > { %3572 = vmatprep.subr.bf16.mxu1 %v4745_v34  ;;  %v6340_v34 = vpack.c.bf16 %v6286_v51, %v6286_v51  ;;  %v4839_v51 = vld [vmem:[%s6165_s30 + $0x9c] ss:$24 sps:$4 sm:$0xff]  }
 0x158   : > { %3532 = vmatpush1.bf16.msra.mxu0 %v4740_v35  ;;  %v4813_v35 = vld [vmem:[%s6165_s30 + $0x158] ss:$24 sps:$4 sm:$0xff]  }
 0x159   : > { %3573 = vmatpush1.bf16.msra.mxu1 %v4743_v36  ;;  %3533 = vmatprep.subr.bf16.mxu0 %v4748_v37  ;;  %v4816_v36 = vld [vmem:[%s6165_s30 + $0x458] ss:$24 sps:$4 sm:$0xff]   ;;  %v4821_v37 = vld [vmem:[%s6165_s30 + $0x12c] ss:$24 sps:$4 sm:$0xff]  }
 0x15a   : > { %3574 = vmatprep.subr.bf16.mxu1 %v4751_v38  ;;  %v4824_v38 = vld [vmem:[%s6165_s30 + $0x42c] ss:$24 sps:$4 sm:$0xff]  }
 0x15c   : > { %3534 = vmatpush1.bf16.msra.mxu0 %v4746_v39  ;;  %v4819_v39 = vld [vmem:[%s6165_s30 + $0x128] ss:$24 sps:$4 sm:$0xff]  }
 0x15d   : > { %3575 = vmatpush1.bf16.msra.mxu1 %v4749_v40  ;;  %3535 = vmatprep.subr.bf16.mxu0 %v4754_v41  ;;  %v4822_v40 = vld [vmem:[%s6165_s30 + $0x428] ss:$24 sps:$4 sm:$0xff]   ;;  %v4827_v41 = vld [vmem:[%s6165_s30 + $0xfc] ss:$24 sps:$4 sm:$0xff]  }
 0x15e   : > { %3576 = vmatprep.subr.bf16.mxu1 %v4757_v42  ;;  %v4830_v42 = vld [vmem:[%s6165_s30 + $0x3fc] ss:$24 sps:$4 sm:$0xff]  }
 0x160   : > { %3536 = vmatpush1.bf16.msra.mxu0 %v4752_v47  ;;  %v4836_v47 = vld [vmem:[%s6165_s30 + $0x3cc] ss:$24 sps:$4 sm:$0xff]  }
 0x161   : > { %3577 = vmatpush1.bf16.msra.mxu1 %v4755_v48  ;;  %3537 = vmatprep.subr.bf16.mxu0 %v4760_v52  ;;  %v4831_v48 = vld [vmem:[%s6165_s30 + $0xc8] ss:$24 sps:$4 sm:$0xff]   ;;  %v4842_v52 = vld [vmem:[%s6165_s30 + $0x39c] ss:$24 sps:$4 sm:$0xff]  }
 0x162   : > { %3578 = vmatprep.subr.bf16.mxu1 %v4763_v53  ;;  %v4837_v53 = vld [vmem:[%s6165_s30 + $0x98] ss:$24 sps:$4 sm:$0xff]  }
 0x164   : > { %3538 = vmatpush1.bf16.msra.mxu0 %v4758_v56  ;;  %v4845_v56 = vld [vmem:[%s6165_s30 + $0x6c] ss:$24 sps:$4 sm:$0xff]  }
 0x165   : > { %3579 = vmatpush1.bf16.msra.mxu1 %v4761_v57  ;;  %3539 = vmatprep.subr.bf16.mxu0 %v4766_v59  ;;  %v4848_v57 = vld [vmem:[%s6165_s30 + $0x36c] ss:$24 sps:$4 sm:$0xff]   ;;  %v4843_v59 = vld [vmem:[%s6165_s30 + $0x68] ss:$24 sps:$4 sm:$0xff]  }
 0x166   : > { %3580 = vmatprep.subr.bf16.mxu1 %v4769_v60  ;;  %v4846_v60 = vld [vmem:[%s6165_s30 + $0x368] ss:$24 sps:$4 sm:$0xff]  }
 0x168   : > { %3540 = vmatpush2.bf16.msra.mxu0 %v4764_v61  ;;  %v4851_v61 = vld [vmem:[%s6165_s30 + $0x3c] ss:$24 sps:$4 sm:$0xff]  }
 0x169   : > { %3581 = vmatpush2.bf16.msra.mxu1 %v4767_v62  ;;  %3541 = vmatprep.subr.bf16.mxu0 %v4772_v0  ;;  %v4854_v62 = vld [vmem:[%s6165_s30 + $0x33c] ss:$24 sps:$4 sm:$0xff]   ;;  %v4849_v0 = vld [vmem:[%s6165_s30 + $0x38] ss:$24 sps:$4 sm:$0xff]  }
 0x16a   : > { %3582 = vmatprep.subr.bf16.mxu1 %v4775_v1  ;;  %v4852_v1 = vld [vmem:[%s6165_s30 + $0x338] ss:$24 sps:$4 sm:$0xff]  }
 0x16c   : > { %3542 = vmatpush2.bf16.msra.mxu0 %v4770_v2  ;;  %v4857_v2 = vld [vmem:[%s6165_s30 + $0xc] ss:$24 sps:$4 sm:$0xff]  }
 0x16d   : > { %3583 = vmatpush2.bf16.msra.mxu1 %v4773_v3  ;;  %3543 = vmatprep.subr.bf16.mxu0 %v4778_v5  ;;  %v4860_v3 = vld [vmem:[%s6165_s30 + $0x30c] ss:$24 sps:$4 sm:$0xff]   ;;  %v4855_v5 = vld [vmem:[%s6165_s30 + $0x8] ss:$24 sps:$4 sm:$0xff]  }
 0x16e   : > { %3584 = vmatprep.subr.bf16.mxu1 %v4781_v6  ;;  %v4858_v6 = vld [vmem:[%s6165_s30 + $0x308] ss:$24 sps:$4 sm:$0xff]  }
 0x170   : > { %3544 = vmatpush2.bf16.msra.mxu0 %v4776_v7  ;;  %v4863_v7 = vld [vmem:[%s6165_s30 + $0x2dc] ss:$24 sps:$4 sm:$0xff]  }
 0x171   : > { %3585 = vmatpush2.bf16.msra.mxu1 %v4779_v8  ;;  %3545 = vmatprep.subr.bf16.mxu0 %v4784_v9  ;;  %v4866_v8 = vld [vmem:[%s6165_s30 + $0x5dc] ss:$24 sps:$4 sm:$0xff]   ;;  %v4861_v9 = vld [vmem:[%s6165_s30 + $0x2d8] ss:$24 sps:$4 sm:$0xff]  }
 0x172   : > { %3586 = vmatprep.subr.bf16.mxu1 %v4787_v10  ;;  %v4864_v10 = vld [vmem:[%s6165_s30 + $0x5d8] ss:$24 sps:$4 sm:$0xff]  }
 0x174   : > { %3546 = vmatpush2.bf16.msra.mxu0 %v4782_v11  ;;  %v4869_v11 = vld [vmem:[%s6165_s30 + $0x2ac] ss:$24 sps:$4 sm:$0xff]  }
 0x175   : > { %3587 = vmatpush2.bf16.msra.mxu1 %v4785_v12  ;;  %3547 = vmatprep.subr.bf16.mxu0 %v4790_v13  ;;  %v4872_v12 = vld [vmem:[%s6165_s30 + $0x5ac] ss:$24 sps:$4 sm:$0xff]   ;;  %v4867_v13 = vld [vmem:[%s6165_s30 + $0x2a8] ss:$24 sps:$4 sm:$0xff]  }
 0x176   : > { %3588 = vmatprep.subr.bf16.mxu1 %v4793_v14  ;;  %v4870_v14 = vld [vmem:[%s6165_s30 + $0x5a8] ss:$24 sps:$4 sm:$0xff]  }
 0x178   : > { %3548 = vmatpush2.bf16.msra.mxu0 %v4788_v15  ;;  %v4875_v15 = vld [vmem:[%s6165_s30 + $0x27c] ss:$24 sps:$4 sm:$0xff]  }
 0x179   : > { %3589 = vmatpush2.bf16.msra.mxu1 %v4791_v16  ;;  %3549 = vmatprep.subr.bf16.mxu0 %v4796_v19  ;;  %v4878_v16 = vld [vmem:[%s6165_s30 + $0x57c] ss:$24 sps:$4 sm:$0xff]   ;;  %v4873_v19 = vld [vmem:[%s6165_s30 + $0x278] ss:$24 sps:$4 sm:$0xff]  }
 0x17a   : > { %3590 = vmatprep.subr.bf16.mxu1 %v4799_v20  ;;  %v4876_v20 = vld [vmem:[%s6165_s30 + $0x578] ss:$24 sps:$4 sm:$0xff]  }
 0x17c   : > { %3550 = vmatpush2.bf16.msra.mxu0 %v4794_v21  ;;  %v4881_v21 = vld [vmem:[%s6165_s30 + $0x24c] ss:$24 sps:$4 sm:$0xff]  }
 0x17d   : > { %3591 = vmatpush2.bf16.msra.mxu1 %v4797_v22  ;;  %3551 = vmatprep.subr.bf16.mxu0 %v4802_v23  ;;  %v4884_v22 = vld [vmem:[%s6165_s30 + $0x54c] ss:$24 sps:$4 sm:$0xff]   ;;  %v4879_v23 = vld [vmem:[%s6165_s30 + $0x248] ss:$24 sps:$4 sm:$0xff]  }
 0x17e   : > { %3592 = vmatprep.subr.bf16.mxu1 %v4805_v24  ;;  %v4882_v24 = vld [vmem:[%s6165_s30 + $0x548] ss:$24 sps:$4 sm:$0xff]  }
 0x180   : > { %3552 = vmatpush2.bf16.msra.mxu0 %v4800_v25  ;;  %v4887_v25 = vld [vmem:[%s6165_s30 + $0x21c] ss:$24 sps:$4 sm:$0xff]  }
 0x181   : > { %3593 = vmatpush2.bf16.msra.mxu1 %v4803_v26  ;;  %3553 = vmatprep.subr.bf16.mxu0 %v4808_v27  ;;  %v4890_v26 = vld [vmem:[%s6165_s30 + $0x51c] ss:$24 sps:$4 sm:$0xff]   ;;  %v4885_v27 = vld [vmem:[%s6165_s30 + $0x218] ss:$24 sps:$4 sm:$0xff]  }
 0x182   : > { %3594 = vmatprep.subr.bf16.mxu1 %v4811_v28  ;;  %v4888_v28 = vld [vmem:[%s6165_s30 + $0x518] ss:$24 sps:$4 sm:$0xff]  }
 0x184   : > { %3554 = vmatpush2.bf16.msra.mxu0 %v4806_v29  ;;  %v4893_v29 = vld [vmem:[%s6165_s30 + $0x1ec] ss:$24 sps:$4 sm:$0xff]  }
 0x185   : > { %3595 = vmatpush2.bf16.msra.mxu1 %v4809_v30  ;;  %3605 = vmatprep.subr.bf16.mxu0 %v4815_v31  ;;  %v4896_v30 = vld [vmem:[%s6165_s30 + $0x4ec] ss:$24 sps:$4 sm:$0xff]   ;;  %v4891_v31 = vld [vmem:[%s6165_s30 + $0x1e8] ss:$24 sps:$4 sm:$0xff]  }
 0x186   : > { %3646 = vmatprep.subr.bf16.mxu1 %v4818_v32  ;;  %v4894_v32 = vld [vmem:[%s6165_s30 + $0x4e8] ss:$24 sps:$4 sm:$0xff]  }
 0x187   : > { %3556 = vmatmul.mubr.bf16.vlgmr.msra.gmra.mxu0 %v6336_v33 }
 0x188   : > { %3597 = vmatmul.mubr.bf16.vlgmr.msra.gmra.mxu1 %v6340_v34  ;;  %3606 = vmatpush1.bf16.msra.mxu0 %v4813_v35  ;;  %v4899_v35 = vld [vmem:[%s6165_s30 + $0x1bc] ss:$24 sps:$4 sm:$0xff]  }
 0x189   : > { %3647 = vmatpush1.bf16.msra.mxu1 %v4816_v36  ;;  %3607 = vmatprep.subr.bf16.mxu0 %v4821_v37  ;;  %v4902_v36 = vld [vmem:[%s6165_s30 + $0x4bc] ss:$24 sps:$4 sm:$0xff]   ;;  %v4897_v37 = vld [vmem:[%s6165_s30 + $0x1b8] ss:$24 sps:$4 sm:$0xff]  }
 0x18a   : > { %3648 = vmatprep.subr.bf16.mxu1 %v4824_v38  ;;  %3637 = vmatprep.mubr.bf16.mxu0 %v6226_v63  ;;  %v4900_v38 = vld [vmem:[%s6165_s30 + $0x4b8] ss:$24 sps:$4 sm:$0xff]  }
 0x18b   : > { %3678 = vmatprep.mubr.bf16.mxu1 %v6231_v4 }
 0x18c   : > { %3608 = vmatpush1.bf16.msra.mxu0 %v4819_v39  ;;  %v4905_v39 = vld [vmem:[%s6165_s30 + $0x18c] ss:$24 sps:$4 sm:$0xff]  }
 0x18d   : > { %3649 = vmatpush1.bf16.msra.mxu1 %v4822_v40  ;;  %3609 = vmatprep.subr.bf16.mxu0 %v4827_v41  ;;  %v4908_v40 = vld [vmem:[%s6165_s30 + $0x48c] ss:$24 sps:$4 sm:$0xff]   ;;  %v4903_v41 = vld [vmem:[%s6165_s30 + $0x188] ss:$24 sps:$4 sm:$0xff]  }
 0x18e   : > { %3650 = vmatprep.subr.bf16.mxu1 %v4830_v42  ;;  %v4906_v42 = vld [vmem:[%s6165_s30 + $0x488] ss:$24 sps:$4 sm:$0xff]  }
 0x190   : > { %3610 = vmatpush1.bf16.msra.mxu0 %v4825_v43  ;;  %v4911_v43 = vld [vmem:[%s6165_s30 + $0x75c] ss:$24 sps:$4 sm:$0xff]  }
 0x191   : > { %3651 = vmatpush1.bf16.msra.mxu1 %v4828_v45  ;;  %3611 = vmatprep.subr.bf16.mxu0 %v4833_v46  ;;  %v4914_v45 = vld [vmem:[%s6165_s30 + $0xa5c] ss:$24 sps:$4 sm:$0xff]   ;;  %v4909_v46 = vld [vmem:[%s6165_s30 + $0x758] ss:$24 sps:$4 sm:$0xff]  }
 0x192   : > { %3652 = vmatprep.subr.bf16.mxu1 %v4836_v47  ;;  %v4912_v47 = vld [vmem:[%s6165_s30 + $0xa58] ss:$24 sps:$4 sm:$0xff]  }
 0x194   : > { %3612 = vmatpush1.bf16.msra.mxu0 %v4831_v48  ;;  %v4917_v48 = vld [vmem:[%s6165_s30 + $0x72c] ss:$24 sps:$4 sm:$0xff]  }
 0x195   : > { %3653 = vmatpush1.bf16.msra.mxu1 %v4834_v49  ;;  %3613 = vmatprep.subr.bf16.mxu0 %v4839_v51  ;;  %v4920_v49 = vld [vmem:[%s6165_s30 + $0xa2c] ss:$24 sps:$4 sm:$0xff]   ;;  %v4915_v51 = vld [vmem:[%s6165_s30 + $0x728] ss:$24 sps:$4 sm:$0xff]  }
 0x196   : > { %3654 = vmatprep.subr.bf16.mxu1 %v4842_v52  ;;  %v4918_v52 = vld [vmem:[%s6165_s30 + $0xa28] ss:$24 sps:$4 sm:$0xff]  }
 0x198   : > { %3614 = vmatpush1.bf16.msra.mxu0 %v4837_v53  ;;  %v4923_v53 = vld [vmem:[%s6165_s30 + $0x6fc] ss:$24 sps:$4 sm:$0xff]  }
 0x199   : > { %3655 = vmatpush1.bf16.msra.mxu1 %v4840_v55  ;;  %3615 = vmatprep.subr.bf16.mxu0 %v4845_v56  ;;  %v4926_v55 = vld [vmem:[%s6165_s30 + $0x9fc] ss:$24 sps:$4 sm:$0xff]   ;;  %v4921_v56 = vld [vmem:[%s6165_s30 + $0x6f8] ss:$24 sps:$4 sm:$0xff]  }
 0x19a   : > { %3656 = vmatprep.subr.bf16.mxu1 %v4848_v57  ;;  %v4924_v57 = vld [vmem:[%s6165_s30 + $0x9f8] ss:$24 sps:$4 sm:$0xff]  }
 0x19c   : > { %3616 = vmatpush1.bf16.msra.mxu0 %v4843_v59  ;;  %v4929_v59 = vld [vmem:[%s6165_s30 + $0x6cc] ss:$24 sps:$4 sm:$0xff]  }
 0x19d   : > { %3657 = vmatpush1.bf16.msra.mxu1 %v4846_v60  ;;  %3617 = vmatprep.subr.bf16.mxu0 %v4851_v61  ;;  %v4932_v60 = vld [vmem:[%s6165_s30 + $0x9cc] ss:$24 sps:$4 sm:$0xff]   ;;  %v4927_v61 = vld [vmem:[%s6165_s30 + $0x6c8] ss:$24 sps:$4 sm:$0xff]  }
 0x19e   : > { %3658 = vmatprep.subr.bf16.mxu1 %v4854_v62  ;;  %v4930_v62 = vld [vmem:[%s6165_s30 + $0x9c8] ss:$24 sps:$4 sm:$0xff]  }
 0x1a0   : > { %3618 = vmatpush1.bf16.msra.mxu0 %v4849_v0  ;;  %v4935_v0 = vld [vmem:[%s6165_s30 + $0x69c] ss:$24 sps:$4 sm:$0xff]  }
 0x1a1   : > { %3659 = vmatpush1.bf16.msra.mxu1 %v4852_v1  ;;  %3619 = vmatprep.subr.bf16.mxu0 %v4857_v2  ;;  %v4938_v1 = vld [vmem:[%s6165_s30 + $0x99c] ss:$24 sps:$4 sm:$0xff]   ;;  %v4933_v2 = vld [vmem:[%s6165_s30 + $0x698] ss:$24 sps:$4 sm:$0xff]  }
 0x1a2   : > { %3660 = vmatprep.subr.bf16.mxu1 %v4860_v3  ;;  %v4936_v3 = vld [vmem:[%s6165_s30 + $0x998] ss:$24 sps:$4 sm:$0xff]  }
 0x1a4   : > { %3620 = vmatpush1.bf16.msra.mxu0 %v4855_v5  ;;  %v4941_v5 = vld [vmem:[%s6165_s30 + $0x66c] ss:$24 sps:$4 sm:$0xff]  }
 0x1a5   : > { %3661 = vmatpush1.bf16.msra.mxu1 %v4858_v6  ;;  %3621 = vmatprep.subr.bf16.mxu0 %v4863_v7  ;;  %v4944_v6 = vld [vmem:[%s6165_s30 + $0x96c] ss:$24 sps:$4 sm:$0xff]   ;;  %v4939_v7 = vld [vmem:[%s6165_s30 + $0x668] ss:$24 sps:$4 sm:$0xff]  }
 0x1a6   : > { %3662 = vmatprep.subr.bf16.mxu1 %v4866_v8  ;;  %v4942_v8 = vld [vmem:[%s6165_s30 + $0x968] ss:$24 sps:$4 sm:$0xff]  }
 0x1a8   : > { %3622 = vmatpush2.bf16.msra.mxu0 %v4861_v9  ;;  %v4947_v9 = vld [vmem:[%s6165_s30 + $0x63c] ss:$24 sps:$4 sm:$0xff]  }
 0x1a9   : > { %3663 = vmatpush2.bf16.msra.mxu1 %v4864_v10  ;;  %3623 = vmatprep.subr.bf16.mxu0 %v4869_v11  ;;  %v4950_v10 = vld [vmem:[%s6165_s30 + $0x93c] ss:$24 sps:$4 sm:$0xff]   ;;  %v4945_v11 = vld [vmem:[%s6165_s30 + $0x638] ss:$24 sps:$4 sm:$0xff]  }
 0x1aa   : > { %3664 = vmatprep.subr.bf16.mxu1 %v4872_v12  ;;  %v4948_v12 = vld [vmem:[%s6165_s30 + $0x938] ss:$24 sps:$4 sm:$0xff]  }
 0x1ac   : > { %3624 = vmatpush2.bf16.msra.mxu0 %v4867_v13  ;;  %v4953_v13 = vld [vmem:[%s6165_s30 + $0x60c] ss:$24 sps:$4 sm:$0xff]  }
 0x1ad   : > { %3665 = vmatpush2.bf16.msra.mxu1 %v4870_v14  ;;  %3625 = vmatprep.subr.bf16.mxu0 %v4875_v15  ;;  %v4956_v14 = vld [vmem:[%s6165_s30 + $0x90c] ss:$24 sps:$4 sm:$0xff]   ;;  %v4951_v15 = vld [vmem:[%s6165_s30 + $0x608] ss:$24 sps:$4 sm:$0xff]  }
 0x1ae   : > { %3666 = vmatprep.subr.bf16.mxu1 %v4878_v16  ;;  %v4954_v16 = vld [vmem:[%s6165_s30 + $0x908] ss:$24 sps:$4 sm:$0xff]  }
 0x1b0   : > { %3626 = vmatpush2.bf16.msra.mxu0 %v4873_v19  ;;  %v4959_v19 = vld [vmem:[%s6165_s30 + $0x8dc] ss:$24 sps:$4 sm:$0xff]  }
 0x1b1   : > { %3667 = vmatpush2.bf16.msra.mxu1 %v4876_v20  ;;  %3627 = vmatprep.subr.bf16.mxu0 %v4881_v21  ;;  %v4962_v20 = vld [vmem:[%s6165_s30 + $0xbdc] ss:$24 sps:$4 sm:$0xff]   ;;  %v4957_v21 = vld [vmem:[%s6165_s30 + $0x8d8] ss:$24 sps:$4 sm:$0xff]  }
 0x1b2   : > { %3668 = vmatprep.subr.bf16.mxu1 %v4884_v22  ;;  %v4960_v22 = vld [vmem:[%s6165_s30 + $0xbd8] ss:$24 sps:$4 sm:$0xff]  }
 0x1b4   : > { %3628 = vmatpush2.bf16.msra.mxu0 %v4879_v23  ;;  %v4965_v23 = vld [vmem:[%s6165_s30 + $0x8ac] ss:$24 sps:$4 sm:$0xff]  }
 0x1b5   : > { %3669 = vmatpush2.bf16.msra.mxu1 %v4882_v24  ;;  %3629 = vmatprep.subr.bf16.mxu0 %v4887_v25  ;;  %v4968_v24 = vld [vmem:[%s6165_s30 + $0xbac] ss:$24 sps:$4 sm:$0xff]   ;;  %v4963_v25 = vld [vmem:[%s6165_s30 + $0x8a8] ss:$24 sps:$4 sm:$0xff]  }
 0x1b6   : > { %3670 = vmatprep.subr.bf16.mxu1 %v4890_v26  ;;  %v4966_v26 = vld [vmem:[%s6165_s30 + $0xba8] ss:$24 sps:$4 sm:$0xff]  }
 0x1b8   : > { %3630 = vmatpush2.bf16.msra.mxu0 %v4885_v27  ;;  %v4971_v27 = vld [vmem:[%s6165_s30 + $0x87c] ss:$24 sps:$4 sm:$0xff]  }
 0x1b9   : > { %3671 = vmatpush2.bf16.msra.mxu1 %v4888_v28  ;;  %3631 = vmatprep.subr.bf16.mxu0 %v4893_v29  ;;  %v4974_v28 = vld [vmem:[%s6165_s30 + $0xb7c] ss:$24 sps:$4 sm:$0xff]   ;;  %v4969_v29 = vld [vmem:[%s6165_s30 + $0x878] ss:$24 sps:$4 sm:$0xff]  }
 0x1ba   : > { %3672 = vmatprep.subr.bf16.mxu1 %v4896_v30  ;;  %v4972_v30 = vld [vmem:[%s6165_s30 + $0xb78] ss:$24 sps:$4 sm:$0xff]  }
 0x1bc   : > { %3632 = vmatpush2.bf16.msra.mxu0 %v4891_v31  ;;  %v4977_v31 = vld [vmem:[%s6165_s30 + $0x84c] ss:$24 sps:$4 sm:$0xff]  }
 0x1bd   : > { %3673 = vmatpush2.bf16.msra.mxu1 %v4894_v32  ;;  %3633 = vmatprep.subr.bf16.mxu0 %v4899_v35  ;;  %v4980_v32 = vld [vmem:[%s6165_s30 + $0xb4c] ss:$24 sps:$4 sm:$0xff]   ;;  %v4975_v35 = vld [vmem:[%s6165_s30 + $0x848] ss:$24 sps:$4 sm:$0xff]  }
 0x1be   : > { %3674 = vmatprep.subr.bf16.mxu1 %v4902_v36  ;;  %v4978_v36 = vld [vmem:[%s6165_s30 + $0xb48] ss:$24 sps:$4 sm:$0xff]  }
 0x1c0   : > { %3634 = vmatpush2.bf16.msra.mxu0 %v4897_v37  ;;  %v4983_v37 = vld [vmem:[%s6165_s30 + $0x81c] ss:$24 sps:$4 sm:$0xff]  }
 0x1c1   : > { %3675 = vmatpush2.bf16.msra.mxu1 %v4900_v38  ;;  %3635 = vmatprep.subr.bf16.mxu0 %v4905_v39  ;;  %v4986_v38 = vld [vmem:[%s6165_s30 + $0xb1c] ss:$24 sps:$4 sm:$0xff]   ;;  %v4981_v39 = vld [vmem:[%s6165_s30 + $0x818] ss:$24 sps:$4 sm:$0xff]  }
 0x1c2   : > { %3676 = vmatprep.subr.bf16.mxu1 %v4908_v40  ;;  %v4984_v40 = vld [vmem:[%s6165_s30 + $0xb18] ss:$24 sps:$4 sm:$0xff]  }
 0x1c4   : > { %3636 = vmatpush2.bf16.msra.mxu0 %v4903_v41  ;;  %v4989_v41 = vld [vmem:[%s6165_s30 + $0x7ec] ss:$24 sps:$4 sm:$0xff]  }
 0x1c5   : > { %3677 = vmatpush2.bf16.msra.mxu1 %v4906_v42  ;;  %3687 = vmatprep.subr.bf16.mxu0 %v4911_v43  ;;  %v4992_v42 = vld [vmem:[%s6165_s30 + $0xaec] ss:$24 sps:$4 sm:$0xff]   ;;  %v4987_v43 = vld [vmem:[%s6165_s30 + $0x7e8] ss:$24 sps:$4 sm:$0xff]  }
 0x1c6   : > { %3728 = vmatprep.subr.bf16.mxu1 %v4914_v45  ;;  %v4990_v45 = vld [vmem:[%s6165_s30 + $0xae8] ss:$24 sps:$4 sm:$0xff]  }
 0x1c7   : > { %3638 = vmatmul.mubr.bf16.vlgmr.msra.gmra.mxu0 %v6247_v17 }
 0x1c8   : > { %3679 = vmatmul.mubr.bf16.vlgmr.msra.gmra.mxu1 %v6249_v18  ;;  %3688 = vmatpush1.bf16.msra.mxu0 %v4909_v46  ;;  %v4995_v46 = vld [vmem:[%s6165_s30 + $0x7bc] ss:$24 sps:$4 sm:$0xff]  }
 0x1c9   : > { %3729 = vmatpush1.bf16.msra.mxu1 %v4912_v47  ;;  %3689 = vmatprep.subr.bf16.mxu0 %v4917_v48  ;;  %v4998_v47 = vld [vmem:[%s6165_s30 + $0xabc] ss:$24 sps:$4 sm:$0xff]   ;;  %v4993_v48 = vld [vmem:[%s6165_s30 + $0x7b8] ss:$24 sps:$4 sm:$0xff]  }
 0x1ca   : > { %3730 = vmatprep.subr.bf16.mxu1 %v4920_v49  ;;  %3719 = vmatprep.mubr.bf16.mxu0 %v6290_v54  ;;  %v4996_v49 = vld [vmem:[%s6165_s30 + $0xab8] ss:$24 sps:$4 sm:$0xff]  }
 0x1cb   : > { %3760 = vmatprep.mubr.bf16.mxu1 %v6296_v58 }
 0x1cc   : > { %3690 = vmatpush1.bf16.msra.mxu0 %v4915_v51  ;;  %v5001_v51 = vld [vmem:[%s6165_s30 + $0x78c] ss:$24 sps:$4 sm:$0xff]  }
 0x1cd   : > { %3731 = vmatpush1.bf16.msra.mxu1 %v4918_v52  ;;  %3691 = vmatprep.subr.bf16.mxu0 %v4923_v53  ;;  %v5004_v52 = vld [vmem:[%s6165_s30 + $0xa8c] ss:$24 sps:$4 sm:$0xff]   ;;  %v4999_v53 = vld [vmem:[%s6165_s30 + $0x788] ss:$24 sps:$4 sm:$0xff]  }
 0x1ce   : > { %3732 = vmatprep.subr.bf16.mxu1 %v4926_v55  ;;  %v5002_v55 = vld [vmem:[%s6165_s30 + $0xa88] ss:$24 sps:$4 sm:$0xff]  }
 0x1d0   : > { %3692 = vmatpush1.bf16.msra.mxu0 %v4921_v56  ;;  %v5007_v56 = vld [vmem:[%s6165_s30 + $0x164] ss:$24 sps:$4 sm:$0xff]  }
 0x1d1   : > { %3733 = vmatpush1.bf16.msra.mxu1 %v4924_v57  ;;  %3693 = vmatprep.subr.bf16.mxu0 %v4929_v59  ;;  %v5010_v57 = vld [vmem:[%s6165_s30 + $0x464] ss:$24 sps:$4 sm:$0xff]   ;;  %v5005_v59 = vld [vmem:[%s6165_s30 + $0x160] ss:$24 sps:$4 sm:$0xff]  }
 0x1d2   : > { %3734 = vmatprep.subr.bf16.mxu1 %v4932_v60  ;;  %v5008_v60 = vld [vmem:[%s6165_s30 + $0x460] ss:$24 sps:$4 sm:$0xff]  }
 0x1d4   : > { %3694 = vmatpush1.bf16.msra.mxu0 %v4927_v61  ;;  %v5013_v61 = vld [vmem:[%s6165_s30 + $0x134] ss:$24 sps:$4 sm:$0xff]  }
 0x1d5   : > { %3735 = vmatpush1.bf16.msra.mxu1 %v4930_v62  ;;  %3695 = vmatprep.subr.bf16.mxu0 %v4935_v0  ;;  %v5016_v62 = vld [vmem:[%s6165_s30 + $0x434] ss:$24 sps:$4 sm:$0xff]  }
 0x1d6   : > { %3736 = vmatprep.subr.bf16.mxu1 %v4938_v1 }
 0x1d8   : > { %3696 = vmatpush1.bf16.msra.mxu0 %v4933_v2 }
 0x1d9   : > { %3737 = vmatpush1.bf16.msra.mxu1 %v4936_v3  ;;  %3697 = vmatprep.subr.bf16.mxu0 %v4941_v5  ;;  %v5011_v3 = vld [vmem:[%s6165_s30 + $0x130] ss:$24 sps:$4 sm:$0xff]  }
 0x1da   : > { %3738 = vmatprep.subr.bf16.mxu1 %v4944_v6  ;;  %v5014_v5 = vld [vmem:[%s6165_s30 + $0x430] ss:$24 sps:$4 sm:$0xff]  }
 0x1dc   : > { %3698 = vmatpush1.bf16.msra.mxu0 %v4939_v7 }
 0x1dd   : > { %3739 = vmatpush1.bf16.msra.mxu1 %v4942_v8  ;;  %3699 = vmatprep.subr.bf16.mxu0 %v4947_v9  ;;  %v5019_v8 = vld [vmem:[%s6165_s30 + $0x104] ss:$24 sps:$4 sm:$0xff]  }
 0x1de   : > { %3740 = vmatprep.subr.bf16.mxu1 %v4950_v10  ;;  %v5022_v9 = vld [vmem:[%s6165_s30 + $0x404] ss:$24 sps:$4 sm:$0xff]  }
 0x1e0   : > { %3700 = vmatpush1.bf16.msra.mxu0 %v4945_v11 }
 0x1e1   : > { %3741 = vmatpush1.bf16.msra.mxu1 %v4948_v12  ;;  %3701 = vmatprep.subr.bf16.mxu0 %v4953_v13  ;;  %v5017_v13 = vld [vmem:[%s6165_s30 + $0x100] ss:$24 sps:$4 sm:$0xff]  }
 0x1e2   : > { %3742 = vmatprep.subr.bf16.mxu1 %v4956_v14  ;;  %v5020_v14 = vld [vmem:[%s6165_s30 + $0x400] ss:$24 sps:$4 sm:$0xff]  }
 0x1e4   : > { %3702 = vmatpush1.bf16.msra.mxu0 %v4951_v15 }
 0x1e5   : > { %3743 = vmatpush1.bf16.msra.mxu1 %v4954_v16  ;;  %3703 = vmatprep.subr.bf16.mxu0 %v4959_v19  ;;  %v5025_v19 = vld [vmem:[%s6165_s30 + $0xd4] ss:$24 sps:$4 sm:$0xff]  }
 0x1e6   : > { %3744 = vmatprep.subr.bf16.mxu1 %v4962_v20  ;;  %v5026_v20 = vld [vmem:[%s6165_s30 + $0x3d0] ss:$24 sps:$4 sm:$0xff]  }
 0x1e8   : > { %3704 = vmatpush2.bf16.msra.mxu0 %v4957_v21  ;;  %v5031_v21 = vld [vmem:[%s6165_s30 + $0xa4] ss:$24 sps:$4 sm:$0xff]  }
 0x1e9   : > { %3745 = vmatpush2.bf16.msra.mxu1 %v4960_v22  ;;  %3705 = vmatprep.subr.bf16.mxu0 %v4965_v23  ;;  %v5034_v22 = vld [vmem:[%s6165_s30 + $0x3a4] ss:$24 sps:$4 sm:$0xff]   ;;  %v5029_v23 = vld [vmem:[%s6165_s30 + $0xa0] ss:$24 sps:$4 sm:$0xff]  }
 0x1ea   : > { %3746 = vmatprep.subr.bf16.mxu1 %v4968_v24  ;;  %v5032_v24 = vld [vmem:[%s6165_s30 + $0x3a0] ss:$24 sps:$4 sm:$0xff]  }
 0x1ec   : > { %3706 = vmatpush2.bf16.msra.mxu0 %v4963_v25  ;;  %v5037_v25 = vld [vmem:[%s6165_s30 + $0x74] ss:$24 sps:$4 sm:$0xff]  }
 0x1ed   : > { %3747 = vmatpush2.bf16.msra.mxu1 %v4966_v26  ;;  %3707 = vmatprep.subr.bf16.mxu0 %v4971_v27  ;;  %v5040_v26 = vld [vmem:[%s6165_s30 + $0x374] ss:$24 sps:$4 sm:$0xff]   ;;  %v5035_v27 = vld [vmem:[%s6165_s30 + $0x70] ss:$24 sps:$4 sm:$0xff]  }
 0x1ee   : > { %3748 = vmatprep.subr.bf16.mxu1 %v4974_v28  ;;  %v5038_v28 = vld [vmem:[%s6165_s30 + $0x370] ss:$24 sps:$4 sm:$0xff]  }
 0x1f0   : > { %3708 = vmatpush2.bf16.msra.mxu0 %v4969_v29  ;;  %v5043_v29 = vld [vmem:[%s6165_s30 + $0x44] ss:$24 sps:$4 sm:$0xff]  }
 0x1f1   : > { %3749 = vmatpush2.bf16.msra.mxu1 %v4972_v30  ;;  %3709 = vmatprep.subr.bf16.mxu0 %v4977_v31  ;;  %v5046_v30 = vld [vmem:[%s6165_s30 + $0x344] ss:$24 sps:$4 sm:$0xff]   ;;  %v5041_v31 = vld [vmem:[%s6165_s30 + $0x40] ss:$24 sps:$4 sm:$0xff]  }
 0x1f2   : > { %3750 = vmatprep.subr.bf16.mxu1 %v4980_v32  ;;  %v5044_v32 = vld [vmem:[%s6165_s30 + $0x340] ss:$24 sps:$4 sm:$0xff]  }
 0x1f4   : > { %3710 = vmatpush2.bf16.msra.mxu0 %v4975_v35  ;;  %v5049_v35 = vld [vmem:[%s6165_s30 + $0x14] ss:$24 sps:$4 sm:$0xff]  }
 0x1f5   : > { %3751 = vmatpush2.bf16.msra.mxu1 %v4978_v36  ;;  %3711 = vmatprep.subr.bf16.mxu0 %v4983_v37  ;;  %v5052_v36 = vld [vmem:[%s6165_s30 + $0x314] ss:$24 sps:$4 sm:$0xff]   ;;  %v5047_v37 = vld [vmem:[%s6165_s30 + $0x10] ss:$24 sps:$4 sm:$0xff]  }
 0x1f6   : > { %3752 = vmatprep.subr.bf16.mxu1 %v4986_v38  ;;  %v5050_v38 = vld [vmem:[%s6165_s30 + $0x310] ss:$24 sps:$4 sm:$0xff]  }
 0x1f8   : > { %3712 = vmatpush2.bf16.msra.mxu0 %v4981_v39  ;;  %v5055_v39 = vld [vmem:[%s6165_s30 + $0x2e4] ss:$24 sps:$4 sm:$0xff]  }
 0x1f9   : > { %3753 = vmatpush2.bf16.msra.mxu1 %v4984_v40  ;;  %3713 = vmatprep.subr.bf16.mxu0 %v4989_v41  ;;  %v5058_v40 = vld [vmem:[%s6165_s30 + $0x5e4] ss:$24 sps:$4 sm:$0xff]   ;;  %v5053_v41 = vld [vmem:[%s6165_s30 + $0x2e0] ss:$24 sps:$4 sm:$0xff]  }
 0x1fa   : > { %3754 = vmatprep.subr.bf16.mxu1 %v4992_v42  ;;  %v5056_v42 = vld [vmem:[%s6165_s30 + $0x5e0] ss:$24 sps:$4 sm:$0xff]  }
 0x1fc   : > { %3714 = vmatpush2.bf16.msra.mxu0 %v4987_v43  ;;  %v5061_v43 = vld [vmem:[%s6165_s30 + $0x2b4] ss:$24 sps:$4 sm:$0xff]  }
 0x1fd   : > { %3755 = vmatpush2.bf16.msra.mxu1 %v4990_v45  ;;  %3715 = vmatprep.subr.bf16.mxu0 %v4995_v46  ;;  %v5064_v45 = vld [vmem:[%s6165_s30 + $0x5b4] ss:$24 sps:$4 sm:$0xff]   ;;  %v5059_v46 = vld [vmem:[%s6165_s30 + $0x2b0] ss:$24 sps:$4 sm:$0xff]  }
 0x1fe   : > { %3756 = vmatprep.subr.bf16.mxu1 %v4998_v47  ;;  %v5062_v47 = vld [vmem:[%s6165_s30 + $0x5b0] ss:$24 sps:$4 sm:$0xff]  }
 0x200   : > { %3716 = vmatpush2.bf16.msra.mxu0 %v4993_v48  ;;  %v5067_v48 = vld [vmem:[%s6165_s30 + $0x284] ss:$24 sps:$4 sm:$0xff]  }
 0x201   : > { %3757 = vmatpush2.bf16.msra.mxu1 %v4996_v49  ;;  %3717 = vmatprep.subr.bf16.mxu0 %v5001_v51  ;;  %v5070_v49 = vld [vmem:[%s6165_s30 + $0x584] ss:$24 sps:$4 sm:$0xff]   ;;  %v5065_v51 = vld [vmem:[%s6165_s30 + $0x280] ss:$24 sps:$4 sm:$0xff]  }
 0x202   : > { %3758 = vmatprep.subr.bf16.mxu1 %v5004_v52  ;;  %v5068_v52 = vld [vmem:[%s6165_s30 + $0x580] ss:$24 sps:$4 sm:$0xff]  }
 0x204   : > { %3718 = vmatpush2.bf16.msra.mxu0 %v4999_v53  ;;  %v5073_v53 = vld [vmem:[%s6165_s30 + $0x254] ss:$24 sps:$4 sm:$0xff]  }
 0x205   : > { %3759 = vmatpush2.bf16.msra.mxu1 %v5002_v55  ;;  %3769 = vmatprep.subr.bf16.mxu0 %v5007_v56  ;;  %v5076_v55 = vld [vmem:[%s6165_s30 + $0x554] ss:$24 sps:$4 sm:$0xff]   ;;  %v5071_v56 = vld [vmem:[%s6165_s30 + $0x250] ss:$24 sps:$4 sm:$0xff]  }
 0x206   : > { %3810 = vmatprep.subr.bf16.mxu1 %v5010_v57  ;;  %v5074_v57 = vld [vmem:[%s6165_s30 + $0x550] ss:$24 sps:$4 sm:$0xff]  }
 0x207   : > { %v3475_v0 = vpop.f32.mrf.mxu0  ;;  %3720 = vmatmul.mubr.bf16.vlgmr.msra.gmra.mxu0 %v6336_v33 }
 0x208   : > { %v3516_v1 = vpop.f32.mrf.mxu1  ;;  %3761 = vmatmul.mubr.bf16.vlgmr.msra.gmra.mxu1 %v6340_v34  ;;  %3770 = vmatpush1.bf16.msra.mxu0 %v5005_v59  ;;  %v5079_v59 = vld [vmem:[%s6165_s30 + $0x224] ss:$24 sps:$4 sm:$0xff]  }
 0x209   : > { %v6484_v2 = vadd.f32 %v3516_v1, %v3475_v0  ;;  %3811 = vmatpush1.bf16.msra.mxu1 %v5008_v60  ;;  %v3477_v6 = vpop.f32.mrf.mxu0  ;;  %3771 = vmatprep.subr.bf16.mxu0 %v5013_v61  ;;  %v5082_v60 = vld [vmem:[%s6165_s30 + $0x524] ss:$24 sps:$4 sm:$0xff]   ;;  %v5077_v61 = vld [vmem:[%s6165_s30 + $0x220] ss:$24 sps:$4 sm:$0xff]   ;;  %v5085_v0 = vld [vmem:[%s6165_s30 + $0x1f4] ss:$24 sps:$4 sm:$0xff]  }
 0x20a   : > { %v3518_v7 = vpop.f32.mrf.mxu1  ;;  %3812 = vmatprep.subr.bf16.mxu1 %v5016_v62  ;;  %3801 = vmatprep.mubr.bf16.mxu0 %v6226_v63  ;;  %v5028_v63 = vld [vmem:[%s6165_s30 + $0x3d4] ss:$24 sps:$4 sm:$0xff]   ;;  %v5080_v62 = vld [vmem:[%s6165_s30 + $0x520] ss:$24 sps:$4 sm:$0xff]  }
 0x20b   : > { %v6490_v10 = vadd.f32 %v3518_v7, %v3477_v6  ;;  %3842 = vmatprep.mubr.bf16.mxu1 %v6231_v4  ;;  %v3479_v11 = vpop.f32.mrf.mxu0  ;;  %v5023_v4 = vld [vmem:[%s6165_s30 + $0xd0] ss:$24 sps:$4 sm:$0xff]   ;;  %v5088_v1 = vld [vmem:[%s6165_s30 + $0x4f4] ss:$24 sps:$4 sm:$0xff]   ;;  %v5091_v6 = vld [vmem:[%s6165_s30 + $0x1c4] ss:$24 sps:$4 sm:$0xff]  }
 0x20c   : > { %v3520_v12 = vpop.f32.mrf.mxu1  ;;  %3772 = vmatpush1.bf16.msra.mxu0 %v5011_v3  ;;  %v5083_v3 = vld [vmem:[%s6165_s30 + $0x1f0] ss:$24 sps:$4 sm:$0xff]   ;;  %v5094_v7 = vld [vmem:[%s6165_s30 + $0x4c4] ss:$24 sps:$4 sm:$0xff]   ;;  %v5097_v11 = vld [vmem:[%s6165_s30 + $0x194] ss:$24 sps:$4 sm:$0xff]  }
 0x20d   : > { %3813 = vmatpush1.bf16.msra.mxu1 %v5014_v5  ;;  %v3480_v15 = vpop.f32.mrf.mxu0  ;;  %3773 = vmatprep.subr.bf16.mxu0 %v5019_v8  ;;  %v5086_v5 = vld [vmem:[%s6165_s30 + $0x4f0] ss:$24 sps:$4 sm:$0xff]   ;;  %v5089_v8 = vld [vmem:[%s6165_s30 + $0x1c0] ss:$24 sps:$4 sm:$0xff]   ;;  %v5100_v12 = vld [vmem:[%s6165_s30 + $0x494] ss:$24 sps:$4 sm:$0xff]  }
 0x20e   : > { %v3521_v16 = vpop.f32.mrf.mxu1  ;;  %3814 = vmatprep.subr.bf16.mxu1 %v5022_v9  ;;  %v5092_v9 = vld [vmem:[%s6165_s30 + $0x4c0] ss:$24 sps:$4 sm:$0xff]   ;;  %v5103_v15 = vld [vmem:[%s6165_s30 + $0x764] ss:$24 sps:$4 sm:$0xff]  }
 0x20f   : > { %v5106_v16 = vld [vmem:[%s6165_s30 + $0xa64] ss:$24 sps:$4 sm:$0xff]  }
 0x210   : > { %3774 = vmatpush1.bf16.msra.mxu0 %v5017_v13  ;;  %v5095_v13 = vld [vmem:[%s6165_s30 + $0x190] ss:$24 sps:$4 sm:$0xff]  }
 0x211   : > { %3815 = vmatpush1.bf16.msra.mxu1 %v5020_v14  ;;  %3775 = vmatprep.subr.bf16.mxu0 %v5025_v19  ;;  %v5098_v14 = vld [vmem:[%s6165_s30 + $0x490] ss:$24 sps:$4 sm:$0xff]   ;;  %v5101_v19 = vld [vmem:[%s6165_s30 + $0x760] ss:$24 sps:$4 sm:$0xff]  }
 0x212   : > { %3816 = vmatprep.subr.bf16.mxu1 %v5028_v63  ;;  %v5104_v63 = vld [vmem:[%s6165_s30 + $0xa60] ss:$24 sps:$4 sm:$0xff]  }
 0x214   : > { %3776 = vmatpush1.bf16.msra.mxu0 %v5023_v4  ;;  %v5109_v4 = vld [vmem:[%s6165_s30 + $0x734] ss:$24 sps:$4 sm:$0xff]  }
 0x215   : > { %3817 = vmatpush1.bf16.msra.mxu1 %v5026_v20  ;;  %3777 = vmatprep.subr.bf16.mxu0 %v5031_v21  ;;  %v5112_v20 = vld [vmem:[%s6165_s30 + $0xa34] ss:$24 sps:$4 sm:$0xff]  }
 0x216   : > { %3818 = vmatprep.subr.bf16.mxu1 %v5034_v22 }
 0x218   : > { %3778 = vmatpush1.bf16.msra.mxu0 %v5029_v23 }
 0x219   : > { %3819 = vmatpush1.bf16.msra.mxu1 %v5032_v24  ;;  %3779 = vmatprep.subr.bf16.mxu0 %v5037_v25  ;;  %v5107_v24 = vld [vmem:[%s6165_s30 + $0x730] ss:$24 sps:$4 sm:$0xff]  }
 0x21a   : > { %3820 = vmatprep.subr.bf16.mxu1 %v5040_v26  ;;  %v5110_v25 = vld [vmem:[%s6165_s30 + $0xa30] ss:$24 sps:$4 sm:$0xff]  }
 0x21c   : > { %3780 = vmatpush1.bf16.msra.mxu0 %v5035_v27 }
 0x21d   : > { %3821 = vmatpush1.bf16.msra.mxu1 %v5038_v28  ;;  %3781 = vmatprep.subr.bf16.mxu0 %v5043_v29  ;;  %v5115_v28 = vld [vmem:[%s6165_s30 + $0x704] ss:$24 sps:$4 sm:$0xff]  }
 0x21e   : > { %3822 = vmatprep.subr.bf16.mxu1 %v5046_v30  ;;  %v5118_v29 = vld [vmem:[%s6165_s30 + $0xa04] ss:$24 sps:$4 sm:$0xff]  }
 0x220   : > { %3782 = vmatpush1.bf16.msra.mxu0 %v5041_v31 }
 0x221   : > { %3823 = vmatpush1.bf16.msra.mxu1 %v5044_v32  ;;  %3783 = vmatprep.subr.bf16.mxu0 %v5049_v35  ;;  %v5113_v32 = vld [vmem:[%s6165_s30 + $0x700] ss:$24 sps:$4 sm:$0xff]  }
 0x222   : > { %3824 = vmatprep.subr.bf16.mxu1 %v5052_v36  ;;  %v5116_v35 = vld [vmem:[%s6165_s30 + $0xa00] ss:$24 sps:$4 sm:$0xff]  }
 0x224   : > { %3784 = vmatpush1.bf16.msra.mxu0 %v5047_v37 }
 0x225   : > { %3825 = vmatpush1.bf16.msra.mxu1 %v5050_v38  ;;  %3785 = vmatprep.subr.bf16.mxu0 %v5055_v39  ;;  %v5119_v38 = vld [vmem:[%s6165_s30 + $0x6d0] ss:$24 sps:$4 sm:$0xff]  }
 0x226   : > { %3826 = vmatprep.subr.bf16.mxu1 %v5058_v40  ;;  %v5122_v39 = vld [vmem:[%s6165_s30 + $0x9d0] ss:$24 sps:$4 sm:$0xff]   ;;  %v5127_v40 = vld [vmem:[%s6165_s30 + $0x6a4] ss:$24 sps:$4 sm:$0xff]  }
 0x228   : > { %3786 = vmatpush2.bf16.msra.mxu0 %v5053_v41  ;;  %v5130_v41 = vld [vmem:[%s6165_s30 + $0x9a4] ss:$24 sps:$4 sm:$0xff]  }
 0x229   : > { %3827 = vmatpush2.bf16.msra.mxu1 %v5056_v42  ;;  %3787 = vmatprep.subr.bf16.mxu0 %v5061_v43  ;;  %v5125_v42 = vld [vmem:[%s6165_s30 + $0x6a0] ss:$24 sps:$4 sm:$0xff]  }
 0x22a   : > { %3828 = vmatprep.subr.bf16.mxu1 %v5064_v45  ;;  %v5128_v43 = vld [vmem:[%s6165_s30 + $0x9a0] ss:$24 sps:$4 sm:$0xff]   ;;  %v5133_v45 = vld [vmem:[%s6165_s30 + $0x674] ss:$24 sps:$4 sm:$0xff]  }
 0x22c   : > { %3788 = vmatpush2.bf16.msra.mxu0 %v5059_v46  ;;  %v5136_v46 = vld [vmem:[%s6165_s30 + $0x974] ss:$24 sps:$4 sm:$0xff]  }
 0x22d   : > { %3829 = vmatpush2.bf16.msra.mxu1 %v5062_v47  ;;  %3789 = vmatprep.subr.bf16.mxu0 %v5067_v48  ;;  %v5131_v47 = vld [vmem:[%s6165_s30 + $0x670] ss:$24 sps:$4 sm:$0xff]  }
 0x22e   : > { %3830 = vmatprep.subr.bf16.mxu1 %v5070_v49  ;;  %v5134_v48 = vld [vmem:[%s6165_s30 + $0x970] ss:$24 sps:$4 sm:$0xff]   ;;  %v5139_v49 = vld [vmem:[%s6165_s30 + $0x644] ss:$24 sps:$4 sm:$0xff]  }
 0x230   : > { %3790 = vmatpush2.bf16.msra.mxu0 %v5065_v51  ;;  %v5142_v51 = vld [vmem:[%s6165_s30 + $0x944] ss:$24 sps:$4 sm:$0xff]  }
 0x231   : > { %3831 = vmatpush2.bf16.msra.mxu1 %v5068_v52  ;;  %3791 = vmatprep.subr.bf16.mxu0 %v5073_v53  ;;  %v5137_v52 = vld [vmem:[%s6165_s30 + $0x640] ss:$24 sps:$4 sm:$0xff]  }
 0x232   : > { %3832 = vmatprep.subr.bf16.mxu1 %v5076_v55  ;;  %v5140_v53 = vld [vmem:[%s6165_s30 + $0x940] ss:$24 sps:$4 sm:$0xff]   ;;  %v5145_v55 = vld [vmem:[%s6165_s30 + $0x614] ss:$24 sps:$4 sm:$0xff]  }
 0x234   : > { %3792 = vmatpush2.bf16.msra.mxu0 %v5071_v56  ;;  %v5148_v56 = vld [vmem:[%s6165_s30 + $0x914] ss:$24 sps:$4 sm:$0xff]  }
 0x235   : > { %3833 = vmatpush2.bf16.msra.mxu1 %v5074_v57  ;;  %3793 = vmatprep.subr.bf16.mxu0 %v5079_v59  ;;  %v5143_v57 = vld [vmem:[%s6165_s30 + $0x610] ss:$24 sps:$4 sm:$0xff]  }
 0x236   : > { %3834 = vmatprep.subr.bf16.mxu1 %v5082_v60  ;;  %v5146_v59 = vld [vmem:[%s6165_s30 + $0x910] ss:$24 sps:$4 sm:$0xff]   ;;  %v5151_v60 = vld [vmem:[%s6165_s30 + $0x8e4] ss:$24 sps:$4 sm:$0xff]  }
 0x238   : > { %3794 = vmatpush2.bf16.msra.mxu0 %v5077_v61  ;;  %v5154_v61 = vld [vmem:[%s6165_s30 + $0xbe4] ss:$24 sps:$4 sm:$0xff]  }
 0x239   : > { %3835 = vmatpush2.bf16.msra.mxu1 %v5080_v62  ;;  %3795 = vmatprep.subr.bf16.mxu0 %v5085_v0  ;;  %v5149_v62 = vld [vmem:[%s6165_s30 + $0x8e0] ss:$24 sps:$4 sm:$0xff]  }
 0x23a   : > { %3836 = vmatprep.subr.bf16.mxu1 %v5088_v1  ;;  %v5152_v0 = vld [vmem:[%s6165_s30 + $0xbe0] ss:$24 sps:$4 sm:$0xff]   ;;  %v5157_v1 = vld [vmem:[%s6165_s30 + $0x8b4] ss:$24 sps:$4 sm:$0xff]  }
 0x23c   : > { %3796 = vmatpush2.bf16.msra.mxu0 %v5083_v3  ;;  %v5160_v3 = vld [vmem:[%s6165_s30 + $0xbb4] ss:$24 sps:$4 sm:$0xff]  }
 0x23d   : > { %3837 = vmatpush2.bf16.msra.mxu1 %v5086_v5  ;;  %3797 = vmatprep.subr.bf16.mxu0 %v5091_v6  ;;  %v5155_v5 = vld [vmem:[%s6165_s30 + $0x8b0] ss:$24 sps:$4 sm:$0xff]  }
 0x23e   : > { %3838 = vmatprep.subr.bf16.mxu1 %v5094_v7  ;;  %v5158_v6 = vld [vmem:[%s6165_s30 + $0xbb0] ss:$24 sps:$4 sm:$0xff]   ;;  %v5163_v7 = vld [vmem:[%s6165_s30 + $0x884] ss:$24 sps:$4 sm:$0xff]  }
 0x240   : > { %3798 = vmatpush2.bf16.msra.mxu0 %v5089_v8  ;;  %v5166_v8 = vld [vmem:[%s6165_s30 + $0xb84] ss:$24 sps:$4 sm:$0xff]  }
 0x241   : > { %3839 = vmatpush2.bf16.msra.mxu1 %v5092_v9  ;;  %3799 = vmatprep.subr.bf16.mxu0 %v5097_v11  ;;  %v5161_v9 = vld [vmem:[%s6165_s30 + $0x880] ss:$24 sps:$4 sm:$0xff]  }
 0x242   : > { %3840 = vmatprep.subr.bf16.mxu1 %v5100_v12  ;;  %v5164_v11 = vld [vmem:[%s6165_s30 + $0xb80] ss:$24 sps:$4 sm:$0xff]   ;;  %v5169_v12 = vld [vmem:[%s6165_s30 + $0x854] ss:$24 sps:$4 sm:$0xff]  }
 0x244   : > { %3800 = vmatpush2.bf16.msra.mxu0 %v5095_v13  ;;  %v5172_v13 = vld [vmem:[%s6165_s30 + $0xb54] ss:$24 sps:$4 sm:$0xff]  }
 0x245   : > { %3841 = vmatpush2.bf16.msra.mxu1 %v5098_v14  ;;  %3851 = vmatprep.subr.bf16.mxu0 %v5103_v15  ;;  %v5167_v14 = vld [vmem:[%s6165_s30 + $0x850] ss:$24 sps:$4 sm:$0xff]  }
 0x246   : > { %3892 = vmatprep.subr.bf16.mxu1 %v5106_v16  ;;  %v5170_v15 = vld [vmem:[%s6165_s30 + $0xb50] ss:$24 sps:$4 sm:$0xff]   ;;  %v5175_v16 = vld [vmem:[%s6165_s30 + $0x824] ss:$24 sps:$4 sm:$0xff]  }
 0x247   : > { %v3557_v21 = vpop.f32.mrf.mxu0  ;;  %3802 = vmatmul.mubr.bf16.vlgmr.msra.gmra.mxu0 %v6247_v17 }
 0x248   : > { %v3598_v22 = vpop.f32.mrf.mxu1  ;;  %3843 = vmatmul.mubr.bf16.vlgmr.msra.gmra.mxu1 %v6249_v18  ;;  %v3558_v23 = vadd.f32 %v3557_v21, %v6484_v2  ;;  %3852 = vmatpush1.bf16.msra.mxu0 %v5101_v19  ;;  %v5178_v19 = vld [vmem:[%s6165_s30 + $0xb24] ss:$24 sps:$4 sm:$0xff]   ;;  %v5184_v21 = vld [vmem:[%s6165_s30 + $0xaf4] ss:$24 sps:$4 sm:$0xff]  }
 0x249   : > { %3893 = vmatpush1.bf16.msra.mxu1 %v5104_v63  ;;  %v3559_v26 = vpop.f32.mrf.mxu0  ;;  %3853 = vmatprep.subr.bf16.mxu0 %v5109_v4  ;;  %v5173_v63 = vld [vmem:[%s6165_s30 + $0x820] ss:$24 sps:$4 sm:$0xff]  }
 0x24a   : > { %v3600_v27 = vpop.f32.mrf.mxu1  ;;  %3894 = vmatprep.subr.bf16.mxu1 %v5112_v20  ;;  %v6561_v30 = vadd.f32 %v3598_v22, %v3558_v23  ;;  %v3560_v17 = vadd.f32 %v3559_v26, %v6490_v10  ;;  %3883 = vmatprep.mubr.bf16.mxu0 %v6290_v54  ;;  %v5121_v54 = vld [vmem:[%s6165_s30 + $0x6d4] ss:$24 sps:$4 sm:$0xff]   ;;  %v5176_v4 = vld [vmem:[%s6165_s30 + $0xb20] ss:$24 sps:$4 sm:$0xff]   ;;  %v5179_v22 = vld [vmem:[%s6165_s30 + $0x7f0] ss:$24 sps:$4 sm:$0xff]  }
 0x24b   : > { %3924 = vmatprep.mubr.bf16.mxu1 %v6296_v58  ;;  %v3561_v18 = vpop.f32.mrf.mxu0  ;;  %v5124_v58 = vld [vmem:[%s6165_s30 + $0x9d4] ss:$24 sps:$4 sm:$0xff]   ;;  %v5182_v23 = vld [vmem:[%s6165_s30 + $0xaf0] ss:$24 sps:$4 sm:$0xff]   ;;  %v5185_v26 = vld [vmem:[%s6165_s30 + $0x7c0] ss:$24 sps:$4 sm:$0xff]  }
 0x24c   : > { %v3602_v2 = vpop.f32.mrf.mxu1  ;;  %v6566_v31 = vadd.f32 %v3600_v27, %v3560_v17  ;;  %3854 = vmatpush1.bf16.msra.mxu0 %v5107_v24  ;;  %v5181_v20 = vld [vmem:[%s6165_s30 + $0x7f4] ss:$24 sps:$4 sm:$0xff]   ;;  %v5187_v24 = vld [vmem:[%s6165_s30 + $0x7c4] ss:$24 sps:$4 sm:$0xff]   ;;  %v5188_v27 = vld [vmem:[%s6165_s30 + $0xac0] ss:$24 sps:$4 sm:$0xff]  }
 0x24d   : > { %3895 = vmatpush1.bf16.msra.mxu1 %v5110_v25  ;;  %v3562_v36 = vpop.f32.mrf.mxu0  ;;  %3855 = vmatprep.subr.bf16.mxu0 %v5115_v28  ;;  %v5190_v25 = vld [vmem:[%s6165_s30 + $0xac4] ss:$24 sps:$4 sm:$0xff]   ;;  %v5193_v28 = vld [vmem:[%s6165_s30 + $0x794] ss:$24 sps:$4 sm:$0xff]   ;;  %v5191_v17 = vld [vmem:[%s6165_s30 + $0x790] ss:$24 sps:$4 sm:$0xff]  }
 0x24e   : > { %v3603_v37 = vpop.f32.mrf.mxu1  ;;  %3896 = vmatprep.subr.bf16.mxu1 %v5118_v29  ;;  %v3939_v10 = vcombine.low %v6561_v30, %v6566_v31  ;;  %v5196_v29 = vld [vmem:[%s6165_s30 + $0xa94] ss:$24 sps:$4 sm:$0xff]   ;;  %v5194_v18 = vld [vmem:[%s6165_s30 + $0xa90] ss:$24 sps:$4 sm:$0xff]  }
 0x250   : > { %3856 = vmatpush1.bf16.msra.mxu0 %v5113_v32 }
 0x251   : > { %3897 = vmatpush1.bf16.msra.mxu1 %v5116_v35  ;;  %3857 = vmatprep.subr.bf16.mxu0 %v5121_v54 }
 0x252   : > { %3898 = vmatprep.subr.bf16.mxu1 %v5124_v58 }
 0x254   : > { %3858 = vmatpush1.bf16.msra.mxu0 %v5119_v38 }
 0x255   : > { %3899 = vmatpush1.bf16.msra.mxu1 %v5122_v39  ;;  %3859 = vmatprep.subr.bf16.mxu0 %v5127_v40 }
 0x256   : > { %3900 = vmatprep.subr.bf16.mxu1 %v5130_v41 }
 0x258   : > { %3860 = vmatpush1.bf16.msra.mxu0 %v5125_v42 }
 0x259   : > { %3901 = vmatpush1.bf16.msra.mxu1 %v5128_v43  ;;  %3861 = vmatprep.subr.bf16.mxu0 %v5133_v45 }
 0x25a   : > { %3902 = vmatprep.subr.bf16.mxu1 %v5136_v46 }
 0x25c   : > { %3862 = vmatpush1.bf16.msra.mxu0 %v5131_v47 }
 0x25d   : > { %3903 = vmatpush1.bf16.msra.mxu1 %v5134_v48  ;;  %3863 = vmatprep.subr.bf16.mxu0 %v5139_v49 }
 0x25e   : > { %3904 = vmatprep.subr.bf16.mxu1 %v5142_v51 }
 0x260   : > { %3864 = vmatpush1.bf16.msra.mxu0 %v5137_v52 }
 0x261   : > { %3905 = vmatpush1.bf16.msra.mxu1 %v5140_v53  ;;  %3865 = vmatprep.subr.bf16.mxu0 %v5145_v55  ;;  %v3947_v55 = vrot.slane %v3939_v10, %v6214_v50 }
 0x262   : > { %3906 = vmatprep.subr.bf16.mxu1 %v5148_v56 }
 0x264   : > { %3866 = vmatpush1.bf16.msra.mxu0 %v5143_v57  ;;  %v1081_v57 = vld [vmem:[#allocation2] sm:$0xff] }
 0x265   : > { %3907 = vmatpush1.bf16.msra.mxu1 %v5146_v59  ;;  %3867 = vmatprep.subr.bf16.mxu0 %v5151_v60 }
 0x266   : > { %3908 = vmatprep.subr.bf16.mxu1 %v5154_v61 }
 0x268   : > { %3868 = vmatpush2.bf16.msra.mxu0 %v5149_v62 }
 0x269   : > { %3909 = vmatpush2.bf16.msra.mxu1 %v5152_v0  ;;  %3869 = vmatprep.subr.bf16.mxu0 %v5157_v1 }
 0x26a   : > { %3910 = vmatprep.subr.bf16.mxu1 %v5160_v3 }
 0x26c   : > { %3870 = vmatpush2.bf16.msra.mxu0 %v5155_v5 }
 0x26d   : > { %3911 = vmatpush2.bf16.msra.mxu1 %v5158_v6  ;;  %3871 = vmatprep.subr.bf16.mxu0 %v5163_v7 }
 0x26e   : > { %3912 = vmatprep.subr.bf16.mxu1 %v5166_v8 }
 0x270   : > { %3872 = vmatpush2.bf16.msra.mxu0 %v5161_v9 }
 0x271   : > { %3913 = vmatpush2.bf16.msra.mxu1 %v5164_v11  ;;  %3873 = vmatprep.subr.bf16.mxu0 %v5169_v12 }
 0x272   : > { %3914 = vmatprep.subr.bf16.mxu1 %v5172_v13 }
 0x274   : > { %3874 = vmatpush2.bf16.msra.mxu0 %v5167_v14 }
 0x275   : > { %3915 = vmatpush2.bf16.msra.mxu1 %v5170_v15  ;;  %3875 = vmatprep.subr.bf16.mxu0 %v5175_v16 }
 0x276   : > { %3916 = vmatprep.subr.bf16.mxu1 %v5178_v19 }
 0x278   : > { %3876 = vmatpush2.bf16.msra.mxu0 %v5173_v63 }
 0x279   : > { %3917 = vmatpush2.bf16.msra.mxu1 %v5176_v4  ;;  %3877 = vmatprep.subr.bf16.mxu0 %v5181_v20 }
 0x27a   : > { %3918 = vmatprep.subr.bf16.mxu1 %v5184_v21  ;;  %v1082_v21 = vld [vmem:[#allocation2 + $0x8] sm:$0xf] }
 0x27c   : > { %3878 = vmatpush2.bf16.msra.mxu0 %v5179_v22 }
 0x27d   : > { %3919 = vmatpush2.bf16.msra.mxu1 %v5182_v23  ;;  %3879 = vmatprep.subr.bf16.mxu0 %v5187_v24  ;;  %v3975_v24 = vld [vmem:[%s1046_s15] sm:$0x3f] (%p6160_p12) }
 0x27e   : > { %3920 = vmatprep.subr.bf16.mxu1 %v5190_v25  ;;  %v3979_v25 = vsub.s32 (%p6160_p12), 0, %v6206_v44 }
 0x280   : > { %3880 = vmatpush2.bf16.msra.mxu0 %v5185_v26  ;;  %v3983_v26 = vsub.s32 (%p6160_p12), 1, %v6206_v44 }
 0x281   : > { %3921 = vmatpush2.bf16.msra.mxu1 %v5188_v27  ;;  %3881 = vmatprep.subr.bf16.mxu0 %v5193_v28  ;;  %v3987_v27 = vsub.s32 (%p6160_p12), 2, %v6206_v44  ;;  %v3991_v28 = vsub.s32 (%p6160_p12), 3, %v6206_v44 }
 0x282   : > { %3922 = vmatprep.subr.bf16.mxu1 %v5196_v29  ;;  %v3995_v29 = vsub.s32 (%p6160_p12), 4, %v6206_v44 }
 0x284   : > { %3882 = vmatpush2.bf16.msra.mxu0 %v5191_v17  ;;  %v3999_v17 = vsub.s32 (%p6160_p12), 5, %v6206_v44 }
 0x285   : > { %3923 = vmatpush2.bf16.msra.mxu1 %v5194_v18  ;;  %v3980_v18 = vrot.slane (%p6160_p12), %v3975_v24, %v3979_v25 }
 0x287   : > { %v3639_v2 = vpop.f32.mrf.mxu0  ;;  %3884 = vmatmul.mubr.bf16.vlgmr.msra.gmra.mxu0 %v6336_v33 }
 0x288   : > { %v3680_v32 = vpop.f32.mrf.mxu1  ;;  %3925 = vmatmul.mubr.bf16.vlgmr.msra.gmra.mxu1 %v6340_v34 }
 0x289   : > { %v3681_v35 = vadd.f32 %v3680_v32, %v3639_v2  ;;  %v3641_v36 = vpop.f32.mrf.mxu0  ;;  %v3984_v2 = vrot.slane (%p6160_p12), %v3975_v24, %v3983_v26  ;;  %v3988_v32 = vrot.slane (%p6160_p12), %v3975_v24, %v3987_v27 }
 0x28a   : > { %v3682_v37 = vpop.f32.mrf.mxu1 }
 0x28b   : > { %v3643_v54 = vpop.f32.mrf.mxu0  ;;  %v3683_v42 = vadd.f32 %v3682_v37, %v3641_v36  ;;  %v3996_v36 = vrot.slane (%p6160_p12), %v3975_v24, %v3995_v29  ;;  %v4000_v37 = vrot.slane (%p6160_p12), %v3975_v24, %v3999_v17 }
 0x28c   : > { %v3684_v58 = vpop.f32.mrf.mxu1  ;;  %v4001_v54 = vcombine.low (%p6160_p12), %v3980_v18, %v3984_v2 }
 0x28d   : > { %v3644_v38 = vpop.f32.mrf.mxu0 }
 0x28e   : > { %v3685_v39 = vpop.f32.mrf.mxu1  ;;  %v4018_v38 = vcombine.low (%p6160_p12), %v3996_v36, %v4000_v37 }
 0x28f   : > { %v4009_v39 = vrot.slane (%p6160_p12), %v4001_v54, %v6214_v50 }
 0x2c7   : > { %v3721_v40 = vpop.f32.mrf.mxu0 }
 0x2c8   : > { %v3762_v41 = vpop.f32.mrf.mxu1  ;;  %v3722_v43 = vadd.f32 %v3721_v40, %v3681_v35  ;;  %v3992_v35 = vrot.slane (%p6160_p12), %v3975_v24, %v3991_v28 }
 0x2c9   : > { %v3723_v45 = vpop.f32.mrf.mxu0 }
 0x2ca   : > { %v3764_v46 = vpop.f32.mrf.mxu1  ;;  %v3724_v47 = vadd.f32 %v3723_v45, %v3683_v42  ;;  %v3763_v51 = vadd.f32 %v3762_v41, %v3722_v43  ;;  %v4002_v58 = vcombine.low (%p6160_p12), %v3988_v32, %v3992_v35  ;;  %v4025_v42 = vrot.slane (%p6160_p12), %v4018_v38, %v6214_v50 }
 0x2cb   : > { %v3725_v48 = vpop.f32.mrf.mxu0 }
 0x2cc   : > { %v3766_v49 = vpop.f32.mrf.mxu1  ;;  %v3765_v33 = vadd.f32 %v3764_v46, %v3724_v47  ;;  %v4016_v41 = vrot.slane (%p6160_p12), %v4002_v58, %v6214_v50 }
 0x2cd   : > { %v3726_v52 = vpop.f32.mrf.mxu0 }
 0x2ce   : > { %v3767_v34 = vpop.f32.mrf.mxu1  ;;  %v3940_v53 = vcombine.low %v3763_v51, %v3765_v33  ;;  %v4017_v44 = vcombine.low (%p6160_p12), %v4009_v39, %v4016_v41 }
 0x2d0   : > { %v3954_v56 = vrot.slane %v3940_v53, %v6214_v50 }
 0x2d2   : > { %v3955_v59 = vcombine.low %v3947_v55, %v3954_v56 }
 0x2d4   : > { %v3966_v60 = vadd.f32 %v3955_v59, %v1081_v57 }
 0x2d6   : > { %3968 = vst [vmem:[#allocation2] sm:$0xff] %v3966_v60 }
 0x2dd   : > { %v3973_v43 = vld [vmem:[#allocation2] sm:$0xff] (%p6160_p12) }
 0x2de   : > { %v4028_v46 = vadd.f32 (%p6160_p12), %v4017_v44, %v3973_v43 }
 0x2e0   : > { %v4030_v48 = vmax.f32 (%p6160_p12), %v4028_v46, 0.0 }
 0x2e2   : > { %4032 = vst [vmem:[%s6156_s28] sm:$0xff] (%p6160_p12), %v4030_v48 }
 0x307   : > { %v3803_v61 = vpop.f32.mrf.mxu0 }
 0x308   : > { %v3844_v62 = vpop.f32.mrf.mxu1 }
 0x309   : > { %v3845_v0 = vadd.f32 %v3844_v62, %v3803_v61  ;;  %v3805_v1 = vpop.f32.mrf.mxu0 }
 0x30a   : > { %v3846_v3 = vpop.f32.mrf.mxu1 }
 0x30b   : > { %v3807_v5 = vpop.f32.mrf.mxu0  ;;  %v3847_v12 = vadd.f32 %v3846_v3, %v3805_v1 }
 0x30c   : > { %v3848_v6 = vpop.f32.mrf.mxu1 }
 0x30d   : > { %v3808_v7 = vpop.f32.mrf.mxu0 }
 0x30e   : > { %v3849_v8 = vpop.f32.mrf.mxu1 }
 0x347   : > { %v3885_v9 = vpop.f32.mrf.mxu0 }
 0x348   : > { %v3926_v11 = vpop.f32.mrf.mxu1  ;;  %v3886_v30 = vadd.f32 %v3885_v9, %v3845_v0 }
 0x349   : > { %v3887_v31 = vpop.f32.mrf.mxu0 }
 0x34a   : > { %v3928_v10 = vpop.f32.mrf.mxu1  ;;  %v3888_v13 = vadd.f32 %v3887_v31, %v3847_v12  ;;  %v3927_v16 = vadd.f32 %v3926_v11, %v3886_v30 }
 0x34b   : > { %v3889_v14 = vpop.f32.mrf.mxu0 }
 0x34c   : > { %v3930_v15 = vpop.f32.mrf.mxu1  ;;  %v3929_v19 = vadd.f32 %v3928_v10, %v3888_v13 }
 0x34d   : > { %v3890_v63 = vpop.f32.mrf.mxu0 }
 0x34e   : > { %v3931_v4 = vpop.f32.mrf.mxu1  ;;  %v3956_v20 = vcombine.low %v3927_v16, %v3929_v19 }
 0x350   : > { %v3963_v22 = vrot.slane %v3956_v20, %v6214_v50  ;;  %3972 = sbr.rel (!%p6160_p12) target bundleno = 865 (0x361), region = 63 }
 0x352   : > { %v3967_v23 = vadd.f32 %v3963_v22, %v1082_v21 }
 0x354   : > { %3969 = vst [vmem:[#allocation2 + $0x8] sm:$0xf] %v3967_v23 }
 0x35b   : > { %v3974_v40 = vld [vmem:[#allocation2 + $0x8] sm:$0xf] }
 0x35c   : > { %v4029_v45 = vadd.f32 %v4025_v42, %v3974_v40 }
 0x35e   : > { %v4031_v47 = vmax.f32 %v4029_v45, 0.0 }
 0x360   : > { %4033 = vst [vmem:[%s6156_s28 + $0x8] sm:$0xf] %v4031_v47 }
 0x361 PF: > { %s20_s25 = sadd.s32 1, %s5265_s25   ;;  %s6677_s20 = smov %s5245_s21 }
 0x362   : > { %p17_p13 = scmp.ge.s32.totalorder %s20_s25, 16   ;;  %s6678_s21 = smov %s5349_s6 }
 0x363   : > { %s6679_s22 = smov %s5257_s23  ;;  %s6680_s0 = smov %s5261_s24 }
 0x364   : > { %s6681_s23 = smov %s6684_s26  ;;  %s6682_s24 = smov %s6688_s27 }
 0x365   :  { %19 = sbr.rel (!%p17_p13) target bundleno = 19 (0x13), region = 104 }

// kernel: forward.7
= control target key start
LH: loop header
LB: loop body
LE: loop exit
PB: predicated region body
PF: predicated region fallthrough
CT: control target
= control target key end

     0   :  { %11 = vsyncpa [#allocation4], 0  ;;  %s4696_s21 = smov 0   ;;  %s5446_s0 = inlined_call_operand.vmem [shape: f32[4,2,1536], index: 0, kind: input, shape index: {}]   ;;  %s5447_s1 = inlined_call_operand.vmem [shape: bf16[4,1536,512], index: 1, kind: input, shape index: {}]   ;;  %s5448_s2 = inlined_call_operand.vmem [shape: f32[4,1,512], index: 2, kind: input, shape index: {}]   ;;  %s5449_s3 = inlined_call_operand.vmem [shape: f32[4,1,1], index: 3, kind: input, shape index: {}]   ;;  %s5450_s4 = inlined_call_operand.vmem [shape: f32[512,10], index: 4, kind: input, shape index: {}]   ;;  %s5451_s5 = inlined_call_operand.vmem [shape: f32[1,10], index: 5, kind: input, shape index: {}]   ;;  %s5452_s6 = inlined_call_operand.hbm [shape: f32[2,10], index: 6, kind: output, shape index: {}]  }
   0x1 LB: > { %s4702_s22 = sadd.s32 4294967295, %s4655_s21   ;;  %p3554_p0 = scmp.ge.s32.totalorder %s4655_s21, 1  ;;  %s4655_s21 = sphi %s4696_s21, %s17_s21  }
   0x2   : > { %p235_p1 = scmp.lt.s32.totalorder %s4655_s21, 5 }
   0x4   : > { %p236_p2 = pnand %p3554_p0, %p235_p1 }
   0x5   : > { %p272_p3 = scmp.lt.s32.totalorder (!%p236_p2), %s4702_s22, 3  ;;  %p3558_p4 = scmp.ne.s32.totalorder (!%p236_p2), %s4702_s22, 0 }
   0x6   : > { %239 = sbr.rel (%p236_p2) target bundleno = 866 (0x362), region = 44 }
   0xb   : > { %s4708_s23 = scalar_select %p272_p3, %s4702_s22, 3 }
   0xc   : > { %292 = sbr.rel (%p3558_p4) target bundleno = 19 (0x13), region = 48 }
   0xd   : > { %s4020_s24 = smul.u32 24, %s4708_s23  ;;  %s3557_s25 = sshll.u32 %s4708_s23, 2 }
   0xe   : > { %s4021_s26 = smul.u32 3072, %s4708_s23  ;;  %s4716_s29 = scalar_lea.vmem %s5448_s2, %s3557_s25 }
   0xf   : > { %s4721_s8 = scalar_lea.vmem %s5446_s0, %s4020_s24  ;;  %s288_s11 = scalar_lea.vmem %s5449_s3, %s4708_s23 }
  0x10   : > { %s4730_s14 = scalar_lea.vmem %s5447_s1, %s4021_s26 }
  0x11   : > { %v4657_v0 = vmov 0.0  }
  0x12   : > { %293 = vst [vmem:[#allocation2] sm:$0xff] %v4657_v0 }
  0x13 PF: > { %v4041_v1 = vld [vmem:[%s4730_s14 + $0xe4] ss:$16 sps:$4 sm:$0xff]   ;;  %v4045_v3 = vld [vmem:[%s4730_s14 + $0xe0] ss:$16 sps:$4 sm:$0xff]   ;;  %v4658_v37 = vmov 1983009808   ;;  %v304_v39 = vlaneseq }
  0x14   : > { %v4043_v2 = vld [vmem:[%s4730_s14 + $0x2e4] ss:$16 sps:$4 sm:$0xff]   ;;  %2701 = vmatprep.subr.bf16.mxu0 %v4041_v1  ;;  %v4046_v4 = vld [vmem:[%s4730_s14 + $0x2e0] ss:$16 sps:$4 sm:$0xff]   ;;  %v302_v38 = vunpack.c.l.s4 %v4658_v37  ;;  %p3944_p5 = scmp.ne.s32.totalorder %s4702_s22, 3 }
  0x15   : > { %2742 = vmatprep.subr.bf16.mxu1 %v4043_v2  ;;  %v4047_v5 = vld [vmem:[%s4730_s14 + $0xc4] ss:$16 sps:$4 sm:$0xff]   ;;  %2702 = vmatpush1.bf16.msra.mxu0 %v4045_v3  ;;  %v4051_v7 = vld [vmem:[%s4730_s14 + $0xc0] ss:$16 sps:$4 sm:$0xff]   ;;  %v4772_v44 = vshrl.u32 %v304_v39, 7 }
  0x16   : > { %2743 = vmatpush1.bf16.msra.mxu1 %v4046_v4  ;;  %v4049_v6 = vld [vmem:[%s4730_s14 + $0x2c4] ss:$16 sps:$4 sm:$0xff]   ;;  %2703 = vmatprep.subr.bf16.mxu0 %v4047_v5  ;;  %v4052_v8 = vld [vmem:[%s4730_s14 + $0x2c0] ss:$16 sps:$4 sm:$0xff]   ;;  %v303_v43 = vunpack.c.0.s8 %v302_v38 }
  0x17   : > { %2744 = vmatprep.subr.bf16.mxu1 %v4049_v6  ;;  %v4053_v9 = vld [vmem:[%s4730_s14 + $0xa4] ss:$16 sps:$4 sm:$0xff]   ;;  %v4057_v11 = vld [vmem:[%s4730_s14 + $0xa0] ss:$16 sps:$4 sm:$0xff]  }
  0x18   : > { %v4055_v10 = vld [vmem:[%s4730_s14 + $0x2a4] ss:$16 sps:$4 sm:$0xff]   ;;  %v4058_v12 = vld [vmem:[%s4730_s14 + $0x2a0] ss:$16 sps:$4 sm:$0xff]   ;;  %v4780_v50 = vsub.s32 %v303_v43, %v4772_v44  ;;  %v295_v43 = vld [vmem:[%s4721_s8 + $0x8] sm:$0xff] }
  0x19   : > { %2704 = vmatpush1.bf16.msra.mxu0 %v4051_v7  ;;  %v4059_v13 = vld [vmem:[%s4730_s14 + $0x84] ss:$16 sps:$4 sm:$0xff]   ;;  %v4063_v15 = vld [vmem:[%s4730_s14 + $0x80] ss:$16 sps:$4 sm:$0xff]  }
  0x1a   : > { %2745 = vmatpush1.bf16.msra.mxu1 %v4052_v8  ;;  %2705 = vmatprep.subr.bf16.mxu0 %v4053_v9  ;;  %v4061_v14 = vld [vmem:[%s4730_s14 + $0x284] ss:$16 sps:$4 sm:$0xff]   ;;  %v4064_v16 = vld [vmem:[%s4730_s14 + $0x280] ss:$16 sps:$4 sm:$0xff]  }
  0x1b   : > { %2746 = vmatprep.subr.bf16.mxu1 %v4055_v10  ;;  %v4065_v17 = vld [vmem:[%s4730_s14 + $0x64] ss:$16 sps:$4 sm:$0xff]   ;;  %v4069_v19 = vld [vmem:[%s4730_s14 + $0x60] ss:$16 sps:$4 sm:$0xff]  }
  0x1c   : > { %v4067_v18 = vld [vmem:[%s4730_s14 + $0x264] ss:$16 sps:$4 sm:$0xff]   ;;  %v4070_v20 = vld [vmem:[%s4730_s14 + $0x260] ss:$16 sps:$4 sm:$0xff]  }
  0x1d   : > { %2706 = vmatpush1.bf16.msra.mxu0 %v4057_v11  ;;  %v4071_v21 = vld [vmem:[%s4730_s14 + $0x44] ss:$16 sps:$4 sm:$0xff]   ;;  %v4075_v23 = vld [vmem:[%s4730_s14 + $0x40] ss:$16 sps:$4 sm:$0xff]  }
  0x1e   : > { %2747 = vmatpush1.bf16.msra.mxu1 %v4058_v12  ;;  %2707 = vmatprep.subr.bf16.mxu0 %v4059_v13  ;;  %v4073_v22 = vld [vmem:[%s4730_s14 + $0x244] ss:$16 sps:$4 sm:$0xff]   ;;  %v4076_v24 = vld [vmem:[%s4730_s14 + $0x240] ss:$16 sps:$4 sm:$0xff]  }
  0x1f   : > { %2748 = vmatprep.subr.bf16.mxu1 %v4061_v14  ;;  %v4077_v25 = vld [vmem:[%s4730_s14 + $0x24] ss:$16 sps:$4 sm:$0xff]   ;;  %v4081_v27 = vld [vmem:[%s4730_s14 + $0x20] ss:$16 sps:$4 sm:$0xff]  }
  0x20   : > { %v4079_v26 = vld [vmem:[%s4730_s14 + $0x224] ss:$16 sps:$4 sm:$0xff]   ;;  %v4082_v28 = vld [vmem:[%s4730_s14 + $0x220] ss:$16 sps:$4 sm:$0xff]  }
  0x21   : > { %2708 = vmatpush1.bf16.msra.mxu0 %v4063_v15  ;;  %v4083_v29 = vld [vmem:[%s4730_s14 + $0x4] ss:$16 sps:$4 sm:$0xff]   ;;  %v4087_v31 = vld [vmem:[%s4730_s14] ss:$16 sps:$4 sm:$0xff]  }
  0x22   : > { %2749 = vmatpush1.bf16.msra.mxu1 %v4064_v16  ;;  %2709 = vmatprep.subr.bf16.mxu0 %v4065_v17  ;;  %v4085_v30 = vld [vmem:[%s4730_s14 + $0x204] ss:$16 sps:$4 sm:$0xff]   ;;  %v4088_v32 = vld [vmem:[%s4730_s14 + $0x200] ss:$16 sps:$4 sm:$0xff]  }
  0x23   : > { %2750 = vmatprep.subr.bf16.mxu1 %v4067_v18  ;;  %v4089_v33 = vld [vmem:[%s4730_s14 + $0x1e4] ss:$16 sps:$4 sm:$0xff]   ;;  %v4093_v35 = vld [vmem:[%s4730_s14 + $0x1e0] ss:$16 sps:$4 sm:$0xff]  }
  0x24   : > { %v4091_v34 = vld [vmem:[%s4730_s14 + $0x3e4] ss:$16 sps:$4 sm:$0xff]   ;;  %v4094_v36 = vld [vmem:[%s4730_s14 + $0x3e0] ss:$16 sps:$4 sm:$0xff]  }
  0x25   : > { %2710 = vmatpush1.bf16.msra.mxu0 %v4069_v19  ;;  %v4095_v40 = vld [vmem:[%s4730_s14 + $0x1c4] ss:$16 sps:$4 sm:$0xff]   ;;  %v4099_v42 = vld [vmem:[%s4730_s14 + $0x1c0] ss:$16 sps:$4 sm:$0xff]  }
  0x26   : > { %2751 = vmatpush1.bf16.msra.mxu1 %v4070_v20  ;;  %2711 = vmatprep.subr.bf16.mxu0 %v4071_v21  ;;  %v4097_v41 = vld [vmem:[%s4730_s14 + $0x3c4] ss:$16 sps:$4 sm:$0xff]   ;;  %v4100_v45 = vld [vmem:[%s4730_s14 + $0x3c0] ss:$16 sps:$4 sm:$0xff]  }
  0x27   : > { %2752 = vmatprep.subr.bf16.mxu1 %v4073_v22  ;;  %v4101_v46 = vld [vmem:[%s4730_s14 + $0x1a4] ss:$16 sps:$4 sm:$0xff]   ;;  %v4105_v48 = vld [vmem:[%s4730_s14 + $0x1a0] ss:$16 sps:$4 sm:$0xff]  }
  0x28   : > { %v4103_v47 = vld [vmem:[%s4730_s14 + $0x3a4] ss:$16 sps:$4 sm:$0xff]   ;;  %v4106_v49 = vld [vmem:[%s4730_s14 + $0x3a0] ss:$16 sps:$4 sm:$0xff]  }
  0x29   : > { %2712 = vmatpush1.bf16.msra.mxu0 %v4075_v23  ;;  %v4107_v51 = vld [vmem:[%s4730_s14 + $0x184] ss:$16 sps:$4 sm:$0xff]   ;;  %v4111_v54 = vld [vmem:[%s4730_s14 + $0x180] ss:$16 sps:$4 sm:$0xff]  }
  0x2a   : > { %2753 = vmatpush1.bf16.msra.mxu1 %v4076_v24  ;;  %2713 = vmatprep.subr.bf16.mxu0 %v4077_v25  ;;  %v4109_v52 = vld [vmem:[%s4730_s14 + $0x384] ss:$16 sps:$4 sm:$0xff]   ;;  %v4112_v57 = vld [vmem:[%s4730_s14 + $0x380] ss:$16 sps:$4 sm:$0xff]  }
  0x2b   : > { %2754 = vmatprep.subr.bf16.mxu1 %v4079_v26  ;;  %v294_v53 = vld [vmem:[%s4721_s8] sm:$0xff] }
  0x2c   : > { %v307_v55 = vrot.slane %v294_v53, %v4780_v50  ;;  %v300_v56 = vcombine.high %v294_v53, %v294_v53  ;;  %v4113_v58 = vld [vmem:[%s4730_s14 + $0x164] ss:$16 sps:$4 sm:$0xff]   ;;  %v4117_v62 = vld [vmem:[%s4730_s14 + $0x160] ss:$16 sps:$4 sm:$0xff]  }
  0x2d   : > { %2714 = vmatpush1.bf16.msra.mxu0 %v4081_v27  ;;  %v4115_v59 = vld [vmem:[%s4730_s14 + $0x364] ss:$16 sps:$4 sm:$0xff]   ;;  %v4118_v1 = vld [vmem:[%s4730_s14 + $0x360] ss:$16 sps:$4 sm:$0xff]  }
  0x2e   : > { %2755 = vmatpush1.bf16.msra.mxu1 %v4082_v28  ;;  %2715 = vmatprep.subr.bf16.mxu0 %v4083_v29  ;;  %v315_v60 = vcombine.high %v307_v55, %v307_v55  ;;  %v314_v61 = vrot.slane %v300_v56, %v4780_v50  ;;  %v4119_v2 = vld [vmem:[%s4730_s14 + $0x144] ss:$16 sps:$4 sm:$0xff]   ;;  %v4123_v5 = vld [vmem:[%s4730_s14 + $0x140] ss:$16 sps:$4 sm:$0xff]   ;;  %v4813_v17 = vpack.c.bf16 %v307_v55, %v307_v55 }
  0x2f   : > { %2756 = vmatprep.subr.bf16.mxu1 %v4085_v30  ;;  %v4121_v3 = vld [vmem:[%s4730_s14 + $0x344] ss:$16 sps:$4 sm:$0xff]   ;;  %v4124_v6 = vld [vmem:[%s4730_s14 + $0x340] ss:$16 sps:$4 sm:$0xff]  }
  0x30   : > { %v4792_v63 = vpack.c.bf16 %v315_v60, %v315_v60  ;;  %v316_v0 = vcombine.high %v314_v61, %v314_v61  ;;  %v4125_v7 = vld [vmem:[%s4730_s14 + $0x124] ss:$16 sps:$4 sm:$0xff]   ;;  %v4129_v9 = vld [vmem:[%s4730_s14 + $0x120] ss:$16 sps:$4 sm:$0xff]   ;;  %v4815_v18 = vpack.c.bf16 %v314_v61, %v314_v61 }
  0x31   : > { %2716 = vmatpush1.bf16.msra.mxu0 %v4087_v31  ;;  %v4127_v8 = vld [vmem:[%s4730_s14 + $0x324] ss:$16 sps:$4 sm:$0xff]   ;;  %v4130_v10 = vld [vmem:[%s4730_s14 + $0x320] ss:$16 sps:$4 sm:$0xff]  }
  0x32   : > { %2757 = vmatpush1.bf16.msra.mxu1 %v4088_v32  ;;  %2717 = vmatprep.subr.bf16.mxu0 %v4089_v33  ;;  %v4797_v4 = vpack.c.bf16 %v316_v0, %v316_v0  ;;  %v4131_v11 = vld [vmem:[%s4730_s14 + $0x104] ss:$16 sps:$4 sm:$0xff]   ;;  %v4135_v13 = vld [vmem:[%s4730_s14 + $0x100] ss:$16 sps:$4 sm:$0xff]  }
  0x33   : > { %2758 = vmatprep.subr.bf16.mxu1 %v4091_v34  ;;  %2733 = vmatprep.mubr.bf16.mxu0 %v4792_v63  ;;  %v4133_v12 = vld [vmem:[%s4730_s14 + $0x304] ss:$16 sps:$4 sm:$0xff]   ;;  %v4136_v14 = vld [vmem:[%s4730_s14 + $0x300] ss:$16 sps:$4 sm:$0xff]  }
  0x34   : > { %2774 = vmatprep.mubr.bf16.mxu1 %v4797_v4  ;;  %v4140_v15 = vld [vmem:[%s4730_s14 + $0x4e4] ss:$16 sps:$4 sm:$0xff]   ;;  %v4138_v19 = vld [vmem:[%s4730_s14 + $0x4e0] ss:$16 sps:$4 sm:$0xff]  }
  0x35   : > { %2718 = vmatpush2.bf16.msra.mxu0 %v4093_v35  ;;  %v4143_v16 = vld [vmem:[%s4730_s14 + $0x6e4] ss:$16 sps:$4 sm:$0xff]   ;;  %v4141_v20 = vld [vmem:[%s4730_s14 + $0x6e0] ss:$16 sps:$4 sm:$0xff]  }
  0x36   : > { %2759 = vmatpush2.bf16.msra.mxu1 %v4094_v36  ;;  %2719 = vmatprep.subr.bf16.mxu0 %v4095_v40  ;;  %v4146_v21 = vld [vmem:[%s4730_s14 + $0x4c4] ss:$16 sps:$4 sm:$0xff]   ;;  %v4144_v23 = vld [vmem:[%s4730_s14 + $0x4c0] ss:$16 sps:$4 sm:$0xff]  }
  0x37   : > { %2760 = vmatprep.subr.bf16.mxu1 %v4097_v41  ;;  %v4149_v22 = vld [vmem:[%s4730_s14 + $0x6c4] ss:$16 sps:$4 sm:$0xff]   ;;  %v4147_v24 = vld [vmem:[%s4730_s14 + $0x6c0] ss:$16 sps:$4 sm:$0xff]  }
  0x38   : > { %v4152_v25 = vld [vmem:[%s4730_s14 + $0x4a4] ss:$16 sps:$4 sm:$0xff]   ;;  %v4150_v27 = vld [vmem:[%s4730_s14 + $0x4a0] ss:$16 sps:$4 sm:$0xff]  }
  0x39   : > { %2720 = vmatpush2.bf16.msra.mxu0 %v4099_v42  ;;  %v4155_v26 = vld [vmem:[%s4730_s14 + $0x6a4] ss:$16 sps:$4 sm:$0xff]   ;;  %v4153_v28 = vld [vmem:[%s4730_s14 + $0x6a0] ss:$16 sps:$4 sm:$0xff]  }
  0x3a   : > { %2761 = vmatpush2.bf16.msra.mxu1 %v4100_v45  ;;  %2721 = vmatprep.subr.bf16.mxu0 %v4101_v46  ;;  %v4158_v29 = vld [vmem:[%s4730_s14 + $0x484] ss:$16 sps:$4 sm:$0xff]   ;;  %v4156_v31 = vld [vmem:[%s4730_s14 + $0x480] ss:$16 sps:$4 sm:$0xff]   ;;  %v4845_v45 = vrot.slane %v295_v43, %v4780_v50  ;;  %v317_v46 = vcombine.high %v295_v43, %v295_v43 }
  0x3b   : > { %2762 = vmatprep.subr.bf16.mxu1 %v4103_v47  ;;  %v4161_v30 = vld [vmem:[%s4730_s14 + $0x684] ss:$16 sps:$4 sm:$0xff]   ;;  %v4159_v32 = vld [vmem:[%s4730_s14 + $0x680] ss:$16 sps:$4 sm:$0xff]  }
  0x3c   : > { %v4164_v33 = vld [vmem:[%s4730_s14 + $0x464] ss:$16 sps:$4 sm:$0xff]   ;;  %v4162_v35 = vld [vmem:[%s4730_s14 + $0x460] ss:$16 sps:$4 sm:$0xff]  }
  0x3d   : > { %2722 = vmatpush2.bf16.msra.mxu0 %v4105_v48  ;;  %v4167_v34 = vld [vmem:[%s4730_s14 + $0x664] ss:$16 sps:$4 sm:$0xff]   ;;  %v4165_v36 = vld [vmem:[%s4730_s14 + $0x660] ss:$16 sps:$4 sm:$0xff]  }
  0x3e   : > { %2763 = vmatpush2.bf16.msra.mxu1 %v4106_v49  ;;  %2723 = vmatprep.subr.bf16.mxu0 %v4107_v51  ;;  %v4170_v37 = vld [vmem:[%s4730_s14 + $0x444] ss:$16 sps:$4 sm:$0xff]   ;;  %v4168_v39 = vld [vmem:[%s4730_s14 + $0x440] ss:$16 sps:$4 sm:$0xff]   ;;  %v332_v49 = vcombine.high %v4845_v45, %v4845_v45  ;;  %v4852_v51 = vrot.slane %v317_v46, %v4780_v50 }
  0x3f   : > { %2764 = vmatprep.subr.bf16.mxu1 %v4109_v52  ;;  %v4173_v38 = vld [vmem:[%s4730_s14 + $0x644] ss:$16 sps:$4 sm:$0xff]   ;;  %v4171_v40 = vld [vmem:[%s4730_s14 + $0x640] ss:$16 sps:$4 sm:$0xff]  }
  0x40   : > { %v4176_v41 = vld [vmem:[%s4730_s14 + $0x424] ss:$16 sps:$4 sm:$0xff]   ;;  %v4174_v47 = vld [vmem:[%s4730_s14 + $0x420] ss:$16 sps:$4 sm:$0xff]   ;;  %v333_v55 = vcombine.high %v4852_v51, %v4852_v51 }
  0x41   : > { %2724 = vmatpush2.bf16.msra.mxu0 %v4111_v54  ;;  %v4179_v42 = vld [vmem:[%s4730_s14 + $0x624] ss:$16 sps:$4 sm:$0xff]   ;;  %v4177_v48 = vld [vmem:[%s4730_s14 + $0x620] ss:$16 sps:$4 sm:$0xff]   ;;  %v4856_v54 = vpack.c.bf16 %v332_v49, %v332_v49 }
  0x42   : > { %2765 = vmatpush2.bf16.msra.mxu1 %v4112_v57  ;;  %2725 = vmatprep.subr.bf16.mxu0 %v4113_v58  ;;  %v4182_v52 = vld [vmem:[%s4730_s14 + $0x404] ss:$16 sps:$4 sm:$0xff]   ;;  %v4180_v56 = vld [vmem:[%s4730_s14 + $0x400] ss:$16 sps:$4 sm:$0xff]   ;;  %v4862_v58 = vpack.c.bf16 %v333_v55, %v333_v55 }
  0x43   : > { %2766 = vmatprep.subr.bf16.mxu1 %v4115_v59  ;;  %v4185_v53 = vld [vmem:[%s4730_s14 + $0x604] ss:$16 sps:$4 sm:$0xff]   ;;  %v4183_v57 = vld [vmem:[%s4730_s14 + $0x600] ss:$16 sps:$4 sm:$0xff]  }
  0x44   : > { %v4188_v59 = vld [vmem:[%s4730_s14 + $0x5e4] ss:$16 sps:$4 sm:$0xff]   ;;  %v4186_v61 = vld [vmem:[%s4730_s14 + $0x5e0] ss:$16 sps:$4 sm:$0xff]  }
  0x45   : > { %2726 = vmatpush2.bf16.msra.mxu0 %v4117_v62  ;;  %v4191_v60 = vld [vmem:[%s4730_s14 + $0x7e4] ss:$16 sps:$4 sm:$0xff]   ;;  %v4189_v62 = vld [vmem:[%s4730_s14 + $0x7e0] ss:$16 sps:$4 sm:$0xff]  }
  0x46   : > { %2767 = vmatpush2.bf16.msra.mxu1 %v4118_v1  ;;  %2727 = vmatprep.subr.bf16.mxu0 %v4119_v2  ;;  %v4194_v0 = vld [vmem:[%s4730_s14 + $0x5c4] ss:$16 sps:$4 sm:$0xff]   ;;  %v4192_v2 = vld [vmem:[%s4730_s14 + $0x5c0] ss:$16 sps:$4 sm:$0xff]  }
  0x47   : > { %2768 = vmatprep.subr.bf16.mxu1 %v4121_v3  ;;  %v4197_v1 = vld [vmem:[%s4730_s14 + $0x7c4] ss:$16 sps:$4 sm:$0xff]   ;;  %v4195_v3 = vld [vmem:[%s4730_s14 + $0x7c0] ss:$16 sps:$4 sm:$0xff]  }
  0x48   : > { %v4244_v46 = vld [vmem:[%s4730_s14 + $0xac0] ss:$16 sps:$4 sm:$0xff]  }
  0x49   : > { %2728 = vmatpush2.bf16.msra.mxu0 %v4123_v5  ;;  %v4200_v5 = vld [vmem:[%s4730_s14 + $0x5a4] ss:$16 sps:$4 sm:$0xff]   ;;  %v4250_v55 = vld [vmem:[%s4730_s14 + $0xaa0] ss:$16 sps:$4 sm:$0xff]  }
  0x4a   : > { %2769 = vmatpush2.bf16.msra.mxu1 %v4124_v6  ;;  %2729 = vmatprep.subr.bf16.mxu0 %v4125_v7  ;;  %v4203_v6 = vld [vmem:[%s4730_s14 + $0x7a4] ss:$16 sps:$4 sm:$0xff]   ;;  %v4198_v7 = vld [vmem:[%s4730_s14 + $0x5a0] ss:$16 sps:$4 sm:$0xff]  }
  0x4b   : > { %2770 = vmatprep.subr.bf16.mxu1 %v4127_v8  ;;  %v4201_v8 = vld [vmem:[%s4730_s14 + $0x7a0] ss:$16 sps:$4 sm:$0xff]  }
  0x4d   : > { %2730 = vmatpush2.bf16.msra.mxu0 %v4129_v9  ;;  %v4206_v9 = vld [vmem:[%s4730_s14 + $0x584] ss:$16 sps:$4 sm:$0xff]  }
  0x4e   : > { %2771 = vmatpush2.bf16.msra.mxu1 %v4130_v10  ;;  %2731 = vmatprep.subr.bf16.mxu0 %v4131_v11  ;;  %v4209_v10 = vld [vmem:[%s4730_s14 + $0x784] ss:$16 sps:$4 sm:$0xff]   ;;  %v4204_v11 = vld [vmem:[%s4730_s14 + $0x580] ss:$16 sps:$4 sm:$0xff]  }
  0x4f   : > { %2772 = vmatprep.subr.bf16.mxu1 %v4133_v12  ;;  %v4207_v12 = vld [vmem:[%s4730_s14 + $0x780] ss:$16 sps:$4 sm:$0xff]  }
  0x51   : > { %2732 = vmatpush2.bf16.msra.mxu0 %v4135_v13  ;;  %v4212_v13 = vld [vmem:[%s4730_s14 + $0x564] ss:$16 sps:$4 sm:$0xff]  }
  0x52   : > { %2773 = vmatpush2.bf16.msra.mxu1 %v4136_v14  ;;  %2783 = vmatprep.subr.bf16.mxu0 %v4140_v15  ;;  %v4215_v14 = vld [vmem:[%s4730_s14 + $0x764] ss:$16 sps:$4 sm:$0xff]   ;;  %v4210_v15 = vld [vmem:[%s4730_s14 + $0x560] ss:$16 sps:$4 sm:$0xff]  }
  0x53   : > { %2824 = vmatprep.subr.bf16.mxu1 %v4143_v16  ;;  %v4213_v16 = vld [vmem:[%s4730_s14 + $0x760] ss:$16 sps:$4 sm:$0xff]  }
  0x54   : > { %2734 = vmatmul.mubr.bf16.vlgmr.msra.gmra.mxu0 %v4813_v17 }
  0x55   : > { %2775 = vmatmul.mubr.bf16.vlgmr.msra.gmra.mxu1 %v4815_v18  ;;  %2784 = vmatpush1.bf16.msra.mxu0 %v4138_v19  ;;  %v4218_v19 = vld [vmem:[%s4730_s14 + $0x544] ss:$16 sps:$4 sm:$0xff]  }
  0x56   : > { %2825 = vmatpush1.bf16.msra.mxu1 %v4141_v20  ;;  %2785 = vmatprep.subr.bf16.mxu0 %v4146_v21  ;;  %v4221_v20 = vld [vmem:[%s4730_s14 + $0x744] ss:$16 sps:$4 sm:$0xff]   ;;  %v4216_v21 = vld [vmem:[%s4730_s14 + $0x540] ss:$16 sps:$4 sm:$0xff]  }
  0x57   : > { %2826 = vmatprep.subr.bf16.mxu1 %v4149_v22  ;;  %2815 = vmatprep.mubr.bf16.mxu0 %v4856_v54  ;;  %v4219_v22 = vld [vmem:[%s4730_s14 + $0x740] ss:$16 sps:$4 sm:$0xff]  }
  0x58   : > { %2856 = vmatprep.mubr.bf16.mxu1 %v4862_v58 }
  0x59   : > { %2786 = vmatpush1.bf16.msra.mxu0 %v4144_v23  ;;  %v4224_v23 = vld [vmem:[%s4730_s14 + $0x524] ss:$16 sps:$4 sm:$0xff]  }
  0x5a   : > { %2827 = vmatpush1.bf16.msra.mxu1 %v4147_v24  ;;  %2787 = vmatprep.subr.bf16.mxu0 %v4152_v25  ;;  %v4227_v24 = vld [vmem:[%s4730_s14 + $0x724] ss:$16 sps:$4 sm:$0xff]   ;;  %v4222_v25 = vld [vmem:[%s4730_s14 + $0x520] ss:$16 sps:$4 sm:$0xff]  }
  0x5b   : > { %2828 = vmatprep.subr.bf16.mxu1 %v4155_v26  ;;  %v4225_v26 = vld [vmem:[%s4730_s14 + $0x720] ss:$16 sps:$4 sm:$0xff]  }
  0x5d   : > { %2788 = vmatpush1.bf16.msra.mxu0 %v4150_v27  ;;  %v4230_v27 = vld [vmem:[%s4730_s14 + $0x504] ss:$16 sps:$4 sm:$0xff]  }
  0x5e   : > { %2829 = vmatpush1.bf16.msra.mxu1 %v4153_v28  ;;  %2789 = vmatprep.subr.bf16.mxu0 %v4158_v29  ;;  %v4233_v28 = vld [vmem:[%s4730_s14 + $0x704] ss:$16 sps:$4 sm:$0xff]   ;;  %v4228_v29 = vld [vmem:[%s4730_s14 + $0x500] ss:$16 sps:$4 sm:$0xff]  }
  0x5f   : > { %2830 = vmatprep.subr.bf16.mxu1 %v4161_v30  ;;  %v4231_v30 = vld [vmem:[%s4730_s14 + $0x700] ss:$16 sps:$4 sm:$0xff]  }
  0x61   : > { %2790 = vmatpush1.bf16.msra.mxu0 %v4156_v31  ;;  %v4237_v31 = vld [vmem:[%s4730_s14 + $0x8e4] ss:$16 sps:$4 sm:$0xff]  }
  0x62   : > { %2831 = vmatpush1.bf16.msra.mxu1 %v4159_v32  ;;  %2791 = vmatprep.subr.bf16.mxu0 %v4164_v33  ;;  %v4240_v32 = vld [vmem:[%s4730_s14 + $0xae4] ss:$16 sps:$4 sm:$0xff]   ;;  %v4902_v33 = vpack.c.bf16 %v4845_v45, %v4845_v45 }
  0x63   : > { %2832 = vmatprep.subr.bf16.mxu1 %v4167_v34  ;;  %v4906_v34 = vpack.c.bf16 %v4852_v51, %v4852_v51 }
  0x65   : > { %2792 = vmatpush1.bf16.msra.mxu0 %v4162_v35  ;;  %v4235_v35 = vld [vmem:[%s4730_s14 + $0x8e0] ss:$16 sps:$4 sm:$0xff]  }
  0x66   : > { %2833 = vmatpush1.bf16.msra.mxu1 %v4165_v36  ;;  %2793 = vmatprep.subr.bf16.mxu0 %v4170_v37  ;;  %v4238_v36 = vld [vmem:[%s4730_s14 + $0xae0] ss:$16 sps:$4 sm:$0xff]   ;;  %v4243_v37 = vld [vmem:[%s4730_s14 + $0x8c4] ss:$16 sps:$4 sm:$0xff]  }
  0x67   : > { %2834 = vmatprep.subr.bf16.mxu1 %v4173_v38  ;;  %v296_v38 = vld [vmem:[%s4721_s8 + $0x10] sm:$0xff] }
  0x69   : > { %2794 = vmatpush1.bf16.msra.mxu0 %v4168_v39  ;;  %v4246_v39 = vld [vmem:[%s4730_s14 + $0xac4] ss:$16 sps:$4 sm:$0xff]  }
  0x6a   : > { %2835 = vmatpush1.bf16.msra.mxu1 %v4171_v40  ;;  %2795 = vmatprep.subr.bf16.mxu0 %v4176_v41  ;;  %v4914_v40 = vrot.slane %v296_v38, %v4780_v50  ;;  %v334_v41 = vcombine.high %v296_v38, %v296_v38  ;;  %v4307_v38 = vld [vmem:[%s4730_s14 + $0x960] ss:$16 sps:$4 sm:$0xff]  }
  0x6b   : > { %2836 = vmatprep.subr.bf16.mxu1 %v4179_v42  ;;  %v4241_v42 = vld [vmem:[%s4730_s14 + $0x8c0] ss:$16 sps:$4 sm:$0xff]  }
  0x6c   : > { %v349_v43 = vcombine.high %v4914_v40, %v4914_v40  ;;  %v4922_v45 = vrot.slane %v334_v41, %v4780_v50  ;;  %v4315_v41 = vld [vmem:[%s4730_s14 + $0x944] ss:$16 sps:$4 sm:$0xff]  }
  0x6d   : > { %2796 = vmatpush1.bf16.msra.mxu0 %v4174_v47  ;;  %v4249_v47 = vld [vmem:[%s4730_s14 + $0x8a4] ss:$16 sps:$4 sm:$0xff]  }
  0x6e   : > { %2837 = vmatpush1.bf16.msra.mxu1 %v4177_v48  ;;  %2797 = vmatprep.subr.bf16.mxu0 %v4182_v52  ;;  %v4252_v48 = vld [vmem:[%s4730_s14 + $0xaa4] ss:$16 sps:$4 sm:$0xff]   ;;  %v4927_v49 = vpack.c.bf16 %v349_v43, %v349_v43  ;;  %v350_v51 = vcombine.high %v4922_v45, %v4922_v45  ;;  %v4247_v52 = vld [vmem:[%s4730_s14 + $0x8a0] ss:$16 sps:$4 sm:$0xff]  }
  0x6f   : > { %2838 = vmatprep.subr.bf16.mxu1 %v4185_v53  ;;  %v4313_v43 = vld [vmem:[%s4730_s14 + $0x940] ss:$16 sps:$4 sm:$0xff]  }
  0x70   : > { %v4933_v53 = vpack.c.bf16 %v350_v51, %v350_v51  ;;  %v4324_v51 = vld [vmem:[%s4730_s14 + $0xb24] ss:$16 sps:$4 sm:$0xff]  }
  0x71   : > { %2798 = vmatpush1.bf16.msra.mxu0 %v4180_v56  ;;  %v4255_v56 = vld [vmem:[%s4730_s14 + $0x884] ss:$16 sps:$4 sm:$0xff]  }
  0x72   : > { %2839 = vmatpush1.bf16.msra.mxu1 %v4183_v57  ;;  %2799 = vmatprep.subr.bf16.mxu0 %v4188_v59  ;;  %v4258_v57 = vld [vmem:[%s4730_s14 + $0xa84] ss:$16 sps:$4 sm:$0xff]   ;;  %v4659_v59 = vmov 0  }
  0x73   : > { %2840 = vmatprep.subr.bf16.mxu1 %v4191_v60  ;;  %4040 = vset.pattern.permute.xlu0 %v4659_v59  ;;  %v4253_v60 = vld [vmem:[%s4730_s14 + $0x880] ss:$16 sps:$4 sm:$0xff]  }
  0x74   : > { %v4325_v59 = vld [vmem:[%s4730_s14 + $0x900] ss:$16 sps:$4 sm:$0xff]  }
  0x75   : > { %2800 = vmatpush2.bf16.msra.mxu0 %v4186_v61  ;;  %v4256_v61 = vld [vmem:[%s4730_s14 + $0xa80] ss:$16 sps:$4 sm:$0xff]  }
  0x76   : > { %2841 = vmatpush2.bf16.msra.mxu1 %v4189_v62  ;;  %2801 = vmatprep.subr.bf16.mxu0 %v4194_v0  ;;  %v4261_v62 = vld [vmem:[%s4730_s14 + $0x864] ss:$16 sps:$4 sm:$0xff]  }
  0x77   : > { %2842 = vmatprep.subr.bf16.mxu1 %v4197_v1  ;;  %v4264_v0 = vld [vmem:[%s4730_s14 + $0xa64] ss:$16 sps:$4 sm:$0xff]   ;;  %v4259_v1 = vld [vmem:[%s4730_s14 + $0x860] ss:$16 sps:$4 sm:$0xff]  }
  0x79   : > { %2802 = vmatpush2.bf16.msra.mxu0 %v4192_v2  ;;  %v4262_v2 = vld [vmem:[%s4730_s14 + $0xa60] ss:$16 sps:$4 sm:$0xff]  }
  0x7a   : > { %2843 = vmatpush2.bf16.msra.mxu1 %v4195_v3  ;;  %2803 = vmatprep.subr.bf16.mxu0 %v4200_v5  ;;  %v4267_v3 = vld [vmem:[%s4730_s14 + $0x844] ss:$16 sps:$4 sm:$0xff]  }
  0x7b   : > { %2844 = vmatprep.subr.bf16.mxu1 %v4203_v6  ;;  %v4270_v5 = vld [vmem:[%s4730_s14 + $0xa44] ss:$16 sps:$4 sm:$0xff]   ;;  %v4265_v6 = vld [vmem:[%s4730_s14 + $0x840] ss:$16 sps:$4 sm:$0xff]  }
  0x7d   : > { %2804 = vmatpush2.bf16.msra.mxu0 %v4198_v7  ;;  %v4268_v7 = vld [vmem:[%s4730_s14 + $0xa40] ss:$16 sps:$4 sm:$0xff]  }
  0x7e   : > { %2845 = vmatpush2.bf16.msra.mxu1 %v4201_v8  ;;  %2805 = vmatprep.subr.bf16.mxu0 %v4206_v9  ;;  %v4273_v8 = vld [vmem:[%s4730_s14 + $0x824] ss:$16 sps:$4 sm:$0xff]  }
  0x7f   : > { %2846 = vmatprep.subr.bf16.mxu1 %v4209_v10  ;;  %v4276_v9 = vld [vmem:[%s4730_s14 + $0xa24] ss:$16 sps:$4 sm:$0xff]   ;;  %v4271_v10 = vld [vmem:[%s4730_s14 + $0x820] ss:$16 sps:$4 sm:$0xff]  }
  0x81   : > { %2806 = vmatpush2.bf16.msra.mxu0 %v4204_v11  ;;  %v4274_v11 = vld [vmem:[%s4730_s14 + $0xa20] ss:$16 sps:$4 sm:$0xff]  }
  0x82   : > { %2847 = vmatpush2.bf16.msra.mxu1 %v4207_v12  ;;  %2807 = vmatprep.subr.bf16.mxu0 %v4212_v13  ;;  %v4279_v12 = vld [vmem:[%s4730_s14 + $0x804] ss:$16 sps:$4 sm:$0xff]  }
  0x83   : > { %2848 = vmatprep.subr.bf16.mxu1 %v4215_v14  ;;  %v4282_v13 = vld [vmem:[%s4730_s14 + $0xa04] ss:$16 sps:$4 sm:$0xff]   ;;  %v4277_v14 = vld [vmem:[%s4730_s14 + $0x800] ss:$16 sps:$4 sm:$0xff]  }
  0x85   : > { %2808 = vmatpush2.bf16.msra.mxu0 %v4210_v15  ;;  %v4280_v15 = vld [vmem:[%s4730_s14 + $0xa00] ss:$16 sps:$4 sm:$0xff]  }
  0x86   : > { %2849 = vmatpush2.bf16.msra.mxu1 %v4213_v16  ;;  %2809 = vmatprep.subr.bf16.mxu0 %v4218_v19  ;;  %v4285_v16 = vld [vmem:[%s4730_s14 + $0x9e4] ss:$16 sps:$4 sm:$0xff]  }
  0x87   : > { %2850 = vmatprep.subr.bf16.mxu1 %v4221_v20  ;;  %v4288_v19 = vld [vmem:[%s4730_s14 + $0xbe4] ss:$16 sps:$4 sm:$0xff]   ;;  %v4283_v20 = vld [vmem:[%s4730_s14 + $0x9e0] ss:$16 sps:$4 sm:$0xff]  }
  0x89   : > { %2810 = vmatpush2.bf16.msra.mxu0 %v4216_v21  ;;  %v4286_v21 = vld [vmem:[%s4730_s14 + $0xbe0] ss:$16 sps:$4 sm:$0xff]  }
  0x8a   : > { %2851 = vmatpush2.bf16.msra.mxu1 %v4219_v22  ;;  %2811 = vmatprep.subr.bf16.mxu0 %v4224_v23  ;;  %v4291_v22 = vld [vmem:[%s4730_s14 + $0x9c4] ss:$16 sps:$4 sm:$0xff]  }
  0x8b   : > { %2852 = vmatprep.subr.bf16.mxu1 %v4227_v24  ;;  %v4294_v23 = vld [vmem:[%s4730_s14 + $0xbc4] ss:$16 sps:$4 sm:$0xff]   ;;  %v4289_v24 = vld [vmem:[%s4730_s14 + $0x9c0] ss:$16 sps:$4 sm:$0xff]  }
  0x8d   : > { %2812 = vmatpush2.bf16.msra.mxu0 %v4222_v25  ;;  %v4292_v25 = vld [vmem:[%s4730_s14 + $0xbc0] ss:$16 sps:$4 sm:$0xff]  }
  0x8e   : > { %2853 = vmatpush2.bf16.msra.mxu1 %v4225_v26  ;;  %2813 = vmatprep.subr.bf16.mxu0 %v4230_v27  ;;  %v4297_v26 = vld [vmem:[%s4730_s14 + $0x9a4] ss:$16 sps:$4 sm:$0xff]  }
  0x8f   : > { %2854 = vmatprep.subr.bf16.mxu1 %v4233_v28  ;;  %v4300_v27 = vld [vmem:[%s4730_s14 + $0xba4] ss:$16 sps:$4 sm:$0xff]   ;;  %v4295_v28 = vld [vmem:[%s4730_s14 + $0x9a0] ss:$16 sps:$4 sm:$0xff]  }
  0x91   : > { %2814 = vmatpush2.bf16.msra.mxu0 %v4228_v29  ;;  %v4298_v29 = vld [vmem:[%s4730_s14 + $0xba0] ss:$16 sps:$4 sm:$0xff]  }
  0x92   : > { %2855 = vmatpush2.bf16.msra.mxu1 %v4231_v30  ;;  %2865 = vmatprep.subr.bf16.mxu0 %v4237_v31  ;;  %v4303_v30 = vld [vmem:[%s4730_s14 + $0x984] ss:$16 sps:$4 sm:$0xff]  }
  0x93   : > { %2906 = vmatprep.subr.bf16.mxu1 %v4240_v32  ;;  %v4306_v31 = vld [vmem:[%s4730_s14 + $0xb84] ss:$16 sps:$4 sm:$0xff]   ;;  %v4301_v32 = vld [vmem:[%s4730_s14 + $0x980] ss:$16 sps:$4 sm:$0xff]  }
  0x94   : > { %2816 = vmatmul.mubr.bf16.vlgmr.msra.gmra.mxu0 %v4902_v33 }
  0x95   : > { %2857 = vmatmul.mubr.bf16.vlgmr.msra.gmra.mxu1 %v4906_v34  ;;  %2866 = vmatpush1.bf16.msra.mxu0 %v4235_v35  ;;  %v4304_v35 = vld [vmem:[%s4730_s14 + $0xb80] ss:$16 sps:$4 sm:$0xff]  }
  0x96   : > { %2907 = vmatpush1.bf16.msra.mxu1 %v4238_v36  ;;  %2867 = vmatprep.subr.bf16.mxu0 %v4243_v37  ;;  %v4309_v36 = vld [vmem:[%s4730_s14 + $0x964] ss:$16 sps:$4 sm:$0xff]  }
  0x97   : > { %2908 = vmatprep.subr.bf16.mxu1 %v4246_v39  ;;  %2897 = vmatprep.mubr.bf16.mxu0 %v4927_v49  ;;  %v4312_v37 = vld [vmem:[%s4730_s14 + $0xb64] ss:$16 sps:$4 sm:$0xff]   ;;  %v4310_v39 = vld [vmem:[%s4730_s14 + $0xb60] ss:$16 sps:$4 sm:$0xff]  }
  0x98   : > { %2938 = vmatprep.mubr.bf16.mxu1 %v4933_v53 }
  0x99   : > { %2868 = vmatpush1.bf16.msra.mxu0 %v4241_v42  ;;  %v4318_v42 = vld [vmem:[%s4730_s14 + $0xb44] ss:$16 sps:$4 sm:$0xff]  }
  0x9a   : > { %2909 = vmatpush1.bf16.msra.mxu1 %v4244_v46  ;;  %2869 = vmatprep.subr.bf16.mxu0 %v4249_v47  ;;  %v4316_v46 = vld [vmem:[%s4730_s14 + $0xb40] ss:$16 sps:$4 sm:$0xff]  }
  0x9b   : > { %2910 = vmatprep.subr.bf16.mxu1 %v4252_v48  ;;  %v3943_v47 = vld [vmem:[%s288_s11] ss:$0 sm:$0xff]  ;;  %v4321_v48 = vld [vmem:[%s4730_s14 + $0x924] ss:$16 sps:$4 sm:$0xff]  }
  0x9c   : > { %3201 = vperm.xlu0 %4040, %v3943_v47   ;;  %v4395_v47 = vld [vmem:[%s4730_s14 + $0x3a8] ss:$16 sps:$4 sm:$0xff]  }
  0x9d   : > { %2870 = vmatpush1.bf16.msra.mxu0 %v4247_v52  ;;  %v4319_v52 = vld [vmem:[%s4730_s14 + $0x920] ss:$16 sps:$4 sm:$0xff]  }
  0x9e   : > { %2911 = vmatpush1.bf16.msra.mxu1 %v4250_v55  ;;  %2871 = vmatprep.subr.bf16.mxu0 %v4255_v56  ;;  %v4322_v55 = vld [vmem:[%s4730_s14 + $0xb20] ss:$16 sps:$4 sm:$0xff]   ;;  %v4327_v56 = vld [vmem:[%s4730_s14 + $0x904] ss:$16 sps:$4 sm:$0xff]  }
  0x9f   : > { %2912 = vmatprep.subr.bf16.mxu1 %v4258_v57  ;;  %v4330_v57 = vld [vmem:[%s4730_s14 + $0xb04] ss:$16 sps:$4 sm:$0xff]  }
  0xa1   : > { %2872 = vmatpush1.bf16.msra.mxu0 %v4253_v60  ;;  %v4328_v60 = vld [vmem:[%s4730_s14 + $0xb00] ss:$16 sps:$4 sm:$0xff]  }
  0xa2   : > { %2913 = vmatpush1.bf16.msra.mxu1 %v4256_v61  ;;  %2873 = vmatprep.subr.bf16.mxu0 %v4261_v62  ;;  %v4334_v61 = vld [vmem:[%s4730_s14 + $0xec] ss:$16 sps:$4 sm:$0xff]  }
  0xa3   : > { %2914 = vmatprep.subr.bf16.mxu1 %v4264_v0  ;;  %v4337_v62 = vld [vmem:[%s4730_s14 + $0x2ec] ss:$16 sps:$4 sm:$0xff]   ;;  %v4998_v0 = vpack.c.bf16 %v4914_v40, %v4914_v40  ;;  %v4338_v40 = vld [vmem:[%s4730_s14 + $0xc8] ss:$16 sps:$4 sm:$0xff]  }
  0xa5   : > { %2874 = vmatpush1.bf16.msra.mxu0 %v4259_v1  ;;  %v5002_v1 = vpack.c.bf16 %v4922_v45, %v4922_v45  ;;  %v4341_v45 = vld [vmem:[%s4730_s14 + $0x2c8] ss:$16 sps:$4 sm:$0xff]  }
  0xa6   : > { %2915 = vmatpush1.bf16.msra.mxu1 %v4262_v2  ;;  %2875 = vmatprep.subr.bf16.mxu0 %v4267_v3  ;;  %v4332_v2 = vld [vmem:[%s4730_s14 + $0xe8] ss:$16 sps:$4 sm:$0xff]  }
  0xa7   : > { %2916 = vmatprep.subr.bf16.mxu1 %v4270_v5  ;;  %v4335_v3 = vld [vmem:[%s4730_s14 + $0x2e8] ss:$16 sps:$4 sm:$0xff]   ;;  %v4340_v5 = vld [vmem:[%s4730_s14 + $0xcc] ss:$16 sps:$4 sm:$0xff]  }
  0xa9   : > { %2876 = vmatpush1.bf16.msra.mxu0 %v4265_v6  ;;  %v4343_v6 = vld [vmem:[%s4730_s14 + $0x2cc] ss:$16 sps:$4 sm:$0xff]  }
  0xaa   : > { %2917 = vmatpush1.bf16.msra.mxu1 %v4268_v7  ;;  %2877 = vmatprep.subr.bf16.mxu0 %v4273_v8  ;;  %v4346_v7 = vld [vmem:[%s4730_s14 + $0xac] ss:$16 sps:$4 sm:$0xff]  }
  0xab   : > { %2918 = vmatprep.subr.bf16.mxu1 %v4276_v9  ;;  %v4349_v8 = vld [vmem:[%s4730_s14 + $0x2ac] ss:$16 sps:$4 sm:$0xff]   ;;  %v4344_v9 = vld [vmem:[%s4730_s14 + $0xa8] ss:$16 sps:$4 sm:$0xff]  }
  0xad   : > { %2878 = vmatpush1.bf16.msra.mxu0 %v4271_v10  ;;  %v4347_v10 = vld [vmem:[%s4730_s14 + $0x2a8] ss:$16 sps:$4 sm:$0xff]  }
  0xae   : > { %2919 = vmatpush1.bf16.msra.mxu1 %v4274_v11  ;;  %2879 = vmatprep.subr.bf16.mxu0 %v4279_v12  ;;  %v4352_v11 = vld [vmem:[%s4730_s14 + $0x8c] ss:$16 sps:$4 sm:$0xff]  }
  0xaf   : > { %2920 = vmatprep.subr.bf16.mxu1 %v4282_v13  ;;  %v4355_v12 = vld [vmem:[%s4730_s14 + $0x28c] ss:$16 sps:$4 sm:$0xff]   ;;  %v4350_v13 = vld [vmem:[%s4730_s14 + $0x88] ss:$16 sps:$4 sm:$0xff]  }
  0xb1   : > { %2880 = vmatpush1.bf16.msra.mxu0 %v4277_v14  ;;  %v4361_v14 = vld [vmem:[%s4730_s14 + $0x26c] ss:$16 sps:$4 sm:$0xff]  }
  0xb2   : > { %2921 = vmatpush1.bf16.msra.mxu1 %v4280_v15  ;;  %2881 = vmatprep.subr.bf16.mxu0 %v4285_v16  ;;  %v4356_v15 = vld [vmem:[%s4730_s14 + $0x68] ss:$16 sps:$4 sm:$0xff]  }
  0xb3   : > { %2922 = vmatprep.subr.bf16.mxu1 %v4288_v19  ;;  %v4359_v16 = vld [vmem:[%s4730_s14 + $0x268] ss:$16 sps:$4 sm:$0xff]   ;;  %v4364_v19 = vld [vmem:[%s4730_s14 + $0x4c] ss:$16 sps:$4 sm:$0xff]  }
  0xb5   : > { %2882 = vmatpush2.bf16.msra.mxu0 %v4283_v20  ;;  %v4367_v20 = vld [vmem:[%s4730_s14 + $0x24c] ss:$16 sps:$4 sm:$0xff]  }
  0xb6   : > { %2923 = vmatpush2.bf16.msra.mxu1 %v4286_v21  ;;  %2883 = vmatprep.subr.bf16.mxu0 %v4291_v22  ;;  %v4362_v21 = vld [vmem:[%s4730_s14 + $0x48] ss:$16 sps:$4 sm:$0xff]  }
  0xb7   : > { %2924 = vmatprep.subr.bf16.mxu1 %v4294_v23  ;;  %v4365_v22 = vld [vmem:[%s4730_s14 + $0x248] ss:$16 sps:$4 sm:$0xff]   ;;  %v4370_v23 = vld [vmem:[%s4730_s14 + $0x2c] ss:$16 sps:$4 sm:$0xff]  }
  0xb9   : > { %2884 = vmatpush2.bf16.msra.mxu0 %v4289_v24  ;;  %v4373_v24 = vld [vmem:[%s4730_s14 + $0x22c] ss:$16 sps:$4 sm:$0xff]  }
  0xba   : > { %2925 = vmatpush2.bf16.msra.mxu1 %v4292_v25  ;;  %2885 = vmatprep.subr.bf16.mxu0 %v4297_v26  ;;  %v4368_v25 = vld [vmem:[%s4730_s14 + $0x28] ss:$16 sps:$4 sm:$0xff]  }
  0xbb   : > { %2926 = vmatprep.subr.bf16.mxu1 %v4300_v27  ;;  %v4371_v26 = vld [vmem:[%s4730_s14 + $0x228] ss:$16 sps:$4 sm:$0xff]   ;;  %v4376_v27 = vld [vmem:[%s4730_s14 + $0xc] ss:$16 sps:$4 sm:$0xff]  }
  0xbd   : > { %2886 = vmatpush2.bf16.msra.mxu0 %v4295_v28  ;;  %v4379_v28 = vld [vmem:[%s4730_s14 + $0x20c] ss:$16 sps:$4 sm:$0xff]  }
  0xbe   : > { %2927 = vmatpush2.bf16.msra.mxu1 %v4298_v29  ;;  %2887 = vmatprep.subr.bf16.mxu0 %v4303_v30  ;;  %v4374_v29 = vld [vmem:[%s4730_s14 + $0x8] ss:$16 sps:$4 sm:$0xff]  }
  0xbf   : > { %2928 = vmatprep.subr.bf16.mxu1 %v4306_v31  ;;  %v4377_v30 = vld [vmem:[%s4730_s14 + $0x208] ss:$16 sps:$4 sm:$0xff]   ;;  %v4382_v31 = vld [vmem:[%s4730_s14 + $0x1ec] ss:$16 sps:$4 sm:$0xff]  }
  0xc1   : > { %2888 = vmatpush2.bf16.msra.mxu0 %v4301_v32  ;;  %v4385_v32 = vld [vmem:[%s4730_s14 + $0x3ec] ss:$16 sps:$4 sm:$0xff]  }
  0xc2   : > { %2929 = vmatpush2.bf16.msra.mxu1 %v4304_v35  ;;  %2889 = vmatprep.subr.bf16.mxu0 %v4309_v36  ;;  %v4380_v35 = vld [vmem:[%s4730_s14 + $0x1e8] ss:$16 sps:$4 sm:$0xff]  }
  0xc3   : > { %2930 = vmatprep.subr.bf16.mxu1 %v4312_v37  ;;  %v4383_v36 = vld [vmem:[%s4730_s14 + $0x3e8] ss:$16 sps:$4 sm:$0xff]   ;;  %v4388_v37 = vld [vmem:[%s4730_s14 + $0x1cc] ss:$16 sps:$4 sm:$0xff]  }
  0xc5   : > { %2890 = vmatpush2.bf16.msra.mxu0 %v4307_v38  ;;  %v4391_v38 = vld [vmem:[%s4730_s14 + $0x3cc] ss:$16 sps:$4 sm:$0xff]  }
  0xc6   : > { %2931 = vmatpush2.bf16.msra.mxu1 %v4310_v39  ;;  %2891 = vmatprep.subr.bf16.mxu0 %v4315_v41  ;;  %v4386_v39 = vld [vmem:[%s4730_s14 + $0x1c8] ss:$16 sps:$4 sm:$0xff]  }
  0xc7   : > { %2932 = vmatprep.subr.bf16.mxu1 %v4318_v42  ;;  %v4389_v41 = vld [vmem:[%s4730_s14 + $0x3c8] ss:$16 sps:$4 sm:$0xff]   ;;  %v4394_v42 = vld [vmem:[%s4730_s14 + $0x1ac] ss:$16 sps:$4 sm:$0xff]  }
  0xc9   : > { %2892 = vmatpush2.bf16.msra.mxu0 %v4313_v43  ;;  %v4397_v43 = vld [vmem:[%s4730_s14 + $0x3ac] ss:$16 sps:$4 sm:$0xff]  }
  0xca   : > { %2933 = vmatpush2.bf16.msra.mxu1 %v4316_v46  ;;  %2893 = vmatprep.subr.bf16.mxu0 %v4321_v48  ;;  %v4392_v46 = vld [vmem:[%s4730_s14 + $0x1a8] ss:$16 sps:$4 sm:$0xff]   ;;  %v4400_v48 = vld [vmem:[%s4730_s14 + $0x18c] ss:$16 sps:$4 sm:$0xff]  }
  0xcb   : > { %2934 = vmatprep.subr.bf16.mxu1 %v4324_v51  ;;  %v4403_v51 = vld [vmem:[%s4730_s14 + $0x38c] ss:$16 sps:$4 sm:$0xff]  }
  0xcd   : > { %2894 = vmatpush2.bf16.msra.mxu0 %v4319_v52  ;;  %v4398_v52 = vld [vmem:[%s4730_s14 + $0x188] ss:$16 sps:$4 sm:$0xff]  }
  0xce   : > { %2935 = vmatpush2.bf16.msra.mxu1 %v4322_v55  ;;  %2895 = vmatprep.subr.bf16.mxu0 %v4327_v56  ;;  %v4401_v55 = vld [vmem:[%s4730_s14 + $0x388] ss:$16 sps:$4 sm:$0xff]   ;;  %v4406_v56 = vld [vmem:[%s4730_s14 + $0x16c] ss:$16 sps:$4 sm:$0xff]  }
  0xcf   : > { %2936 = vmatprep.subr.bf16.mxu1 %v4330_v57  ;;  %v4409_v57 = vld [vmem:[%s4730_s14 + $0x36c] ss:$16 sps:$4 sm:$0xff]  }
  0xd1   : > { %2896 = vmatpush2.bf16.msra.mxu0 %v4325_v59  ;;  %v4404_v59 = vld [vmem:[%s4730_s14 + $0x168] ss:$16 sps:$4 sm:$0xff]  }
  0xd2   : > { %2937 = vmatpush2.bf16.msra.mxu1 %v4328_v60  ;;  %2947 = vmatprep.subr.bf16.mxu0 %v4334_v61  ;;  %v4407_v60 = vld [vmem:[%s4730_s14 + $0x368] ss:$16 sps:$4 sm:$0xff]   ;;  %v4412_v61 = vld [vmem:[%s4730_s14 + $0x14c] ss:$16 sps:$4 sm:$0xff]  }
  0xd3   : > { %2988 = vmatprep.subr.bf16.mxu1 %v4337_v62  ;;  %v4415_v62 = vld [vmem:[%s4730_s14 + $0x34c] ss:$16 sps:$4 sm:$0xff]  }
  0xd4   : > { %2898 = vmatmul.mubr.bf16.vlgmr.msra.gmra.mxu0 %v4998_v0 }
  0xd5   : > { %2939 = vmatmul.mubr.bf16.vlgmr.msra.gmra.mxu1 %v5002_v1  ;;  %2948 = vmatpush1.bf16.msra.mxu0 %v4332_v2  ;;  %v4410_v2 = vld [vmem:[%s4730_s14 + $0x148] ss:$16 sps:$4 sm:$0xff]  }
  0xd6   : > { %2989 = vmatpush1.bf16.msra.mxu1 %v4335_v3  ;;  %2949 = vmatprep.subr.bf16.mxu0 %v4340_v5  ;;  %v4413_v3 = vld [vmem:[%s4730_s14 + $0x348] ss:$16 sps:$4 sm:$0xff]   ;;  %v4418_v5 = vld [vmem:[%s4730_s14 + $0x12c] ss:$16 sps:$4 sm:$0xff]  }
  0xd7   : > { %2990 = vmatprep.subr.bf16.mxu1 %v4343_v6  ;;  %2979 = vmatprep.mubr.bf16.mxu0 %v4792_v63  ;;  %v4353_v63 = vld [vmem:[%s4730_s14 + $0x288] ss:$16 sps:$4 sm:$0xff]   ;;  %v4421_v6 = vld [vmem:[%s4730_s14 + $0x32c] ss:$16 sps:$4 sm:$0xff]  }
  0xd8   : > { %3020 = vmatprep.mubr.bf16.mxu1 %v4797_v4  ;;  %v4358_v4 = vld [vmem:[%s4730_s14 + $0x6c] ss:$16 sps:$4 sm:$0xff]  }
  0xd9   : > { %2950 = vmatpush1.bf16.msra.mxu0 %v4338_v40  ;;  %v4416_v40 = vld [vmem:[%s4730_s14 + $0x128] ss:$16 sps:$4 sm:$0xff]  }
  0xda   : > { %2991 = vmatpush1.bf16.msra.mxu1 %v4341_v45  ;;  %2951 = vmatprep.subr.bf16.mxu0 %v4346_v7  ;;  %v4419_v45 = vld [vmem:[%s4730_s14 + $0x328] ss:$16 sps:$4 sm:$0xff]   ;;  %v4424_v7 = vld [vmem:[%s4730_s14 + $0x10c] ss:$16 sps:$4 sm:$0xff]  }
  0xdb   : > { %2992 = vmatprep.subr.bf16.mxu1 %v4349_v8  ;;  %v4427_v8 = vld [vmem:[%s4730_s14 + $0x30c] ss:$16 sps:$4 sm:$0xff]  }
  0xdd   : > { %2952 = vmatpush1.bf16.msra.mxu0 %v4344_v9  ;;  %v4422_v9 = vld [vmem:[%s4730_s14 + $0x108] ss:$16 sps:$4 sm:$0xff]  }
  0xde   : > { %2993 = vmatpush1.bf16.msra.mxu1 %v4347_v10  ;;  %2953 = vmatprep.subr.bf16.mxu0 %v4352_v11  ;;  %v4425_v10 = vld [vmem:[%s4730_s14 + $0x308] ss:$16 sps:$4 sm:$0xff]   ;;  %v5071_v11 = vld [vmem:[%s4716_s29] sm:$0xf] }
  0xdf   : > { %2994 = vmatprep.subr.bf16.mxu1 %v4355_v12  ;;  %v763_v12 = vsub.s32 0, %v4772_v44 }
  0xe1   : > { %2954 = vmatpush1.bf16.msra.mxu0 %v4350_v13  ;;  %v4430_v13 = vld [vmem:[%s4730_s14 + $0x4ec] ss:$16 sps:$4 sm:$0xff]  }
  0xe2   : > { %2995 = vmatpush1.bf16.msra.mxu1 %v4353_v63  ;;  %2955 = vmatprep.subr.bf16.mxu0 %v4358_v4  ;;  %v4433_v63 = vld [vmem:[%s4730_s14 + $0x6ec] ss:$16 sps:$4 sm:$0xff]   ;;  %v767_v4 = vsub.s32 1, %v4772_v44 }
  0xe3   : > { %2996 = vmatprep.subr.bf16.mxu1 %v4361_v14  ;;  %v4428_v14 = vld [vmem:[%s4730_s14 + $0x4e8] ss:$16 sps:$4 sm:$0xff]  }
  0xe5   : > { %2956 = vmatpush1.bf16.msra.mxu0 %v4356_v15  ;;  %v764_v15 = vrot.slane %v5071_v11, %v763_v12  ;;  %v4485_v12 = vld [vmem:[%s4730_s14 + $0x7c8] ss:$16 sps:$4 sm:$0xff]  }
  0xe6   : > { %2997 = vmatpush1.bf16.msra.mxu1 %v4359_v16  ;;  %2957 = vmatprep.subr.bf16.mxu0 %v4364_v19  ;;  %v4431_v16 = vld [vmem:[%s4730_s14 + $0x6e8] ss:$16 sps:$4 sm:$0xff]   ;;  %v4436_v19 = vld [vmem:[%s4730_s14 + $0x4cc] ss:$16 sps:$4 sm:$0xff]  }
  0xe7   : > { %2998 = vmatprep.subr.bf16.mxu1 %v4367_v20  ;;  %v4439_v20 = vld [vmem:[%s4730_s14 + $0x6cc] ss:$16 sps:$4 sm:$0xff]  }
  0xe9   : > { %2958 = vmatpush1.bf16.msra.mxu0 %v4362_v21  ;;  %v768_v21 = vrot.slane %v5071_v11, %v767_v4  ;;  %v4488_v4 = vld [vmem:[%s4730_s14 + $0x5a8] ss:$16 sps:$4 sm:$0xff]  }
  0xea   : > { %2999 = vmatpush1.bf16.msra.mxu1 %v4365_v22  ;;  %2959 = vmatprep.subr.bf16.mxu0 %v4370_v23 }
  0xeb   : > { %3000 = vmatprep.subr.bf16.mxu1 %v4373_v24 }
  0xed   : > { %2960 = vmatpush1.bf16.msra.mxu0 %v4368_v25  ;;  %v4434_v25 = vld [vmem:[%s4730_s14 + $0x4c8] ss:$16 sps:$4 sm:$0xff]  }
  0xee   : > { %3001 = vmatpush1.bf16.msra.mxu1 %v4371_v26  ;;  %2961 = vmatprep.subr.bf16.mxu0 %v4376_v27  ;;  %v4437_v26 = vld [vmem:[%s4730_s14 + $0x6c8] ss:$16 sps:$4 sm:$0xff]  }
  0xef   : > { %3002 = vmatprep.subr.bf16.mxu1 %v4379_v28 }
  0xf1   : > { %2962 = vmatpush1.bf16.msra.mxu0 %v4374_v29  ;;  %v4442_v29 = vld [vmem:[%s4730_s14 + $0x4ac] ss:$16 sps:$4 sm:$0xff]  }
  0xf2   : > { %3003 = vmatpush1.bf16.msra.mxu1 %v4377_v30  ;;  %2963 = vmatprep.subr.bf16.mxu0 %v4382_v31  ;;  %v4445_v30 = vld [vmem:[%s4730_s14 + $0x6ac] ss:$16 sps:$4 sm:$0xff]  }
  0xf3   : > { %3004 = vmatprep.subr.bf16.mxu1 %v4385_v32 }
  0xf5   : > { %2964 = vmatpush2.bf16.msra.mxu0 %v4380_v35 }
  0xf6   : > { %3005 = vmatpush2.bf16.msra.mxu1 %v4383_v36  ;;  %2965 = vmatprep.subr.bf16.mxu0 %v4388_v37  ;;  %v4440_v36 = vld [vmem:[%s4730_s14 + $0x4a8] ss:$16 sps:$4 sm:$0xff]  }
  0xf7   : > { %3006 = vmatprep.subr.bf16.mxu1 %v4391_v38  ;;  %v4443_v37 = vld [vmem:[%s4730_s14 + $0x6a8] ss:$16 sps:$4 sm:$0xff]  }
  0xf9   : > { %2966 = vmatpush2.bf16.msra.mxu0 %v4386_v39 }
  0xfa   : > { %3007 = vmatpush2.bf16.msra.mxu1 %v4389_v41  ;;  %2967 = vmatprep.subr.bf16.mxu0 %v4394_v42  ;;  %v4446_v41 = vld [vmem:[%s4730_s14 + $0x488] ss:$16 sps:$4 sm:$0xff]  }
  0xfb   : > { %3008 = vmatprep.subr.bf16.mxu1 %v4397_v43  ;;  %v4449_v42 = vld [vmem:[%s4730_s14 + $0x688] ss:$16 sps:$4 sm:$0xff]   ;;  %v4454_v43 = vld [vmem:[%s4730_s14 + $0x46c] ss:$16 sps:$4 sm:$0xff]  }
  0xfd   : > { %2968 = vmatpush2.bf16.msra.mxu0 %v4392_v46  ;;  %v4457_v46 = vld [vmem:[%s4730_s14 + $0x66c] ss:$16 sps:$4 sm:$0xff]  }
  0xfe   : > { %3009 = vmatpush2.bf16.msra.mxu1 %v4395_v47  ;;  %2969 = vmatprep.subr.bf16.mxu0 %v4400_v48  ;;  %v4452_v47 = vld [vmem:[%s4730_s14 + $0x468] ss:$16 sps:$4 sm:$0xff]  }
  0xff   : > { %3010 = vmatprep.subr.bf16.mxu1 %v4403_v51  ;;  %v4455_v48 = vld [vmem:[%s4730_s14 + $0x668] ss:$16 sps:$4 sm:$0xff]   ;;  %v4460_v51 = vld [vmem:[%s4730_s14 + $0x44c] ss:$16 sps:$4 sm:$0xff]  }
 0x101   : > { %2970 = vmatpush2.bf16.msra.mxu0 %v4398_v52  ;;  %v4463_v52 = vld [vmem:[%s4730_s14 + $0x64c] ss:$16 sps:$4 sm:$0xff]  }
 0x102   : > { %3011 = vmatpush2.bf16.msra.mxu1 %v4401_v55  ;;  %2971 = vmatprep.subr.bf16.mxu0 %v4406_v56  ;;  %v4458_v55 = vld [vmem:[%s4730_s14 + $0x448] ss:$16 sps:$4 sm:$0xff]  }
 0x103   : > { %3012 = vmatprep.subr.bf16.mxu1 %v4409_v57  ;;  %v4461_v56 = vld [vmem:[%s4730_s14 + $0x648] ss:$16 sps:$4 sm:$0xff]   ;;  %v4466_v57 = vld [vmem:[%s4730_s14 + $0x42c] ss:$16 sps:$4 sm:$0xff]  }
 0x105   : > { %2972 = vmatpush2.bf16.msra.mxu0 %v4404_v59  ;;  %v4469_v59 = vld [vmem:[%s4730_s14 + $0x62c] ss:$16 sps:$4 sm:$0xff]  }
 0x106   : > { %3013 = vmatpush2.bf16.msra.mxu1 %v4407_v60  ;;  %2973 = vmatprep.subr.bf16.mxu0 %v4412_v61  ;;  %v4464_v60 = vld [vmem:[%s4730_s14 + $0x428] ss:$16 sps:$4 sm:$0xff]  }
 0x107   : > { %3014 = vmatprep.subr.bf16.mxu1 %v4415_v62  ;;  %v4467_v61 = vld [vmem:[%s4730_s14 + $0x628] ss:$16 sps:$4 sm:$0xff]   ;;  %v4472_v62 = vld [vmem:[%s4730_s14 + $0x40c] ss:$16 sps:$4 sm:$0xff]  }
 0x109   : > { %2974 = vmatpush2.bf16.msra.mxu0 %v4410_v2  ;;  %v4475_v2 = vld [vmem:[%s4730_s14 + $0x60c] ss:$16 sps:$4 sm:$0xff]  }
 0x10a   : > { %3015 = vmatpush2.bf16.msra.mxu1 %v4413_v3  ;;  %2975 = vmatprep.subr.bf16.mxu0 %v4418_v5  ;;  %v4470_v3 = vld [vmem:[%s4730_s14 + $0x408] ss:$16 sps:$4 sm:$0xff]  }
 0x10b   : > { %3016 = vmatprep.subr.bf16.mxu1 %v4421_v6  ;;  %v4473_v5 = vld [vmem:[%s4730_s14 + $0x608] ss:$16 sps:$4 sm:$0xff]   ;;  %v4478_v6 = vld [vmem:[%s4730_s14 + $0x5ec] ss:$16 sps:$4 sm:$0xff]  }
 0x10d   : > { %2976 = vmatpush2.bf16.msra.mxu0 %v4416_v40  ;;  %v4481_v40 = vld [vmem:[%s4730_s14 + $0x7ec] ss:$16 sps:$4 sm:$0xff]  }
 0x10e   : > { %3017 = vmatpush2.bf16.msra.mxu1 %v4419_v45  ;;  %2977 = vmatprep.subr.bf16.mxu0 %v4424_v7  ;;  %v4476_v45 = vld [vmem:[%s4730_s14 + $0x5e8] ss:$16 sps:$4 sm:$0xff]  }
 0x10f   : > { %3018 = vmatprep.subr.bf16.mxu1 %v4427_v8  ;;  %v4479_v7 = vld [vmem:[%s4730_s14 + $0x7e8] ss:$16 sps:$4 sm:$0xff]   ;;  %v4484_v8 = vld [vmem:[%s4730_s14 + $0x5cc] ss:$16 sps:$4 sm:$0xff]  }
 0x111   : > { %2978 = vmatpush2.bf16.msra.mxu0 %v4422_v9  ;;  %v4487_v9 = vld [vmem:[%s4730_s14 + $0x7cc] ss:$16 sps:$4 sm:$0xff]  }
 0x112   : > { %3019 = vmatpush2.bf16.msra.mxu1 %v4425_v10  ;;  %3029 = vmatprep.subr.bf16.mxu0 %v4430_v13  ;;  %v4482_v10 = vld [vmem:[%s4730_s14 + $0x5c8] ss:$16 sps:$4 sm:$0xff]   ;;  %v4490_v13 = vld [vmem:[%s4730_s14 + $0x5ac] ss:$16 sps:$4 sm:$0xff]  }
 0x113   : > { %3070 = vmatprep.subr.bf16.mxu1 %v4433_v63  ;;  %v4493_v63 = vld [vmem:[%s4730_s14 + $0x7ac] ss:$16 sps:$4 sm:$0xff]  }
 0x114   : > { %v2735_v22 = vpop.f32.mrf.mxu0  ;;  %2980 = vmatmul.mubr.bf16.vlgmr.msra.gmra.mxu0 %v4813_v17 }
 0x115   : > { %v2776_v23 = vpop.f32.mrf.mxu1  ;;  %3021 = vmatmul.mubr.bf16.vlgmr.msra.gmra.mxu1 %v4815_v18  ;;  %v2736_v24 = vadd.f32 %v2735_v22, %v764_v15  ;;  %3030 = vmatpush1.bf16.msra.mxu0 %v4428_v14  ;;  %v4491_v14 = vld [vmem:[%s4730_s14 + $0x7a8] ss:$16 sps:$4 sm:$0xff]   ;;  %v4496_v15 = vld [vmem:[%s4730_s14 + $0x58c] ss:$16 sps:$4 sm:$0xff]  }
 0x116   : > { %3071 = vmatpush1.bf16.msra.mxu1 %v4431_v16  ;;  %v2737_v27 = vpop.f32.mrf.mxu0  ;;  %3031 = vmatprep.subr.bf16.mxu0 %v4436_v19  ;;  %v4499_v16 = vld [vmem:[%s4730_s14 + $0x78c] ss:$16 sps:$4 sm:$0xff]   ;;  %v4494_v19 = vld [vmem:[%s4730_s14 + $0x588] ss:$16 sps:$4 sm:$0xff]  }
 0x117   : > { %v2778_v28 = vpop.f32.mrf.mxu1  ;;  %3072 = vmatprep.subr.bf16.mxu1 %v4439_v20  ;;  %v5089_v31 = vadd.f32 %v2776_v23, %v2736_v24  ;;  %v2738_v17 = vadd.f32 %v2737_v27, %v768_v21  ;;  %3061 = vmatprep.mubr.bf16.mxu0 %v4856_v54  ;;  %v4448_v54 = vld [vmem:[%s4730_s14 + $0x48c] ss:$16 sps:$4 sm:$0xff]   ;;  %v4497_v20 = vld [vmem:[%s4730_s14 + $0x788] ss:$16 sps:$4 sm:$0xff]  }
 0x118   : > { %3102 = vmatprep.mubr.bf16.mxu1 %v4862_v58  ;;  %v2739_v18 = vpop.f32.mrf.mxu0  ;;  %v4451_v58 = vld [vmem:[%s4730_s14 + $0x68c] ss:$16 sps:$4 sm:$0xff]   ;;  %v4500_v23 = vld [vmem:[%s4730_s14 + $0x568] ss:$16 sps:$4 sm:$0xff]  }
 0x119   : > { %v2780_v32 = vpop.f32.mrf.mxu1  ;;  %v5093_v35 = vadd.f32 %v2778_v28, %v2738_v17  ;;  %3032 = vmatpush1.bf16.msra.mxu0 %v4434_v25  ;;  %v4502_v21 = vld [vmem:[%s4730_s14 + $0x56c] ss:$16 sps:$4 sm:$0xff]   ;;  %v4503_v24 = vld [vmem:[%s4730_s14 + $0x768] ss:$16 sps:$4 sm:$0xff]  }
 0x11a   : > { %3073 = vmatpush1.bf16.msra.mxu1 %v4437_v26  ;;  %v2740_v38 = vpop.f32.mrf.mxu0  ;;  %3033 = vmatprep.subr.bf16.mxu0 %v4442_v29  ;;  %v4505_v22 = vld [vmem:[%s4730_s14 + $0x76c] ss:$16 sps:$4 sm:$0xff]   ;;  %v4506_v27 = vld [vmem:[%s4730_s14 + $0x548] ss:$16 sps:$4 sm:$0xff]  }
 0x11b   : > { %v2781_v39 = vpop.f32.mrf.mxu1  ;;  %3074 = vmatprep.subr.bf16.mxu1 %v4445_v30  ;;  %v4508_v25 = vld [vmem:[%s4730_s14 + $0x54c] ss:$16 sps:$4 sm:$0xff]   ;;  %v4509_v28 = vld [vmem:[%s4730_s14 + $0x748] ss:$16 sps:$4 sm:$0xff]  }
 0x11c   : > { %v4511_v26 = vld [vmem:[%s4730_s14 + $0x74c] ss:$16 sps:$4 sm:$0xff]   ;;  %v4512_v17 = vld [vmem:[%s4730_s14 + $0x528] ss:$16 sps:$4 sm:$0xff]  }
 0x11d   : > { %3034 = vmatpush1.bf16.msra.mxu0 %v4440_v36  ;;  %v4514_v29 = vld [vmem:[%s4730_s14 + $0x52c] ss:$16 sps:$4 sm:$0xff]   ;;  %v4515_v18 = vld [vmem:[%s4730_s14 + $0x728] ss:$16 sps:$4 sm:$0xff]  }
 0x11e   : > { %3075 = vmatpush1.bf16.msra.mxu1 %v4443_v37  ;;  %3035 = vmatprep.subr.bf16.mxu0 %v4448_v54  ;;  %v4517_v30 = vld [vmem:[%s4730_s14 + $0x72c] ss:$16 sps:$4 sm:$0xff]   ;;  %v4518_v37 = vld [vmem:[%s4730_s14 + $0x508] ss:$16 sps:$4 sm:$0xff]  }
 0x11f   : > { %3076 = vmatprep.subr.bf16.mxu1 %v4451_v58  ;;  %v4520_v32 = vld [vmem:[%s4730_s14 + $0x50c] ss:$16 sps:$4 sm:$0xff]   ;;  %v4521_v38 = vld [vmem:[%s4730_s14 + $0x708] ss:$16 sps:$4 sm:$0xff]  }
 0x120   : > { %v4523_v36 = vld [vmem:[%s4730_s14 + $0x70c] ss:$16 sps:$4 sm:$0xff]   ;;  %v4524_v58 = vld [vmem:[%s4730_s14 + $0x8e8] ss:$16 sps:$4 sm:$0xff]  }
 0x121   : > { %3036 = vmatpush1.bf16.msra.mxu0 %v4446_v41  ;;  %v4526_v39 = vld [vmem:[%s4730_s14 + $0x8ec] ss:$16 sps:$4 sm:$0xff]   ;;  %v4527_v41 = vld [vmem:[%s4730_s14 + $0xae8] ss:$16 sps:$4 sm:$0xff]  }
 0x122   : > { %3077 = vmatpush1.bf16.msra.mxu1 %v4449_v42  ;;  %3037 = vmatprep.subr.bf16.mxu0 %v4454_v43  ;;  %v4529_v54 = vld [vmem:[%s4730_s14 + $0xaec] ss:$16 sps:$4 sm:$0xff]  }
 0x123   : > { %3078 = vmatprep.subr.bf16.mxu1 %v4457_v46  ;;  %v4532_v42 = vld [vmem:[%s4730_s14 + $0x8cc] ss:$16 sps:$4 sm:$0xff]  }
 0x124   : > { %v4535_v43 = vld [vmem:[%s4730_s14 + $0xacc] ss:$16 sps:$4 sm:$0xff]  }
 0x125   : > { %3038 = vmatpush1.bf16.msra.mxu0 %v4452_v47 }
 0x126   : > { %3079 = vmatpush1.bf16.msra.mxu1 %v4455_v48  ;;  %3039 = vmatprep.subr.bf16.mxu0 %v4460_v51  ;;  %v4530_v51 = vld [vmem:[%s4730_s14 + $0x8c8] ss:$16 sps:$4 sm:$0xff]  }
 0x127   : > { %3080 = vmatprep.subr.bf16.mxu1 %v4463_v52  ;;  %v4533_v52 = vld [vmem:[%s4730_s14 + $0xac8] ss:$16 sps:$4 sm:$0xff]  }
 0x129   : > { %3040 = vmatpush1.bf16.msra.mxu0 %v4458_v55 }
 0x12a   : > { %3081 = vmatpush1.bf16.msra.mxu1 %v4461_v56  ;;  %3041 = vmatprep.subr.bf16.mxu0 %v4466_v57  ;;  %v4538_v57 = vld [vmem:[%s4730_s14 + $0x8ac] ss:$16 sps:$4 sm:$0xff]  }
 0x12b   : > { %3082 = vmatprep.subr.bf16.mxu1 %v4469_v59  ;;  %v4541_v59 = vld [vmem:[%s4730_s14 + $0xaac] ss:$16 sps:$4 sm:$0xff]  }
 0x12d   : > { %3042 = vmatpush1.bf16.msra.mxu0 %v4464_v60 }
 0x12e   : > { %3083 = vmatpush1.bf16.msra.mxu1 %v4467_v61  ;;  %3043 = vmatprep.subr.bf16.mxu0 %v4472_v62  ;;  %v4536_v62 = vld [vmem:[%s4730_s14 + $0x8a8] ss:$16 sps:$4 sm:$0xff]  }
 0x12f   : > { %3084 = vmatprep.subr.bf16.mxu1 %v4475_v2  ;;  %v4539_v2 = vld [vmem:[%s4730_s14 + $0xaa8] ss:$16 sps:$4 sm:$0xff]  }
 0x131   : > { %3044 = vmatpush1.bf16.msra.mxu0 %v4470_v3 }
 0x132   : > { %3085 = vmatpush1.bf16.msra.mxu1 %v4473_v5  ;;  %3045 = vmatprep.subr.bf16.mxu0 %v4478_v6  ;;  %v4545_v6 = vld [vmem:[%s4730_s14 + $0xa88] ss:$16 sps:$4 sm:$0xff]  }
 0x133   : > { %3086 = vmatprep.subr.bf16.mxu1 %v4481_v40  ;;  %v4550_v40 = vld [vmem:[%s4730_s14 + $0x86c] ss:$16 sps:$4 sm:$0xff]  }
 0x135   : > { %3046 = vmatpush2.bf16.msra.mxu0 %v4476_v45  ;;  %v4553_v45 = vld [vmem:[%s4730_s14 + $0xa6c] ss:$16 sps:$4 sm:$0xff]  }
 0x136   : > { %3087 = vmatpush2.bf16.msra.mxu1 %v4479_v7  ;;  %3047 = vmatprep.subr.bf16.mxu0 %v4484_v8  ;;  %v4548_v7 = vld [vmem:[%s4730_s14 + $0x868] ss:$16 sps:$4 sm:$0xff]  }
 0x137   : > { %3088 = vmatprep.subr.bf16.mxu1 %v4487_v9  ;;  %v4551_v8 = vld [vmem:[%s4730_s14 + $0xa68] ss:$16 sps:$4 sm:$0xff]   ;;  %v4556_v9 = vld [vmem:[%s4730_s14 + $0x84c] ss:$16 sps:$4 sm:$0xff]  }
 0x139   : > { %3048 = vmatpush2.bf16.msra.mxu0 %v4482_v10  ;;  %v4559_v10 = vld [vmem:[%s4730_s14 + $0xa4c] ss:$16 sps:$4 sm:$0xff]  }
 0x13a   : > { %3089 = vmatpush2.bf16.msra.mxu1 %v4485_v12  ;;  %3049 = vmatprep.subr.bf16.mxu0 %v4490_v13  ;;  %v4554_v12 = vld [vmem:[%s4730_s14 + $0x848] ss:$16 sps:$4 sm:$0xff]  }
 0x13b   : > { %3090 = vmatprep.subr.bf16.mxu1 %v4493_v63  ;;  %v4557_v13 = vld [vmem:[%s4730_s14 + $0xa48] ss:$16 sps:$4 sm:$0xff]   ;;  %v4562_v63 = vld [vmem:[%s4730_s14 + $0x82c] ss:$16 sps:$4 sm:$0xff]  }
 0x13d   : > { %3050 = vmatpush2.bf16.msra.mxu0 %v4488_v4  ;;  %v4565_v4 = vld [vmem:[%s4730_s14 + $0xa2c] ss:$16 sps:$4 sm:$0xff]  }
 0x13e   : > { %3091 = vmatpush2.bf16.msra.mxu1 %v4491_v14  ;;  %3051 = vmatprep.subr.bf16.mxu0 %v4496_v15  ;;  %v4560_v14 = vld [vmem:[%s4730_s14 + $0x828] ss:$16 sps:$4 sm:$0xff]  }
 0x13f   : > { %3092 = vmatprep.subr.bf16.mxu1 %v4499_v16  ;;  %v4563_v15 = vld [vmem:[%s4730_s14 + $0xa28] ss:$16 sps:$4 sm:$0xff]   ;;  %v4568_v16 = vld [vmem:[%s4730_s14 + $0x80c] ss:$16 sps:$4 sm:$0xff]  }
 0x141   : > { %3052 = vmatpush2.bf16.msra.mxu0 %v4494_v19  ;;  %v4571_v19 = vld [vmem:[%s4730_s14 + $0xa0c] ss:$16 sps:$4 sm:$0xff]  }
 0x142   : > { %3093 = vmatpush2.bf16.msra.mxu1 %v4497_v20  ;;  %3053 = vmatprep.subr.bf16.mxu0 %v4502_v21  ;;  %v4566_v20 = vld [vmem:[%s4730_s14 + $0x808] ss:$16 sps:$4 sm:$0xff]  }
 0x143   : > { %3094 = vmatprep.subr.bf16.mxu1 %v4505_v22  ;;  %v4569_v21 = vld [vmem:[%s4730_s14 + $0xa08] ss:$16 sps:$4 sm:$0xff]   ;;  %v4574_v22 = vld [vmem:[%s4730_s14 + $0x9ec] ss:$16 sps:$4 sm:$0xff]  }
 0x145   : > { %3054 = vmatpush2.bf16.msra.mxu0 %v4500_v23  ;;  %v4577_v23 = vld [vmem:[%s4730_s14 + $0xbec] ss:$16 sps:$4 sm:$0xff]  }
 0x146   : > { %3095 = vmatpush2.bf16.msra.mxu1 %v4503_v24  ;;  %3055 = vmatprep.subr.bf16.mxu0 %v4508_v25  ;;  %v4572_v24 = vld [vmem:[%s4730_s14 + $0x9e8] ss:$16 sps:$4 sm:$0xff]  }
 0x147   : > { %3096 = vmatprep.subr.bf16.mxu1 %v4511_v26  ;;  %v4575_v25 = vld [vmem:[%s4730_s14 + $0xbe8] ss:$16 sps:$4 sm:$0xff]   ;;  %v4580_v26 = vld [vmem:[%s4730_s14 + $0x9cc] ss:$16 sps:$4 sm:$0xff]  }
 0x149   : > { %3056 = vmatpush2.bf16.msra.mxu0 %v4506_v27  ;;  %v4583_v27 = vld [vmem:[%s4730_s14 + $0xbcc] ss:$16 sps:$4 sm:$0xff]  }
 0x14a   : > { %3097 = vmatpush2.bf16.msra.mxu1 %v4509_v28  ;;  %3057 = vmatprep.subr.bf16.mxu0 %v4514_v29  ;;  %v4578_v28 = vld [vmem:[%s4730_s14 + $0x9c8] ss:$16 sps:$4 sm:$0xff]  }
 0x14b   : > { %3098 = vmatprep.subr.bf16.mxu1 %v4517_v30  ;;  %v4581_v29 = vld [vmem:[%s4730_s14 + $0xbc8] ss:$16 sps:$4 sm:$0xff]   ;;  %v4586_v30 = vld [vmem:[%s4730_s14 + $0x9ac] ss:$16 sps:$4 sm:$0xff]  }
 0x14d   : > { %3058 = vmatpush2.bf16.msra.mxu0 %v4512_v17  ;;  %v4589_v17 = vld [vmem:[%s4730_s14 + $0xbac] ss:$16 sps:$4 sm:$0xff]  }
 0x14e   : > { %3099 = vmatpush2.bf16.msra.mxu1 %v4515_v18  ;;  %3059 = vmatprep.subr.bf16.mxu0 %v4520_v32  ;;  %v4584_v18 = vld [vmem:[%s4730_s14 + $0x9a8] ss:$16 sps:$4 sm:$0xff]  }
 0x14f   : > { %3100 = vmatprep.subr.bf16.mxu1 %v4523_v36  ;;  %v4587_v32 = vld [vmem:[%s4730_s14 + $0xba8] ss:$16 sps:$4 sm:$0xff]   ;;  %v4592_v36 = vld [vmem:[%s4730_s14 + $0x98c] ss:$16 sps:$4 sm:$0xff]  }
 0x151   : > { %3060 = vmatpush2.bf16.msra.mxu0 %v4518_v37  ;;  %v4595_v37 = vld [vmem:[%s4730_s14 + $0xb8c] ss:$16 sps:$4 sm:$0xff]  }
 0x152   : > { %3101 = vmatpush2.bf16.msra.mxu1 %v4521_v38  ;;  %3111 = vmatprep.subr.bf16.mxu0 %v4526_v39  ;;  %v4590_v38 = vld [vmem:[%s4730_s14 + $0x988] ss:$16 sps:$4 sm:$0xff]  }
 0x153   : > { %3152 = vmatprep.subr.bf16.mxu1 %v4529_v54  ;;  %v4593_v39 = vld [vmem:[%s4730_s14 + $0xb88] ss:$16 sps:$4 sm:$0xff]   ;;  %v4598_v54 = vld [vmem:[%s4730_s14 + $0x96c] ss:$16 sps:$4 sm:$0xff]  }
 0x154   : > { %v2817_v46 = vpop.f32.mrf.mxu0  ;;  %3062 = vmatmul.mubr.bf16.vlgmr.msra.gmra.mxu0 %v4902_v33 }
 0x155   : > { %v2858_v47 = vpop.f32.mrf.mxu1  ;;  %3103 = vmatmul.mubr.bf16.vlgmr.msra.gmra.mxu1 %v4906_v34  ;;  %v2818_v48 = vadd.f32 %v2817_v46, %v5089_v31  ;;  %3112 = vmatpush1.bf16.msra.mxu0 %v4524_v58  ;;  %v4601_v58 = vld [vmem:[%s4730_s14 + $0xb6c] ss:$16 sps:$4 sm:$0xff]  }
 0x156   : > { %3153 = vmatpush1.bf16.msra.mxu1 %v4527_v41  ;;  %v2819_v55 = vpop.f32.mrf.mxu0  ;;  %3113 = vmatprep.subr.bf16.mxu0 %v4532_v42  ;;  %v4596_v41 = vld [vmem:[%s4730_s14 + $0x968] ss:$16 sps:$4 sm:$0xff]   ;;  %v4607_v46 = vld [vmem:[%s4730_s14 + $0xb4c] ss:$16 sps:$4 sm:$0xff]  }
 0x157   : > { %v2860_v56 = vpop.f32.mrf.mxu1  ;;  %3154 = vmatprep.subr.bf16.mxu1 %v4535_v43  ;;  %v5162_v60 = vadd.f32 %v2858_v47, %v2818_v48  ;;  %v2820_v33 = vadd.f32 %v2819_v55, %v5093_v35  ;;  %3143 = vmatprep.mubr.bf16.mxu0 %v4927_v49  ;;  %v4544_v49 = vld [vmem:[%s4730_s14 + $0x88c] ss:$16 sps:$4 sm:$0xff]   ;;  %v4542_v35 = vld [vmem:[%s4730_s14 + $0x888] ss:$16 sps:$4 sm:$0xff]  }
 0x158   : > { %3184 = vmatprep.mubr.bf16.mxu1 %v4933_v53  ;;  %v2821_v34 = vpop.f32.mrf.mxu0  ;;  %v4547_v53 = vld [vmem:[%s4730_s14 + $0xa8c] ss:$16 sps:$4 sm:$0xff]   ;;  %v4599_v42 = vld [vmem:[%s4730_s14 + $0xb68] ss:$16 sps:$4 sm:$0xff]  }
 0x159   : > { %v2862_v31 = vpop.f32.mrf.mxu1  ;;  %v5167_v61 = vadd.f32 %v2860_v56, %v2820_v33  ;;  %3114 = vmatpush1.bf16.msra.mxu0 %v4530_v51  ;;  %v4604_v43 = vld [vmem:[%s4730_s14 + $0x94c] ss:$16 sps:$4 sm:$0xff]   ;;  %v4602_v47 = vld [vmem:[%s4730_s14 + $0x948] ss:$16 sps:$4 sm:$0xff]  }
 0x15a   : > { %3155 = vmatpush1.bf16.msra.mxu1 %v4533_v52  ;;  %v2822_v3 = vpop.f32.mrf.mxu0  ;;  %3115 = vmatprep.subr.bf16.mxu0 %v4538_v57  ;;  %v4605_v48 = vld [vmem:[%s4730_s14 + $0xb48] ss:$16 sps:$4 sm:$0xff]   ;;  %v4610_v51 = vld [vmem:[%s4730_s14 + $0x92c] ss:$16 sps:$4 sm:$0xff]  }
 0x15b   : > { %v2863_v5 = vpop.f32.mrf.mxu1  ;;  %3156 = vmatprep.subr.bf16.mxu1 %v4541_v59  ;;  %v4613_v52 = vld [vmem:[%s4730_s14 + $0xb2c] ss:$16 sps:$4 sm:$0xff]   ;;  %v4608_v55 = vld [vmem:[%s4730_s14 + $0x928] ss:$16 sps:$4 sm:$0xff]  }
 0x15c   : > { %v4611_v56 = vld [vmem:[%s4730_s14 + $0xb28] ss:$16 sps:$4 sm:$0xff]   ;;  %v4616_v57 = vld [vmem:[%s4730_s14 + $0x90c] ss:$16 sps:$4 sm:$0xff]  }
 0x15d   : > { %3116 = vmatpush1.bf16.msra.mxu0 %v4536_v62  ;;  %v4619_v59 = vld [vmem:[%s4730_s14 + $0xb0c] ss:$16 sps:$4 sm:$0xff]   ;;  %v4614_v33 = vld [vmem:[%s4730_s14 + $0x908] ss:$16 sps:$4 sm:$0xff]  }
 0x15e   : > { %3157 = vmatpush1.bf16.msra.mxu1 %v4539_v2  ;;  %3117 = vmatprep.subr.bf16.mxu0 %v4544_v49  ;;  %v4617_v34 = vld [vmem:[%s4730_s14 + $0xb08] ss:$16 sps:$4 sm:$0xff]  }
 0x15f   : > { %3158 = vmatprep.subr.bf16.mxu1 %v4547_v53 }
 0x161   : > { %3118 = vmatpush1.bf16.msra.mxu0 %v4542_v35  ;;  %v3202_v35 = vpop.permute.xlu0 %3201 }
 0x162   : > { %3159 = vmatpush1.bf16.msra.mxu1 %v4545_v6  ;;  %3119 = vmatprep.subr.bf16.mxu0 %v4550_v40 }
 0x163   : > { %3160 = vmatprep.subr.bf16.mxu1 %v4553_v45 }
 0x165   : > { %3120 = vmatpush1.bf16.msra.mxu0 %v4548_v7 }
 0x166   : > { %3161 = vmatpush1.bf16.msra.mxu1 %v4551_v8  ;;  %3121 = vmatprep.subr.bf16.mxu0 %v4556_v9 }
 0x167   : > { %3162 = vmatprep.subr.bf16.mxu1 %v4559_v10 }
 0x169   : > { %3122 = vmatpush1.bf16.msra.mxu0 %v4554_v12 }
 0x16a   : > { %3163 = vmatpush1.bf16.msra.mxu1 %v4557_v13  ;;  %3123 = vmatprep.subr.bf16.mxu0 %v4562_v63 }
 0x16b   : > { %3164 = vmatprep.subr.bf16.mxu1 %v4565_v4 }
 0x16d   : > { %3124 = vmatpush1.bf16.msra.mxu0 %v4560_v14 }
 0x16e   : > { %3165 = vmatpush1.bf16.msra.mxu1 %v4563_v15  ;;  %3125 = vmatprep.subr.bf16.mxu0 %v4568_v16 }
 0x16f   : > { %3166 = vmatprep.subr.bf16.mxu1 %v4571_v19 }
 0x171   : > { %3126 = vmatpush1.bf16.msra.mxu0 %v4566_v20 }
 0x172   : > { %3167 = vmatpush1.bf16.msra.mxu1 %v4569_v21  ;;  %3127 = vmatprep.subr.bf16.mxu0 %v4574_v22 }
 0x173   : > { %3168 = vmatprep.subr.bf16.mxu1 %v4577_v23 }
 0x175   : > { %3128 = vmatpush2.bf16.msra.mxu0 %v4572_v24 }
 0x176   : > { %3169 = vmatpush2.bf16.msra.mxu1 %v4575_v25  ;;  %3129 = vmatprep.subr.bf16.mxu0 %v4580_v26 }
 0x177   : > { %3170 = vmatprep.subr.bf16.mxu1 %v4583_v27 }
 0x179   : > { %3130 = vmatpush2.bf16.msra.mxu0 %v4578_v28 }
 0x17a   : > { %3171 = vmatpush2.bf16.msra.mxu1 %v4581_v29  ;;  %3131 = vmatprep.subr.bf16.mxu0 %v4586_v30 }
 0x17b   : > { %3172 = vmatprep.subr.bf16.mxu1 %v4589_v17 }
 0x17d   : > { %3132 = vmatpush2.bf16.msra.mxu0 %v4584_v18 }
 0x17e   : > { %3173 = vmatpush2.bf16.msra.mxu1 %v4587_v32  ;;  %3133 = vmatprep.subr.bf16.mxu0 %v4592_v36 }
 0x17f   : > { %3174 = vmatprep.subr.bf16.mxu1 %v4595_v37 }
 0x181   : > { %3134 = vmatpush2.bf16.msra.mxu0 %v4590_v38 }
 0x182   : > { %3175 = vmatpush2.bf16.msra.mxu1 %v4593_v39  ;;  %3135 = vmatprep.subr.bf16.mxu0 %v4598_v54 }
 0x183   : > { %3176 = vmatprep.subr.bf16.mxu1 %v4601_v58 }
 0x185   : > { %3136 = vmatpush2.bf16.msra.mxu0 %v4596_v41 }
 0x186   : > { %3177 = vmatpush2.bf16.msra.mxu1 %v4599_v42  ;;  %3137 = vmatprep.subr.bf16.mxu0 %v4604_v43 }
 0x187   : > { %3178 = vmatprep.subr.bf16.mxu1 %v4607_v46 }
 0x189   : > { %3138 = vmatpush2.bf16.msra.mxu0 %v4602_v47 }
 0x18a   : > { %3179 = vmatpush2.bf16.msra.mxu1 %v4605_v48  ;;  %3139 = vmatprep.subr.bf16.mxu0 %v4610_v51 }
 0x18b   : > { %3180 = vmatprep.subr.bf16.mxu1 %v4613_v52 }
 0x18d   : > { %3140 = vmatpush2.bf16.msra.mxu0 %v4608_v55 }
 0x18e   : > { %3181 = vmatpush2.bf16.msra.mxu1 %v4611_v56  ;;  %3141 = vmatprep.subr.bf16.mxu0 %v4616_v57 }
 0x18f   : > { %3182 = vmatprep.subr.bf16.mxu1 %v4619_v59 }
 0x191   : > { %3142 = vmatpush2.bf16.msra.mxu0 %v4614_v33  ;;  %v3193_v33 = vld [vmem:[#allocation2] sm:$0xff] }
 0x192   : > { %3183 = vmatpush2.bf16.msra.mxu1 %v4617_v34 }
 0x194   : > { %v2899_v31 = vpop.f32.mrf.mxu0  ;;  %3144 = vmatmul.mubr.bf16.vlgmr.msra.gmra.mxu0 %v4998_v0  ;;  %v771_v0 = vsub.s32 2, %v4772_v44 }
 0x195   : > { %v2940_v62 = vpop.f32.mrf.mxu1  ;;  %3185 = vmatmul.mubr.bf16.vlgmr.msra.gmra.mxu1 %v5002_v1  ;;  %v2900_v2 = vadd.f32 %v2899_v31, %v5162_v60  ;;  %v775_v1 = vsub.s32 3, %v4772_v44 }
 0x196   : > { %v2901_v3 = vpop.f32.mrf.mxu0  ;;  %v772_v60 = vrot.slane %v5071_v11, %v771_v0 }
 0x197   : > { %v2942_v5 = vpop.f32.mrf.mxu1  ;;  %v2941_v49 = vadd.f32 %v2940_v62, %v2900_v2  ;;  %v2902_v53 = vadd.f32 %v2901_v3, %v5167_v61  ;;  %v776_v13 = vrot.slane %v5071_v11, %v775_v1 }
 0x198   : > { %v2903_v6 = vpop.f32.mrf.mxu0 }
 0x199   : > { %v2944_v40 = vpop.f32.mrf.mxu1  ;;  %v2943_v45 = vadd.f32 %v2942_v5, %v2902_v53  ;;  %v3204_v9 = vmax.f32 %v2941_v49, %v3202_v35 }
 0x19a   : > { %v2904_v7 = vpop.f32.mrf.mxu0 }
 0x19b   : > { %v2945_v8 = vpop.f32.mrf.mxu1  ;;  %v3205_v10 = vmax.f32 %v2943_v45, %v3202_v35 }
 0x19d   : > { %v3212_v12 = vcombine.low %v3204_v9, %v3205_v10 }
 0x19f   : > { %v3220_v57 = vrot.slane %v3212_v12, %v4780_v50 }
 0x1d4   : > { %v2981_v63 = vpop.f32.mrf.mxu0 }
 0x1d5   : > { %v3022_v4 = vpop.f32.mrf.mxu1  ;;  %v2982_v61 = vadd.f32 %v2981_v63, %v772_v60 }
 0x1d6   : > { %v2983_v14 = vpop.f32.mrf.mxu0 }
 0x1d7   : > { %v3024_v15 = vpop.f32.mrf.mxu1  ;;  %v3023_v16 = vadd.f32 %v3022_v4, %v2982_v61  ;;  %v2984_v19 = vadd.f32 %v2983_v14, %v776_v13 }
 0x1d8   : > { %v2985_v20 = vpop.f32.mrf.mxu0 }
 0x1d9   : > { %v3026_v21 = vpop.f32.mrf.mxu1  ;;  %v3025_v22 = vadd.f32 %v3024_v15, %v2984_v19 }
 0x1da   : > { %v2986_v23 = vpop.f32.mrf.mxu0 }
 0x1db   : > { %v3027_v24 = vpop.f32.mrf.mxu1 }
 0x214   : > { %v3063_v25 = vpop.f32.mrf.mxu0 }
 0x215   : > { %v3104_v26 = vpop.f32.mrf.mxu1  ;;  %v3064_v27 = vadd.f32 %v3063_v25, %v3023_v16 }
 0x216   : > { %v3065_v44 = vpop.f32.mrf.mxu0 }
 0x217   : > { %v3106_v28 = vpop.f32.mrf.mxu1  ;;  %v3105_v29 = vadd.f32 %v3104_v26, %v3064_v27  ;;  %v3066_v32 = vadd.f32 %v3065_v44, %v3025_v22 }
 0x218   : > { %v3067_v30 = vpop.f32.mrf.mxu0 }
 0x219   : > { %v3108_v11 = vpop.f32.mrf.mxu1  ;;  %v3107_v38 = vadd.f32 %v3106_v28, %v3066_v32 }
 0x21a   : > { %v3068_v17 = vpop.f32.mrf.mxu0 }
 0x21b   : > { %v3109_v18 = vpop.f32.mrf.mxu1 }
 0x254   : > { %v3145_v36 = vpop.f32.mrf.mxu0 }
 0x255   : > { %v3186_v37 = vpop.f32.mrf.mxu1  ;;  %v3146_v39 = vadd.f32 %v3145_v36, %v3105_v29 }
 0x256   : > { %v3147_v54 = vpop.f32.mrf.mxu0 }
 0x257   : > { %v3188_v58 = vpop.f32.mrf.mxu1  ;;  %v3187_v41 = vadd.f32 %v3186_v37, %v3146_v39  ;;  %v3148_v42 = vadd.f32 %v3147_v54, %v3107_v38 }
 0x258   : > { %v3149_v43 = vpop.f32.mrf.mxu0 }
 0x259   : > { %v3190_v46 = vpop.f32.mrf.mxu1  ;;  %v3189_v47 = vadd.f32 %v3188_v58, %v3148_v42  ;;  %v3206_v52 = vmax.f32 %v3187_v41, %v3202_v35 }
 0x25a   : > { %v3150_v48 = vpop.f32.mrf.mxu0 }
 0x25b   : > { %v3191_v51 = vpop.f32.mrf.mxu1  ;;  %v3207_v55 = vmax.f32 %v3189_v47, %v3202_v35 }
 0x25d   : > { %v3213_v56 = vcombine.low %v3206_v52, %v3207_v55 }
 0x25f   : > { %v3227_v59 = vrot.slane %v3213_v56, %v4780_v50 }
 0x261   : > { %v3228_v34 = vcombine.low %v3220_v57, %v3227_v59  ;;  %3235 = sbr.rel (%p3944_p5) target bundleno = 851 (0x353), region = 52 }
 0x263   : > { %v3230_v31 = vadd.f32 %v3228_v34, %v3193_v33 }
 0x265   : > { %3231 = vst [vmem:[#allocation2] sm:$0xff] %v3230_v31 }
 0x266   : > { %v3268_v62 = vld [vmem:[%s5450_s4 + $0xf8] sm:$0xff]  ;;  %v3267_v49 = vld [vmem:[%s5450_s4 + $0xf0] sm:$0xff]  ;;  %v3266_v40 = vld [vmem:[%s5450_s4 + $0xe8] sm:$0xff]  ;;  %vm3470_vm0 = vcmask 74752  }
 0x267   : > { %v3300_v2 = vld [vmem:[%s5450_s4 + $0x1f8] sm:$0xff]  ;;  %3950 = vmatprep.subr.mxu0 %v3268_v62  ;;  %v3299_v53 = vld [vmem:[%s5450_s4 + $0x1f0] sm:$0xff]  ;;  %v3298_v45 = vld [vmem:[%s5450_s4 + $0x1e8] sm:$0xff] }
 0x268   : > { %v3252_v3 = vld [vmem:[%s5450_s4 + $0x78] sm:$0xff]  ;;  %3985 = vmatprep.subr.mxu1 %v3300_v2  ;;  %v3251_v35 = vld [vmem:[%s5450_s4 + $0x70] sm:$0xff]  ;;  %v3250_v7 = vld [vmem:[%s5450_s4 + $0x68] sm:$0xff] }
 0x269   : > { %v3284_v5 = vld [vmem:[%s5450_s4 + $0x178] sm:$0xff]  ;;  %3951 = vmatpush3.msra.mxu0 %v3252_v3  ;;  %v3283_v6 = vld [vmem:[%s5450_s4 + $0x170] sm:$0xff]  ;;  %v3282_v8 = vld [vmem:[%s5450_s4 + $0x168] sm:$0xff] }
 0x26a   : > { %3986 = vmatpush3.msra.mxu1 %v3284_v5  ;;  %3952 = vmatprep.subr.mxu0 %v3267_v49  ;;  %v3265_v9 = vld [vmem:[%s5450_s4 + $0xe0] sm:$0xff]  ;;  %v3264_v1 = vld [vmem:[%s5450_s4 + $0xd8] sm:$0xff]  ;;  %v3263_v4 = vld [vmem:[%s5450_s4 + $0xd0] sm:$0xff] }
 0x26b   : > { %3987 = vmatprep.subr.mxu1 %v3299_v53  ;;  %3953 = vmatpush3.msra.mxu0 %v3251_v35  ;;  %v3297_v10 = vld [vmem:[%s5450_s4 + $0x1e0] sm:$0xff]  ;;  %v3296_v60 = vld [vmem:[%s5450_s4 + $0x1d8] sm:$0xff]  ;;  %v3295_v61 = vld [vmem:[%s5450_s4 + $0x1d0] sm:$0xff] }
 0x26c   : > { %3988 = vmatpush3.msra.mxu1 %v3283_v6  ;;  %3954 = vmatprep.subr.mxu0 %v3266_v40  ;;  %v3249_v12 = vld [vmem:[%s5450_s4 + $0x60] sm:$0xff]  ;;  %v3248_v13 = vld [vmem:[%s5450_s4 + $0x58] sm:$0xff]  ;;  %v3247_v14 = vld [vmem:[%s5450_s4 + $0x50] sm:$0xff] }
 0x26d   : > { %3989 = vmatprep.subr.mxu1 %v3298_v45  ;;  %v3281_v0 = vld [vmem:[%s5450_s4 + $0x160] sm:$0xff]  ;;  %3955 = vmatpush3.msra.mxu0 %v3250_v7  ;;  %v3280_v63 = vld [vmem:[%s5450_s4 + $0x158] sm:$0xff]  ;;  %v3279_v15 = vld [vmem:[%s5450_s4 + $0x150] sm:$0xff] }
 0x26e   : > { %3990 = vmatpush3.msra.mxu1 %v3282_v8  ;;  %3956 = vmatprep.subr.mxu0 %v3265_v9  ;;  %v3262_v16 = vld [vmem:[%s5450_s4 + $0xc8] sm:$0xff]  ;;  %v3261_v22 = vld [vmem:[%s5450_s4 + $0xc0] sm:$0xff]  ;;  %v3260_v26 = vld [vmem:[%s5450_s4 + $0xb8] sm:$0xff] }
 0x26f   : > { %3991 = vmatprep.subr.mxu1 %v3297_v10  ;;  %3957 = vmatpush3.msra.mxu0 %v3249_v12  ;;  %v3294_v19 = vld [vmem:[%s5450_s4 + $0x1c8] sm:$0xff]  ;;  %v3293_v23 = vld [vmem:[%s5450_s4 + $0x1c0] sm:$0xff]  ;;  %v3292_v27 = vld [vmem:[%s5450_s4 + $0x1b8] sm:$0xff] }
 0x270   : > { %3992 = vmatpush3.msra.mxu1 %v3281_v0  ;;  %3958 = vmatprep.subr.mxu0 %v3264_v1  ;;  %v3246_v20 = vld [vmem:[%s5450_s4 + $0x48] sm:$0xff]  ;;  %v3245_v24 = vld [vmem:[%s5450_s4 + $0x40] sm:$0xff]  ;;  %v3244_v44 = vld [vmem:[%s5450_s4 + $0x38] sm:$0xff] }
 0x271   : > { %3993 = vmatprep.subr.mxu1 %v3296_v60  ;;  %3959 = vmatpush3.msra.mxu0 %v3248_v13  ;;  %v3278_v21 = vld [vmem:[%s5450_s4 + $0x148] sm:$0xff]  ;;  %v3277_v25 = vld [vmem:[%s5450_s4 + $0x140] sm:$0xff]  ;;  %v3276_v28 = vld [vmem:[%s5450_s4 + $0x138] sm:$0xff] }
 0x272   : > { %3994 = vmatpush3.msra.mxu1 %v3280_v63  ;;  %3960 = vmatprep.subr.mxu0 %v3263_v4  ;;  %v3259_v29 = vld [vmem:[%s5450_s4 + $0xb0] sm:$0xff]  ;;  %v3258_v18 = vld [vmem:[%s5450_s4 + $0xa8] sm:$0xff]  ;;  %v3257_v38 = vld [vmem:[%s5450_s4 + $0xa0] sm:$0xff] }
 0x273   : > { %3995 = vmatprep.subr.mxu1 %v3295_v61  ;;  %3961 = vmatpush3.msra.mxu0 %v3247_v14  ;;  %v3291_v30 = vld [vmem:[%s5450_s4 + $0x1b0] sm:$0xff]  ;;  %v3290_v32 = vld [vmem:[%s5450_s4 + $0x1a8] sm:$0xff]  ;;  %v3289_v39 = vld [vmem:[%s5450_s4 + $0x1a0] sm:$0xff] }
 0x274   : > { %3996 = vmatpush3.msra.mxu1 %v3279_v15  ;;  %3962 = vmatprep.subr.mxu0 %v3262_v16  ;;  %v3243_v11 = vld [vmem:[%s5450_s4 + $0x30] sm:$0xff]  ;;  %v3242_v36 = vld [vmem:[%s5450_s4 + $0x28] sm:$0xff]  ;;  %v3241_v54 = vld [vmem:[%s5450_s4 + $0x20] sm:$0xff] }
 0x275   : > { %3997 = vmatprep.subr.mxu1 %v3294_v19  ;;  %3963 = vmatpush3.msra.mxu0 %v3246_v20  ;;  %v3275_v17 = vld [vmem:[%s5450_s4 + $0x130] sm:$0xff]  ;;  %v3274_v37 = vld [vmem:[%s5450_s4 + $0x128] sm:$0xff]  ;;  %v3273_v58 = vld [vmem:[%s5450_s4 + $0x120] sm:$0xff] }
 0x276   : > { %3998 = vmatpush3.msra.mxu1 %v3278_v21  ;;  %3964 = vmatprep.subr.mxu0 %v3261_v22  ;;  %v3236_v41 = vld [vmem:[#allocation2] sm:$0xff]  ;;  %v3256_v42 = vld [vmem:[%s5450_s4 + $0x98] sm:$0xff]  ;;  %v3255_v51 = vld [vmem:[%s5450_s4 + $0x90] sm:$0xff] }
 0x277   : > { %3999 = vmatprep.subr.mxu1 %v3293_v23  ;;  %3965 = vmatpush3.msra.mxu0 %v3245_v24  ;;  %v3288_v43 = vld [vmem:[%s5450_s4 + $0x198] sm:$0xff]  ;;  %v3309_v46 = vcombine.high %v3236_v41, %v3236_v41  ;;  %v3287_v52 = vld [vmem:[%s5450_s4 + $0x190] sm:$0xff]  ;;  %v3316_v55 = vrot.slane %v3236_v41, %v4780_v50  ;;  %v3254_v33 = vld [vmem:[%s5450_s4 + $0x88] sm:$0xff] }
 0x278   : > { %4000 = vmatpush3.msra.mxu1 %v3277_v25  ;;  %3966 = vmatprep.subr.mxu0 %v3260_v26  ;;  %v3240_v47 = vld [vmem:[%s5450_s4 + $0x18] sm:$0xff]  ;;  %v3239_v56 = vld [vmem:[%s5450_s4 + $0x10] sm:$0xff]  ;;  %v3286_v34 = vld [vmem:[%s5450_s4 + $0x188] sm:$0xff] }
 0x279   : > { %4001 = vmatprep.subr.mxu1 %v3292_v27  ;;  %3967 = vmatpush3.msra.mxu0 %v3244_v44  ;;  %v3272_v48 = vld [vmem:[%s5450_s4 + $0x118] sm:$0xff]  ;;  %v3271_v57 = vld [vmem:[%s5450_s4 + $0x110] sm:$0xff]  ;;  %v3323_v59 = vrot.slane %v3309_v46, %v4780_v50  ;;  %v3238_v31 = vld [vmem:[%s5450_s4 + $0x8] sm:$0xff]  ;;  %v3324_v3 = vcombine.high %v3316_v55, %v3316_v55 }
 0x27a   : > { %4002 = vmatpush3.msra.mxu1 %v3276_v28  ;;  %3968 = vmatprep.subr.mxu0 %v3259_v29  ;;  %v3270_v50 = vld [vmem:[%s5450_s4 + $0x108] sm:$0xff]  ;;  %v3253_v62 = vld [vmem:[%s5450_s4 + $0x80] sm:$0xff] }
 0x27b   : > { %4003 = vmatprep.subr.mxu1 %v3291_v30  ;;  %3969 = vmatpush3.msra.mxu0 %v3243_v11  ;;  %v3285_v2 = vld [vmem:[%s5450_s4 + $0x180] sm:$0xff]  ;;  %v3325_v49 = vcombine.high %v3323_v59, %v3323_v59 }
 0x27c   : > { %4004 = vmatpush3.msra.mxu1 %v3275_v17  ;;  %3970 = vmatprep.subr.mxu0 %v3258_v18  ;;  %v3237_v5 = vld [vmem:[%s5450_s4] sm:$0xff] }
 0x27d   : > { %4005 = vmatprep.subr.mxu1 %v3290_v32  ;;  %3971 = vmatpush3.msra.mxu0 %v3242_v36  ;;  %v3269_v53 = vld [vmem:[%s5450_s4 + $0x100] sm:$0xff] }
 0x27e   : > { %4006 = vmatpush3.msra.mxu1 %v3274_v37  ;;  %3972 = vmatprep.subr.mxu0 %v3257_v38  ;;  %v3945_v40 = vld [vmem:[%s5451_s5] ss:$0 sm:$0xff] }
 0x27f   : > { %4007 = vmatprep.subr.mxu1 %v3289_v39  ;;  %3973 = vmatpush3.msra.mxu0 %v3241_v54 }
 0x280   : > { %4008 = vmatpush3.msra.mxu1 %v3273_v58  ;;  %3974 = vmatprep.subr.mxu0 %v3256_v42 }
 0x281   : > { %4009 = vmatprep.subr.mxu1 %v3288_v43  ;;  %3975 = vmatpush3.msra.mxu0 %v3240_v47 }
 0x282   : > { %4010 = vmatpush3.msra.mxu1 %v3272_v48  ;;  %3976 = vmatprep.subr.mxu0 %v3255_v51 }
 0x283   : > { %4011 = vmatprep.subr.mxu1 %v3287_v52  ;;  %3977 = vmatpush3.msra.mxu0 %v3239_v56 }
 0x284   : > { %4012 = vmatpush3.msra.mxu1 %v3271_v57  ;;  %3978 = vmatprep.subr.mxu0 %v3254_v33 }
 0x285   : > { %4013 = vmatprep.subr.mxu1 %v3286_v34  ;;  %3979 = vmatpush3.msra.mxu0 %v3238_v31 }
 0x286   : > { %4014 = vmatpush3.msra.mxu1 %v3270_v50  ;;  %3980 = vmatprep.subr.mxu0 %v3253_v62 }
 0x287   : > { %4015 = vmatprep.subr.mxu1 %v3285_v2  ;;  %3981 = vmatpush3.msra.mxu0 %v3237_v5 }
 0x288   : > { %3394 = vmatprep.mubr.f32.mxu0 %v3324_v3  ;;  %4016 = vmatpush3.msra.mxu1 %v3269_v53 }
 0x289   : > { %3464 = vmatprep.mubr.f32.mxu1 %v3325_v49  ;;  %3395 = vmatmul.mubr.f32.vlgmr.msra.gmra.mxu0 %v3316_v55 }
 0x28a   : > { %3465 = vmatmul.mubr.f32.vlgmr.msra.gmra.mxu1 %v3323_v59 }
 0x349   : > { %v3982_v35 = vpop.f32.mrf.mxu0 }
 0x34a   : > { %v4017_v6 = vpop.f32.mrf.mxu1 }
 0x34b   : > { %v3983_v45 = vpop.f32.mrf.mxu0 }
 0x34c   : > { %v4018_v7 = vpop.f32.mrf.mxu1  ;;  %v3984_v8 = vadd.f32 %v3983_v45, %v3982_v35 }
 0x34d   : > { %v4019_v10 = vadd.f32 %v4018_v7, %v4017_v6 }
 0x34e   : > { %v3397_v9 = vadd.f32 %v3984_v8, %v3945_v40 }
 0x350   : > { %v3467_v12 = vadd.f32 %v4019_v10, %v3397_v9 }
 0x352   : > { %3471 = vst.msk [vmem:[#allocation3] sm:$0x3] %vm3470_vm0, %v3467_v12 }
 0x353 PF: > { %p4026_p6 = scmp.eq.s32.totalorder %s4702_s22, 3  ;;  %s4660_s15 = smov [#allocation3]  }
 0x354   : > { %s3479_s16 = sshll.u32 %s4660_s15, 4  ;;  %s3480_s16 = int_to_ptr.vmem [resolvable:$true] %s3479_s16 }
 0x355   : > { %s4621_s17 = scalar_lea.vmem %s3480_s16, 32  ;;  %p4628_p10 = scmp.lt.s32.totalorder %s3480_s16, %s3480_s16 }
 0x356   : > { %p4622_p7 = scmp.ne.s32.totalorder %s3480_s16, %s4621_s17  ;;  %p4629_p11 = scmp.lt.s32.totalorder %s4621_s17, %s4621_s17 }
 0x358   : > { %p4623_p8 = pnand %p4622_p7, %p4026_p6  ;;  %p4630_p12 = por %p4629_p11, %p4628_p10 }
 0x35a   : > { %p4624_p9 = pneg %p4623_p8 }
 0x35c   : > { %p4631_p13 = pnand %p4630_p12, %p4624_p9 }
 0x35e   : > { %4634 = shalt.err (!%p4631_p13)
}
 0x35f   : > { %4023 = dma.vmem_to_hbm [thread:$0]  (%p4026_p6), %s3480_s16, 32, %s5452_s6, [#allocation4]  }
 0x360   : > { %4650 = dma.done.wait (%p4026_p6), [#allocation4], 32  }
 0x361   : > { %4652 = vsyncadd (%p4026_p6), [#allocation4], 4294967264 }
 0x362 PF: > { %s17_s21 = sadd.s32 1, %s4655_s21  }
 0x363   : > { %p14_p0 = scmp.ge.s32.totalorder %s17_s21, 6  }
 0x365   :  { %16 = sbr.rel (!%p14_p0) target bundleno = 1 (0x1), region = 88 }
 0x36a   :  { %3492 = vsyncpa [#allocation4], 1 }
 0x36b   :  { %3494 = vsyncpa [#allocation4 + $0x1], 1 }

</bundles_post_ra>
